<compile_context>
chip_gen: v5e
topology: v5e:2x2
jax: 0.10.0
libtpu: 0.0.40
codegen_flags: <defaults>
</compile_context>

<pallas_src>
import jax
import jax.numpy as jnp
from jax.experimental import pallas as pl
from jax.experimental.pallas import tpu as pltpu

# (Cin, Cout, kernel_size) for the 7 ConvBNReLU blocks of Encoder
LAYER_CFG = [
    (3, 8, 11),
    (8, 16, 9),
    (16, 16, 7),
    (16, 32, 7),
    (32, 32, 5),
    (32, 64, 5),
    (64, 64, 3),
]


def _encoder_kernel(*refs):
    """Fused 7 x [Conv1d -> folded-BN -> ReLU -> MaxPool1d(2,2)] for ONE batch element.

    refs layout (n = number of layers):
      refs[0]                     x_ref       (1, L0, Cin0)  f32
      refs[1+3i], [2+3i], [3+3i]  w_i (K,Cin,Cout) bf16, scale_i (1,Cout) f32, bias_i (1,Cout) f32
      refs[1+3n]                  o_ref       (1, Lf, Cf)    f32
      refs[2+3n+2i]               xpad_scr_i  (L_i+2*pad_i, Cin_i)  f32  padded conv input staging
      refs[3+3n+2i]               ypre_scr_i  (L_i, Cout_i)          f32  pre-pool activation staging
    """
    n_layers = (len(refs) - 2) // 5
    x_ref = refs[0]
    o_ref = refs[1 + 3 * n_layers]
    scratches = refs[2 + 3 * n_layers:]

    y = x_ref[0]  # (L0, Cin0) f32 value; all layer-to-layer data stays in vregs/VMEM
    for i in range(n_layers):
        w_ref = refs[1 + 3 * i]
        s_ref = refs[2 + 3 * i]
        b_ref = refs[3 + 3 * i]
        xscr = scratches[2 * i]
        yscr = scratches[2 * i + 1]

        K, cin, cout = w_ref.shape
        L = y.shape[0]
        pad = (K - 1) // 2
        Lout = L // 2

        # Stage the 'same'-padded input in VMEM (halo rows zero), so each conv tap
        # is a cheap offset read from a ref.
        xscr[...] = jnp.zeros(xscr.shape, jnp.float32)
        xscr[pad:pad + L, :] = y

        # Conv1d(stride=1) as K shifted (L, Cin) @ (Cin, Cout) MXU matmuls.
        # bf16 operands, f32 accumulation (preferred_element_type).
        acc = jnp.zeros((L, cout), jnp.float32)
        for k in range(K):  # K is small and static -> fully unrolled
            a = xscr[pl.ds(k, L), :].astype(jnp.bfloat16)
            acc = acc + jnp.dot(a, w_ref[k], preferred_element_type=jnp.float32)

        # Folded BatchNorm (inference running stats) + ReLU, in f32.
        yscr[...] = jnp.maximum(acc * s_ref[...] + b_ref[...], 0.0)

        # MaxPool1d(kernel=2, stride=2) via stride-2 sublane reads from VMEM.
        even = yscr[pl.ds(0, Lout, stride=2), :]
        odd = yscr[pl.ds(1, Lout, stride=2), :]
        y = jnp.maximum(even, odd)

    o_ref[0] = y.astype(o_ref.dtype)


def encoder_pallas(x_blc, params):
    """x_blc: (B, L0, Cin0) channel-last f32.  Returns (B, L0 / 2^n_layers, Cout_last) f32."""
    B, L0, cin0 = x_blc.shape
    n_layers = len(params)
    Lf = L0 // (2 ** n_layers)
    cout_f = params[-1][0].shape[2]

    inputs = [x_blc]
    in_specs = [pl.BlockSpec((1, L0, cin0), lambda b: (b, 0, 0))]
    scratch_shapes = []

    L = L0
    for (w, s, bias) in params:
        K, ci, co = w.shape
        assert K % 2 == 1, "'same' padding (K-1)//2 is only symmetric for odd kernel sizes"
        assert L % 2 == 0, "MaxPool1d(2,2) requires an even length at every stage"
        pad = (K - 1) // 2
        # bf16 conv weights for the MXU; BN scale/bias stay f32.
        inputs += [w.astype(jnp.bfloat16), s, bias]
        in_specs += [
            pl.BlockSpec((K, ci, co), lambda b: (0, 0, 0)),
            pl.BlockSpec((1, co), lambda b: (0, 0)),
            pl.BlockSpec((1, co), lambda b: (0, 0)),
        ]
        scratch_shapes.append(pltpu.VMEM((L + 2 * pad, ci), jnp.float32))  # padded input
        scratch_shapes.append(pltpu.VMEM((L, co), jnp.float32))            # pre-pool activation
        L = L // 2

    return pl.pallas_call(
        _encoder_kernel,
        out_shape=jax.ShapeDtypeStruct((B, Lf, cout_f), jnp.float32),
        grid_spec=pltpu.PrefetchScalarGridSpec(
            num_scalar_prefetch=0,
            grid=(B,),
            in_specs=in_specs,
            out_specs=pl.BlockSpec((1, Lf, cout_f), lambda b: (b, 0, 0)),
            scratch_shapes=scratch_shapes,
        ),
        compiler_params=pltpu.CompilerParams(
            dimension_semantics=("parallel",),  # shard batch across TCs (v7x has 2)
        ),
    )(*inputs)


def init_encoder_params(key):
    """Deterministic synthetic parameters (conv W/b + BN gamma/beta/mean/var, folded)."""
    params = []
    for (cin, cout, k) in LAYER_CFG:
        key, k1, k2, k3, k4, k5, k6 = jax.random.split(key, 7)
        bound = 1.0 / (cin * k) ** 0.5
        # Conv1d weight in PyTorch is (Cout, Cin, K); we store it tap-major (K, Cin, Cout).
        w = jax.random.uniform(k1, (k, cin, cout), jnp.float32, -bound, bound)
        b = jax.random.uniform(k2, (cout,), jnp.float32, -bound, bound)
        gamma = 1.0 + 0.1 * jax.random.normal(k3, (cout,), jnp.float32)
        beta = 0.1 * jax.random.normal(k4, (cout,), jnp.float32)
        mean = 0.05 * jax.random.normal(k5, (cout,), jnp.float32)
        var = 1.0 + 0.1 * jnp.abs(jax.random.normal(k6, (cout,), jnp.float32))
        eps = 1e-5
        s = gamma / jnp.sqrt(var + eps)
        eff_scale = s.reshape(1, cout)
        eff_bias = ((b - mean) * s + beta).reshape(1, cout)
        params.append((w, eff_scale, eff_bias))
    return params


@jax.jit
def encoder_forward(x_ncl, params):
    # BatchNorm is applied in inference mode with folded running statistics.
    # TODO(synk): training-mode BN (batch statistics) is not implemented.
    x = jnp.transpose(x_ncl, (0, 2, 1))        # NCL -> (B, L, C), channels on lanes
    y = encoder_pallas(x, params)              # fused 7-layer stack, one pallas_call
    return jnp.transpose(y, (0, 2, 1))         # back to NCL: (B, 64, L/128)


if __name__ == "__main__":
    key = jax.random.PRNGKey(0)
    kx, kp = jax.random.split(key)

    B, C, L = 2, 3, 256  # 7 maxpools of stride 2 -> final length 2
    x = jax.random.normal(kx, (B, C, L), jnp.float32)

    params = init_encoder_params(kp)
    out = encoder_forward(x, params)
    out = jax.block_until_ready(out)

    assert out.shape == (B, 64, L // 128), out.shape
    assert jnp.all(jnp.isfinite(out))
    print("KERNEL_OK")
</pallas_src>

<mosaic_0001>
module attributes {stable_mosaic.version = 11 : i64} {
  func.func @_encoder_kernel(%arg0: i32, %arg1: memref<1x256x3xf32, #tpu.memory_space<vmem>>, %arg2: memref<11x3x8xbf16, #tpu.memory_space<vmem>>, %arg3: memref<1x8xf32, #tpu.memory_space<vmem>>, %arg4: memref<1x8xf32, #tpu.memory_space<vmem>>, %arg5: memref<9x8x16xbf16, #tpu.memory_space<vmem>>, %arg6: memref<1x16xf32, #tpu.memory_space<vmem>>, %arg7: memref<1x16xf32, #tpu.memory_space<vmem>>, %arg8: memref<7x16x16xbf16, #tpu.memory_space<vmem>>, %arg9: memref<1x16xf32, #tpu.memory_space<vmem>>, %arg10: memref<1x16xf32, #tpu.memory_space<vmem>>, %arg11: memref<7x16x32xbf16, #tpu.memory_space<vmem>>, %arg12: memref<1x32xf32, #tpu.memory_space<vmem>>, %arg13: memref<1x32xf32, #tpu.memory_space<vmem>>, %arg14: memref<5x32x32xbf16, #tpu.memory_space<vmem>>, %arg15: memref<1x32xf32, #tpu.memory_space<vmem>>, %arg16: memref<1x32xf32, #tpu.memory_space<vmem>>, %arg17: memref<5x32x64xbf16, #tpu.memory_space<vmem>>, %arg18: memref<1x64xf32, #tpu.memory_space<vmem>>, %arg19: memref<1x64xf32, #tpu.memory_space<vmem>>, %arg20: memref<3x64x64xbf16, #tpu.memory_space<vmem>>, %arg21: memref<1x64xf32, #tpu.memory_space<vmem>>, %arg22: memref<1x64xf32, #tpu.memory_space<vmem>>, %arg23: memref<1x2x64xf32, #tpu.memory_space<vmem>>, %arg24: memref<266x3xf32, #tpu.memory_space<vmem>>, %arg25: memref<256x8xf32, #tpu.memory_space<vmem>>, %arg26: memref<136x8xf32, #tpu.memory_space<vmem>>, %arg27: memref<128x16xf32, #tpu.memory_space<vmem>>, %arg28: memref<70x16xf32, #tpu.memory_space<vmem>>, %arg29: memref<64x16xf32, #tpu.memory_space<vmem>>, %arg30: memref<38x16xf32, #tpu.memory_space<vmem>>, %arg31: memref<32x32xf32, #tpu.memory_space<vmem>>, %arg32: memref<20x32xf32, #tpu.memory_space<vmem>>, %arg33: memref<16x32xf32, #tpu.memory_space<vmem>>, %arg34: memref<12x32xf32, #tpu.memory_space<vmem>>, %arg35: memref<8x64xf32, #tpu.memory_space<vmem>>, %arg36: memref<6x64xf32, #tpu.memory_space<vmem>>, %arg37: memref<4x64xf32, #tpu.memory_space<vmem>>) attributes {dimension_semantics = [#tpu.dimension_semantics<parallel>], iteration_bounds = array<i64: 2>, scalar_prefetch = 0 : i64, scratch_operands = 14 : i64, tpu.core_type = #tpu.core_type<tc>, window_params = [{transform_indices = @transform_0, window_bounds = array<i64: 1, 256, 3>}, {pipeline_mode = #tpu.pipeline_mode<synchronous>, transform_indices = @transform_1, window_bounds = array<i64: 11, 3, 8>}, {pipeline_mode = #tpu.pipeline_mode<synchronous>, transform_indices = @transform_2, window_bounds = array<i64: 1, 8>}, {pipeline_mode = #tpu.pipeline_mode<synchronous>, transform_indices = @transform_3, window_bounds = array<i64: 1, 8>}, {pipeline_mode = #tpu.pipeline_mode<synchronous>, transform_indices = @transform_4, window_bounds = array<i64: 9, 8, 16>}, {pipeline_mode = #tpu.pipeline_mode<synchronous>, transform_indices = @transform_5, window_bounds = array<i64: 1, 16>}, {pipeline_mode = #tpu.pipeline_mode<synchronous>, transform_indices = @transform_6, window_bounds = array<i64: 1, 16>}, {pipeline_mode = #tpu.pipeline_mode<synchronous>, transform_indices = @transform_7, window_bounds = array<i64: 7, 16, 16>}, {pipeline_mode = #tpu.pipeline_mode<synchronous>, transform_indices = @transform_8, window_bounds = array<i64: 1, 16>}, {pipeline_mode = #tpu.pipeline_mode<synchronous>, transform_indices = @transform_9, window_bounds = array<i64: 1, 16>}, {pipeline_mode = #tpu.pipeline_mode<synchronous>, transform_indices = @transform_10, window_bounds = array<i64: 7, 16, 32>}, {pipeline_mode = #tpu.pipeline_mode<synchronous>, transform_indices = @transform_11, window_bounds = array<i64: 1, 32>}, {pipeline_mode = #tpu.pipeline_mode<synchronous>, transform_indices = @transform_12, window_bounds = array<i64: 1, 32>}, {pipeline_mode = #tpu.pipeline_mode<synchronous>, transform_indices = @transform_13, window_bounds = array<i64: 5, 32, 32>}, {pipeline_mode = #tpu.pipeline_mode<synchronous>, transform_indices = @transform_14, window_bounds = array<i64: 1, 32>}, {pipeline_mode = #tpu.pipeline_mode<synchronous>, transform_indices = @transform_15, window_bounds = array<i64: 1, 32>}, {pipeline_mode = #tpu.pipeline_mode<synchronous>, transform_indices = @transform_16, window_bounds = array<i64: 5, 32, 64>}, {pipeline_mode = #tpu.pipeline_mode<synchronous>, transform_indices = @transform_17, window_bounds = array<i64: 1, 64>}, {pipeline_mode = #tpu.pipeline_mode<synchronous>, transform_indices = @transform_18, window_bounds = array<i64: 1, 64>}, {pipeline_mode = #tpu.pipeline_mode<synchronous>, transform_indices = @transform_19, window_bounds = array<i64: 3, 64, 64>}, {pipeline_mode = #tpu.pipeline_mode<synchronous>, transform_indices = @transform_20, window_bounds = array<i64: 1, 64>}, {pipeline_mode = #tpu.pipeline_mode<synchronous>, transform_indices = @transform_21, window_bounds = array<i64: 1, 64>}, {transform_indices = @transform_22, window_bounds = array<i64: 1, 2, 64>}]} {
    %c0 = arith.constant 0 : index
    %c0_0 = arith.constant 0 : index
    %c0_1 = arith.constant 0 : index
    %0 = vector.load %arg1[%c0, %c0_0, %c0_1] : memref<1x256x3xf32, #tpu.memory_space<vmem>>, vector<1x256x3xf32>
    %1 = vector.shape_cast %0 : vector<1x256x3xf32> to vector<256x3xf32>
    %cst = arith.constant 0.000000e+00 : f32
    %2 = vector.broadcast %cst : f32 to vector<266x3xf32>
    %c0_2 = arith.constant 0 : index
    %c0_3 = arith.constant 0 : index
    %3 = vector.load %arg24[%c0_2, %c0_3] : memref<266x3xf32, #tpu.memory_space<vmem>>, vector<266x3xf32>
    tpu.vector_store %arg24[%c0_2, %c0_3], %2 {strides = array<i32>} : memref<266x3xf32, #tpu.memory_space<vmem>>, vector<266x3xf32>,
    %c5 = arith.constant 5 : index
    %c0_4 = arith.constant 0 : index
    %4 = vector.load %arg24[%c5, %c0_4] : memref<266x3xf32, #tpu.memory_space<vmem>>, vector<256x3xf32>
    tpu.vector_store %arg24[%c5, %c0_4], %1 {strides = array<i32>} : memref<266x3xf32, #tpu.memory_space<vmem>>, vector<256x3xf32>,
    %cst_5 = arith.constant 0.000000e+00 : f32
    %5 = vector.broadcast %cst_5 : f32 to vector<256x8xf32>
    %c0_6 = arith.constant 0 : index
    %c0_7 = arith.constant 0 : index
    %6 = vector.load %arg24[%c0_6, %c0_7] : memref<266x3xf32, #tpu.memory_space<vmem>>, vector<256x3xf32>
    %7 = arith.truncf %6 : vector<256x3xf32> to vector<256x3xbf16>
    %c0_8 = arith.constant 0 : index
    %c0_9 = arith.constant 0 : index
    %c0_10 = arith.constant 0 : index
    %8 = vector.load %arg2[%c0_8, %c0_9, %c0_10] : memref<11x3x8xbf16, #tpu.memory_space<vmem>>, vector<1x3x8xbf16>
    %9 = vector.shape_cast %8 : vector<1x3x8xbf16> to vector<3x8xbf16>
    %cst_11 = arith.constant dense<0.000000e+00> : vector<256x8xf32>
    %10 = tpu.matmul %7, %9, %cst_11 {dimension_numbers = #tpu.dot_dimension_numbers<[1], [0], [0], [1], [0, 0, 1, 1], [], []>} : vector<256x3xbf16>, vector<3x8xbf16>, vector<256x8xf32> -> vector<256x8xf32>
    %11 = arith.addf %5, %10 : vector<256x8xf32>
    %c1 = arith.constant 1 : index
    %c0_12 = arith.constant 0 : index
    %12 = vector.load %arg24[%c1, %c0_12] : memref<266x3xf32, #tpu.memory_space<vmem>>, vector<256x3xf32>
    %13 = arith.truncf %12 : vector<256x3xf32> to vector<256x3xbf16>
    %c1_13 = arith.constant 1 : index
    %c0_14 = arith.constant 0 : index
    %c0_15 = arith.constant 0 : index
    %14 = vector.load %arg2[%c1_13, %c0_14, %c0_15] : memref<11x3x8xbf16, #tpu.memory_space<vmem>>, vector<1x3x8xbf16>
    %15 = vector.shape_cast %14 : vector<1x3x8xbf16> to vector<3x8xbf16>
    %cst_16 = arith.constant dense<0.000000e+00> : vector<256x8xf32>
    %16 = tpu.matmul %13, %15, %cst_16 {dimension_numbers = #tpu.dot_dimension_numbers<[1], [0], [0], [1], [0, 0, 1, 1], [], []>} : vector<256x3xbf16>, vector<3x8xbf16>, vector<256x8xf32> -> vector<256x8xf32>
    %17 = arith.addf %11, %16 : vector<256x8xf32>
    %c2 = arith.constant 2 : index
    %c0_17 = arith.constant 0 : index
    %18 = vector.load %arg24[%c2, %c0_17] : memref<266x3xf32, #tpu.memory_space<vmem>>, vector<256x3xf32>
    %19 = arith.truncf %18 : vector<256x3xf32> to vector<256x3xbf16>
    %c2_18 = arith.constant 2 : index
    %c0_19 = arith.constant 0 : index
    %c0_20 = arith.constant 0 : index
    %20 = vector.load %arg2[%c2_18, %c0_19, %c0_20] : memref<11x3x8xbf16, #tpu.memory_space<vmem>>, vector<1x3x8xbf16>
    %21 = vector.shape_cast %20 : vector<1x3x8xbf16> to vector<3x8xbf16>
    %cst_21 = arith.constant dense<0.000000e+00> : vector<256x8xf32>
    %22 = tpu.matmul %19, %21, %cst_21 {dimension_numbers = #tpu.dot_dimension_numbers<[1], [0], [0], [1], [0, 0, 1, 1], [], []>} : vector<256x3xbf16>, vector<3x8xbf16>, vector<256x8xf32> -> vector<256x8xf32>
    %23 = arith.addf %17, %22 : vector<256x8xf32>
    %c3 = arith.constant 3 : index
    %c0_22 = arith.constant 0 : index
    %24 = vector.load %arg24[%c3, %c0_22] : memref<266x3xf32, #tpu.memory_space<vmem>>, vector<256x3xf32>
    %25 = arith.truncf %24 : vector<256x3xf32> to vector<256x3xbf16>
    %c3_23 = arith.constant 3 : index
    %c0_24 = arith.constant 0 : index
    %c0_25 = arith.constant 0 : index
    %26 = vector.load %arg2[%c3_23, %c0_24, %c0_25] : memref<11x3x8xbf16, #tpu.memory_space<vmem>>, vector<1x3x8xbf16>
    %27 = vector.shape_cast %26 : vector<1x3x8xbf16> to vector<3x8xbf16>
    %cst_26 = arith.constant dense<0.000000e+00> : vector<256x8xf32>
    %28 = tpu.matmul %25, %27, %cst_26 {dimension_numbers = #tpu.dot_dimension_numbers<[1], [0], [0], [1], [0, 0, 1, 1], [], []>} : vector<256x3xbf16>, vector<3x8xbf16>, vector<256x8xf32> -> vector<256x8xf32>
    %29 = arith.addf %23, %28 : vector<256x8xf32>
    %c4 = arith.constant 4 : index
    %c0_27 = arith.constant 0 : index
    %30 = vector.load %arg24[%c4, %c0_27] : memref<266x3xf32, #tpu.memory_space<vmem>>, vector<256x3xf32>
    %31 = arith.truncf %30 : vector<256x3xf32> to vector<256x3xbf16>
    %c4_28 = arith.constant 4 : index
    %c0_29 = arith.constant 0 : index
    %c0_30 = arith.constant 0 : index
    %32 = vector.load %arg2[%c4_28, %c0_29, %c0_30] : memref<11x3x8xbf16, #tpu.memory_space<vmem>>, vector<1x3x8xbf16>
    %33 = vector.shape_cast %32 : vector<1x3x8xbf16> to vector<3x8xbf16>
    %cst_31 = arith.constant dense<0.000000e+00> : vector<256x8xf32>
    %34 = tpu.matmul %31, %33, %cst_31 {dimension_numbers = #tpu.dot_dimension_numbers<[1], [0], [0], [1], [0, 0, 1, 1], [], []>} : vector<256x3xbf16>, vector<3x8xbf16>, vector<256x8xf32> -> vector<256x8xf32>
    %35 = arith.addf %29, %34 : vector<256x8xf32>
    %c5_32 = arith.constant 5 : index
    %c0_33 = arith.constant 0 : index
    %36 = vector.load %arg24[%c5_32, %c0_33] : memref<266x3xf32, #tpu.memory_space<vmem>>, vector<256x3xf32>
    %37 = arith.truncf %36 : vector<256x3xf32> to vector<256x3xbf16>
    %c5_34 = arith.constant 5 : index
    %c0_35 = arith.constant 0 : index
    %c0_36 = arith.constant 0 : index
    %38 = vector.load %arg2[%c5_34, %c0_35, %c0_36] : memref<11x3x8xbf16, #tpu.memory_space<vmem>>, vector<1x3x8xbf16>
    %39 = vector.shape_cast %38 : vector<1x3x8xbf16> to vector<3x8xbf16>
    %cst_37 = arith.constant dense<0.000000e+00> : vector<256x8xf32>
    %40 = tpu.matmul %37, %39, %cst_37 {dimension_numbers = #tpu.dot_dimension_numbers<[1], [0], [0], [1], [0, 0, 1, 1], [], []>} : vector<256x3xbf16>, vector<3x8xbf16>, vector<256x8xf32> -> vector<256x8xf32>
    %41 = arith.addf %35, %40 : vector<256x8xf32>
    %c6 = arith.constant 6 : index
    %c0_38 = arith.constant 0 : index
    %42 = vector.load %arg24[%c6, %c0_38] : memref<266x3xf32, #tpu.memory_space<vmem>>, vector<256x3xf32>
    %43 = arith.truncf %42 : vector<256x3xf32> to vector<256x3xbf16>
    %c6_39 = arith.constant 6 : index
    %c0_40 = arith.constant 0 : index
    %c0_41 = arith.constant 0 : index
    %44 = vector.load %arg2[%c6_39, %c0_40, %c0_41] : memref<11x3x8xbf16, #tpu.memory_space<vmem>>, vector<1x3x8xbf16>
    %45 = vector.shape_cast %44 : vector<1x3x8xbf16> to vector<3x8xbf16>
    %cst_42 = arith.constant dense<0.000000e+00> : vector<256x8xf32>
    %46 = tpu.matmul %43, %45, %cst_42 {dimension_numbers = #tpu.dot_dimension_numbers<[1], [0], [0], [1], [0, 0, 1, 1], [], []>} : vector<256x3xbf16>, vector<3x8xbf16>, vector<256x8xf32> -> vector<256x8xf32>
    %47 = arith.addf %41, %46 : vector<256x8xf32>
    %c7 = arith.constant 7 : index
    %c0_43 = arith.constant 0 : index
    %48 = vector.load %arg24[%c7, %c0_43] : memref<266x3xf32, #tpu.memory_space<vmem>>, vector<256x3xf32>
    %49 = arith.truncf %48 : vector<256x3xf32> to vector<256x3xbf16>
    %c7_44 = arith.constant 7 : index
    %c0_45 = arith.constant 0 : index
    %c0_46 = arith.constant 0 : index
    %50 = vector.load %arg2[%c7_44, %c0_45, %c0_46] : memref<11x3x8xbf16, #tpu.memory_space<vmem>>, vector<1x3x8xbf16>
    %51 = vector.shape_cast %50 : vector<1x3x8xbf16> to vector<3x8xbf16>
    %cst_47 = arith.constant dense<0.000000e+00> : vector<256x8xf32>
    %52 = tpu.matmul %49, %51, %cst_47 {dimension_numbers = #tpu.dot_dimension_numbers<[1], [0], [0], [1], [0, 0, 1, 1], [], []>} : vector<256x3xbf16>, vector<3x8xbf16>, vector<256x8xf32> -> vector<256x8xf32>
    %53 = arith.addf %47, %52 : vector<256x8xf32>
    %c8 = arith.constant 8 : index
    %c0_48 = arith.constant 0 : index
    %54 = vector.load %arg24[%c8, %c0_48] : memref<266x3xf32, #tpu.memory_space<vmem>>, vector<256x3xf32>
    %55 = arith.truncf %54 : vector<256x3xf32> to vector<256x3xbf16>
    %c8_49 = arith.constant 8 : index
    %c0_50 = arith.constant 0 : index
    %c0_51 = arith.constant 0 : index
    %56 = vector.load %arg2[%c8_49, %c0_50, %c0_51] : memref<11x3x8xbf16, #tpu.memory_space<vmem>>, vector<1x3x8xbf16>
    %57 = vector.shape_cast %56 : vector<1x3x8xbf16> to vector<3x8xbf16>
    %cst_52 = arith.constant dense<0.000000e+00> : vector<256x8xf32>
    %58 = tpu.matmul %55, %57, %cst_52 {dimension_numbers = #tpu.dot_dimension_numbers<[1], [0], [0], [1], [0, 0, 1, 1], [], []>} : vector<256x3xbf16>, vector<3x8xbf16>, vector<256x8xf32> -> vector<256x8xf32>
    %59 = arith.addf %53, %58 : vector<256x8xf32>
    %c9 = arith.constant 9 : index
    %c0_53 = arith.constant 0 : index
    %60 = vector.load %arg24[%c9, %c0_53] : memref<266x3xf32, #tpu.memory_space<vmem>>, vector<256x3xf32>
    %61 = arith.truncf %60 : vector<256x3xf32> to vector<256x3xbf16>
    %c9_54 = arith.constant 9 : index
    %c0_55 = arith.constant 0 : index
    %c0_56 = arith.constant 0 : index
    %62 = vector.load %arg2[%c9_54, %c0_55, %c0_56] : memref<11x3x8xbf16, #tpu.memory_space<vmem>>, vector<1x3x8xbf16>
    %63 = vector.shape_cast %62 : vector<1x3x8xbf16> to vector<3x8xbf16>
    %cst_57 = arith.constant dense<0.000000e+00> : vector<256x8xf32>
    %64 = tpu.matmul %61, %63, %cst_57 {dimension_numbers = #tpu.dot_dimension_numbers<[1], [0], [0], [1], [0, 0, 1, 1], [], []>} : vector<256x3xbf16>, vector<3x8xbf16>, vector<256x8xf32> -> vector<256x8xf32>
    %65 = arith.addf %59, %64 : vector<256x8xf32>
    %c10 = arith.constant 10 : index
    %c0_58 = arith.constant 0 : index
    %66 = vector.load %arg24[%c10, %c0_58] : memref<266x3xf32, #tpu.memory_space<vmem>>, vector<256x3xf32>
    %67 = arith.truncf %66 : vector<256x3xf32> to vector<256x3xbf16>
    %c10_59 = arith.constant 10 : index
    %c0_60 = arith.constant 0 : index
    %c0_61 = arith.constant 0 : index
    %68 = vector.load %arg2[%c10_59, %c0_60, %c0_61] : memref<11x3x8xbf16, #tpu.memory_space<vmem>>, vector<1x3x8xbf16>
    %69 = vector.shape_cast %68 : vector<1x3x8xbf16> to vector<3x8xbf16>
    %cst_62 = arith.constant dense<0.000000e+00> : vector<256x8xf32>
    %70 = tpu.matmul %67, %69, %cst_62 {dimension_numbers = #tpu.dot_dimension_numbers<[1], [0], [0], [1], [0, 0, 1, 1], [], []>} : vector<256x3xbf16>, vector<3x8xbf16>, vector<256x8xf32> -> vector<256x8xf32>
    %71 = arith.addf %65, %70 : vector<256x8xf32>
    %c0_63 = arith.constant 0 : index
    %c0_64 = arith.constant 0 : index
    %72 = vector.load %arg3[%c0_63, %c0_64] : memref<1x8xf32, #tpu.memory_space<vmem>>, vector<1x8xf32>
    %73 = vector.broadcast %72 : vector<1x8xf32> to vector<256x8xf32>
    %74 = arith.mulf %71, %73 : vector<256x8xf32>
    %c0_65 = arith.constant 0 : index
    %c0_66 = arith.constant 0 : index
    %75 = vector.load %arg4[%c0_65, %c0_66] : memref<1x8xf32, #tpu.memory_space<vmem>>, vector<1x8xf32>
    %76 = vector.broadcast %75 : vector<1x8xf32> to vector<256x8xf32>
    %77 = arith.addf %74, %76 : vector<256x8xf32>
    %cst_67 = arith.constant 0.000000e+00 : f32
    %78 = vector.broadcast %cst_67 : f32 to vector<256x8xf32>
    %79 = arith.maximumf %77, %78 : vector<256x8xf32>
    %c0_68 = arith.constant 0 : index
    %c0_69 = arith.constant 0 : index
    %80 = vector.load %arg25[%c0_68, %c0_69] : memref<256x8xf32, #tpu.memory_space<vmem>>, vector<256x8xf32>
    tpu.vector_store %arg25[%c0_68, %c0_69], %79 {strides = array<i32>} : memref<256x8xf32, #tpu.memory_space<vmem>>, vector<256x8xf32>,
    %c0_70 = arith.constant 0 : index
    %c0_71 = arith.constant 0 : index
    %81 = tpu.strided_load %arg25[%c0_70, %c0_71] {strides = array<i32: 2, 1>} : memref<256x8xf32, #tpu.memory_space<vmem>>, vector<128x8xf32>
    %c1_72 = arith.constant 1 : index
    %c0_73 = arith.constant 0 : index
    %82 = tpu.strided_load %arg25[%c1_72, %c0_73] {strides = array<i32: 2, 1>} : memref<256x8xf32, #tpu.memory_space<vmem>>, vector<128x8xf32>
    %83 = arith.maximumf %81, %82 : vector<128x8xf32>
    %cst_74 = arith.constant 0.000000e+00 : f32
    %84 = vector.broadcast %cst_74 : f32 to vector<136x8xf32>
    %c0_75 = arith.constant 0 : index
    %c0_76 = arith.constant 0 : index
    %85 = vector.load %arg26[%c0_75, %c0_76] : memref<136x8xf32, #tpu.memory_space<vmem>>, vector<136x8xf32>
    tpu.vector_store %arg26[%c0_75, %c0_76], %84 {strides = array<i32>} : memref<136x8xf32, #tpu.memory_space<vmem>>, vector<136x8xf32>,
    %c4_77 = arith.constant 4 : index
    %c0_78 = arith.constant 0 : index
    %86 = vector.load %arg26[%c4_77, %c0_78] : memref<136x8xf32, #tpu.memory_space<vmem>>, vector<128x8xf32>
    tpu.vector_store %arg26[%c4_77, %c0_78], %83 {strides = array<i32>} : memref<136x8xf32, #tpu.memory_space<vmem>>, vector<128x8xf32>,
    %cst_79 = arith.constant 0.000000e+00 : f32
    %87 = vector.broadcast %cst_79 : f32 to vector<128x16xf32>
    %c0_80 = arith.constant 0 : index
    %c0_81 = arith.constant 0 : index
    %88 = vector.load %arg26[%c0_80, %c0_81] : memref<136x8xf32, #tpu.memory_space<vmem>>, vector<128x8xf32>
    %89 = arith.truncf %88 : vector<128x8xf32> to vector<128x8xbf16>
    %c0_82 = arith.constant 0 : index
    %c0_83 = arith.constant 0 : index
    %c0_84 = arith.constant 0 : index
    %90 = vector.load %arg5[%c0_82, %c0_83, %c0_84] : memref<9x8x16xbf16, #tpu.memory_space<vmem>>, vector<1x8x16xbf16>
    %91 = vector.shape_cast %90 : vector<1x8x16xbf16> to vector<8x16xbf16>
    %cst_85 = arith.constant dense<0.000000e+00> : vector<128x16xf32>
    %92 = tpu.matmul %89, %91, %cst_85 {dimension_numbers = #tpu.dot_dimension_numbers<[1], [0], [0], [1], [0, 0, 1, 1], [], []>} : vector<128x8xbf16>, vector<8x16xbf16>, vector<128x16xf32> -> vector<128x16xf32>
    %93 = arith.addf %87, %92 : vector<128x16xf32>
    %c1_86 = arith.constant 1 : index
    %c0_87 = arith.constant 0 : index
    %94 = vector.load %arg26[%c1_86, %c0_87] : memref<136x8xf32, #tpu.memory_space<vmem>>, vector<128x8xf32>
    %95 = arith.truncf %94 : vector<128x8xf32> to vector<128x8xbf16>
    %c1_88 = arith.constant 1 : index
    %c0_89 = arith.constant 0 : index
    %c0_90 = arith.constant 0 : index
    %96 = vector.load %arg5[%c1_88, %c0_89, %c0_90] : memref<9x8x16xbf16, #tpu.memory_space<vmem>>, vector<1x8x16xbf16>
    %97 = vector.shape_cast %96 : vector<1x8x16xbf16> to vector<8x16xbf16>
    %cst_91 = arith.constant dense<0.000000e+00> : vector<128x16xf32>
    %98 = tpu.matmul %95, %97, %cst_91 {dimension_numbers = #tpu.dot_dimension_numbers<[1], [0], [0], [1], [0, 0, 1, 1], [], []>} : vector<128x8xbf16>, vector<8x16xbf16>, vector<128x16xf32> -> vector<128x16xf32>
    %99 = arith.addf %93, %98 : vector<128x16xf32>
    %c2_92 = arith.constant 2 : index
    %c0_93 = arith.constant 0 : index
    %100 = vector.load %arg26[%c2_92, %c0_93] : memref<136x8xf32, #tpu.memory_space<vmem>>, vector<128x8xf32>
    %101 = arith.truncf %100 : vector<128x8xf32> to vector<128x8xbf16>
    %c2_94 = arith.constant 2 : index
    %c0_95 = arith.constant 0 : index
    %c0_96 = arith.constant 0 : index
    %102 = vector.load %arg5[%c2_94, %c0_95, %c0_96] : memref<9x8x16xbf16, #tpu.memory_space<vmem>>, vector<1x8x16xbf16>
    %103 = vector.shape_cast %102 : vector<1x8x16xbf16> to vector<8x16xbf16>
    %cst_97 = arith.constant dense<0.000000e+00> : vector<128x16xf32>
    %104 = tpu.matmul %101, %103, %cst_97 {dimension_numbers = #tpu.dot_dimension_numbers<[1], [0], [0], [1], [0, 0, 1, 1], [], []>} : vector<128x8xbf16>, vector<8x16xbf16>, vector<128x16xf32> -> vector<128x16xf32>
    %105 = arith.addf %99, %104 : vector<128x16xf32>
    %c3_98 = arith.constant 3 : index
    %c0_99 = arith.constant 0 : index
    %106 = vector.load %arg26[%c3_98, %c0_99] : memref<136x8xf32, #tpu.memory_space<vmem>>, vector<128x8xf32>
    %107 = arith.truncf %106 : vector<128x8xf32> to vector<128x8xbf16>
    %c3_100 = arith.constant 3 : index
    %c0_101 = arith.constant 0 : index
    %c0_102 = arith.constant 0 : index
    %108 = vector.load %arg5[%c3_100, %c0_101, %c0_102] : memref<9x8x16xbf16, #tpu.memory_space<vmem>>, vector<1x8x16xbf16>
    %109 = vector.shape_cast %108 : vector<1x8x16xbf16> to vector<8x16xbf16>
    %cst_103 = arith.constant dense<0.000000e+00> : vector<128x16xf32>
    %110 = tpu.matmul %107, %109, %cst_103 {dimension_numbers = #tpu.dot_dimension_numbers<[1], [0], [0], [1], [0, 0, 1, 1], [], []>} : vector<128x8xbf16>, vector<8x16xbf16>, vector<128x16xf32> -> vector<128x16xf32>
    %111 = arith.addf %105, %110 : vector<128x16xf32>
    %c4_104 = arith.constant 4 : index
    %c0_105 = arith.constant 0 : index
    %112 = vector.load %arg26[%c4_104, %c0_105] : memref<136x8xf32, #tpu.memory_space<vmem>>, vector<128x8xf32>
    %113 = arith.truncf %112 : vector<128x8xf32> to vector<128x8xbf16>
    %c4_106 = arith.constant 4 : index
    %c0_107 = arith.constant 0 : index
    %c0_108 = arith.constant 0 : index
    %114 = vector.load %arg5[%c4_106, %c0_107, %c0_108] : memref<9x8x16xbf16, #tpu.memory_space<vmem>>, vector<1x8x16xbf16>
    %115 = vector.shape_cast %114 : vector<1x8x16xbf16> to vector<8x16xbf16>
    %cst_109 = arith.constant dense<0.000000e+00> : vector<128x16xf32>
    %116 = tpu.matmul %113, %115, %cst_109 {dimension_numbers = #tpu.dot_dimension_numbers<[1], [0], [0], [1], [0, 0, 1, 1], [], []>} : vector<128x8xbf16>, vector<8x16xbf16>, vector<128x16xf32> -> vector<128x16xf32>
    %117 = arith.addf %111, %116 : vector<128x16xf32>
    %c5_110 = arith.constant 5 : index
    %c0_111 = arith.constant 0 : index
    %118 = vector.load %arg26[%c5_110, %c0_111] : memref<136x8xf32, #tpu.memory_space<vmem>>, vector<128x8xf32>
    %119 = arith.truncf %118 : vector<128x8xf32> to vector<128x8xbf16>
    %c5_112 = arith.constant 5 : index
    %c0_113 = arith.constant 0 : index
    %c0_114 = arith.constant 0 : index
    %120 = vector.load %arg5[%c5_112, %c0_113, %c0_114] : memref<9x8x16xbf16, #tpu.memory_space<vmem>>, vector<1x8x16xbf16>
    %121 = vector.shape_cast %120 : vector<1x8x16xbf16> to vector<8x16xbf16>
    %cst_115 = arith.constant dense<0.000000e+00> : vector<128x16xf32>
    %122 = tpu.matmul %119, %121, %cst_115 {dimension_numbers = #tpu.dot_dimension_numbers<[1], [0], [0], [1], [0, 0, 1, 1], [], []>} : vector<128x8xbf16>, vector<8x16xbf16>, vector<128x16xf32> -> vector<128x16xf32>
    %123 = arith.addf %117, %122 : vector<128x16xf32>
    %c6_116 = arith.constant 6 : index
    %c0_117 = arith.constant 0 : index
    %124 = vector.load %arg26[%c6_116, %c0_117] : memref<136x8xf32, #tpu.memory_space<vmem>>, vector<128x8xf32>
    %125 = arith.truncf %124 : vector<128x8xf32> to vector<128x8xbf16>
    %c6_118 = arith.constant 6 : index
    %c0_119 = arith.constant 0 : index
    %c0_120 = arith.constant 0 : index
    %126 = vector.load %arg5[%c6_118, %c0_119, %c0_120] : memref<9x8x16xbf16, #tpu.memory_space<vmem>>, vector<1x8x16xbf16>
    %127 = vector.shape_cast %126 : vector<1x8x16xbf16> to vector<8x16xbf16>
    %cst_121 = arith.constant dense<0.000000e+00> : vector<128x16xf32>
    %128 = tpu.matmul %125, %127, %cst_121 {dimension_numbers = #tpu.dot_dimension_numbers<[1], [0], [0], [1], [0, 0, 1, 1], [], []>} : vector<128x8xbf16>, vector<8x16xbf16>, vector<128x16xf32> -> vector<128x16xf32>
    %129 = arith.addf %123, %128 : vector<128x16xf32>
    %c7_122 = arith.constant 7 : index
    %c0_123 = arith.constant 0 : index
    %130 = vector.load %arg26[%c7_122, %c0_123] : memref<136x8xf32, #tpu.memory_space<vmem>>, vector<128x8xf32>
    %131 = arith.truncf %130 : vector<128x8xf32> to vector<128x8xbf16>
    %c7_124 = arith.constant 7 : index
    %c0_125 = arith.constant 0 : index
    %c0_126 = arith.constant 0 : index
    %132 = vector.load %arg5[%c7_124, %c0_125, %c0_126] : memref<9x8x16xbf16, #tpu.memory_space<vmem>>, vector<1x8x16xbf16>
    %133 = vector.shape_cast %132 : vector<1x8x16xbf16> to vector<8x16xbf16>
    %cst_127 = arith.constant dense<0.000000e+00> : vector<128x16xf32>
    %134 = tpu.matmul %131, %133, %cst_127 {dimension_numbers = #tpu.dot_dimension_numbers<[1], [0], [0], [1], [0, 0, 1, 1], [], []>} : vector<128x8xbf16>, vector<8x16xbf16>, vector<128x16xf32> -> vector<128x16xf32>
    %135 = arith.addf %129, %134 : vector<128x16xf32>
    %c8_128 = arith.constant 8 : index
    %c0_129 = arith.constant 0 : index
    %136 = vector.load %arg26[%c8_128, %c0_129] : memref<136x8xf32, #tpu.memory_space<vmem>>, vector<128x8xf32>
    %137 = arith.truncf %136 : vector<128x8xf32> to vector<128x8xbf16>
    %c8_130 = arith.constant 8 : index
    %c0_131 = arith.constant 0 : index
    %c0_132 = arith.constant 0 : index
    %138 = vector.load %arg5[%c8_130, %c0_131, %c0_132] : memref<9x8x16xbf16, #tpu.memory_space<vmem>>, vector<1x8x16xbf16>
    %139 = vector.shape_cast %138 : vector<1x8x16xbf16> to vector<8x16xbf16>
    %cst_133 = arith.constant dense<0.000000e+00> : vector<128x16xf32>
    %140 = tpu.matmul %137, %139, %cst_133 {dimension_numbers = #tpu.dot_dimension_numbers<[1], [0], [0], [1], [0, 0, 1, 1], [], []>} : vector<128x8xbf16>, vector<8x16xbf16>, vector<128x16xf32> -> vector<128x16xf32>
    %141 = arith.addf %135, %140 : vector<128x16xf32>
    %c0_134 = arith.constant 0 : index
    %c0_135 = arith.constant 0 : index
    %142 = vector.load %arg6[%c0_134, %c0_135] : memref<1x16xf32, #tpu.memory_space<vmem>>, vector<1x16xf32>
    %143 = vector.broadcast %142 : vector<1x16xf32> to vector<128x16xf32>
    %144 = arith.mulf %141, %143 : vector<128x16xf32>
    %c0_136 = arith.constant 0 : index
    %c0_137 = arith.constant 0 : index
    %145 = vector.load %arg7[%c0_136, %c0_137] : memref<1x16xf32, #tpu.memory_space<vmem>>, vector<1x16xf32>
    %146 = vector.broadcast %145 : vector<1x16xf32> to vector<128x16xf32>
    %147 = arith.addf %144, %146 : vector<128x16xf32>
    %cst_138 = arith.constant 0.000000e+00 : f32
    %148 = vector.broadcast %cst_138 : f32 to vector<128x16xf32>
    %149 = arith.maximumf %147, %148 : vector<128x16xf32>
    %c0_139 = arith.constant 0 : index
    %c0_140 = arith.constant 0 : index
    %150 = vector.load %arg27[%c0_139, %c0_140] : memref<128x16xf32, #tpu.memory_space<vmem>>, vector<128x16xf32>
    tpu.vector_store %arg27[%c0_139, %c0_140], %149 {strides = array<i32>} : memref<128x16xf32, #tpu.memory_space<vmem>>, vector<128x16xf32>,
    %c0_141 = arith.constant 0 : index
    %c0_142 = arith.constant 0 : index
    %151 = tpu.strided_load %arg27[%c0_141, %c0_142] {strides = array<i32: 2, 1>} : memref<128x16xf32, #tpu.memory_space<vmem>>, vector<64x16xf32>
    %c1_143 = arith.constant 1 : index
    %c0_144 = arith.constant 0 : index
    %152 = tpu.strided_load %arg27[%c1_143, %c0_144] {strides = array<i32: 2, 1>} : memref<128x16xf32, #tpu.memory_space<vmem>>, vector<64x16xf32>
    %153 = arith.maximumf %151, %152 : vector<64x16xf32>
    %cst_145 = arith.constant 0.000000e+00 : f32
    %154 = vector.broadcast %cst_145 : f32 to vector<70x16xf32>
    %c0_146 = arith.constant 0 : index
    %c0_147 = arith.constant 0 : index
    %155 = vector.load %arg28[%c0_146, %c0_147] : memref<70x16xf32, #tpu.memory_space<vmem>>, vector<70x16xf32>
    tpu.vector_store %arg28[%c0_146, %c0_147], %154 {strides = array<i32>} : memref<70x16xf32, #tpu.memory_space<vmem>>, vector<70x16xf32>,
    %c3_148 = arith.constant 3 : index
    %c0_149 = arith.constant 0 : index
    %156 = vector.load %arg28[%c3_148, %c0_149] : memref<70x16xf32, #tpu.memory_space<vmem>>, vector<64x16xf32>
    tpu.vector_store %arg28[%c3_148, %c0_149], %153 {strides = array<i32>} : memref<70x16xf32, #tpu.memory_space<vmem>>, vector<64x16xf32>,
    %cst_150 = arith.constant 0.000000e+00 : f32
    %157 = vector.broadcast %cst_150 : f32 to vector<64x16xf32>
    %c0_151 = arith.constant 0 : index
    %c0_152 = arith.constant 0 : index
    %158 = vector.load %arg28[%c0_151, %c0_152] : memref<70x16xf32, #tpu.memory_space<vmem>>, vector<64x16xf32>
    %159 = arith.truncf %158 : vector<64x16xf32> to vector<64x16xbf16>
    %c0_153 = arith.constant 0 : index
    %c0_154 = arith.constant 0 : index
    %c0_155 = arith.constant 0 : index
    %160 = vector.load %arg8[%c0_153, %c0_154, %c0_155] : memref<7x16x16xbf16, #tpu.memory_space<vmem>>, vector<1x16x16xbf16>
    %161 = vector.shape_cast %160 : vector<1x16x16xbf16> to vector<16x16xbf16>
    %cst_156 = arith.constant dense<0.000000e+00> : vector<64x16xf32>
    %162 = tpu.matmul %159, %161, %cst_156 {dimension_numbers = #tpu.dot_dimension_numbers<[1], [0], [0], [1], [0, 0, 1, 1], [], []>} : vector<64x16xbf16>, vector<16x16xbf16>, vector<64x16xf32> -> vector<64x16xf32>
    %163 = arith.addf %157, %162 : vector<64x16xf32>
    %c1_157 = arith.constant 1 : index
    %c0_158 = arith.constant 0 : index
    %164 = vector.load %arg28[%c1_157, %c0_158] : memref<70x16xf32, #tpu.memory_space<vmem>>, vector<64x16xf32>
    %165 = arith.truncf %164 : vector<64x16xf32> to vector<64x16xbf16>
    %c1_159 = arith.constant 1 : index
    %c0_160 = arith.constant 0 : index
    %c0_161 = arith.constant 0 : index
    %166 = vector.load %arg8[%c1_159, %c0_160, %c0_161] : memref<7x16x16xbf16, #tpu.memory_space<vmem>>, vector<1x16x16xbf16>
    %167 = vector.shape_cast %166 : vector<1x16x16xbf16> to vector<16x16xbf16>
    %cst_162 = arith.constant dense<0.000000e+00> : vector<64x16xf32>
    %168 = tpu.matmul %165, %167, %cst_162 {dimension_numbers = #tpu.dot_dimension_numbers<[1], [0], [0], [1], [0, 0, 1, 1], [], []>} : vector<64x16xbf16>, vector<16x16xbf16>, vector<64x16xf32> -> vector<64x16xf32>
    %169 = arith.addf %163, %168 : vector<64x16xf32>
    %c2_163 = arith.constant 2 : index
    %c0_164 = arith.constant 0 : index
    %170 = vector.load %arg28[%c2_163, %c0_164] : memref<70x16xf32, #tpu.memory_space<vmem>>, vector<64x16xf32>
    %171 = arith.truncf %170 : vector<64x16xf32> to vector<64x16xbf16>
    %c2_165 = arith.constant 2 : index
    %c0_166 = arith.constant 0 : index
    %c0_167 = arith.constant 0 : index
    %172 = vector.load %arg8[%c2_165, %c0_166, %c0_167] : memref<7x16x16xbf16, #tpu.memory_space<vmem>>, vector<1x16x16xbf16>
    %173 = vector.shape_cast %172 : vector<1x16x16xbf16> to vector<16x16xbf16>
    %cst_168 = arith.constant dense<0.000000e+00> : vector<64x16xf32>
    %174 = tpu.matmul %171, %173, %cst_168 {dimension_numbers = #tpu.dot_dimension_numbers<[1], [0], [0], [1], [0, 0, 1, 1], [], []>} : vector<64x16xbf16>, vector<16x16xbf16>, vector<64x16xf32> -> vector<64x16xf32>
    %175 = arith.addf %169, %174 : vector<64x16xf32>
    %c3_169 = arith.constant 3 : index
    %c0_170 = arith.constant 0 : index
    %176 = vector.load %arg28[%c3_169, %c0_170] : memref<70x16xf32, #tpu.memory_space<vmem>>, vector<64x16xf32>
    %177 = arith.truncf %176 : vector<64x16xf32> to vector<64x16xbf16>
    %c3_171 = arith.constant 3 : index
    %c0_172 = arith.constant 0 : index
    %c0_173 = arith.constant 0 : index
    %178 = vector.load %arg8[%c3_171, %c0_172, %c0_173] : memref<7x16x16xbf16, #tpu.memory_space<vmem>>, vector<1x16x16xbf16>
    %179 = vector.shape_cast %178 : vector<1x16x16xbf16> to vector<16x16xbf16>
    %cst_174 = arith.constant dense<0.000000e+00> : vector<64x16xf32>
    %180 = tpu.matmul %177, %179, %cst_174 {dimension_numbers = #tpu.dot_dimension_numbers<[1], [0], [0], [1], [0, 0, 1, 1], [], []>} : vector<64x16xbf16>, vector<16x16xbf16>, vector<64x16xf32> -> vector<64x16xf32>
    %181 = arith.addf %175, %180 : vector<64x16xf32>
    %c4_175 = arith.constant 4 : index
    %c0_176 = arith.constant 0 : index
    %182 = vector.load %arg28[%c4_175, %c0_176] : memref<70x16xf32, #tpu.memory_space<vmem>>, vector<64x16xf32>
    %183 = arith.truncf %182 : vector<64x16xf32> to vector<64x16xbf16>
    %c4_177 = arith.constant 4 : index
    %c0_178 = arith.constant 0 : index
    %c0_179 = arith.constant 0 : index
    %184 = vector.load %arg8[%c4_177, %c0_178, %c0_179] : memref<7x16x16xbf16, #tpu.memory_space<vmem>>, vector<1x16x16xbf16>
    %185 = vector.shape_cast %184 : vector<1x16x16xbf16> to vector<16x16xbf16>
    %cst_180 = arith.constant dense<0.000000e+00> : vector<64x16xf32>
    %186 = tpu.matmul %183, %185, %cst_180 {dimension_numbers = #tpu.dot_dimension_numbers<[1], [0], [0], [1], [0, 0, 1, 1], [], []>} : vector<64x16xbf16>, vector<16x16xbf16>, vector<64x16xf32> -> vector<64x16xf32>
    %187 = arith.addf %181, %186 : vector<64x16xf32>
    %c5_181 = arith.constant 5 : index
    %c0_182 = arith.constant 0 : index
    %188 = vector.load %arg28[%c5_181, %c0_182] : memref<70x16xf32, #tpu.memory_space<vmem>>, vector<64x16xf32>
    %189 = arith.truncf %188 : vector<64x16xf32> to vector<64x16xbf16>
    %c5_183 = arith.constant 5 : index
    %c0_184 = arith.constant 0 : index
    %c0_185 = arith.constant 0 : index
    %190 = vector.load %arg8[%c5_183, %c0_184, %c0_185] : memref<7x16x16xbf16, #tpu.memory_space<vmem>>, vector<1x16x16xbf16>
    %191 = vector.shape_cast %190 : vector<1x16x16xbf16> to vector<16x16xbf16>
    %cst_186 = arith.constant dense<0.000000e+00> : vector<64x16xf32>
    %192 = tpu.matmul %189, %191, %cst_186 {dimension_numbers = #tpu.dot_dimension_numbers<[1], [0], [0], [1], [0, 0, 1, 1], [], []>} : vector<64x16xbf16>, vector<16x16xbf16>, vector<64x16xf32> -> vector<64x16xf32>
    %193 = arith.addf %187, %192 : vector<64x16xf32>
    %c6_187 = arith.constant 6 : index
    %c0_188 = arith.constant 0 : index
    %194 = vector.load %arg28[%c6_187, %c0_188] : memref<70x16xf32, #tpu.memory_space<vmem>>, vector<64x16xf32>
    %195 = arith.truncf %194 : vector<64x16xf32> to vector<64x16xbf16>
    %c6_189 = arith.constant 6 : index
    %c0_190 = arith.constant 0 : index
    %c0_191 = arith.constant 0 : index
    %196 = vector.load %arg8[%c6_189, %c0_190, %c0_191] : memref<7x16x16xbf16, #tpu.memory_space<vmem>>, vector<1x16x16xbf16>
    %197 = vector.shape_cast %196 : vector<1x16x16xbf16> to vector<16x16xbf16>
    %cst_192 = arith.constant dense<0.000000e+00> : vector<64x16xf32>
    %198 = tpu.matmul %195, %197, %cst_192 {dimension_numbers = #tpu.dot_dimension_numbers<[1], [0], [0], [1], [0, 0, 1, 1], [], []>} : vector<64x16xbf16>, vector<16x16xbf16>, vector<64x16xf32> -> vector<64x16xf32>
    %199 = arith.addf %193, %198 : vector<64x16xf32>
    %c0_193 = arith.constant 0 : index
    %c0_194 = arith.constant 0 : index
    %200 = vector.load %arg9[%c0_193, %c0_194] : memref<1x16xf32, #tpu.memory_space<vmem>>, vector<1x16xf32>
    %201 = vector.broadcast %200 : vector<1x16xf32> to vector<64x16xf32>
    %202 = arith.mulf %199, %201 : vector<64x16xf32>
    %c0_195 = arith.constant 0 : index
    %c0_196 = arith.constant 0 : index
    %203 = vector.load %arg10[%c0_195, %c0_196] : memref<1x16xf32, #tpu.memory_space<vmem>>, vector<1x16xf32>
    %204 = vector.broadcast %203 : vector<1x16xf32> to vector<64x16xf32>
    %205 = arith.addf %202, %204 : vector<64x16xf32>
    %cst_197 = arith.constant 0.000000e+00 : f32
    %206 = vector.broadcast %cst_197 : f32 to vector<64x16xf32>
    %207 = arith.maximumf %205, %206 : vector<64x16xf32>
    %c0_198 = arith.constant 0 : index
    %c0_199 = arith.constant 0 : index
    %208 = vector.load %arg29[%c0_198, %c0_199] : memref<64x16xf32, #tpu.memory_space<vmem>>, vector<64x16xf32>
    tpu.vector_store %arg29[%c0_198, %c0_199], %207 {strides = array<i32>} : memref<64x16xf32, #tpu.memory_space<vmem>>, vector<64x16xf32>,
    %c0_200 = arith.constant 0 : index
    %c0_201 = arith.constant 0 : index
    %209 = tpu.strided_load %arg29[%c0_200, %c0_201] {strides = array<i32: 2, 1>} : memref<64x16xf32, #tpu.memory_space<vmem>>, vector<32x16xf32>
    %c1_202 = arith.constant 1 : index
    %c0_203 = arith.constant 0 : index
    %210 = tpu.strided_load %arg29[%c1_202, %c0_203] {strides = array<i32: 2, 1>} : memref<64x16xf32, #tpu.memory_space<vmem>>, vector<32x16xf32>
    %211 = arith.maximumf %209, %210 : vector<32x16xf32>
    %cst_204 = arith.constant 0.000000e+00 : f32
    %212 = vector.broadcast %cst_204 : f32 to vector<38x16xf32>
    %c0_205 = arith.constant 0 : index
    %c0_206 = arith.constant 0 : index
    %213 = vector.load %arg30[%c0_205, %c0_206] : memref<38x16xf32, #tpu.memory_space<vmem>>, vector<38x16xf32>
    tpu.vector_store %arg30[%c0_205, %c0_206], %212 {strides = array<i32>} : memref<38x16xf32, #tpu.memory_space<vmem>>, vector<38x16xf32>,
    %c3_207 = arith.constant 3 : index
    %c0_208 = arith.constant 0 : index
    %214 = vector.load %arg30[%c3_207, %c0_208] : memref<38x16xf32, #tpu.memory_space<vmem>>, vector<32x16xf32>
    tpu.vector_store %arg30[%c3_207, %c0_208], %211 {strides = array<i32>} : memref<38x16xf32, #tpu.memory_space<vmem>>, vector<32x16xf32>,
    %cst_209 = arith.constant 0.000000e+00 : f32
    %215 = vector.broadcast %cst_209 : f32 to vector<32x32xf32>
    %c0_210 = arith.constant 0 : index
    %c0_211 = arith.constant 0 : index
    %216 = vector.load %arg30[%c0_210, %c0_211] : memref<38x16xf32, #tpu.memory_space<vmem>>, vector<32x16xf32>
    %217 = arith.truncf %216 : vector<32x16xf32> to vector<32x16xbf16>
    %c0_212 = arith.constant 0 : index
    %c0_213 = arith.constant 0 : index
    %c0_214 = arith.constant 0 : index
    %218 = vector.load %arg11[%c0_212, %c0_213, %c0_214] : memref<7x16x32xbf16, #tpu.memory_space<vmem>>, vector<1x16x32xbf16>
    %219 = vector.shape_cast %218 : vector<1x16x32xbf16> to vector<16x32xbf16>
    %cst_215 = arith.constant dense<0.000000e+00> : vector<32x32xf32>
    %220 = tpu.matmul %217, %219, %cst_215 {dimension_numbers = #tpu.dot_dimension_numbers<[1], [0], [0], [1], [0, 0, 1, 1], [], []>} : vector<32x16xbf16>, vector<16x32xbf16>, vector<32x32xf32> -> vector<32x32xf32>
    %221 = arith.addf %215, %220 : vector<32x32xf32>
    %c1_216 = arith.constant 1 : index
    %c0_217 = arith.constant 0 : index
    %222 = vector.load %arg30[%c1_216, %c0_217] : memref<38x16xf32, #tpu.memory_space<vmem>>, vector<32x16xf32>
    %223 = arith.truncf %222 : vector<32x16xf32> to vector<32x16xbf16>
    %c1_218 = arith.constant 1 : index
    %c0_219 = arith.constant 0 : index
    %c0_220 = arith.constant 0 : index
    %224 = vector.load %arg11[%c1_218, %c0_219, %c0_220] : memref<7x16x32xbf16, #tpu.memory_space<vmem>>, vector<1x16x32xbf16>
    %225 = vector.shape_cast %224 : vector<1x16x32xbf16> to vector<16x32xbf16>
    %cst_221 = arith.constant dense<0.000000e+00> : vector<32x32xf32>
    %226 = tpu.matmul %223, %225, %cst_221 {dimension_numbers = #tpu.dot_dimension_numbers<[1], [0], [0], [1], [0, 0, 1, 1], [], []>} : vector<32x16xbf16>, vector<16x32xbf16>, vector<32x32xf32> -> vector<32x32xf32>
    %227 = arith.addf %221, %226 : vector<32x32xf32>
    %c2_222 = arith.constant 2 : index
    %c0_223 = arith.constant 0 : index
    %228 = vector.load %arg30[%c2_222, %c0_223] : memref<38x16xf32, #tpu.memory_space<vmem>>, vector<32x16xf32>
    %229 = arith.truncf %228 : vector<32x16xf32> to vector<32x16xbf16>
    %c2_224 = arith.constant 2 : index
    %c0_225 = arith.constant 0 : index
    %c0_226 = arith.constant 0 : index
    %230 = vector.load %arg11[%c2_224, %c0_225, %c0_226] : memref<7x16x32xbf16, #tpu.memory_space<vmem>>, vector<1x16x32xbf16>
    %231 = vector.shape_cast %230 : vector<1x16x32xbf16> to vector<16x32xbf16>
    %cst_227 = arith.constant dense<0.000000e+00> : vector<32x32xf32>
    %232 = tpu.matmul %229, %231, %cst_227 {dimension_numbers = #tpu.dot_dimension_numbers<[1], [0], [0], [1], [0, 0, 1, 1], [], []>} : vector<32x16xbf16>, vector<16x32xbf16>, vector<32x32xf32> -> vector<32x32xf32>
    %233 = arith.addf %227, %232 : vector<32x32xf32>
    %c3_228 = arith.constant 3 : index
    %c0_229 = arith.constant 0 : index
    %234 = vector.load %arg30[%c3_228, %c0_229] : memref<38x16xf32, #tpu.memory_space<vmem>>, vector<32x16xf32>
    %235 = arith.truncf %234 : vector<32x16xf32> to vector<32x16xbf16>
    %c3_230 = arith.constant 3 : index
    %c0_231 = arith.constant 0 : index
    %c0_232 = arith.constant 0 : index
    %236 = vector.load %arg11[%c3_230, %c0_231, %c0_232] : memref<7x16x32xbf16, #tpu.memory_space<vmem>>, vector<1x16x32xbf16>
    %237 = vector.shape_cast %236 : vector<1x16x32xbf16> to vector<16x32xbf16>
    %cst_233 = arith.constant dense<0.000000e+00> : vector<32x32xf32>
    %238 = tpu.matmul %235, %237, %cst_233 {dimension_numbers = #tpu.dot_dimension_numbers<[1], [0], [0], [1], [0, 0, 1, 1], [], []>} : vector<32x16xbf16>, vector<16x32xbf16>, vector<32x32xf32> -> vector<32x32xf32>
    %239 = arith.addf %233, %238 : vector<32x32xf32>
    %c4_234 = arith.constant 4 : index
    %c0_235 = arith.constant 0 : index
    %240 = vector.load %arg30[%c4_234, %c0_235] : memref<38x16xf32, #tpu.memory_space<vmem>>, vector<32x16xf32>
    %241 = arith.truncf %240 : vector<32x16xf32> to vector<32x16xbf16>
    %c4_236 = arith.constant 4 : index
    %c0_237 = arith.constant 0 : index
    %c0_238 = arith.constant 0 : index
    %242 = vector.load %arg11[%c4_236, %c0_237, %c0_238] : memref<7x16x32xbf16, #tpu.memory_space<vmem>>, vector<1x16x32xbf16>
    %243 = vector.shape_cast %242 : vector<1x16x32xbf16> to vector<16x32xbf16>
    %cst_239 = arith.constant dense<0.000000e+00> : vector<32x32xf32>
    %244 = tpu.matmul %241, %243, %cst_239 {dimension_numbers = #tpu.dot_dimension_numbers<[1], [0], [0], [1], [0, 0, 1, 1], [], []>} : vector<32x16xbf16>, vector<16x32xbf16>, vector<32x32xf32> -> vector<32x32xf32>
    %245 = arith.addf %239, %244 : vector<32x32xf32>
    %c5_240 = arith.constant 5 : index
    %c0_241 = arith.constant 0 : index
    %246 = vector.load %arg30[%c5_240, %c0_241] : memref<38x16xf32, #tpu.memory_space<vmem>>, vector<32x16xf32>
    %247 = arith.truncf %246 : vector<32x16xf32> to vector<32x16xbf16>
    %c5_242 = arith.constant 5 : index
    %c0_243 = arith.constant 0 : index
    %c0_244 = arith.constant 0 : index
    %248 = vector.load %arg11[%c5_242, %c0_243, %c0_244] : memref<7x16x32xbf16, #tpu.memory_space<vmem>>, vector<1x16x32xbf16>
    %249 = vector.shape_cast %248 : vector<1x16x32xbf16> to vector<16x32xbf16>
    %cst_245 = arith.constant dense<0.000000e+00> : vector<32x32xf32>
    %250 = tpu.matmul %247, %249, %cst_245 {dimension_numbers = #tpu.dot_dimension_numbers<[1], [0], [0], [1], [0, 0, 1, 1], [], []>} : vector<32x16xbf16>, vector<16x32xbf16>, vector<32x32xf32> -> vector<32x32xf32>
    %251 = arith.addf %245, %250 : vector<32x32xf32>
    %c6_246 = arith.constant 6 : index
    %c0_247 = arith.constant 0 : index
    %252 = vector.load %arg30[%c6_246, %c0_247] : memref<38x16xf32, #tpu.memory_space<vmem>>, vector<32x16xf32>
    %253 = arith.truncf %252 : vector<32x16xf32> to vector<32x16xbf16>
    %c6_248 = arith.constant 6 : index
    %c0_249 = arith.constant 0 : index
    %c0_250 = arith.constant 0 : index
    %254 = vector.load %arg11[%c6_248, %c0_249, %c0_250] : memref<7x16x32xbf16, #tpu.memory_space<vmem>>, vector<1x16x32xbf16>
    %255 = vector.shape_cast %254 : vector<1x16x32xbf16> to vector<16x32xbf16>
    %cst_251 = arith.constant dense<0.000000e+00> : vector<32x32xf32>
    %256 = tpu.matmul %253, %255, %cst_251 {dimension_numbers = #tpu.dot_dimension_numbers<[1], [0], [0], [1], [0, 0, 1, 1], [], []>} : vector<32x16xbf16>, vector<16x32xbf16>, vector<32x32xf32> -> vector<32x32xf32>
    %257 = arith.addf %251, %256 : vector<32x32xf32>
    %c0_252 = arith.constant 0 : index
    %c0_253 = arith.constant 0 : index
    %258 = vector.load %arg12[%c0_252, %c0_253] : memref<1x32xf32, #tpu.memory_space<vmem>>, vector<1x32xf32>
    %259 = vector.broadcast %258 : vector<1x32xf32> to vector<32x32xf32>
    %260 = arith.mulf %257, %259 : vector<32x32xf32>
    %c0_254 = arith.constant 0 : index
    %c0_255 = arith.constant 0 : index
    %261 = vector.load %arg13[%c0_254, %c0_255] : memref<1x32xf32, #tpu.memory_space<vmem>>, vector<1x32xf32>
    %262 = vector.broadcast %261 : vector<1x32xf32> to vector<32x32xf32>
    %263 = arith.addf %260, %262 : vector<32x32xf32>
    %cst_256 = arith.constant 0.000000e+00 : f32
    %264 = vector.broadcast %cst_256 : f32 to vector<32x32xf32>
    %265 = arith.maximumf %263, %264 : vector<32x32xf32>
    %c0_257 = arith.constant 0 : index
    %c0_258 = arith.constant 0 : index
    %266 = vector.load %arg31[%c0_257, %c0_258] : memref<32x32xf32, #tpu.memory_space<vmem>>, vector<32x32xf32>
    tpu.vector_store %arg31[%c0_257, %c0_258], %265 {strides = array<i32>} : memref<32x32xf32, #tpu.memory_space<vmem>>, vector<32x32xf32>,
    %c0_259 = arith.constant 0 : index
    %c0_260 = arith.constant 0 : index
    %267 = tpu.strided_load %arg31[%c0_259, %c0_260] {strides = array<i32: 2, 1>} : memref<32x32xf32, #tpu.memory_space<vmem>>, vector<16x32xf32>
    %c1_261 = arith.constant 1 : index
    %c0_262 = arith.constant 0 : index
    %268 = tpu.strided_load %arg31[%c1_261, %c0_262] {strides = array<i32: 2, 1>} : memref<32x32xf32, #tpu.memory_space<vmem>>, vector<16x32xf32>
    %269 = arith.maximumf %267, %268 : vector<16x32xf32>
    %cst_263 = arith.constant 0.000000e+00 : f32
    %270 = vector.broadcast %cst_263 : f32 to vector<20x32xf32>
    %c0_264 = arith.constant 0 : index
    %c0_265 = arith.constant 0 : index
    %271 = vector.load %arg32[%c0_264, %c0_265] : memref<20x32xf32, #tpu.memory_space<vmem>>, vector<20x32xf32>
    tpu.vector_store %arg32[%c0_264, %c0_265], %270 {strides = array<i32>} : memref<20x32xf32, #tpu.memory_space<vmem>>, vector<20x32xf32>,
    %c2_266 = arith.constant 2 : index
    %c0_267 = arith.constant 0 : index
    %272 = vector.load %arg32[%c2_266, %c0_267] : memref<20x32xf32, #tpu.memory_space<vmem>>, vector<16x32xf32>
    tpu.vector_store %arg32[%c2_266, %c0_267], %269 {strides = array<i32>} : memref<20x32xf32, #tpu.memory_space<vmem>>, vector<16x32xf32>,
    %cst_268 = arith.constant 0.000000e+00 : f32
    %273 = vector.broadcast %cst_268 : f32 to vector<16x32xf32>
    %c0_269 = arith.constant 0 : index
    %c0_270 = arith.constant 0 : index
    %274 = vector.load %arg32[%c0_269, %c0_270] : memref<20x32xf32, #tpu.memory_space<vmem>>, vector<16x32xf32>
    %275 = arith.truncf %274 : vector<16x32xf32> to vector<16x32xbf16>
    %c0_271 = arith.constant 0 : index
    %c0_272 = arith.constant 0 : index
    %c0_273 = arith.constant 0 : index
    %276 = vector.load %arg14[%c0_271, %c0_272, %c0_273] : memref<5x32x32xbf16, #tpu.memory_space<vmem>>, vector<1x32x32xbf16>
    %277 = vector.shape_cast %276 : vector<1x32x32xbf16> to vector<32x32xbf16>
    %cst_274 = arith.constant dense<0.000000e+00> : vector<16x32xf32>
    %278 = tpu.matmul %275, %277, %cst_274 {dimension_numbers = #tpu.dot_dimension_numbers<[1], [0], [0], [1], [0, 0, 1, 1], [], []>} : vector<16x32xbf16>, vector<32x32xbf16>, vector<16x32xf32> -> vector<16x32xf32>
    %279 = arith.addf %273, %278 : vector<16x32xf32>
    %c1_275 = arith.constant 1 : index
    %c0_276 = arith.constant 0 : index
    %280 = vector.load %arg32[%c1_275, %c0_276] : memref<20x32xf32, #tpu.memory_space<vmem>>, vector<16x32xf32>
    %281 = arith.truncf %280 : vector<16x32xf32> to vector<16x32xbf16>
    %c1_277 = arith.constant 1 : index
    %c0_278 = arith.constant 0 : index
    %c0_279 = arith.constant 0 : index
    %282 = vector.load %arg14[%c1_277, %c0_278, %c0_279] : memref<5x32x32xbf16, #tpu.memory_space<vmem>>, vector<1x32x32xbf16>
    %283 = vector.shape_cast %282 : vector<1x32x32xbf16> to vector<32x32xbf16>
    %cst_280 = arith.constant dense<0.000000e+00> : vector<16x32xf32>
    %284 = tpu.matmul %281, %283, %cst_280 {dimension_numbers = #tpu.dot_dimension_numbers<[1], [0], [0], [1], [0, 0, 1, 1], [], []>} : vector<16x32xbf16>, vector<32x32xbf16>, vector<16x32xf32> -> vector<16x32xf32>
    %285 = arith.addf %279, %284 : vector<16x32xf32>
    %c2_281 = arith.constant 2 : index
    %c0_282 = arith.constant 0 : index
    %286 = vector.load %arg32[%c2_281, %c0_282] : memref<20x32xf32, #tpu.memory_space<vmem>>, vector<16x32xf32>
    %287 = arith.truncf %286 : vector<16x32xf32> to vector<16x32xbf16>
    %c2_283 = arith.constant 2 : index
    %c0_284 = arith.constant 0 : index
    %c0_285 = arith.constant 0 : index
    %288 = vector.load %arg14[%c2_283, %c0_284, %c0_285] : memref<5x32x32xbf16, #tpu.memory_space<vmem>>, vector<1x32x32xbf16>
    %289 = vector.shape_cast %288 : vector<1x32x32xbf16> to vector<32x32xbf16>
    %cst_286 = arith.constant dense<0.000000e+00> : vector<16x32xf32>
    %290 = tpu.matmul %287, %289, %cst_286 {dimension_numbers = #tpu.dot_dimension_numbers<[1], [0], [0], [1], [0, 0, 1, 1], [], []>} : vector<16x32xbf16>, vector<32x32xbf16>, vector<16x32xf32> -> vector<16x32xf32>
    %291 = arith.addf %285, %290 : vector<16x32xf32>
    %c3_287 = arith.constant 3 : index
    %c0_288 = arith.constant 0 : index
    %292 = vector.load %arg32[%c3_287, %c0_288] : memref<20x32xf32, #tpu.memory_space<vmem>>, vector<16x32xf32>
    %293 = arith.truncf %292 : vector<16x32xf32> to vector<16x32xbf16>
    %c3_289 = arith.constant 3 : index
    %c0_290 = arith.constant 0 : index
    %c0_291 = arith.constant 0 : index
    %294 = vector.load %arg14[%c3_289, %c0_290, %c0_291] : memref<5x32x32xbf16, #tpu.memory_space<vmem>>, vector<1x32x32xbf16>
    %295 = vector.shape_cast %294 : vector<1x32x32xbf16> to vector<32x32xbf16>
    %cst_292 = arith.constant dense<0.000000e+00> : vector<16x32xf32>
    %296 = tpu.matmul %293, %295, %cst_292 {dimension_numbers = #tpu.dot_dimension_numbers<[1], [0], [0], [1], [0, 0, 1, 1], [], []>} : vector<16x32xbf16>, vector<32x32xbf16>, vector<16x32xf32> -> vector<16x32xf32>
    %297 = arith.addf %291, %296 : vector<16x32xf32>
    %c4_293 = arith.constant 4 : index
    %c0_294 = arith.constant 0 : index
    %298 = vector.load %arg32[%c4_293, %c0_294] : memref<20x32xf32, #tpu.memory_space<vmem>>, vector<16x32xf32>
    %299 = arith.truncf %298 : vector<16x32xf32> to vector<16x32xbf16>
    %c4_295 = arith.constant 4 : index
    %c0_296 = arith.constant 0 : index
    %c0_297 = arith.constant 0 : index
    %300 = vector.load %arg14[%c4_295, %c0_296, %c0_297] : memref<5x32x32xbf16, #tpu.memory_space<vmem>>, vector<1x32x32xbf16>
    %301 = vector.shape_cast %300 : vector<1x32x32xbf16> to vector<32x32xbf16>
    %cst_298 = arith.constant dense<0.000000e+00> : vector<16x32xf32>
    %302 = tpu.matmul %299, %301, %cst_298 {dimension_numbers = #tpu.dot_dimension_numbers<[1], [0], [0], [1], [0, 0, 1, 1], [], []>} : vector<16x32xbf16>, vector<32x32xbf16>, vector<16x32xf32> -> vector<16x32xf32>
    %303 = arith.addf %297, %302 : vector<16x32xf32>
    %c0_299 = arith.constant 0 : index
    %c0_300 = arith.constant 0 : index
    %304 = vector.load %arg15[%c0_299, %c0_300] : memref<1x32xf32, #tpu.memory_space<vmem>>, vector<1x32xf32>
    %305 = vector.broadcast %304 : vector<1x32xf32> to vector<16x32xf32>
    %306 = arith.mulf %303, %305 : vector<16x32xf32>
    %c0_301 = arith.constant 0 : index
    %c0_302 = arith.constant 0 : index
    %307 = vector.load %arg16[%c0_301, %c0_302] : memref<1x32xf32, #tpu.memory_space<vmem>>, vector<1x32xf32>
    %308 = vector.broadcast %307 : vector<1x32xf32> to vector<16x32xf32>
    %309 = arith.addf %306, %308 : vector<16x32xf32>
    %cst_303 = arith.constant 0.000000e+00 : f32
    %310 = vector.broadcast %cst_303 : f32 to vector<16x32xf32>
    %311 = arith.maximumf %309, %310 : vector<16x32xf32>
    %c0_304 = arith.constant 0 : index
    %c0_305 = arith.constant 0 : index
    %312 = vector.load %arg33[%c0_304, %c0_305] : memref<16x32xf32, #tpu.memory_space<vmem>>, vector<16x32xf32>
    tpu.vector_store %arg33[%c0_304, %c0_305], %311 {strides = array<i32>} : memref<16x32xf32, #tpu.memory_space<vmem>>, vector<16x32xf32>,
    %c0_306 = arith.constant 0 : index
    %c0_307 = arith.constant 0 : index
    %313 = tpu.strided_load %arg33[%c0_306, %c0_307] {strides = array<i32: 2, 1>} : memref<16x32xf32, #tpu.memory_space<vmem>>, vector<8x32xf32>
    %c1_308 = arith.constant 1 : index
    %c0_309 = arith.constant 0 : index
    %314 = tpu.strided_load %arg33[%c1_308, %c0_309] {strides = array<i32: 2, 1>} : memref<16x32xf32, #tpu.memory_space<vmem>>, vector<8x32xf32>
    %315 = arith.maximumf %313, %314 : vector<8x32xf32>
    %cst_310 = arith.constant 0.000000e+00 : f32
    %316 = vector.broadcast %cst_310 : f32 to vector<12x32xf32>
    %c0_311 = arith.constant 0 : index
    %c0_312 = arith.constant 0 : index
    %317 = vector.load %arg34[%c0_311, %c0_312] : memref<12x32xf32, #tpu.memory_space<vmem>>, vector<12x32xf32>
    tpu.vector_store %arg34[%c0_311, %c0_312], %316 {strides = array<i32>} : memref<12x32xf32, #tpu.memory_space<vmem>>, vector<12x32xf32>,
    %c2_313 = arith.constant 2 : index
    %c0_314 = arith.constant 0 : index
    %318 = vector.load %arg34[%c2_313, %c0_314] : memref<12x32xf32, #tpu.memory_space<vmem>>, vector<8x32xf32>
    tpu.vector_store %arg34[%c2_313, %c0_314], %315 {strides = array<i32>} : memref<12x32xf32, #tpu.memory_space<vmem>>, vector<8x32xf32>,
    %cst_315 = arith.constant 0.000000e+00 : f32
    %319 = vector.broadcast %cst_315 : f32 to vector<8x64xf32>
    %c0_316 = arith.constant 0 : index
    %c0_317 = arith.constant 0 : index
    %320 = vector.load %arg34[%c0_316, %c0_317] : memref<12x32xf32, #tpu.memory_space<vmem>>, vector<8x32xf32>
    %321 = arith.truncf %320 : vector<8x32xf32> to vector<8x32xbf16>
    %c0_318 = arith.constant 0 : index
    %c0_319 = arith.constant 0 : index
    %c0_320 = arith.constant 0 : index
    %322 = vector.load %arg17[%c0_318, %c0_319, %c0_320] : memref<5x32x64xbf16, #tpu.memory_space<vmem>>, vector<1x32x64xbf16>
    %323 = vector.shape_cast %322 : vector<1x32x64xbf16> to vector<32x64xbf16>
    %cst_321 = arith.constant dense<0.000000e+00> : vector<8x64xf32>
    %324 = tpu.matmul %321, %323, %cst_321 {dimension_numbers = #tpu.dot_dimension_numbers<[1], [0], [0], [1], [0, 0, 1, 1], [], []>} : vector<8x32xbf16>, vector<32x64xbf16>, vector<8x64xf32> -> vector<8x64xf32>
    %325 = arith.addf %319, %324 : vector<8x64xf32>
    %c1_322 = arith.constant 1 : index
    %c0_323 = arith.constant 0 : index
    %326 = vector.load %arg34[%c1_322, %c0_323] : memref<12x32xf32, #tpu.memory_space<vmem>>, vector<8x32xf32>
    %327 = arith.truncf %326 : vector<8x32xf32> to vector<8x32xbf16>
    %c1_324 = arith.constant 1 : index
    %c0_325 = arith.constant 0 : index
    %c0_326 = arith.constant 0 : index
    %328 = vector.load %arg17[%c1_324, %c0_325, %c0_326] : memref<5x32x64xbf16, #tpu.memory_space<vmem>>, vector<1x32x64xbf16>
    %329 = vector.shape_cast %328 : vector<1x32x64xbf16> to vector<32x64xbf16>
    %cst_327 = arith.constant dense<0.000000e+00> : vector<8x64xf32>
    %330 = tpu.matmul %327, %329, %cst_327 {dimension_numbers = #tpu.dot_dimension_numbers<[1], [0], [0], [1], [0, 0, 1, 1], [], []>} : vector<8x32xbf16>, vector<32x64xbf16>, vector<8x64xf32> -> vector<8x64xf32>
    %331 = arith.addf %325, %330 : vector<8x64xf32>
    %c2_328 = arith.constant 2 : index
    %c0_329 = arith.constant 0 : index
    %332 = vector.load %arg34[%c2_328, %c0_329] : memref<12x32xf32, #tpu.memory_space<vmem>>, vector<8x32xf32>
    %333 = arith.truncf %332 : vector<8x32xf32> to vector<8x32xbf16>
    %c2_330 = arith.constant 2 : index
    %c0_331 = arith.constant 0 : index
    %c0_332 = arith.constant 0 : index
    %334 = vector.load %arg17[%c2_330, %c0_331, %c0_332] : memref<5x32x64xbf16, #tpu.memory_space<vmem>>, vector<1x32x64xbf16>
    %335 = vector.shape_cast %334 : vector<1x32x64xbf16> to vector<32x64xbf16>
    %cst_333 = arith.constant dense<0.000000e+00> : vector<8x64xf32>
    %336 = tpu.matmul %333, %335, %cst_333 {dimension_numbers = #tpu.dot_dimension_numbers<[1], [0], [0], [1], [0, 0, 1, 1], [], []>} : vector<8x32xbf16>, vector<32x64xbf16>, vector<8x64xf32> -> vector<8x64xf32>
    %337 = arith.addf %331, %336 : vector<8x64xf32>
    %c3_334 = arith.constant 3 : index
    %c0_335 = arith.constant 0 : index
    %338 = vector.load %arg34[%c3_334, %c0_335] : memref<12x32xf32, #tpu.memory_space<vmem>>, vector<8x32xf32>
    %339 = arith.truncf %338 : vector<8x32xf32> to vector<8x32xbf16>
    %c3_336 = arith.constant 3 : index
    %c0_337 = arith.constant 0 : index
    %c0_338 = arith.constant 0 : index
    %340 = vector.load %arg17[%c3_336, %c0_337, %c0_338] : memref<5x32x64xbf16, #tpu.memory_space<vmem>>, vector<1x32x64xbf16>
    %341 = vector.shape_cast %340 : vector<1x32x64xbf16> to vector<32x64xbf16>
    %cst_339 = arith.constant dense<0.000000e+00> : vector<8x64xf32>
    %342 = tpu.matmul %339, %341, %cst_339 {dimension_numbers = #tpu.dot_dimension_numbers<[1], [0], [0], [1], [0, 0, 1, 1], [], []>} : vector<8x32xbf16>, vector<32x64xbf16>, vector<8x64xf32> -> vector<8x64xf32>
    %343 = arith.addf %337, %342 : vector<8x64xf32>
    %c4_340 = arith.constant 4 : index
    %c0_341 = arith.constant 0 : index
    %344 = vector.load %arg34[%c4_340, %c0_341] : memref<12x32xf32, #tpu.memory_space<vmem>>, vector<8x32xf32>
    %345 = arith.truncf %344 : vector<8x32xf32> to vector<8x32xbf16>
    %c4_342 = arith.constant 4 : index
    %c0_343 = arith.constant 0 : index
    %c0_344 = arith.constant 0 : index
    %346 = vector.load %arg17[%c4_342, %c0_343, %c0_344] : memref<5x32x64xbf16, #tpu.memory_space<vmem>>, vector<1x32x64xbf16>
    %347 = vector.shape_cast %346 : vector<1x32x64xbf16> to vector<32x64xbf16>
    %cst_345 = arith.constant dense<0.000000e+00> : vector<8x64xf32>
    %348 = tpu.matmul %345, %347, %cst_345 {dimension_numbers = #tpu.dot_dimension_numbers<[1], [0], [0], [1], [0, 0, 1, 1], [], []>} : vector<8x32xbf16>, vector<32x64xbf16>, vector<8x64xf32> -> vector<8x64xf32>
    %349 = arith.addf %343, %348 : vector<8x64xf32>
    %c0_346 = arith.constant 0 : index
    %c0_347 = arith.constant 0 : index
    %350 = vector.load %arg18[%c0_346, %c0_347] : memref<1x64xf32, #tpu.memory_space<vmem>>, vector<1x64xf32>
    %351 = vector.broadcast %350 : vector<1x64xf32> to vector<8x64xf32>
    %352 = arith.mulf %349, %351 : vector<8x64xf32>
    %c0_348 = arith.constant 0 : index
    %c0_349 = arith.constant 0 : index
    %353 = vector.load %arg19[%c0_348, %c0_349] : memref<1x64xf32, #tpu.memory_space<vmem>>, vector<1x64xf32>
    %354 = vector.broadcast %353 : vector<1x64xf32> to vector<8x64xf32>
    %355 = arith.addf %352, %354 : vector<8x64xf32>
    %cst_350 = arith.constant 0.000000e+00 : f32
    %356 = vector.broadcast %cst_350 : f32 to vector<8x64xf32>
    %357 = arith.maximumf %355, %356 : vector<8x64xf32>
    %c0_351 = arith.constant 0 : index
    %c0_352 = arith.constant 0 : index
    %358 = vector.load %arg35[%c0_351, %c0_352] : memref<8x64xf32, #tpu.memory_space<vmem>>, vector<8x64xf32>
    tpu.vector_store %arg35[%c0_351, %c0_352], %357 {strides = array<i32>} : memref<8x64xf32, #tpu.memory_space<vmem>>, vector<8x64xf32>,
    %c0_353 = arith.constant 0 : index
    %c0_354 = arith.constant 0 : index
    %359 = tpu.strided_load %arg35[%c0_353, %c0_354] {strides = array<i32: 2, 1>} : memref<8x64xf32, #tpu.memory_space<vmem>>, vector<4x64xf32>
    %c1_355 = arith.constant 1 : index
    %c0_356 = arith.constant 0 : index
    %360 = tpu.strided_load %arg35[%c1_355, %c0_356] {strides = array<i32: 2, 1>} : memref<8x64xf32, #tpu.memory_space<vmem>>, vector<4x64xf32>
    %361 = arith.maximumf %359, %360 : vector<4x64xf32>
    %cst_357 = arith.constant 0.000000e+00 : f32
    %362 = vector.broadcast %cst_357 : f32 to vector<6x64xf32>
    %c0_358 = arith.constant 0 : index
    %c0_359 = arith.constant 0 : index
    %363 = vector.load %arg36[%c0_358, %c0_359] : memref<6x64xf32, #tpu.memory_space<vmem>>, vector<6x64xf32>
    tpu.vector_store %arg36[%c0_358, %c0_359], %362 {strides = array<i32>} : memref<6x64xf32, #tpu.memory_space<vmem>>, vector<6x64xf32>,
    %c1_360 = arith.constant 1 : index
    %c0_361 = arith.constant 0 : index
    %364 = vector.load %arg36[%c1_360, %c0_361] : memref<6x64xf32, #tpu.memory_space<vmem>>, vector<4x64xf32>
    tpu.vector_store %arg36[%c1_360, %c0_361], %361 {strides = array<i32>} : memref<6x64xf32, #tpu.memory_space<vmem>>, vector<4x64xf32>,
    %cst_362 = arith.constant 0.000000e+00 : f32
    %365 = vector.broadcast %cst_362 : f32 to vector<4x64xf32>
    %c0_363 = arith.constant 0 : index
    %c0_364 = arith.constant 0 : index
    %366 = vector.load %arg36[%c0_363, %c0_364] : memref<6x64xf32, #tpu.memory_space<vmem>>, vector<4x64xf32>
    %367 = arith.truncf %366 : vector<4x64xf32> to vector<4x64xbf16>
    %c0_365 = arith.constant 0 : index
    %c0_366 = arith.constant 0 : index
    %c0_367 = arith.constant 0 : index
    %368 = vector.load %arg20[%c0_365, %c0_366, %c0_367] : memref<3x64x64xbf16, #tpu.memory_space<vmem>>, vector<1x64x64xbf16>
    %369 = vector.shape_cast %368 : vector<1x64x64xbf16> to vector<64x64xbf16>
    %cst_368 = arith.constant dense<0.000000e+00> : vector<4x64xf32>
    %370 = tpu.matmul %367, %369, %cst_368 {dimension_numbers = #tpu.dot_dimension_numbers<[1], [0], [0], [1], [0, 0, 1, 1], [], []>} : vector<4x64xbf16>, vector<64x64xbf16>, vector<4x64xf32> -> vector<4x64xf32>
    %371 = arith.addf %365, %370 : vector<4x64xf32>
    %c1_369 = arith.constant 1 : index
    %c0_370 = arith.constant 0 : index
    %372 = vector.load %arg36[%c1_369, %c0_370] : memref<6x64xf32, #tpu.memory_space<vmem>>, vector<4x64xf32>
    %373 = arith.truncf %372 : vector<4x64xf32> to vector<4x64xbf16>
    %c1_371 = arith.constant 1 : index
    %c0_372 = arith.constant 0 : index
    %c0_373 = arith.constant 0 : index
    %374 = vector.load %arg20[%c1_371, %c0_372, %c0_373] : memref<3x64x64xbf16, #tpu.memory_space<vmem>>, vector<1x64x64xbf16>
    %375 = vector.shape_cast %374 : vector<1x64x64xbf16> to vector<64x64xbf16>
    %cst_374 = arith.constant dense<0.000000e+00> : vector<4x64xf32>
    %376 = tpu.matmul %373, %375, %cst_374 {dimension_numbers = #tpu.dot_dimension_numbers<[1], [0], [0], [1], [0, 0, 1, 1], [], []>} : vector<4x64xbf16>, vector<64x64xbf16>, vector<4x64xf32> -> vector<4x64xf32>
    %377 = arith.addf %371, %376 : vector<4x64xf32>
    %c2_375 = arith.constant 2 : index
    %c0_376 = arith.constant 0 : index
    %378 = vector.load %arg36[%c2_375, %c0_376] : memref<6x64xf32, #tpu.memory_space<vmem>>, vector<4x64xf32>
    %379 = arith.truncf %378 : vector<4x64xf32> to vector<4x64xbf16>
    %c2_377 = arith.constant 2 : index
    %c0_378 = arith.constant 0 : index
    %c0_379 = arith.constant 0 : index
    %380 = vector.load %arg20[%c2_377, %c0_378, %c0_379] : memref<3x64x64xbf16, #tpu.memory_space<vmem>>, vector<1x64x64xbf16>
    %381 = vector.shape_cast %380 : vector<1x64x64xbf16> to vector<64x64xbf16>
    %cst_380 = arith.constant dense<0.000000e+00> : vector<4x64xf32>
    %382 = tpu.matmul %379, %381, %cst_380 {dimension_numbers = #tpu.dot_dimension_numbers<[1], [0], [0], [1], [0, 0, 1, 1], [], []>} : vector<4x64xbf16>, vector<64x64xbf16>, vector<4x64xf32> -> vector<4x64xf32>
    %383 = arith.addf %377, %382 : vector<4x64xf32>
    %c0_381 = arith.constant 0 : index
    %c0_382 = arith.constant 0 : index
    %384 = vector.load %arg21[%c0_381, %c0_382] : memref<1x64xf32, #tpu.memory_space<vmem>>, vector<1x64xf32>
    %385 = vector.broadcast %384 : vector<1x64xf32> to vector<4x64xf32>
    %386 = arith.mulf %383, %385 : vector<4x64xf32>
    %c0_383 = arith.constant 0 : index
    %c0_384 = arith.constant 0 : index
    %387 = vector.load %arg22[%c0_383, %c0_384] : memref<1x64xf32, #tpu.memory_space<vmem>>, vector<1x64xf32>
    %388 = vector.broadcast %387 : vector<1x64xf32> to vector<4x64xf32>
    %389 = arith.addf %386, %388 : vector<4x64xf32>
    %cst_385 = arith.constant 0.000000e+00 : f32
    %390 = vector.broadcast %cst_385 : f32 to vector<4x64xf32>
    %391 = arith.maximumf %389, %390 : vector<4x64xf32>
    %c0_386 = arith.constant 0 : index
    %c0_387 = arith.constant 0 : index
    %392 = vector.load %arg37[%c0_386, %c0_387] : memref<4x64xf32, #tpu.memory_space<vmem>>, vector<4x64xf32>
    tpu.vector_store %arg37[%c0_386, %c0_387], %391 {strides = array<i32>} : memref<4x64xf32, #tpu.memory_space<vmem>>, vector<4x64xf32>,
    %c0_388 = arith.constant 0 : index
    %c0_389 = arith.constant 0 : index
    %393 = tpu.strided_load %arg37[%c0_388, %c0_389] {strides = array<i32: 2, 1>} : memref<4x64xf32, #tpu.memory_space<vmem>>, vector<2x64xf32>
    %c1_390 = arith.constant 1 : index
    %c0_391 = arith.constant 0 : index
    %394 = tpu.strided_load %arg37[%c1_390, %c0_391] {strides = array<i32: 2, 1>} : memref<4x64xf32, #tpu.memory_space<vmem>>, vector<2x64xf32>
    %395 = arith.maximumf %393, %394 : vector<2x64xf32>
    %c0_392 = arith.constant 0 : index
    %c0_393 = arith.constant 0 : index
    %c0_394 = arith.constant 0 : index
    %396 = vector.load %arg23[%c0_392, %c0_393, %c0_394] : memref<1x2x64xf32, #tpu.memory_space<vmem>>, vector<1x2x64xf32>
    %397 = vector.shape_cast %396 : vector<1x2x64xf32> to vector<2x64xf32>
    %398 = vector.shape_cast %395 : vector<2x64xf32> to vector<1x2x64xf32>
    tpu.vector_store %arg23[%c0_392, %c0_393, %c0_394], %398 {strides = array<i32>} : memref<1x2x64xf32, #tpu.memory_space<vmem>>, vector<1x2x64xf32>,
    return
  }
  func.func @transform_0(%arg0: i32) -> (i32, i32, i32) {
    %c0_i32 = arith.constant 0 : i32
    %c0_i32_0 = arith.constant 0 : i32
    %c0_i32_1 = arith.constant 0 : i32
    return %arg0, %c0_i32, %c0_i32_0 : i32, i32, i32
  }
  func.func @transform_1(%arg0: i32) -> (i32, i32, i32) {
    %c0_i32 = arith.constant 0 : i32
    %c0_i32_0 = arith.constant 0 : i32
    %c0_i32_1 = arith.constant 0 : i32
    %c0_i32_2 = arith.constant 0 : i32
    return %c0_i32, %c0_i32_0, %c0_i32_1 : i32, i32, i32
  }
  func.func @transform_2(%arg0: i32) -> (i32, i32) {
    %c0_i32 = arith.constant 0 : i32
    %c0_i32_0 = arith.constant 0 : i32
    %c0_i32_1 = arith.constant 0 : i32
    return %c0_i32, %c0_i32_0 : i32, i32
  }
  func.func @transform_3(%arg0: i32) -> (i32, i32) {
    %c0_i32 = arith.constant 0 : i32
    %c0_i32_0 = arith.constant 0 : i32
    %c0_i32_1 = arith.constant 0 : i32
    return %c0_i32, %c0_i32_0 : i32, i32
  }
  func.func @transform_4(%arg0: i32) -> (i32, i32, i32) {
    %c0_i32 = arith.constant 0 : i32
    %c0_i32_0 = arith.constant 0 : i32
    %c0_i32_1 = arith.constant 0 : i32
    %c0_i32_2 = arith.constant 0 : i32
    return %c0_i32, %c0_i32_0, %c0_i32_1 : i32, i32, i32
  }
  func.func @transform_5(%arg0: i32) -> (i32, i32) {
    %c0_i32 = arith.constant 0 : i32
    %c0_i32_0 = arith.constant 0 : i32
    %c0_i32_1 = arith.constant 0 : i32
    return %c0_i32, %c0_i32_0 : i32, i32
  }
  func.func @transform_6(%arg0: i32) -> (i32, i32) {
    %c0_i32 = arith.constant 0 : i32
    %c0_i32_0 = arith.constant 0 : i32
    %c0_i32_1 = arith.constant 0 : i32
    return %c0_i32, %c0_i32_0 : i32, i32
  }
  func.func @transform_7(%arg0: i32) -> (i32, i32, i32) {
    %c0_i32 = arith.constant 0 : i32
    %c0_i32_0 = arith.constant 0 : i32
    %c0_i32_1 = arith.constant 0 : i32
    %c0_i32_2 = arith.constant 0 : i32
    return %c0_i32, %c0_i32_0, %c0_i32_1 : i32, i32, i32
  }
  func.func @transform_8(%arg0: i32) -> (i32, i32) {
    %c0_i32 = arith.constant 0 : i32
    %c0_i32_0 = arith.constant 0 : i32
    %c0_i32_1 = arith.constant 0 : i32
    return %c0_i32, %c0_i32_0 : i32, i32
  }
  func.func @transform_9(%arg0: i32) -> (i32, i32) {
    %c0_i32 = arith.constant 0 : i32
    %c0_i32_0 = arith.constant 0 : i32
    %c0_i32_1 = arith.constant 0 : i32
    return %c0_i32, %c0_i32_0 : i32, i32
  }
  func.func @transform_10(%arg0: i32) -> (i32, i32, i32) {
    %c0_i32 = arith.constant 0 : i32
    %c0_i32_0 = arith.constant 0 : i32
    %c0_i32_1 = arith.constant 0 : i32
    %c0_i32_2 = arith.constant 0 : i32
    return %c0_i32, %c0_i32_0, %c0_i32_1 : i32, i32, i32
  }
  func.func @transform_11(%arg0: i32) -> (i32, i32) {
    %c0_i32 = arith.constant 0 : i32
    %c0_i32_0 = arith.constant 0 : i32
    %c0_i32_1 = arith.constant 0 : i32
    return %c0_i32, %c0_i32_0 : i32, i32
  }
  func.func @transform_12(%arg0: i32) -> (i32, i32) {
    %c0_i32 = arith.constant 0 : i32
    %c0_i32_0 = arith.constant 0 : i32
    %c0_i32_1 = arith.constant 0 : i32
    return %c0_i32, %c0_i32_0 : i32, i32
  }
  func.func @transform_13(%arg0: i32) -> (i32, i32, i32) {
    %c0_i32 = arith.constant 0 : i32
    %c0_i32_0 = arith.constant 0 : i32
    %c0_i32_1 = arith.constant 0 : i32
    %c0_i32_2 = arith.constant 0 : i32
    return %c0_i32, %c0_i32_0, %c0_i32_1 : i32, i32, i32
  }
  func.func @transform_14(%arg0: i32) -> (i32, i32) {
    %c0_i32 = arith.constant 0 : i32
    %c0_i32_0 = arith.constant 0 : i32
    %c0_i32_1 = arith.constant 0 : i32
    return %c0_i32, %c0_i32_0 : i32, i32
  }
  func.func @transform_15(%arg0: i32) -> (i32, i32) {
    %c0_i32 = arith.constant 0 : i32
    %c0_i32_0 = arith.constant 0 : i32
    %c0_i32_1 = arith.constant 0 : i32
    return %c0_i32, %c0_i32_0 : i32, i32
  }
  func.func @transform_16(%arg0: i32) -> (i32, i32, i32) {
    %c0_i32 = arith.constant 0 : i32
    %c0_i32_0 = arith.constant 0 : i32
    %c0_i32_1 = arith.constant 0 : i32
    %c0_i32_2 = arith.constant 0 : i32
    return %c0_i32, %c0_i32_0, %c0_i32_1 : i32, i32, i32
  }
  func.func @transform_17(%arg0: i32) -> (i32, i32) {
    %c0_i32 = arith.constant 0 : i32
    %c0_i32_0 = arith.constant 0 : i32
    %c0_i32_1 = arith.constant 0 : i32
    return %c0_i32, %c0_i32_0 : i32, i32
  }
  func.func @transform_18(%arg0: i32) -> (i32, i32) {
    %c0_i32 = arith.constant 0 : i32
    %c0_i32_0 = arith.constant 0 : i32
    %c0_i32_1 = arith.constant 0 : i32
    return %c0_i32, %c0_i32_0 : i32, i32
  }
  func.func @transform_19(%arg0: i32) -> (i32, i32, i32) {
    %c0_i32 = arith.constant 0 : i32
    %c0_i32_0 = arith.constant 0 : i32
    %c0_i32_1 = arith.constant 0 : i32
    %c0_i32_2 = arith.constant 0 : i32
    return %c0_i32, %c0_i32_0, %c0_i32_1 : i32, i32, i32
  }
  func.func @transform_20(%arg0: i32) -> (i32, i32) {
    %c0_i32 = arith.constant 0 : i32
    %c0_i32_0 = arith.constant 0 : i32
    %c0_i32_1 = arith.constant 0 : i32
    return %c0_i32, %c0_i32_0 : i32, i32
  }
  func.func @transform_21(%arg0: i32) -> (i32, i32) {
    %c0_i32 = arith.constant 0 : i32
    %c0_i32_0 = arith.constant 0 : i32
    %c0_i32_1 = arith.constant 0 : i32
    return %c0_i32, %c0_i32_0 : i32, i32
  }
  func.func @transform_22(%arg0: i32) -> (i32, i32, i32) {
    %c0_i32 = arith.constant 0 : i32
    %c0_i32_0 = arith.constant 0 : i32
    %c0_i32_1 = arith.constant 0 : i32
    return %arg0, %c0_i32, %c0_i32_0 : i32, i32, i32
  }
}

</mosaic_0001>

<bundles_post_ra>
// kernel: encoder_forward.1
= control target key start
LH: loop header
LB: loop body
LE: loop exit
PB: predicated region body
PF: predicated region fallthrough
CT: control target
= control target key end

     0   :  { %s8596_s0 = inlined_call_operand.vmem [shape: f32[2,256,3], index: 0, kind: input, shape index: {}]   ;;  %s8597_s1 = inlined_call_operand.vmem [shape: bf16[11,3,8], index: 1, kind: input, shape index: {}]   ;;  %s8598_s2 = inlined_call_operand.vmem [shape: f32[1,8], index: 2, kind: input, shape index: {}]   ;;  %s8599_s3 = inlined_call_operand.vmem [shape: f32[1,8], index: 3, kind: input, shape index: {}]   ;;  %s8600_s4 = inlined_call_operand.vmem [shape: bf16[9,8,16], index: 4, kind: input, shape index: {}]   ;;  %s8601_s5 = inlined_call_operand.vmem [shape: f32[1,16], index: 5, kind: input, shape index: {}]   ;;  %s8602_s6 = inlined_call_operand.vmem [shape: f32[1,16], index: 6, kind: input, shape index: {}]   ;;  %s8603_s7 = inlined_call_operand.vmem [shape: bf16[7,16,16], index: 7, kind: input, shape index: {}]   ;;  %s8604_s8 = inlined_call_operand.vmem [shape: f32[1,16], index: 8, kind: input, shape index: {}]   ;;  %s8605_s9 = inlined_call_operand.vmem [shape: f32[1,16], index: 9, kind: input, shape index: {}]   ;;  %s8606_s10 = inlined_call_operand.vmem [shape: bf16[7,16,32], index: 10, kind: input, shape index: {}]   ;;  %s8607_s11 = inlined_call_operand.vmem [shape: f32[1,32], index: 11, kind: input, shape index: {}]   ;;  %s8608_s12 = inlined_call_operand.vmem [shape: f32[1,32], index: 12, kind: input, shape index: {}]   ;;  %s8609_s13 = inlined_call_operand.vmem [shape: bf16[5,32,32], index: 13, kind: input, shape index: {}]   ;;  %s8610_s14 = inlined_call_operand.vmem [shape: f32[1,32], index: 14, kind: input, shape index: {}]   ;;  %s8611_s15 = inlined_call_operand.vmem [shape: f32[1,32], index: 15, kind: input, shape index: {}]   ;;  %s8612_s16 = inlined_call_operand.vmem [shape: bf16[5,32,64], index: 16, kind: input, shape index: {}]   ;;  %s8613_s17 = inlined_call_operand.vmem [shape: f32[1,64], index: 17, kind: input, shape index: {}]   ;;  %s8614_s18 = inlined_call_operand.vmem [shape: f32[1,64], index: 18, kind: input, shape index: {}]   ;;  %s8615_s19 = inlined_call_operand.vmem [shape: bf16[3,64,64], index: 19, kind: input, shape index: {}]   ;;  %s8616_s20 = inlined_call_operand.vmem [shape: f32[1,64], index: 20, kind: input, shape index: {}]   ;;  %s8617_s21 = inlined_call_operand.vmem [shape: f32[1,64], index: 21, kind: input, shape index: {}]   ;;  %s8618_s22 = inlined_call_operand.hbm [shape: f32[2,2,64], index: 22, kind: output, shape index: {}]  }
   0x1   :  { %8631 = sst [smem:[#allocation58_spill]] %s8596_s0 }
   0x2   :  { %8632 = sst [smem:[#allocation59_spill]] %s8597_s1 }
   0x3   :  { %8633 = sst [smem:[#allocation60_spill]] %s8598_s2 }
   0x4   :  { %8634 = sst [smem:[#allocation61_spill]] %s8599_s3 }
   0x5   :  { %8635 = sst [smem:[#allocation62_spill]] %s8600_s4 }
   0x6   :  { %8636 = sst [smem:[#allocation63_spill]] %s8601_s5 }
   0x7   :  { %8637 = sst [smem:[#allocation64_spill]] %s8602_s6 }
   0x8   :  { %8638 = sst [smem:[#allocation65_spill]] %s8603_s7 }
   0x9   :  { %8639 = sst [smem:[#allocation66_spill]] %s8604_s8 }
   0xa   :  { %8640 = sst [smem:[#allocation67_spill]] %s8605_s9 }
   0xb   :  { %8641 = sst [smem:[#allocation68_spill]] %s8606_s10 }
   0xc   :  { %27 = vsyncpa [#allocation17], 0 }
   0xd   :  { %29 = vsyncpa [#allocation17 + $0x1], 0  ;;  %s6983_s3 = smov 0   ;;  %s6985_s28 = smov 0  }
   0xe   :  { %s6987_s29 = smov 0   ;;  %s6989_s30 = smov 0  }
   0xf LB: > { %8642 = sst [smem:[#allocation19_spill]] %s6860_s29  ;;  %s7004_s4 = sadd.s32 4294967295, %s6864_s30   ;;  %s6864_s30 = sphi %s6989_s30, %s8732_s30   ;;  %s6860_s29 = sphi %s6987_s29, %s8734_s29   ;;  %s6856_s28 = sphi %s6985_s28, %s8736_s28   ;;  %s6852_s3 = sphi %s6983_s3, %s8735_s3  }
  0x10   : > { %s6110_s0 = sadd.s32 4294967294, %s6864_s30   ;;  %s7008_s23 = sadd.s32 1, %s6864_s30  }
  0x11   : > { %8643 = sst [smem:[#allocation20_spill]] %s7008_s23  ;;  %s509_s1 = sadd.s32 1, %s6860_s29 }
  0x12   : > { %s506_s5 = ssub.s32 %s6864_s30, %s7008_s23  ;;  %p519_p0 = scmp.ne.s32.totalorder %s6860_s29, %s6856_s28 }
  0x13   : > { %p507_p1 = scmp.eq.s32.totalorder %s506_s5, 0  ;;  %p520_p2 = scmp.eq.s32.totalorder %s7004_s4, 1 }
  0x14   : > { %p525_p3 = scmp.ne.s32.totalorder %s6856_s28, %s6852_s3  ;;  %p526_p4 = scmp.eq.s32.totalorder %s6110_s0, 1 }
  0x15   : > { %s7019_s24 = scalar_select %p507_p1, %s6860_s29, %s509_s1  }
  0x16   : > { %p7021_p5 = por %p520_p2, %p519_p0  ;;  %p7025_p6 = por %p526_p4, %p525_p3 }
  0x17   : > { %8644 = sst [smem:[#allocation21_spill]] %s7019_s24  ;;  %p6113_p7 = scmp.ge.s32.totalorder %s6864_s30, 1 }
  0x18   : > { %s8646_s25 = scalar_select %p7025_p6, 1, 0 }
  0x19   : > { %p615_p8 = scmp.lt.s32.totalorder %s6864_s30, 3 }
  0x1a   : > { %8647 = sst [smem:[#allocation22_spill]] %s8646_s25 }
  0x1b   : > { %p616_p9 = pnand %p6113_p7, %p615_p8 }
  0x1d   : > { %619 = sbr.rel (%p616_p9) target bundleno = 2438 (0x986), region = 108 }
  0x22   : > { %s8648_s27 = sld [smem:[#allocation59_spill]]  ;;  %vm930_vm0 = vcmask 1040384   ;;  %vm931_vm1 = vcmask 1041408   ;;  %p677_p10 = scmp.lt.s32.totalorder %s7004_s4, 1  ;;  %v6866_v1 = vmov 65535   ;;  %vm715_vm2 = vcmask 23552  }
  0x23   : > { %v932_v2 = vsel %vm930_vm0, 4294967295, %v6866_v1  ;;  %v8628_v11 = vmov 0.0   ;;  %s8649_s5 = sld [smem:[#allocation58_spill]]  ;;  %vm3488_vm3 = vcmask 1043456   ;;  %vm3268_vm4 = vcmask 64512   ;;  %s674_s1 = sand.u32 1, %s6856_s28  }
  0x24   : > { %v7041_v5 = vsel %vm931_vm1, %v932_v2, 0  ;;  %s678_s29 = scalar_select %p677_p10, %s7004_s4, 1  ;;  %716 = vst.msk [vmem:[#allocation2] sm:$0xff] %vm715_vm2, %v8628_v11  ;;  %vm749_vm5 = vcmask 17408   ;;  %vm4499_vm6 = vcmask 130048   ;;  %vm4563_vm7 = vcmask 128000  }
  0x25   : > { %717 = vst.msk [vmem:[#allocation2 + $0x8] sm:$0xff] %vm715_vm2, %v8628_v11  ;;  %s8650_s25 = sld [smem:[#allocation62_spill]]  ;;  %vm5433_vm8 = vcmask 261120   ;;  %vm5449_vm9 = vcmask 257024   ;;  %vm5860_vm10 = vcmask 521216   ;;  %vm5854_vm11 = vcmask 523264  }
  0x26   : > { %s6698_s24 = sshll.u32 %s678_s29, 8  ;;  %718 = vst.msk [vmem:[#allocation2 + $0x10] sm:$0xff] %vm715_vm2, %v8628_v11  ;;  %s8675_s7 = sld [smem:[#allocation65_spill]]  ;;  %vm5862_vm12 = vcmask 519168   ;;  %vm6033_vm13 = vcmask 517120  }
  0x27   : > { %719 = vst.msk [vmem:[#allocation2 + $0x18] sm:$0xff] %vm715_vm2, %v8628_v11  ;;  %s8690_s2 = sld [smem:[#allocation63_spill]]  ;;  %s6036_s23 = scalar_lea.sflag [#allocation17], %s674_s1 }
  0x28   : > { %v6117_v0 = vld [vmem:[%s8648_s27 + $0x2] sm:$0x3]  ;;  %v831_v3 = vld [vmem:[%s8648_s27] sm:$0x3]  ;;  %v6150_v4 = vld [vmem:[%s8648_s27 + $0x4] sm:$0x3] }
  0x29   : > { %v6167_v6 = vld [vmem:[%s8648_s27 + $0x6] sm:$0x3]  ;;  %v935_v7 = vand.u32 %v6117_v0, %v7041_v5  ;;  %v1075_v8 = vand.u32 %v7041_v5, %v831_v3  ;;  %v1265_v9 = vand.u32 %v6150_v4, %v7041_v5  ;;  %s7058_s26 = scalar_lea.vmem %s8649_s5, %s6698_s24  ;;  %v6218_v12 = vld [vmem:[%s8648_s27 + $0xc] sm:$0x3]  ;;  %v6184_v13 = vld [vmem:[%s8648_s27 + $0x8] sm:$0x3] }
  0x2a   : > { %v1487_v10 = vand.u32 %v6167_v6, %v7041_v5  ;;  %v683_v14 = vld [vmem:[%s7058_s26] sm:$0xff]  ;;  %v684_v15 = vld [vmem:[%s7058_s26 + $0x8] sm:$0xff]  ;;  %v2153_v16 = vand.u32 %v6218_v12, %v7041_v5  ;;  %v1709_v17 = vand.u32 %v6184_v13, %v7041_v5  ;;  %720 = vst.msk [vmem:[#allocation2 + $0x20] sm:$0xff] %vm715_vm2, %v8628_v11  ;;  %v685_v32 = vld [vmem:[%s7058_s26 + $0x10] sm:$0xff]  ;;  %s8652_s24 = sld [smem:[#allocation61_spill]]  ;;  %s6114_s5 = sshll.u32 %s674_s1, 1 }
  0x2b   : > { %944 = vmatpush.bf16.msra.mxu0 %v935_v7  ;;  %1084 = vmatpush.bf16.msra.mxu1 %v1075_v8  ;;  %v6201_v18 = vld [vmem:[%s8648_s27 + $0xa] sm:$0x3]  ;;  %751 = vst.msk [vmem:[#allocation2 + $0x5] sm:$0xff] %vm715_vm2, %v683_v14  ;;  %v686_v33 = vld [vmem:[%s7058_s26 + $0x18] sm:$0xff]  ;;  %v687_v34 = vld [vmem:[%s7058_s26 + $0x20] sm:$0xff]  ;;  %s8728_s10 = sld [smem:[#allocation68_spill]] }
  0x2c   : > { %1274 = vmatpush.bf16.msra.mxu2 %v1265_v9  ;;  %1496 = vmatpush.bf16.msra.mxu3 %v1487_v10  ;;  %v1931_v19 = vand.u32 %v6201_v18, %v7041_v5  ;;  %752 = vst.msk [vmem:[#allocation2 + $0xd] sm:$0xff] %vm715_vm2, %v684_v15  ;;  %v688_v35 = vld [vmem:[%s7058_s26 + $0x28] sm:$0xff]  ;;  %v689_v36 = vld [vmem:[%s7058_s26 + $0x30] sm:$0xff]  ;;  %v690_v37 = vld [vmem:[%s7058_s26 + $0x38] sm:$0xff]  ;;  %s8729_s8 = sld [smem:[#allocation66_spill]]  ;;  %s676_s29 = scalar_lea.vmem [#allocation16], %s6114_s5 }
  0x2d   : > { %721 = vst.msk [vmem:[#allocation2 + $0x28] sm:$0xff] %vm715_vm2, %v8628_v11  ;;  %v691_v50 = vld [vmem:[%s7058_s26 + $0x40] sm:$0xff]  ;;  %v692_v51 = vld [vmem:[%s7058_s26 + $0x48] sm:$0xff]  ;;  %v693_v0 = vld [vmem:[%s7058_s26 + $0x50] sm:$0xff]  ;;  %s8730_s9 = sld [smem:[#allocation67_spill]]  ;;  %s6048_s0 = sshll.u32 %s676_s29, 4  ;;  %s6049_s0 = int_to_ptr.vmem [resolvable:$true] %s6048_s0 }
  0x2e   : > { %722 = vst.msk [vmem:[#allocation2 + $0x30] sm:$0xff] %vm715_vm2, %v8628_v11  ;;  %v694_v1 = vld [vmem:[%s7058_s26 + $0x58] sm:$0xff]  ;;  %s6822_s5 = scalar_lea.hbm %s8618_s22, 4 }
  0x2f   : > { %1718 = vmatpush.bf16.msrb.mxu0 %v1709_v17  ;;  %1940 = vmatpush.bf16.msrb.mxu1 %v1931_v19  ;;  %723 = vst.msk [vmem:[#allocation2 + $0x38] sm:$0xff] %vm715_vm2, %v8628_v11  ;;  %v696_v17 = vld [vmem:[%s7058_s26 + $0x68] sm:$0xff] }
  0x30   : > { %2162 = vmatpush.bf16.msrb.mxu2 %v2153_v16  ;;  %724 = vst.msk [vmem:[#allocation2 + $0x40] sm:$0xff] %vm715_vm2, %v8628_v11  ;;  %v695_v16 = vld [vmem:[%s7058_s26 + $0x60] sm:$0xff] }
  0x31   : > { %725 = vst.msk [vmem:[#allocation2 + $0x48] sm:$0xff] %vm715_vm2, %v8628_v11 }
  0x32   : > { %v832_v20 = vld [vmem:[#allocation2 + $0x1] sm:$0xff]  ;;  %726 = vst.msk [vmem:[#allocation2 + $0x50] sm:$0xff] %vm715_vm2, %v8628_v11 }
  0x33   : > { %v783_v21 = vld [vmem:[#allocation2] sm:$0xff]  ;;  %v833_v23 = vld [vmem:[#allocation2 + $0x9] sm:$0xff]  ;;  %727 = vst.msk [vmem:[#allocation2 + $0x58] sm:$0xff] %vm715_vm2, %v8628_v11 }
  0x34   : > { %v1166_v22 = vld [vmem:[#allocation2 + $0x2] sm:$0xff]  ;;  %v1167_v25 = vld [vmem:[#allocation2 + $0xa] sm:$0xff]  ;;  %v864_v26 = vpack.c.bf16 %v833_v23, %v832_v20  ;;  %728 = vst.msk [vmem:[#allocation2 + $0x60] sm:$0xff] %vm715_vm2, %v8628_v11 }
  0x35   : > { %v784_v24 = vld [vmem:[#allocation2 + $0x8] sm:$0xff]  ;;  %v1198_v28 = vpack.c.bf16 %v1167_v25, %v1166_v22  ;;  %729 = vst.msk [vmem:[#allocation2 + $0x68] sm:$0xff] %vm715_vm2, %v8628_v11 }
  0x36   : > { %v815_v27 = vpack.c.bf16 %v784_v24, %v783_v21  ;;  %v1388_v29 = vld [vmem:[#allocation2 + $0x3] sm:$0xff]  ;;  %v1389_v30 = vld [vmem:[#allocation2 + $0xb] sm:$0xff]  ;;  %6118 = vmatmul.msk.bf16.vlgmr.msra.gmra.mxu0 %vm715_vm2, %v864_v26  ;;  %730 = vst.msk [vmem:[#allocation2 + $0x70] sm:$0xff] %vm715_vm2, %v8628_v11 }
  0x37   : > { %v1420_v31 = vpack.c.bf16 %v1389_v30, %v1388_v29  ;;  %6151 = vmatmul.msk.bf16.vlgmr.msra.gmra.mxu2 %vm715_vm2, %v1198_v28  ;;  %731 = vst.msk [vmem:[#allocation2 + $0x78] sm:$0xff] %vm715_vm2, %v8628_v11  ;;  %v697_v30 = vld [vmem:[%s7058_s26 + $0x70] sm:$0xff] }
  0x38   : > { %6134 = vmatmul.msk.bf16.vlgmr.msra.gmra.mxu1 %vm715_vm2, %v815_v27  ;;  %732 = vst.msk [vmem:[#allocation2 + $0x80] sm:$0xff] %vm715_vm2, %v8628_v11 }
  0x39   : > { %6168 = vmatmul.msk.bf16.vlgmr.msra.gmra.mxu3 %vm715_vm2, %v1420_v31  ;;  %733 = vst.msk [vmem:[#allocation2 + $0x88] sm:$0xff] %vm715_vm2, %v8628_v11  ;;  %v698_v31 = vld [vmem:[%s7058_s26 + $0x78] sm:$0xff] }
  0x3a   : > { %734 = vst.msk [vmem:[#allocation2 + $0x90] sm:$0xff] %vm715_vm2, %v8628_v11 }
  0x3b   : > { %735 = vst.msk [vmem:[#allocation2 + $0x98] sm:$0xff] %vm715_vm2, %v8628_v11 }
  0x3c   : > { %736 = vst.msk [vmem:[#allocation2 + $0xa0] sm:$0xff] %vm715_vm2, %v8628_v11 }
  0x3d   : > { %737 = vst.msk [vmem:[#allocation2 + $0xa8] sm:$0xff] %vm715_vm2, %v8628_v11 }
  0x3e   : > { %738 = vst.msk [vmem:[#allocation2 + $0xb0] sm:$0xff] %vm715_vm2, %v8628_v11 }
  0x3f   : > { %739 = vst.msk [vmem:[#allocation2 + $0xb8] sm:$0xff] %vm715_vm2, %v8628_v11 }
  0x40   : > { %740 = vst.msk [vmem:[#allocation2 + $0xc0] sm:$0xff] %vm715_vm2, %v8628_v11 }
  0x41   : > { %741 = vst.msk [vmem:[#allocation2 + $0xc8] sm:$0xff] %vm715_vm2, %v8628_v11 }
  0x42   : > { %742 = vst.msk [vmem:[#allocation2 + $0xd0] sm:$0xff] %vm715_vm2, %v8628_v11 }
  0x43   : > { %743 = vst.msk [vmem:[#allocation2 + $0xd8] sm:$0xff] %vm715_vm2, %v8628_v11 }
  0x44   : > { %744 = vst.msk [vmem:[#allocation2 + $0xe0] sm:$0xff] %vm715_vm2, %v8628_v11 }
  0x45   : > { %745 = vst.msk [vmem:[#allocation2 + $0xe8] sm:$0xff] %vm715_vm2, %v8628_v11 }
  0x46   : > { %746 = vst.msk [vmem:[#allocation2 + $0xf0] sm:$0xff] %vm715_vm2, %v8628_v11 }
  0x47   : > { %747 = vst.msk [vmem:[#allocation2 + $0xf8] sm:$0xff] %vm715_vm2, %v8628_v11 }
  0x48   : > { %748 = vst.msk [vmem:[#allocation2 + $0x100] sm:$0xff] %vm715_vm2, %v8628_v11 }
  0x49   : > { %753 = vst.msk [vmem:[#allocation2 + $0x15] sm:$0xff] %vm715_vm2, %v685_v32 }
  0x4a   : > { %754 = vst.msk [vmem:[#allocation2 + $0x1d] sm:$0xff] %vm715_vm2, %v686_v33 }
  0x4b   : > { %755 = vst.msk [vmem:[#allocation2 + $0x25] sm:$0xff] %vm715_vm2, %v687_v34 }
  0x4c   : > { %756 = vst.msk [vmem:[#allocation2 + $0x2d] sm:$0xff] %vm715_vm2, %v688_v35 }
  0x4d   : > { %757 = vst.msk [vmem:[#allocation2 + $0x35] sm:$0xff] %vm715_vm2, %v689_v36 }
  0x4e   : > { %758 = vst.msk [vmem:[#allocation2 + $0x3d] sm:$0xff] %vm715_vm2, %v690_v37 }
  0x4f   : > { %759 = vst.msk [vmem:[#allocation2 + $0x45] sm:$0xff] %vm715_vm2, %v691_v50 }
  0x50   : > { %v834_v38 = vld [vmem:[#allocation2 + $0x11] sm:$0xff]  ;;  %760 = vst.msk [vmem:[#allocation2 + $0x4d] sm:$0xff] %vm715_vm2, %v692_v51 }
  0x51   : > { %v785_v39 = vld [vmem:[#allocation2 + $0x10] sm:$0xff]  ;;  %v835_v41 = vld [vmem:[#allocation2 + $0x19] sm:$0xff]  ;;  %761 = vst.msk [vmem:[#allocation2 + $0x55] sm:$0xff] %vm715_vm2, %v693_v0 }
  0x52   : > { %v1168_v40 = vld [vmem:[#allocation2 + $0x12] sm:$0xff]  ;;  %v1169_v43 = vld [vmem:[#allocation2 + $0x1a] sm:$0xff]  ;;  %v865_v44 = vpack.c.bf16 %v835_v41, %v834_v38  ;;  %v1170_v56 = vld [vmem:[#allocation2 + $0x22] sm:$0xff]  ;;  %762 = vst.msk [vmem:[#allocation2 + $0x5d] sm:$0xff] %vm715_vm2, %v694_v1 }
  0x53   : > { %v786_v42 = vld [vmem:[#allocation2 + $0x18] sm:$0xff]  ;;  %v1199_v46 = vpack.c.bf16 %v1169_v43, %v1168_v40  ;;  %v836_v52 = vld [vmem:[#allocation2 + $0x21] sm:$0xff]  ;;  %v837_v53 = vld [vmem:[#allocation2 + $0x29] sm:$0xff]  ;;  %763 = vst.msk [vmem:[#allocation2 + $0x65] sm:$0xff] %vm715_vm2, %v695_v16 }
  0x54   : > { %v816_v45 = vpack.c.bf16 %v786_v42, %v785_v39  ;;  %v1390_v47 = vld [vmem:[#allocation2 + $0x13] sm:$0xff]  ;;  %v1391_v48 = vld [vmem:[#allocation2 + $0x1b] sm:$0xff]  ;;  %6119 = vmatmul.msk.bf16.gmra.mxu0 %vm715_vm2, %v865_v44  ;;  %v788_v55 = vld [vmem:[#allocation2 + $0x28] sm:$0xff]  ;;  %v866_v60 = vpack.c.bf16 %v837_v53, %v836_v52  ;;  %764 = vst.msk [vmem:[#allocation2 + $0x6d] sm:$0xff] %vm715_vm2, %v696_v17 }
  0x55   : > { %v1421_v49 = vpack.c.bf16 %v1391_v48, %v1390_v47  ;;  %6152 = vmatmul.msk.bf16.gmra.mxu2 %vm715_vm2, %v1199_v46  ;;  %v787_v54 = vld [vmem:[#allocation2 + $0x20] sm:$0xff]  ;;  %v1171_v57 = vld [vmem:[#allocation2 + $0x2a] sm:$0xff]  ;;  %v790_v6 = vld [vmem:[#allocation2 + $0x38] sm:$0xff]  ;;  %765 = vst.msk [vmem:[#allocation2 + $0x75] sm:$0xff] %vm715_vm2, %v697_v30 }
  0x56   : > { %6135 = vmatmul.msk.bf16.gmra.mxu1 %vm715_vm2, %v816_v45  ;;  %v1392_v58 = vld [vmem:[#allocation2 + $0x23] sm:$0xff]  ;;  %v1393_v59 = vld [vmem:[#allocation2 + $0x2b] sm:$0xff]  ;;  %v817_v61 = vpack.c.bf16 %v788_v55, %v787_v54  ;;  %v1200_v62 = vpack.c.bf16 %v1171_v57, %v1170_v56  ;;  %v839_v3 = vld [vmem:[#allocation2 + $0x39] sm:$0xff]  ;;  %766 = vst.msk [vmem:[#allocation2 + $0x7d] sm:$0xff] %vm715_vm2, %v698_v31 }
  0x57   : > { %6169 = vmatmul.msk.bf16.gmra.mxu3 %vm715_vm2, %v1421_v49  ;;  %v1422_v63 = vpack.c.bf16 %v1393_v59, %v1392_v58  ;;  %v838_v2 = vld [vmem:[#allocation2 + $0x31] sm:$0xff]  ;;  %v1173_v8 = vld [vmem:[#allocation2 + $0x3a] sm:$0xff]  ;;  %v841_v19 = vld [vmem:[#allocation2 + $0x49] sm:$0xff]  ;;  %3380 = vst.msk [vmem:[#allocation4] sm:$0xff] %vm3268_vm4, %v8628_v11 }
  0x58   : > { %v789_v4 = vld [vmem:[#allocation2 + $0x30] sm:$0xff]  ;;  %v1395_v10 = vld [vmem:[#allocation2 + $0x3b] sm:$0xff]  ;;  %v867_v12 = vpack.c.bf16 %v839_v3, %v838_v2  ;;  %v792_v21 = vld [vmem:[#allocation2 + $0x48] sm:$0xff]  ;;  %3381 = vst.msk [vmem:[#allocation4 + $0x8] sm:$0xff] %vm3268_vm4, %v8628_v11 }
  0x59   : > { %v1172_v7 = vld [vmem:[#allocation2 + $0x32] sm:$0xff]  ;;  %v818_v13 = vpack.c.bf16 %v790_v6, %v789_v4  ;;  %v840_v18 = vld [vmem:[#allocation2 + $0x41] sm:$0xff]  ;;  %v1175_v23 = vld [vmem:[#allocation2 + $0x4a] sm:$0xff]  ;;  %3382 = vst.msk [vmem:[#allocation4 + $0x10] sm:$0xff] %vm3268_vm4, %v8628_v11 }
  0x5a   : > { %v1394_v9 = vld [vmem:[#allocation2 + $0x33] sm:$0xff]  ;;  %v1201_v14 = vpack.c.bf16 %v1173_v8, %v1172_v7  ;;  %v791_v20 = vld [vmem:[#allocation2 + $0x40] sm:$0xff]  ;;  %v1397_v25 = vld [vmem:[#allocation2 + $0x4b] sm:$0xff]  ;;  %v868_v26 = vpack.c.bf16 %v841_v19, %v840_v18  ;;  %3383 = vst.msk [vmem:[#allocation4 + $0x18] sm:$0xff] %vm3268_vm4, %v8628_v11 }
  0x5b   : > { %v1423_v15 = vpack.c.bf16 %v1395_v10, %v1394_v9  ;;  %v1174_v22 = vld [vmem:[#allocation2 + $0x42] sm:$0xff]  ;;  %v819_v27 = vpack.c.bf16 %v792_v21, %v791_v20  ;;  %v842_v32 = vld [vmem:[#allocation2 + $0x51] sm:$0xff]  ;;  %v843_v33 = vld [vmem:[#allocation2 + $0x59] sm:$0xff]  ;;  %3384 = vst.msk [vmem:[#allocation4 + $0x20] sm:$0xff] %vm3268_vm4, %v8628_v11 }
  0x5c   : > { %v1396_v24 = vld [vmem:[#allocation2 + $0x43] sm:$0xff]  ;;  %v1202_v28 = vpack.c.bf16 %v1175_v23, %v1174_v22  ;;  %v793_v34 = vld [vmem:[#allocation2 + $0x50] sm:$0xff]  ;;  %v794_v35 = vld [vmem:[#allocation2 + $0x58] sm:$0xff]  ;;  %v869_v40 = vpack.c.bf16 %v843_v33, %v842_v32  ;;  %3385 = vst.msk [vmem:[#allocation4 + $0x28] sm:$0xff] %vm3268_vm4, %v8628_v11 }
  0x5d   : > { %v1424_v29 = vpack.c.bf16 %v1397_v25, %v1396_v24  ;;  %v1176_v36 = vld [vmem:[#allocation2 + $0x52] sm:$0xff]  ;;  %v1177_v37 = vld [vmem:[#allocation2 + $0x5a] sm:$0xff]  ;;  %v820_v41 = vpack.c.bf16 %v794_v35, %v793_v34  ;;  %v700_v45 = vld [vmem:[%s7058_s26 + $0x88] sm:$0xff]  ;;  %3386 = vst.msk [vmem:[#allocation4 + $0x30] sm:$0xff] %vm3268_vm4, %v8628_v11 }
  0x5e   : > { %v1398_v38 = vld [vmem:[#allocation2 + $0x53] sm:$0xff]  ;;  %v1399_v39 = vld [vmem:[#allocation2 + $0x5b] sm:$0xff]  ;;  %v1203_v42 = vpack.c.bf16 %v1177_v37, %v1176_v36  ;;  %768 = vst.msk [vmem:[#allocation2 + $0x8d] sm:$0xff] %vm715_vm2, %v700_v45  ;;  %v845_v47 = vld [vmem:[#allocation2 + $0x69] sm:$0xff] }
  0x5f   : > { %v1425_v43 = vpack.c.bf16 %v1399_v39, %v1398_v38  ;;  %v699_v44 = vld [vmem:[%s7058_s26 + $0x80] sm:$0xff]  ;;  %v796_v49 = vld [vmem:[#allocation2 + $0x68] sm:$0xff]  ;;  %v701_v58 = vld [vmem:[%s7058_s26 + $0x90] sm:$0xff]  ;;  %3387 = vst.msk [vmem:[#allocation4 + $0x38] sm:$0xff] %vm3268_vm4, %v8628_v11 }
  0x60   : > { %767 = vst.msk [vmem:[#allocation2 + $0x85] sm:$0xff] %vm715_vm2, %v699_v44  ;;  %v844_v46 = vld [vmem:[#allocation2 + $0x61] sm:$0xff]  ;;  %v1179_v51 = vld [vmem:[#allocation2 + $0x6a] sm:$0xff]  ;;  %v702_v59 = vld [vmem:[%s7058_s26 + $0x98] sm:$0xff] }
  0x61   : > { %v795_v48 = vld [vmem:[#allocation2 + $0x60] sm:$0xff]  ;;  %v1401_v53 = vld [vmem:[#allocation2 + $0x6b] sm:$0xff]  ;;  %v870_v54 = vpack.c.bf16 %v845_v47, %v844_v46  ;;  %769 = vst.msk [vmem:[#allocation2 + $0x95] sm:$0xff] %vm715_vm2, %v701_v58  ;;  %v1402_v2 = vld [vmem:[#allocation2 + $0x73] sm:$0xff] }
  0x62   : > { %v1178_v50 = vld [vmem:[#allocation2 + $0x62] sm:$0xff]  ;;  %v821_v55 = vpack.c.bf16 %v796_v49, %v795_v48  ;;  %770 = vst.msk [vmem:[#allocation2 + $0x9d] sm:$0xff] %vm715_vm2, %v702_v59  ;;  %v1180_v0 = vld [vmem:[#allocation2 + $0x72] sm:$0xff]  ;;  %v1181_v1 = vld [vmem:[#allocation2 + $0x7a] sm:$0xff] }
  0x63   : > { %v1400_v52 = vld [vmem:[#allocation2 + $0x63] sm:$0xff]  ;;  %v1204_v56 = vpack.c.bf16 %v1179_v51, %v1178_v50  ;;  %v1403_v3 = vld [vmem:[#allocation2 + $0x7b] sm:$0xff]  ;;  %v1205_v7 = vpack.c.bf16 %v1181_v1, %v1180_v0  ;;  %v705_v33 = vld [vmem:[%s7058_s26 + $0xb0] sm:$0xff]  ;;  %3388 = vst.msk [vmem:[#allocation4 + $0x40] sm:$0xff] %vm3268_vm4, %v8628_v11 }
  0x64   : > { %6120 = vmatmul.msk.bf16.gmra.mxu0 %vm715_vm2, %v866_v60  ;;  %v1426_v57 = vpack.c.bf16 %v1401_v53, %v1400_v52  ;;  %v846_v60 = vld [vmem:[#allocation2 + $0x71] sm:$0xff]  ;;  %v1427_v8 = vpack.c.bf16 %v1403_v3, %v1402_v2  ;;  %v703_v16 = vld [vmem:[%s7058_s26 + $0xa0] sm:$0xff]  ;;  %v704_v17 = vld [vmem:[%s7058_s26 + $0xa8] sm:$0xff]  ;;  %773 = vst.msk [vmem:[#allocation2 + $0xb5] sm:$0xff] %vm715_vm2, %v705_v33 }
  0x65   : > { %6153 = vmatmul.msk.bf16.gmra.mxu2 %vm715_vm2, %v1200_v62  ;;  %v797_v62 = vld [vmem:[#allocation2 + $0x70] sm:$0xff]  ;;  %771 = vst.msk [vmem:[#allocation2 + $0xa5] sm:$0xff] %vm715_vm2, %v703_v16  ;;  %v706_v34 = vld [vmem:[%s7058_s26 + $0xb8] sm:$0xff]  ;;  %v707_v58 = vld [vmem:[%s7058_s26 + $0xc0] sm:$0xff] }
  0x66   : > { %6136 = vmatmul.msk.bf16.gmra.mxu1 %vm715_vm2, %v817_v61  ;;  %v847_v61 = vld [vmem:[#allocation2 + $0x79] sm:$0xff]  ;;  %772 = vst.msk [vmem:[#allocation2 + $0xad] sm:$0xff] %vm715_vm2, %v704_v17  ;;  %v708_v59 = vld [vmem:[%s7058_s26 + $0xc8] sm:$0xff] }
  0x67   : > { %6170 = vmatmul.msk.bf16.gmra.mxu3 %vm715_vm2, %v1422_v63  ;;  %v798_v63 = vld [vmem:[#allocation2 + $0x78] sm:$0xff]  ;;  %v871_v4 = vpack.c.bf16 %v847_v61, %v846_v60  ;;  %v848_v18 = vld [vmem:[#allocation2 + $0x81] sm:$0xff]  ;;  %v849_v19 = vld [vmem:[#allocation2 + $0x89] sm:$0xff]  ;;  %774 = vst.msk [vmem:[#allocation2 + $0xbd] sm:$0xff] %vm715_vm2, %v706_v34 }
  0x68   : > { %v822_v6 = vpack.c.bf16 %v798_v63, %v797_v62  ;;  %v799_v21 = vld [vmem:[#allocation2 + $0x80] sm:$0xff]  ;;  %v800_v22 = vld [vmem:[#allocation2 + $0x88] sm:$0xff]  ;;  %v850_v35 = vld [vmem:[#allocation2 + $0x91] sm:$0xff]  ;;  %775 = vst.msk [vmem:[#allocation2 + $0xc5] sm:$0xff] %vm715_vm2, %v707_v58 }
  0x69   : > { %v1182_v23 = vld [vmem:[#allocation2 + $0x82] sm:$0xff]  ;;  %v1183_v24 = vld [vmem:[#allocation2 + $0x8a] sm:$0xff]  ;;  %v851_v37 = vld [vmem:[#allocation2 + $0x99] sm:$0xff]  ;;  %776 = vst.msk [vmem:[#allocation2 + $0xcd] sm:$0xff] %vm715_vm2, %v708_v59 }
  0x6a   : > { %v1404_v25 = vld [vmem:[#allocation2 + $0x83] sm:$0xff]  ;;  %v801_v36 = vld [vmem:[#allocation2 + $0x90] sm:$0xff]  ;;  %v802_v38 = vld [vmem:[#allocation2 + $0x98] sm:$0xff]  ;;  %v873_v45 = vpack.c.bf16 %v851_v37, %v850_v35  ;;  %3389 = vst.msk [vmem:[#allocation4 + $0x48] sm:$0xff] %vm3268_vm4, %v8628_v11 }
  0x6b   : > { %v1184_v39 = vld [vmem:[#allocation2 + $0x92] sm:$0xff]  ;;  %v1407_v44 = vld [vmem:[#allocation2 + $0x9b] sm:$0xff]  ;;  %v824_v46 = vpack.c.bf16 %v802_v38, %v801_v36  ;;  %v712_v58 = vld [vmem:[%s7058_s26 + $0xe8] sm:$0xff]  ;;  %3390 = vst.msk [vmem:[#allocation4 + $0x50] sm:$0xff] %vm3268_vm4, %v8628_v11 }
  0x6c   : > { %v852_v61 = vld [vmem:[#allocation2 + $0xa1] sm:$0xff]  ;;  %780 = vst.msk [vmem:[#allocation2 + $0xed] sm:$0xff] %vm715_vm2, %v712_v58 }
  0x6d   : > { %v803_v62 = vld [vmem:[#allocation2 + $0xa0] sm:$0xff]  ;;  %v853_v63 = vld [vmem:[#allocation2 + $0xa9] sm:$0xff]  ;;  %v1188_v34 = vld [vmem:[#allocation2 + $0xb2] sm:$0xff]  ;;  %3391 = vst.msk [vmem:[#allocation4 + $0x58] sm:$0xff] %vm3268_vm4, %v8628_v11 }
  0x6e   : > { %v804_v0 = vld [vmem:[#allocation2 + $0xa8] sm:$0xff]  ;;  %v806_v33 = vld [vmem:[#allocation2 + $0xb8] sm:$0xff]  ;;  %3392 = vst.msk [vmem:[#allocation4 + $0x60] sm:$0xff] %vm3268_vm4, %v8628_v11 }
  0x6f   : > { %v1186_v1 = vld [vmem:[#allocation2 + $0xa2] sm:$0xff]  ;;  %v1187_v2 = vld [vmem:[#allocation2 + $0xaa] sm:$0xff]  ;;  %v1189_v35 = vld [vmem:[#allocation2 + $0xba] sm:$0xff]  ;;  %3393 = vst.msk [vmem:[#allocation4 + $0x68] sm:$0xff] %vm3268_vm4, %v8628_v11 }
  0x70   : > { %v1408_v3 = vld [vmem:[#allocation2 + $0xa3] sm:$0xff]  ;;  %v1410_v36 = vld [vmem:[#allocation2 + $0xb3] sm:$0xff]  ;;  %v1411_v37 = vld [vmem:[#allocation2 + $0xbb] sm:$0xff]  ;;  %3394 = vst.msk [vmem:[#allocation4 + $0x70] sm:$0xff] %vm3268_vm4, %v8628_v11 }
  0x71   : > { %3395 = vst.msk [vmem:[#allocation4 + $0x78] sm:$0xff] %vm3268_vm4, %v8628_v11 }
  0x72   : > { %3396 = vst.msk [vmem:[#allocation4 + $0x80] sm:$0xff] %vm3268_vm4, %v8628_v11 }
  0x73   : > { %750 = vst.msk [vmem:[#allocation2 + $0x108] sm:$0x3] %vm749_vm5, %v8628_v11 }
  0x74   : > { %6121 = vmatmul.msk.bf16.gmra.mxu0 %vm715_vm2, %v867_v12 }
  0x75   : > { %6154 = vmatmul.msk.bf16.gmra.mxu2 %vm715_vm2, %v1201_v14 }
  0x76   : > { %6137 = vmatmul.msk.bf16.gmra.mxu1 %vm715_vm2, %v818_v13 }
  0x77   : > { %6171 = vmatmul.msk.bf16.gmra.mxu3 %vm715_vm2, %v1423_v15 }
  0x84   : > { %6122 = vmatmul.msk.bf16.gmra.mxu0 %vm715_vm2, %v868_v26  ;;  %v1405_v26 = vld [vmem:[#allocation2 + $0x8b] sm:$0xff] }
  0x85   : > { %6155 = vmatmul.msk.bf16.gmra.mxu2 %vm715_vm2, %v1202_v28  ;;  %v823_v28 = vpack.c.bf16 %v800_v22, %v799_v21  ;;  %v1428_v30 = vpack.c.bf16 %v1405_v26, %v1404_v25  ;;  %v709_v25 = vld [vmem:[%s7058_s26 + $0xd0] sm:$0xff]  ;;  %v710_v26 = vld [vmem:[%s7058_s26 + $0xd8] sm:$0xff] }
  0x86   : > { %6138 = vmatmul.msk.bf16.gmra.mxu1 %vm715_vm2, %v819_v27  ;;  %v872_v27 = vpack.c.bf16 %v849_v19, %v848_v18  ;;  %777 = vst.msk [vmem:[#allocation2 + $0xd5] sm:$0xff] %vm715_vm2, %v709_v25 }
  0x87   : > { %6172 = vmatmul.msk.bf16.gmra.mxu3 %vm715_vm2, %v1424_v29  ;;  %v1206_v29 = vpack.c.bf16 %v1183_v24, %v1182_v23  ;;  %778 = vst.msk [vmem:[#allocation2 + $0xdd] sm:$0xff] %vm715_vm2, %v710_v26  ;;  %v713_v26 = vld [vmem:[%s7058_s26 + $0xf0] sm:$0xff] }
  0x88   : > { %781 = vst.msk [vmem:[#allocation2 + $0xf5] sm:$0xff] %vm715_vm2, %v713_v26  ;;  %v6252_v26 = vld [vmem:[%s8648_s27 + $0x10] sm:$0x3] }
  0x94   : > { %6123 = vmatmul.msk.bf16.gmra.mxu0 %vm715_vm2, %v869_v40 }
  0x95   : > { %6156 = vmatmul.msk.bf16.gmra.mxu2 %vm715_vm2, %v1203_v42  ;;  %v1185_v42 = vld [vmem:[#allocation2 + $0x9a] sm:$0xff] }
  0x96   : > { %6139 = vmatmul.msk.bf16.gmra.mxu1 %vm715_vm2, %v820_v41  ;;  %v1207_v49 = vpack.c.bf16 %v1185_v42, %v1184_v39 }
  0x97   : > { %6173 = vmatmul.msk.bf16.gmra.mxu3 %vm715_vm2, %v1425_v43  ;;  %v1406_v43 = vld [vmem:[#allocation2 + $0x93] sm:$0xff] }
  0x98   : > { %v1429_v50 = vpack.c.bf16 %v1407_v44, %v1406_v43 }
  0xa4   : > { %6124 = vmatmul.msk.bf16.gmra.mxu0 %vm715_vm2, %v870_v54 }
  0xa5   : > { %6157 = vmatmul.msk.bf16.gmra.mxu2 %vm715_vm2, %v1204_v56 }
  0xa6   : > { %6140 = vmatmul.msk.bf16.gmra.mxu1 %vm715_vm2, %v821_v55 }
  0xa7   : > { %6174 = vmatmul.msk.bf16.gmra.mxu3 %vm715_vm2, %v1426_v57 }
  0xb3   : > { %v946_v9 = vpop.f32.mrf.mxu0 }
  0xb4   : > { %6125 = vmatmul.msk.bf16.gmra.mxu0 %vm715_vm2, %v871_v4  ;;  %v1409_v4 = vld [vmem:[#allocation2 + $0xab] sm:$0xff] }
  0xb5   : > { %v1086_v10 = vpop.f32.mrf.mxu1  ;;  %6158 = vmatmul.msk.bf16.gmra.mxu2 %vm715_vm2, %v1205_v7 }
  0xb6   : > { %v1087_v12 = vadd.f32 %v1086_v10, %v946_v9  ;;  %6141 = vmatmul.msk.bf16.gmra.mxu1 %vm715_vm2, %v822_v6  ;;  %v825_v9 = vpack.c.bf16 %v804_v0, %v803_v62  ;;  %v807_v62 = vld [vmem:[#allocation2 + $0xc0] sm:$0xff]  ;;  %v808_v0 = vld [vmem:[#allocation2 + $0xc8] sm:$0xff] }
  0xb7   : > { %6175 = vmatmul.msk.bf16.gmra.mxu3 %vm715_vm2, %v1427_v8  ;;  %v874_v8 = vpack.c.bf16 %v853_v63, %v852_v61  ;;  %v856_v61 = vld [vmem:[#allocation2 + $0xc1] sm:$0xff]  ;;  %v857_v63 = vld [vmem:[#allocation2 + $0xc9] sm:$0xff] }
  0xba   : > { %v1276_v13 = vpop.f32.mrf.mxu2 }
  0xbb   : > { %v1356_v15 = vadd.f32 %v1276_v13, %v1087_v12  ;;  %v7216_v31 = vpop.f32.mrf.mxu0 }
  0xbc   : > { %v1498_v14 = vpop.f32.mrf.mxu3 }
  0xbd   : > { %v7209_v20 = vadd.f32 %v1498_v14, %v1356_v15  ;;  %v7218_v32 = vpop.f32.mrf.mxu1  ;;  %v1208_v14 = vpack.c.bf16 %v1187_v2, %v1186_v1  ;;  %v1430_v15 = vpack.c.bf16 %v1409_v4, %v1408_v3  ;;  %v1190_v1 = vld [vmem:[#allocation2 + $0xc2] sm:$0xff]  ;;  %v1191_v2 = vld [vmem:[#allocation2 + $0xca] sm:$0xff] }
  0xbe   : > { %v1412_v3 = vld [vmem:[#allocation2 + $0xc3] sm:$0xff]  ;;  %v1413_v4 = vld [vmem:[#allocation2 + $0xcb] sm:$0xff] }
  0xc2   : > { %v7224_v40 = vpop.f32.mrf.mxu2 }
  0xc4   : > { %6126 = vmatmul.msk.bf16.gmra.mxu0 %vm715_vm2, %v872_v27  ;;  %v7226_v41 = vpop.f32.mrf.mxu3 }
  0xc5   : > { %6159 = vmatmul.msk.bf16.gmra.mxu2 %vm715_vm2, %v1206_v29  ;;  %v805_v29 = vld [vmem:[#allocation2 + $0xb0] sm:$0xff] }
  0xc6   : > { %6142 = vmatmul.msk.bf16.gmra.mxu1 %vm715_vm2, %v823_v28  ;;  %v854_v28 = vld [vmem:[#allocation2 + $0xb1] sm:$0xff]  ;;  %v826_v43 = vpack.c.bf16 %v806_v33, %v805_v29 }
  0xc7   : > { %6176 = vmatmul.msk.bf16.gmra.mxu3 %vm715_vm2, %v1428_v30  ;;  %v855_v30 = vld [vmem:[#allocation2 + $0xb9] sm:$0xff]  ;;  %v809_v33 = vld [vmem:[#allocation2 + $0xd0] sm:$0xff] }
  0xc8   : > { %v875_v42 = vpack.c.bf16 %v855_v30, %v854_v28  ;;  %v714_v28 = vld [vmem:[%s7058_s26 + $0xf8] sm:$0xff] }
  0xc9   : > { %v858_v30 = vld [vmem:[#allocation2 + $0xd1] sm:$0xff]  ;;  %782 = vst.msk [vmem:[#allocation2 + $0xfd] sm:$0xff] %vm715_vm2, %v714_v28 }
  0xd1   : > { %v951_v47 = vpop.f32.mrf.mxu0 }
  0xd3   : > { %v1091_v48 = vpop.f32.mrf.mxu1 }
  0xd4   : > { %v1092_v51 = vadd.f32 %v1091_v48, %v951_v47  ;;  %6127 = vmatmul.msk.bf16.gmra.mxu0 %vm715_vm2, %v873_v45  ;;  %v1209_v47 = vpack.c.bf16 %v1189_v35, %v1188_v34  ;;  %v1431_v48 = vpack.c.bf16 %v1411_v37, %v1410_v36  ;;  %v859_v34 = vld [vmem:[#allocation2 + $0xd9] sm:$0xff] }
  0xd5   : > { %6160 = vmatmul.msk.bf16.gmra.mxu2 %vm715_vm2, %v1207_v49  ;;  %v810_v35 = vld [vmem:[#allocation2 + $0xd8] sm:$0xff] }
  0xd6   : > { %6143 = vmatmul.msk.bf16.gmra.mxu1 %vm715_vm2, %v824_v46  ;;  %v1192_v36 = vld [vmem:[#allocation2 + $0xd2] sm:$0xff]  ;;  %v1193_v37 = vld [vmem:[#allocation2 + $0xda] sm:$0xff] }
  0xd7   : > { %6177 = vmatmul.msk.bf16.gmra.mxu3 %vm715_vm2, %v1429_v50 }
  0xd8   : > { %v1281_v52 = vpop.f32.mrf.mxu2 }
  0xd9   : > { %v1358_v54 = vadd.f32 %v1281_v52, %v1092_v51  ;;  %v953_v55 = vpop.f32.mrf.mxu0 }
  0xda   : > { %v1503_v53 = vpop.f32.mrf.mxu3 }
  0xdb   : > { %v1093_v56 = vpop.f32.mrf.mxu1  ;;  %v7234_v60 = vadd.f32 %v1503_v53, %v1358_v54 }
  0xdc   : > { %v1094_v57 = vadd.f32 %v1093_v56, %v953_v55 }
  0xe0   : > { %v1283_v6 = vpop.f32.mrf.mxu2 }
  0xe1   : > { %v1359_v10 = vadd.f32 %v1283_v6, %v1094_v57  ;;  %v956_v12 = vpop.f32.mrf.mxu0  ;;  %v711_v57 = vld [vmem:[%s7058_s26 + $0xe0] sm:$0xff]  ;;  %s8651_s26 = sld [smem:[#allocation60_spill]] }
  0xe2   : > { %v1505_v7 = vpop.f32.mrf.mxu3  ;;  %779 = vst.msk [vmem:[#allocation2 + $0xe5] sm:$0xff] %vm715_vm2, %v711_v57 }
  0xe3   : > { %v1096_v13 = vpop.f32.mrf.mxu1  ;;  %v7238_v17 = vadd.f32 %v1505_v7, %v1359_v10 }
  0xe4   : > { %v1097_v16 = vadd.f32 %v1096_v13, %v956_v12  ;;  %6128 = vmatmul.msk.bf16.gmra.mxu0 %vm715_vm2, %v874_v8  ;;  %v876_v8 = vpack.c.bf16 %v857_v63, %v856_v61  ;;  %v6235_v63 = vld [vmem:[%s8648_s27 + $0xe] sm:$0x3] }
  0xe5   : > { %6161 = vmatmul.msk.bf16.gmra.mxu2 %vm715_vm2, %v1208_v14  ;;  %v1210_v14 = vpack.c.bf16 %v1191_v2, %v1190_v1  ;;  %v2375_v2 = vand.u32 %v6235_v63, %v7041_v5 }
  0xe6   : > { %6144 = vmatmul.msk.bf16.gmra.mxu1 %vm715_vm2, %v825_v9  ;;  %v827_v9 = vpack.c.bf16 %v808_v0, %v807_v62 }
  0xe7   : > { %6178 = vmatmul.msk.bf16.gmra.mxu3 %vm715_vm2, %v1430_v15  ;;  %v1432_v15 = vpack.c.bf16 %v1413_v4, %v1412_v3 }
  0xe8   : > { %v1286_v18 = vpop.f32.mrf.mxu2  ;;  %2384 = vmatpush.bf16.msrb.mxu3 %v2375_v2 }
  0xe9   : > { %v1360_v21 = vadd.f32 %v1286_v18, %v1097_v16  ;;  %v958_v22 = vpop.f32.mrf.mxu0  ;;  %v860_v0 = vld [vmem:[#allocation2 + $0xe1] sm:$0xff]  ;;  %v861_v3 = vld [vmem:[#allocation2 + $0xe9] sm:$0xff] }
  0xea   : > { %v1508_v19 = vpop.f32.mrf.mxu3  ;;  %v811_v1 = vld [vmem:[#allocation2 + $0xe0] sm:$0xff]  ;;  %v812_v4 = vld [vmem:[#allocation2 + $0xe8] sm:$0xff] }
  0xeb   : > { %v1098_v23 = vpop.f32.mrf.mxu1  ;;  %v7246_v27 = vadd.f32 %v1508_v19, %v1360_v21 }
  0xec   : > { %v1099_v24 = vadd.f32 %v1098_v23, %v958_v22 }
  0xf0   : > { %v1288_v38 = vpop.f32.mrf.mxu2 }
  0xf1   : > { %v1361_v44 = vadd.f32 %v1288_v38, %v1099_v24  ;;  %v961_v45 = vpop.f32.mrf.mxu0  ;;  %v1414_v38 = vld [vmem:[#allocation2 + $0xd3] sm:$0xff] }
  0xf2   : > { %v1510_v39 = vpop.f32.mrf.mxu3 }
  0xf3   : > { %v1101_v46 = vpop.f32.mrf.mxu1  ;;  %v7250_v50 = vadd.f32 %v1510_v39, %v1361_v44  ;;  %v1415_v39 = vld [vmem:[#allocation2 + $0xdb] sm:$0xff]  ;;  %v877_v44 = vpack.c.bf16 %v859_v34, %v858_v30  ;;  %v2597_v30 = vand.u32 %v6252_v26, %v7041_v5 }
  0xf4   : > { %v1102_v49 = vadd.f32 %v1101_v46, %v961_v45  ;;  %6129 = vmatmul.msk.bf16.gmra.mxu0 %vm715_vm2, %v875_v42  ;;  %v828_v45 = vpack.c.bf16 %v810_v35, %v809_v33 }
  0xf5   : > { %6162 = vmatmul.msk.bf16.gmra.mxu2 %vm715_vm2, %v1209_v47  ;;  %2606 = vmatpush.bf16.msra.mxu0 %v2597_v30 }
  0xf6   : > { %6145 = vmatmul.msk.bf16.gmra.mxu1 %vm715_vm2, %v826_v43 }
  0xf7   : > { %6179 = vmatmul.msk.bf16.gmra.mxu3 %vm715_vm2, %v1431_v48 }
  0xf8   : > { %v1291_v51 = vpop.f32.mrf.mxu2 }
  0xf9   : > { %v1362_v53 = vadd.f32 %v1291_v51, %v1102_v49  ;;  %v963_v54 = vpop.f32.mrf.mxu0  ;;  %v1211_v49 = vpack.c.bf16 %v1193_v37, %v1192_v36  ;;  %v1433_v51 = vpack.c.bf16 %v1415_v39, %v1414_v38  ;;  %v6269_v38 = vld [vmem:[%s8648_s27 + $0x12] sm:$0x3] }
  0xfa   : > { %v1513_v52 = vpop.f32.mrf.mxu3 }
  0xfb   : > { %v1103_v55 = vpop.f32.mrf.mxu1  ;;  %v7258_v59 = vadd.f32 %v1513_v52, %v1362_v53 }
  0xfc   : > { %v1104_v56 = vadd.f32 %v1103_v55, %v963_v54 }
 0x100   : > { %v1293_v6 = vpop.f32.mrf.mxu2 }
 0x101   : > { %v1363_v10 = vadd.f32 %v1293_v6, %v1104_v56  ;;  %v966_v12 = vpop.f32.mrf.mxu0  ;;  %v1194_v6 = vld [vmem:[#allocation2 + $0xe2] sm:$0xff] }
 0x102   : > { %v1515_v7 = vpop.f32.mrf.mxu3 }
 0x103   : > { %v1106_v13 = vpop.f32.mrf.mxu1  ;;  %v7262_v18 = vadd.f32 %v1515_v7, %v1363_v10  ;;  %v1195_v7 = vld [vmem:[#allocation2 + $0xea] sm:$0xff] }
 0x104   : > { %v1107_v16 = vadd.f32 %v1106_v13, %v966_v12  ;;  %6130 = vmatmul.msk.bf16.gmra.mxu0 %vm715_vm2, %v876_v8  ;;  %v1416_v8 = vld [vmem:[#allocation2 + $0xe3] sm:$0xff]  ;;  %v878_v13 = vpack.c.bf16 %v861_v3, %v860_v0 }
 0x105   : > { %6163 = vmatmul.msk.bf16.gmra.mxu2 %vm715_vm2, %v1210_v14  ;;  %v829_v14 = vpack.c.bf16 %v812_v4, %v811_v1 }
 0x106   : > { %6146 = vmatmul.msk.bf16.gmra.mxu1 %vm715_vm2, %v827_v9  ;;  %v1417_v9 = vld [vmem:[#allocation2 + $0xeb] sm:$0xff] }
 0x107   : > { %6180 = vmatmul.msk.bf16.gmra.mxu3 %vm715_vm2, %v1432_v15 }
 0x108   : > { %v1296_v19 = vpop.f32.mrf.mxu2 }
 0x109   : > { %v1364_v22 = vadd.f32 %v1296_v19, %v1107_v16  ;;  %v968_v23 = vpop.f32.mrf.mxu0 }
 0x10a   : > { %v1518_v21 = vpop.f32.mrf.mxu3 }
 0x10b   : > { %v1108_v24 = vpop.f32.mrf.mxu1  ;;  %v7270_v29 = vadd.f32 %v1518_v21, %v1364_v22  ;;  %v1212_v21 = vpack.c.bf16 %v1195_v7, %v1194_v6  ;;  %v1434_v22 = vpack.c.bf16 %v1417_v9, %v1416_v8 }
 0x10c   : > { %v1109_v25 = vadd.f32 %v1108_v24, %v968_v23 }
 0x110   : > { %v1298_v42 = vpop.f32.mrf.mxu2 }
 0x111   : > { %v1365_v46 = vadd.f32 %v1298_v42, %v1109_v25  ;;  %v971_v47 = vpop.f32.mrf.mxu0  ;;  %v6286_v25 = vld [vmem:[%s8648_s27 + $0x14] sm:$0x3]  ;;  %v2819_v42 = vand.u32 %v6269_v38, %v7041_v5 }
 0x112   : > { %v1520_v43 = vpop.f32.mrf.mxu3  ;;  %v3041_v28 = vand.u32 %v6286_v25, %v7041_v5 }
 0x113   : > { %v1111_v48 = vpop.f32.mrf.mxu1  ;;  %v7274_v53 = vadd.f32 %v1520_v43, %v1365_v46  ;;  %2828 = vmatpush.bf16.msra.mxu1 %v2819_v42  ;;  %v863_v46 = vld [vmem:[#allocation2 + $0xf9] sm:$0xff] }
 0x114   : > { %v1112_v52 = vadd.f32 %v1111_v48, %v971_v47  ;;  %6131 = vmatmul.msk.bf16.gmra.mxu0 %vm715_vm2, %v877_v44  ;;  %3050 = vmatpush.bf16.msra.mxu2 %v3041_v28  ;;  %v862_v44 = vld [vmem:[#allocation2 + $0xf1] sm:$0xff] }
 0x115   : > { %6164 = vmatmul.msk.bf16.gmra.mxu2 %vm715_vm2, %v1211_v49  ;;  %v814_v47 = vld [vmem:[#allocation2 + $0xf8] sm:$0xff] }
 0x116   : > { %6147 = vmatmul.msk.bf16.gmra.mxu1 %vm715_vm2, %v828_v45  ;;  %v813_v45 = vld [vmem:[#allocation2 + $0xf0] sm:$0xff]  ;;  %v1197_v49 = vld [vmem:[#allocation2 + $0xfa] sm:$0xff] }
 0x117   : > { %6181 = vmatmul.msk.bf16.gmra.mxu3 %vm715_vm2, %v1433_v51  ;;  %v1196_v48 = vld [vmem:[#allocation2 + $0xf2] sm:$0xff] }
 0x118   : > { %v1301_v54 = vpop.f32.mrf.mxu2  ;;  %v1418_v51 = vld [vmem:[#allocation2 + $0xf3] sm:$0xff]  ;;  %v1213_v0 = vpack.c.bf16 %v1197_v49, %v1196_v48 }
 0x119   : > { %v1366_v56 = vadd.f32 %v1301_v54, %v1112_v52  ;;  %v973_v57 = vpop.f32.mrf.mxu0  ;;  %v1419_v52 = vld [vmem:[#allocation2 + $0xfb] sm:$0xff] }
 0x11a   : > { %v1523_v55 = vpop.f32.mrf.mxu3  ;;  %v1435_v5 = vpack.c.bf16 %v1419_v52, %v1418_v51  ;;  %v1612_v49 = vld [vmem:[#allocation2 + $0x14] sm:$0xff]  ;;  %v1613_v51 = vld [vmem:[#allocation2 + $0x1c] sm:$0xff] }
 0x11b   : > { %v1113_v58 = vpop.f32.mrf.mxu1  ;;  %v7280_v62 = vadd.f32 %v1523_v55, %v1366_v56  ;;  %v879_v56 = vpack.c.bf16 %v863_v46, %v862_v44  ;;  %v1834_v52 = vld [vmem:[#allocation2 + $0x15] sm:$0xff] }
 0x11c   : > { %v1114_v61 = vadd.f32 %v1113_v58, %v973_v57  ;;  %v830_v57 = vpack.c.bf16 %v814_v47, %v813_v45 }
 0x120   : > { %v1303_v10 = vpop.f32.mrf.mxu2 }
 0x121   : > { %v1367_v15 = vadd.f32 %v1303_v10, %v1114_v61  ;;  %v976_v16 = vpop.f32.mrf.mxu0 }
 0x122   : > { %v1525_v12 = vpop.f32.mrf.mxu3 }
 0x123   : > { %v1116_v19 = vpop.f32.mrf.mxu1  ;;  %v7286_v24 = vadd.f32 %v1525_v12, %v1367_v15  ;;  %v1610_v12 = vld [vmem:[#allocation2 + $0x4] sm:$0xff]  ;;  %v1833_v15 = vld [vmem:[#allocation2 + $0xd] sm:$0xff] }
 0x124   : > { %v1117_v23 = vadd.f32 %v1116_v19, %v976_v16  ;;  %6132 = vmatmul.msk.bf16.gmra.mxu0 %vm715_vm2, %v878_v13  ;;  %v1611_v13 = vld [vmem:[#allocation2 + $0xc] sm:$0xff] }
 0x125   : > { %6165 = vmatmul.msk.bf16.gmra.mxu2 %vm715_vm2, %v1212_v21  ;;  %v2054_v16 = vld [vmem:[#allocation2 + $0x6] sm:$0xff]  ;;  %v2055_v19 = vld [vmem:[#allocation2 + $0xe] sm:$0xff]  ;;  %v1642_v26 = vpack.c.bf16 %v1611_v13, %v1610_v12 }
 0x126   : > { %6148 = vmatmul.msk.bf16.gmra.mxu1 %vm715_vm2, %v829_v14  ;;  %v1832_v14 = vld [vmem:[#allocation2 + $0x5] sm:$0xff] }
 0x127   : > { %6182 = vmatmul.msk.bf16.gmra.mxu3 %vm715_vm2, %v1434_v22  ;;  %v2276_v21 = vld [vmem:[#allocation2 + $0x7] sm:$0xff]  ;;  %v2277_v22 = vld [vmem:[#allocation2 + $0xf] sm:$0xff]  ;;  %v1864_v28 = vpack.c.bf16 %v1833_v15, %v1832_v14 }
 0x128   : > { %v1306_v33 = vpop.f32.mrf.mxu2 }
 0x129   : > { %v1368_v35 = vadd.f32 %v1306_v33, %v1117_v23  ;;  %v978_v36 = vpop.f32.mrf.mxu0 }
 0x12a   : > { %v1528_v34 = vpop.f32.mrf.mxu3 }
 0x12b   : > { %v1118_v37 = vpop.f32.mrf.mxu1  ;;  %v7304_v43 = vadd.f32 %v1528_v34, %v1368_v35  ;;  %v2086_v35 = vpack.c.bf16 %v2055_v19, %v2054_v16 }
 0x12c   : > { %v1119_v39 = vadd.f32 %v1118_v37, %v978_v36  ;;  %v2308_v36 = vpack.c.bf16 %v2277_v22, %v2276_v21  ;;  %v1614_v22 = vld [vmem:[#allocation2 + $0x24] sm:$0xff] }
 0x130   : > { %v1308_v54 = vpop.f32.mrf.mxu2 }
 0x131   : > { %v1369_v58 = vadd.f32 %v1308_v54, %v1119_v39  ;;  %v981_v61 = vpop.f32.mrf.mxu0  ;;  %v1835_v54 = vld [vmem:[#allocation2 + $0x1d] sm:$0xff] }
 0x132   : > { %v1530_v55 = vpop.f32.mrf.mxu3 }
 0x133   : > { %v1121_v63 = vpop.f32.mrf.mxu1  ;;  %v7306_v2 = vadd.f32 %v1530_v55, %v1369_v58  ;;  %v2056_v55 = vld [vmem:[#allocation2 + $0x16] sm:$0xff]  ;;  %v2279_v58 = vld [vmem:[#allocation2 + $0x1f] sm:$0xff] }
 0x134   : > { %v1122_v1 = vadd.f32 %v1121_v63, %v981_v61  ;;  %6133 = vmatmul.msk.bf16.gmra.mxu0 %vm715_vm2, %v879_v56  ;;  %v2057_v56 = vld [vmem:[#allocation2 + $0x1e] sm:$0xff] }
 0x135   : > { %6166 = vmatmul.msk.bf16.gmra.mxu2 %vm715_vm2, %v1213_v0  ;;  %v1643_v0 = vpack.c.bf16 %v1613_v51, %v1612_v49 }
 0x136   : > { %6149 = vmatmul.msk.bf16.gmra.mxu1 %vm715_vm2, %v830_v57  ;;  %v2278_v57 = vld [vmem:[#allocation2 + $0x17] sm:$0xff] }
 0x137   : > { %6183 = vmatmul.msk.bf16.gmra.mxu3 %vm715_vm2, %v1435_v5  ;;  %v1865_v5 = vpack.c.bf16 %v1835_v54, %v1834_v52 }
 0x138   : > { %v1311_v3 = vpop.f32.mrf.mxu2 }
 0x139   : > { %v1370_v6 = vadd.f32 %v1311_v3, %v1122_v1  ;;  %v983_v7 = vpop.f32.mrf.mxu0 }
 0x13a   : > { %v1533_v4 = vpop.f32.mrf.mxu3 }
 0x13b   : > { %v1123_v8 = vpop.f32.mrf.mxu1  ;;  %v7312_v10 = vadd.f32 %v1533_v4, %v1370_v6  ;;  %v2087_v6 = vpack.c.bf16 %v2057_v56, %v2056_v55 }
 0x13c   : > { %v1124_v9 = vadd.f32 %v1123_v8, %v983_v7  ;;  %v2309_v7 = vpack.c.bf16 %v2279_v58, %v2278_v57 }
 0x140   : > { %v1313_v23 = vpop.f32.mrf.mxu2 }
 0x141   : > { %v1371_v30 = vadd.f32 %v1313_v23, %v1124_v9  ;;  %v986_v33 = vpop.f32.mrf.mxu0  ;;  %v1615_v23 = vld [vmem:[#allocation2 + $0x2c] sm:$0xff] }
 0x142   : > { %v1535_v25 = vpop.f32.mrf.mxu3 }
 0x143   : > { %v1126_v34 = vpop.f32.mrf.mxu1  ;;  %v7314_v38 = vadd.f32 %v1535_v25, %v1371_v30  ;;  %v1836_v25 = vld [vmem:[#allocation2 + $0x25] sm:$0xff]  ;;  %v2059_v30 = vld [vmem:[#allocation2 + $0x2e] sm:$0xff] }
 0x144   : > { %v1127_v37 = vadd.f32 %v1126_v34, %v986_v33  ;;  %6185 = vmatmul.msk.bf16.vlgmr.msrb.gmra.mxu0 %vm715_vm2, %v1642_v26  ;;  %v1837_v26 = vld [vmem:[#allocation2 + $0x2d] sm:$0xff] }
 0x145   : > { %6219 = vmatmul.msk.bf16.vlgmr.msrb.gmra.mxu2 %vm715_vm2, %v2086_v35  ;;  %v2280_v33 = vld [vmem:[#allocation2 + $0x27] sm:$0xff]  ;;  %v2281_v34 = vld [vmem:[#allocation2 + $0x2f] sm:$0xff] }
 0x146   : > { %6202 = vmatmul.msk.bf16.vlgmr.msrb.gmra.mxu1 %vm715_vm2, %v1864_v28  ;;  %v2058_v28 = vld [vmem:[#allocation2 + $0x26] sm:$0xff] }
 0x147   : > { %6236 = vmatmul.msk.bf16.vlgmr.msrb.gmra.mxu3 %vm715_vm2, %v2308_v36 }
 0x148   : > { %v1316_v39 = vpop.f32.mrf.mxu2 }
 0x149   : > { %v1372_v44 = vadd.f32 %v1316_v39, %v1127_v37  ;;  %v988_v45 = vpop.f32.mrf.mxu0  ;;  %v1644_v37 = vpack.c.bf16 %v1615_v23, %v1614_v22  ;;  %v1866_v39 = vpack.c.bf16 %v1837_v26, %v1836_v25 }
 0x14a   : > { %v1538_v42 = vpop.f32.mrf.mxu3 }
 0x14b   : > { %v1128_v46 = vpop.f32.mrf.mxu1  ;;  %v7320_v48 = vadd.f32 %v1538_v42, %v1372_v44 }
 0x14c   : > { %v1129_v47 = vadd.f32 %v1128_v46, %v988_v45  ;;  %v2088_v46 = vpack.c.bf16 %v2059_v30, %v2058_v28 }
 0x150   : > { %v1318_v61 = vpop.f32.mrf.mxu2 }
 0x151   : > { %v1373_v1 = vadd.f32 %v1318_v61, %v1129_v47  ;;  %v991_v3 = vpop.f32.mrf.mxu0  ;;  %v2310_v47 = vpack.c.bf16 %v2281_v34, %v2280_v33 }
 0x152   : > { %v1540_v63 = vpop.f32.mrf.mxu3 }
 0x153   : > { %v1131_v4 = vpop.f32.mrf.mxu1  ;;  %v7322_v9 = vadd.f32 %v1540_v63, %v1373_v1  ;;  %v1616_v63 = vld [vmem:[#allocation2 + $0x34] sm:$0xff]  ;;  %v1839_v1 = vld [vmem:[#allocation2 + $0x3d] sm:$0xff] }
 0x154   : > { %v1132_v8 = vadd.f32 %v1131_v4, %v991_v3  ;;  %6186 = vmatmul.msk.bf16.gmra.mxu0 %vm715_vm2, %v1643_v0  ;;  %v1617_v0 = vld [vmem:[#allocation2 + $0x3c] sm:$0xff] }
 0x155   : > { %6220 = vmatmul.msk.bf16.gmra.mxu2 %vm715_vm2, %v2087_v6  ;;  %v2060_v3 = vld [vmem:[#allocation2 + $0x36] sm:$0xff]  ;;  %v2061_v4 = vld [vmem:[#allocation2 + $0x3e] sm:$0xff] }
 0x156   : > { %6203 = vmatmul.msk.bf16.gmra.mxu1 %vm715_vm2, %v1865_v5  ;;  %v1838_v5 = vld [vmem:[#allocation2 + $0x35] sm:$0xff]  ;;  %v2089_v22 = vpack.c.bf16 %v2061_v4, %v2060_v3 }
 0x157   : > { %6237 = vmatmul.msk.bf16.gmra.mxu3 %vm715_vm2, %v2309_v7  ;;  %v2282_v6 = vld [vmem:[#allocation2 + $0x37] sm:$0xff]  ;;  %v2283_v7 = vld [vmem:[#allocation2 + $0x3f] sm:$0xff] }
 0x158   : > { %v1321_v12 = vpop.f32.mrf.mxu2  ;;  %v2311_v23 = vpack.c.bf16 %v2283_v7, %v2282_v6 }
 0x159   : > { %v1374_v14 = vadd.f32 %v1321_v12, %v1132_v8  ;;  %v993_v15 = vpop.f32.mrf.mxu0 }
 0x15a   : > { %v1543_v13 = vpop.f32.mrf.mxu3 }
 0x15b   : > { %v1133_v16 = vpop.f32.mrf.mxu1  ;;  %v7328_v21 = vadd.f32 %v1543_v13, %v1374_v14  ;;  %v1645_v13 = vpack.c.bf16 %v1617_v0, %v1616_v63  ;;  %v1867_v14 = vpack.c.bf16 %v1839_v1, %v1838_v5 }
 0x15c   : > { %v1134_v19 = vadd.f32 %v1133_v16, %v993_v15 }
 0x160   : > { %v1323_v35 = vpop.f32.mrf.mxu2 }
 0x161   : > { %v1375_v42 = vadd.f32 %v1323_v35, %v1134_v19  ;;  %v996_v44 = vpop.f32.mrf.mxu0 }
 0x162   : > { %v1545_v36 = vpop.f32.mrf.mxu3 }
 0x163   : > { %v1136_v45 = vpop.f32.mrf.mxu1  ;;  %v7330_v51 = vadd.f32 %v1545_v36, %v1375_v42  ;;  %v1619_v42 = vld [vmem:[#allocation2 + $0x4c] sm:$0xff] }
 0x164   : > { %v1137_v49 = vadd.f32 %v1136_v45, %v996_v44  ;;  %6187 = vmatmul.msk.bf16.gmra.mxu0 %vm715_vm2, %v1644_v37  ;;  %v1840_v44 = vld [vmem:[#allocation2 + $0x45] sm:$0xff]  ;;  %v1841_v45 = vld [vmem:[#allocation2 + $0x4d] sm:$0xff] }
 0x165   : > { %6221 = vmatmul.msk.bf16.gmra.mxu2 %vm715_vm2, %v2088_v46  ;;  %v2062_v46 = vld [vmem:[#allocation2 + $0x46] sm:$0xff] }
 0x166   : > { %6204 = vmatmul.msk.bf16.gmra.mxu1 %vm715_vm2, %v1866_v39  ;;  %v1618_v39 = vld [vmem:[#allocation2 + $0x44] sm:$0xff] }
 0x167   : > { %6238 = vmatmul.msk.bf16.gmra.mxu3 %vm715_vm2, %v2310_v47  ;;  %v2063_v47 = vld [vmem:[#allocation2 + $0x4e] sm:$0xff] }
 0x168   : > { %v1326_v52 = vpop.f32.mrf.mxu2  ;;  %v2090_v5 = vpack.c.bf16 %v2063_v47, %v2062_v46 }
 0x169   : > { %v1376_v55 = vadd.f32 %v1326_v52, %v1137_v49  ;;  %v998_v56 = vpop.f32.mrf.mxu0  ;;  %v2284_v49 = vld [vmem:[#allocation2 + $0x47] sm:$0xff]  ;;  %v2285_v52 = vld [vmem:[#allocation2 + $0x4f] sm:$0xff] }
 0x16a   : > { %v1548_v54 = vpop.f32.mrf.mxu3  ;;  %v2312_v1 = vpack.c.bf16 %v2285_v52, %v2284_v49 }
 0x16b   : > { %v1138_v57 = vpop.f32.mrf.mxu1  ;;  %v7336_v61 = vadd.f32 %v1548_v54, %v1376_v55 }
 0x16c   : > { %v1139_v58 = vadd.f32 %v1138_v57, %v998_v56  ;;  %v1646_v56 = vpack.c.bf16 %v1619_v42, %v1618_v39  ;;  %v1868_v57 = vpack.c.bf16 %v1841_v45, %v1840_v44 }
 0x170   : > { %v1328_v8 = vpop.f32.mrf.mxu2 }
 0x171   : > { %v1377_v15 = vadd.f32 %v1328_v8, %v1139_v58  ;;  %v1001_v16 = vpop.f32.mrf.mxu0 }
 0x172   : > { %v1550_v12 = vpop.f32.mrf.mxu3 }
 0x173   : > { %v1141_v19 = vpop.f32.mrf.mxu1  ;;  %v7338_v26 = vadd.f32 %v1550_v12, %v1377_v15 }
 0x174   : > { %v1142_v25 = vadd.f32 %v1141_v19, %v1001_v16  ;;  %6188 = vmatmul.msk.bf16.gmra.mxu0 %vm715_vm2, %v1645_v13  ;;  %v1620_v16 = vld [vmem:[#allocation2 + $0x54] sm:$0xff]  ;;  %v1621_v19 = vld [vmem:[#allocation2 + $0x5c] sm:$0xff] }
 0x175   : > { %6222 = vmatmul.msk.bf16.gmra.mxu2 %vm715_vm2, %v2089_v22  ;;  %v1842_v22 = vld [vmem:[#allocation2 + $0x55] sm:$0xff] }
 0x176   : > { %6205 = vmatmul.msk.bf16.gmra.mxu1 %vm715_vm2, %v1867_v14 }
 0x177   : > { %6239 = vmatmul.msk.bf16.gmra.mxu3 %vm715_vm2, %v2311_v23  ;;  %v1843_v23 = vld [vmem:[#allocation2 + $0x5d] sm:$0xff] }
 0x178   : > { %v1331_v28 = vpop.f32.mrf.mxu2  ;;  %v1869_v39 = vpack.c.bf16 %v1843_v23, %v1842_v22 }
 0x179   : > { %v1378_v33 = vadd.f32 %v1331_v28, %v1142_v25  ;;  %v1003_v34 = vpop.f32.mrf.mxu0  ;;  %v2064_v25 = vld [vmem:[#allocation2 + $0x56] sm:$0xff]  ;;  %v2065_v28 = vld [vmem:[#allocation2 + $0x5e] sm:$0xff] }
 0x17a   : > { %v1553_v30 = vpop.f32.mrf.mxu3  ;;  %v2091_v46 = vpack.c.bf16 %v2065_v28, %v2064_v25 }
 0x17b   : > { %v1143_v35 = vpop.f32.mrf.mxu1  ;;  %v7344_v37 = vadd.f32 %v1553_v30, %v1378_v33  ;;  %v2286_v30 = vld [vmem:[#allocation2 + $0x57] sm:$0xff]  ;;  %v2287_v33 = vld [vmem:[#allocation2 + $0x5f] sm:$0xff] }
 0x17c   : > { %v1144_v36 = vadd.f32 %v1143_v35, %v1003_v34  ;;  %v2313_v47 = vpack.c.bf16 %v2287_v33, %v2286_v30 }
 0x180   : > { %v1333_v54 = vpop.f32.mrf.mxu2 }
 0x181   : > { %v1379_v58 = vadd.f32 %v1333_v54, %v1144_v36  ;;  %v1006_v63 = vpop.f32.mrf.mxu0  ;;  %v1647_v36 = vpack.c.bf16 %v1621_v19, %v1620_v16 }
 0x182   : > { %v1555_v55 = vpop.f32.mrf.mxu3 }
 0x183   : > { %v1146_v0 = vpop.f32.mrf.mxu1  ;;  %v7346_v4 = vadd.f32 %v1555_v55, %v1379_v58 }
 0x184   : > { %v1147_v3 = vadd.f32 %v1146_v0, %v1006_v63  ;;  %6189 = vmatmul.msk.bf16.gmra.mxu0 %vm715_vm2, %v1646_v56 }
 0x185   : > { %6223 = vmatmul.msk.bf16.gmra.mxu2 %vm715_vm2, %v2090_v5  ;;  %v1622_v5 = vld [vmem:[#allocation2 + $0x64] sm:$0xff] }
 0x186   : > { %6206 = vmatmul.msk.bf16.gmra.mxu1 %vm715_vm2, %v1868_v57 }
 0x187   : > { %6240 = vmatmul.msk.bf16.gmra.mxu3 %vm715_vm2, %v2312_v1  ;;  %v1623_v1 = vld [vmem:[#allocation2 + $0x6c] sm:$0xff] }
 0x188   : > { %v1336_v6 = vpop.f32.mrf.mxu2  ;;  %v1648_v19 = vpack.c.bf16 %v1623_v1, %v1622_v5  ;;  %v2291_v5 = vld [vmem:[#allocation2 + $0x7f] sm:$0xff] }
 0x189   : > { %v1380_v8 = vadd.f32 %v1336_v6, %v1147_v3  ;;  %v1008_v12 = vpop.f32.mrf.mxu0  ;;  %v1844_v3 = vld [vmem:[#allocation2 + $0x65] sm:$0xff]  ;;  %v1845_v6 = vld [vmem:[#allocation2 + $0x6d] sm:$0xff] }
 0x18a   : > { %v1558_v7 = vpop.f32.mrf.mxu3  ;;  %v1870_v22 = vpack.c.bf16 %v1845_v6, %v1844_v3 }
 0x18b   : > { %v1148_v13 = vpop.f32.mrf.mxu1  ;;  %v7352_v15 = vadd.f32 %v1558_v7, %v1380_v8  ;;  %v2066_v7 = vld [vmem:[#allocation2 + $0x66] sm:$0xff]  ;;  %v2067_v8 = vld [vmem:[#allocation2 + $0x6e] sm:$0xff] }
 0x18c   : > { %v1149_v14 = vadd.f32 %v1148_v13, %v1008_v12  ;;  %v2288_v12 = vld [vmem:[#allocation2 + $0x67] sm:$0xff]  ;;  %v2289_v13 = vld [vmem:[#allocation2 + $0x6f] sm:$0xff]  ;;  %v2092_v30 = vpack.c.bf16 %v2067_v8, %v2066_v7 }
 0x18d   : > { %v2314_v33 = vpack.c.bf16 %v2289_v13, %v2288_v12 }
 0x190   : > { %v1338_v34 = vpop.f32.mrf.mxu2 }
 0x191   : > { %v1381_v42 = vadd.f32 %v1338_v34, %v1149_v14  ;;  %v1011_v44 = vpop.f32.mrf.mxu0 }
 0x192   : > { %v1560_v35 = vpop.f32.mrf.mxu3 }
 0x193   : > { %v1151_v45 = vpop.f32.mrf.mxu1  ;;  %v7354_v52 = vadd.f32 %v1560_v35, %v1381_v42 }
 0x194   : > { %v1152_v49 = vadd.f32 %v1151_v45, %v1011_v44  ;;  %6190 = vmatmul.msk.bf16.gmra.mxu0 %vm715_vm2, %v1647_v36 }
 0x195   : > { %6224 = vmatmul.msk.bf16.gmra.mxu2 %vm715_vm2, %v2091_v46 }
 0x196   : > { %6207 = vmatmul.msk.bf16.gmra.mxu1 %vm715_vm2, %v1869_v39 }
 0x197   : > { %6241 = vmatmul.msk.bf16.gmra.mxu3 %vm715_vm2, %v2313_v47 }
 0x198   : > { %v1341_v54 = vpop.f32.mrf.mxu2 }
 0x199   : > { %v1382_v56 = vadd.f32 %v1341_v54, %v1152_v49  ;;  %v1013_v57 = vpop.f32.mrf.mxu0  ;;  %v1624_v49 = vld [vmem:[#allocation2 + $0x74] sm:$0xff]  ;;  %v1625_v54 = vld [vmem:[#allocation2 + $0x7c] sm:$0xff] }
 0x19a   : > { %v1563_v55 = vpop.f32.mrf.mxu3  ;;  %v1649_v6 = vpack.c.bf16 %v1625_v54, %v1624_v49  ;;  %v2071_v49 = vld [vmem:[#allocation2 + $0x8e] sm:$0xff] }
 0x19b   : > { %v1153_v58 = vpop.f32.mrf.mxu1  ;;  %v7360_v0 = vadd.f32 %v1563_v55, %v1382_v56  ;;  %v1846_v55 = vld [vmem:[#allocation2 + $0x75] sm:$0xff]  ;;  %v1847_v56 = vld [vmem:[#allocation2 + $0x7d] sm:$0xff]  ;;  %v2292_v54 = vld [vmem:[#allocation2 + $0x87] sm:$0xff] }
 0x19c   : > { %v1154_v63 = vadd.f32 %v1153_v58, %v1013_v57  ;;  %v2068_v57 = vld [vmem:[#allocation2 + $0x76] sm:$0xff]  ;;  %v2069_v58 = vld [vmem:[#allocation2 + $0x7e] sm:$0xff]  ;;  %v1871_v7 = vpack.c.bf16 %v1847_v56, %v1846_v55 }
 0x19d   : > { %v2293_v55 = vld [vmem:[#allocation2 + $0x8f] sm:$0xff] }
 0x1a0   : > { %v1343_v14 = vpop.f32.mrf.mxu2 }
 0x1a1   : > { %v1383_v23 = vadd.f32 %v1343_v14, %v1154_v63  ;;  %v1016_v25 = vpop.f32.mrf.mxu0  ;;  %v2290_v63 = vld [vmem:[#allocation2 + $0x77] sm:$0xff]  ;;  %v2093_v14 = vpack.c.bf16 %v2069_v58, %v2068_v57 }
 0x1a2   : > { %v1565_v16 = vpop.f32.mrf.mxu3 }
 0x1a3   : > { %v1156_v28 = vpop.f32.mrf.mxu1  ;;  %v7362_v35 = vadd.f32 %v1565_v16, %v1383_v23  ;;  %v2315_v16 = vpack.c.bf16 %v2291_v5, %v2290_v63 }
 0x1a4   : > { %v1157_v34 = vadd.f32 %v1156_v28, %v1016_v25  ;;  %6191 = vmatmul.msk.bf16.gmra.mxu0 %vm715_vm2, %v1648_v19 }
 0x1a5   : > { %6225 = vmatmul.msk.bf16.gmra.mxu2 %vm715_vm2, %v2092_v30 }
 0x1a6   : > { %6208 = vmatmul.msk.bf16.gmra.mxu1 %vm715_vm2, %v1870_v22 }
 0x1a7   : > { %6242 = vmatmul.msk.bf16.gmra.mxu3 %vm715_vm2, %v2314_v33 }
 0x1a8   : > { %v1346_v36 = vpop.f32.mrf.mxu2 }
 0x1a9   : > { %v1384_v42 = vadd.f32 %v1346_v36, %v1157_v34  ;;  %v1018_v44 = vpop.f32.mrf.mxu0 }
 0x1aa   : > { %v1568_v39 = vpop.f32.mrf.mxu3 }
 0x1ab   : > { %v1158_v45 = vpop.f32.mrf.mxu1  ;;  %v7368_v47 = vadd.f32 %v1568_v39, %v1384_v42  ;;  %v1626_v39 = vld [vmem:[#allocation2 + $0x84] sm:$0xff]  ;;  %v1627_v42 = vld [vmem:[#allocation2 + $0x8c] sm:$0xff] }
 0x1ac   : > { %v1159_v46 = vadd.f32 %v1158_v45, %v1018_v44  ;;  %v1848_v44 = vld [vmem:[#allocation2 + $0x85] sm:$0xff]  ;;  %v1849_v45 = vld [vmem:[#allocation2 + $0x8d] sm:$0xff]  ;;  %v1650_v58 = vpack.c.bf16 %v1627_v42, %v1626_v39  ;;  %v1850_v39 = vld [vmem:[#allocation2 + $0x95] sm:$0xff] }
 0x1ad   : > { %v1872_v63 = vpack.c.bf16 %v1849_v45, %v1848_v44  ;;  %v1851_v42 = vld [vmem:[#allocation2 + $0x9d] sm:$0xff] }
 0x1ae   : > { %v2072_v44 = vld [vmem:[#allocation2 + $0x96] sm:$0xff]  ;;  %v2073_v45 = vld [vmem:[#allocation2 + $0x9e] sm:$0xff] }
 0x1b0   : > { %v1348_v1 = vpop.f32.mrf.mxu2 }
 0x1b1   : > { %v1385_v8 = vadd.f32 %v1348_v1, %v1159_v46  ;;  %v1021_v12 = vpop.f32.mrf.mxu0  ;;  %v2070_v46 = vld [vmem:[#allocation2 + $0x86] sm:$0xff] }
 0x1b2   : > { %v1570_v3 = vpop.f32.mrf.mxu3 }
 0x1b3   : > { %v1161_v13 = vpop.f32.mrf.mxu1  ;;  %v7370_v22 = vadd.f32 %v1570_v3, %v1385_v8  ;;  %v1089_v8 = vadd.f32 %v7218_v32, %v7216_v31 }
 0x1b4   : > { %v1162_v19 = vadd.f32 %v1161_v13, %v1021_v12  ;;  %6192 = vmatmul.msk.bf16.gmra.mxu0 %vm715_vm2, %v1649_v6  ;;  %v2094_v6 = vpack.c.bf16 %v2071_v49, %v2070_v46  ;;  %v2294_v46 = vld [vmem:[#allocation2 + $0x97] sm:$0xff]  ;;  %v2295_v49 = vld [vmem:[#allocation2 + $0x9f] sm:$0xff] }
 0x1b5   : > { %6226 = vmatmul.msk.bf16.gmra.mxu2 %vm715_vm2, %v2093_v14  ;;  %v1357_v14 = vadd.f32 %v7224_v40, %v1089_v8 }
 0x1b6   : > { %6209 = vmatmul.msk.bf16.gmra.mxu1 %vm715_vm2, %v1871_v7  ;;  %v2316_v7 = vpack.c.bf16 %v2293_v55, %v2292_v54 }
 0x1b7   : > { %6243 = vmatmul.msk.bf16.gmra.mxu3 %vm715_vm2, %v2315_v16 }
 0x1b8   : > { %v1351_v23 = vpop.f32.mrf.mxu2 }
 0x1b9   : > { %v1386_v28 = vadd.f32 %v1351_v23, %v1162_v19  ;;  %v1023_v30 = vpop.f32.mrf.mxu0  ;;  %v1579_v19 = vadd.f32 %v7226_v41, %v1357_v14 }
 0x1ba   : > { %v1573_v25 = vpop.f32.mrf.mxu3 }
 0x1bb   : > { %v1163_v33 = vpop.f32.mrf.mxu1  ;;  %v7376_v36 = vadd.f32 %v1573_v25, %v1386_v28 }
 0x1bc   : > { %v1164_v34 = vadd.f32 %v1163_v33, %v1023_v30  ;;  %v1628_v33 = vld [vmem:[#allocation2 + $0x94] sm:$0xff] }
 0x1c0   : > { %v1353_v56 = vpop.f32.mrf.mxu2 }
 0x1c1   : > { %v1387_v5 = vadd.f32 %v1353_v56, %v1164_v34  ;;  %v1720_v1 = vpop.f32.mrf.mxu0  ;;  %v1629_v34 = vld [vmem:[#allocation2 + $0x9c] sm:$0xff]  ;;  %v1873_v56 = vpack.c.bf16 %v1851_v42, %v1850_v39  ;;  %v2297_v39 = vld [vmem:[#allocation2 + $0xaf] sm:$0xff] }
 0x1c2   : > { %v1575_v57 = vpop.f32.mrf.mxu3  ;;  %v1800_v12 = vadd.f32 %v1720_v1, %v7209_v20  ;;  %v1651_v41 = vpack.c.bf16 %v1629_v34, %v1628_v33  ;;  %v2317_v1 = vpack.c.bf16 %v2295_v49, %v2294_v46  ;;  %v2075_v33 = vld [vmem:[#allocation2 + $0xae] sm:$0xff] }
 0x1c3   : > { %v1942_v3 = vpop.f32.mrf.mxu1  ;;  %v7381_v13 = vadd.f32 %v1575_v57, %v1387_v5  ;;  %v2095_v5 = vpack.c.bf16 %v2073_v45, %v2072_v44  ;;  %v2296_v34 = vld [vmem:[#allocation2 + $0xa7] sm:$0xff] }
 0x1c4   : > { %v2022_v16 = vadd.f32 %v1942_v3, %v1800_v12  ;;  %6193 = vmatmul.msk.bf16.gmra.mxu0 %vm715_vm2, %v1650_v58 }
 0x1c5   : > { %6227 = vmatmul.msk.bf16.gmra.mxu2 %vm715_vm2, %v2094_v6 }
 0x1c6   : > { %6210 = vmatmul.msk.bf16.gmra.mxu1 %vm715_vm2, %v1872_v63 }
 0x1c7   : > { %6244 = vmatmul.msk.bf16.gmra.mxu3 %vm715_vm2, %v2316_v7 }
 0x1c8   : > { %v2164_v23 = vpop.f32.mrf.mxu2 }
 0x1c9   : > { %v2244_v31 = vadd.f32 %v2164_v23, %v2022_v16  ;;  %v1722_v32 = vpop.f32.mrf.mxu0 }
 0x1ca   : > { %v2386_v25 = vpop.f32.mrf.mxu3  ;;  %v1801_v28 = vadd.f32 %v1722_v32, %v1579_v19  ;;  %v1631_v32 = vld [vmem:[#allocation2 + $0xac] sm:$0xff] }
 0x1cb   : > { %v1944_v20 = vpop.f32.mrf.mxu1  ;;  %v7389_v30 = vadd.f32 %v2386_v25, %v2244_v31  ;;  %v1630_v31 = vld [vmem:[#allocation2 + $0xa4] sm:$0xff] }
 0x1cc   : > { %v2023_v40 = vadd.f32 %v1944_v20, %v1801_v28  ;;  %v1852_v20 = vld [vmem:[#allocation2 + $0xa5] sm:$0xff]  ;;  %v1853_v28 = vld [vmem:[#allocation2 + $0xad] sm:$0xff]  ;;  %v1652_v45 = vpack.c.bf16 %v1631_v32, %v1630_v31  ;;  %v2298_v32 = vld [vmem:[#allocation2 + $0xb7] sm:$0xff] }
 0x1cd   : > { %v1874_v46 = vpack.c.bf16 %v1853_v28, %v1852_v20  ;;  %v2077_v31 = vld [vmem:[#allocation2 + $0xbe] sm:$0xff] }
 0x1ce   : > { %v2299_v20 = vld [vmem:[#allocation2 + $0xbf] sm:$0xff] }
 0x1d0   : > { %v2166_v54 = vpop.f32.mrf.mxu2 }
 0x1d1   : > { %v2245_v57 = vadd.f32 %v2166_v54, %v2023_v40  ;;  %v1725_v58 = vpop.f32.mrf.mxu0  ;;  %v2074_v40 = vld [vmem:[#allocation2 + $0xa6] sm:$0xff] }
 0x1d2   : > { %v2388_v55 = vpop.f32.mrf.mxu3  ;;  %v1802_v3 = vadd.f32 %v1725_v58, %v7234_v60 }
 0x1d3   : > { %v1947_v63 = vpop.f32.mrf.mxu1  ;;  %v7392_v6 = vadd.f32 %v2388_v55, %v2245_v57 }
 0x1d4   : > { %v2024_v7 = vadd.f32 %v1947_v63, %v1802_v3  ;;  %6194 = vmatmul.msk.bf16.gmra.mxu0 %vm715_vm2, %v1651_v41  ;;  %v2096_v41 = vpack.c.bf16 %v2075_v33, %v2074_v40 }
 0x1d5   : > { %6228 = vmatmul.msk.bf16.gmra.mxu2 %vm715_vm2, %v2095_v5 }
 0x1d6   : > { %6211 = vmatmul.msk.bf16.gmra.mxu1 %vm715_vm2, %v1873_v56 }
 0x1d7   : > { %6245 = vmatmul.msk.bf16.gmra.mxu3 %vm715_vm2, %v2317_v1 }
 0x1d8   : > { %v2169_v8 = vpop.f32.mrf.mxu2 }
 0x1d9   : > { %v2246_v14 = vadd.f32 %v2169_v8, %v2024_v7  ;;  %v1727_v16 = vpop.f32.mrf.mxu0 }
 0x1da   : > { %v2391_v12 = vpop.f32.mrf.mxu3  ;;  %v1803_v23 = vadd.f32 %v1727_v16, %v7238_v17  ;;  %v2318_v17 = vpack.c.bf16 %v2297_v39, %v2296_v34  ;;  %v1633_v16 = vld [vmem:[#allocation2 + $0xbc] sm:$0xff] }
 0x1db   : > { %v1949_v19 = vpop.f32.mrf.mxu1  ;;  %v7399_v25 = vadd.f32 %v2391_v12, %v2246_v14  ;;  %v1632_v14 = vld [vmem:[#allocation2 + $0xb4] sm:$0xff] }
 0x1dc   : > { %v2025_v60 = vadd.f32 %v1949_v19, %v1803_v23  ;;  %v1854_v19 = vld [vmem:[#allocation2 + $0xb5] sm:$0xff]  ;;  %v1855_v23 = vld [vmem:[#allocation2 + $0xbd] sm:$0xff]  ;;  %v1653_v33 = vpack.c.bf16 %v1633_v16, %v1632_v14  ;;  %v2300_v16 = vld [vmem:[#allocation2 + $0xc7] sm:$0xff] }
 0x1dd   : > { %v1875_v34 = vpack.c.bf16 %v1855_v23, %v1854_v19  ;;  %v2079_v14 = vld [vmem:[#allocation2 + $0xce] sm:$0xff] }
 0x1de   : > { %v2301_v19 = vld [vmem:[#allocation2 + $0xcf] sm:$0xff] }
 0x1e0   : > { %v2171_v42 = vpop.f32.mrf.mxu2 }
 0x1e1   : > { %v2247_v49 = vadd.f32 %v2171_v42, %v2025_v60  ;;  %v1730_v54 = vpop.f32.mrf.mxu0  ;;  %v2076_v60 = vld [vmem:[#allocation2 + $0xb6] sm:$0xff] }
 0x1e2   : > { %v2393_v44 = vpop.f32.mrf.mxu3  ;;  %v1804_v56 = vadd.f32 %v1730_v54, %v7246_v27 }
 0x1e3   : > { %v1952_v55 = vpop.f32.mrf.mxu1  ;;  %v7402_v57 = vadd.f32 %v2393_v44, %v2247_v49 }
 0x1e4   : > { %v2026_v58 = vadd.f32 %v1952_v55, %v1804_v56  ;;  %6195 = vmatmul.msk.bf16.gmra.mxu0 %vm715_vm2, %v1652_v45  ;;  %v2097_v45 = vpack.c.bf16 %v2077_v31, %v2076_v60 }
 0x1e5   : > { %6229 = vmatmul.msk.bf16.gmra.mxu2 %vm715_vm2, %v2096_v41 }
 0x1e6   : > { %6212 = vmatmul.msk.bf16.gmra.mxu1 %vm715_vm2, %v1874_v46 }
 0x1e7   : > { %6246 = vmatmul.msk.bf16.gmra.mxu3 %vm715_vm2, %v2318_v17 }
 0x1e8   : > { %v2174_v63 = vpop.f32.mrf.mxu2 }
 0x1e9   : > { %v2248_v1 = vadd.f32 %v2174_v63, %v2026_v58  ;;  %v1732_v3 = vpop.f32.mrf.mxu0 }
 0x1ea   : > { %v2396_v5 = vpop.f32.mrf.mxu3  ;;  %v1805_v8 = vadd.f32 %v1732_v3, %v7250_v50  ;;  %v2319_v50 = vpack.c.bf16 %v2299_v20, %v2298_v32  ;;  %v1635_v3 = vld [vmem:[#allocation2 + $0xcc] sm:$0xff] }
 0x1eb   : > { %v1954_v7 = vpop.f32.mrf.mxu1  ;;  %v7409_v12 = vadd.f32 %v2396_v5, %v2248_v1  ;;  %v1634_v1 = vld [vmem:[#allocation2 + $0xc4] sm:$0xff] }
 0x1ec   : > { %v2027_v27 = vadd.f32 %v1954_v7, %v1805_v8  ;;  %v1856_v7 = vld [vmem:[#allocation2 + $0xc5] sm:$0xff]  ;;  %v1857_v8 = vld [vmem:[#allocation2 + $0xcd] sm:$0xff]  ;;  %v1654_v31 = vpack.c.bf16 %v1635_v3, %v1634_v1 }
 0x1ed   : > { %v1876_v32 = vpack.c.bf16 %v1857_v8, %v1856_v7  ;;  %v2303_v1 = vld [vmem:[#allocation2 + $0xdf] sm:$0xff] }
 0x1f0   : > { %v2176_v28 = vpop.f32.mrf.mxu2 }
 0x1f1   : > { %v2249_v39 = vadd.f32 %v2176_v28, %v2027_v27  ;;  %v1735_v42 = vpop.f32.mrf.mxu0  ;;  %v2078_v27 = vld [vmem:[#allocation2 + $0xc6] sm:$0xff] }
 0x1f2   : > { %v2398_v40 = vpop.f32.mrf.mxu3  ;;  %v1806_v46 = vadd.f32 %v1735_v42, %v7258_v59 }
 0x1f3   : > { %v1957_v44 = vpop.f32.mrf.mxu1  ;;  %v7412_v49 = vadd.f32 %v2398_v40, %v2249_v39 }
 0x1f4   : > { %v2028_v54 = vadd.f32 %v1957_v44, %v1806_v46  ;;  %6196 = vmatmul.msk.bf16.gmra.mxu0 %vm715_vm2, %v1653_v33  ;;  %v2098_v33 = vpack.c.bf16 %v2079_v14, %v2078_v27 }
 0x1f5   : > { %6230 = vmatmul.msk.bf16.gmra.mxu2 %vm715_vm2, %v2097_v45 }
 0x1f6   : > { %6213 = vmatmul.msk.bf16.gmra.mxu1 %vm715_vm2, %v1875_v34 }
 0x1f7   : > { %6247 = vmatmul.msk.bf16.gmra.mxu3 %vm715_vm2, %v2319_v50 }
 0x1f8   : > { %v2179_v55 = vpop.f32.mrf.mxu2 }
 0x1f9   : > { %v2250_v17 = vadd.f32 %v2179_v55, %v2028_v54  ;;  %v1737_v56 = vpop.f32.mrf.mxu0 }
 0x1fa   : > { %v2401_v41 = vpop.f32.mrf.mxu3  ;;  %v1807_v63 = vadd.f32 %v1737_v56, %v7262_v18  ;;  %v2320_v18 = vpack.c.bf16 %v2301_v19, %v2300_v16  ;;  %v1859_v56 = vld [vmem:[#allocation2 + $0xdd] sm:$0xff] }
 0x1fb   : > { %v1959_v58 = vpop.f32.mrf.mxu1  ;;  %v7419_v5 = vadd.f32 %v2401_v41, %v2250_v17  ;;  %v1637_v41 = vld [vmem:[#allocation2 + $0xdc] sm:$0xff] }
 0x1fc   : > { %v2029_v59 = vadd.f32 %v1959_v58, %v1807_v63  ;;  %v1858_v17 = vld [vmem:[#allocation2 + $0xd5] sm:$0xff]  ;;  %v2081_v63 = vld [vmem:[#allocation2 + $0xde] sm:$0xff] }
 0x1fd   : > { %v2080_v58 = vld [vmem:[#allocation2 + $0xd6] sm:$0xff]  ;;  %v1877_v8 = vpack.c.bf16 %v1859_v56, %v1858_v17 }
 0x1fe   : > { %v2099_v19 = vpack.c.bf16 %v2081_v63, %v2080_v58 }
 0x200   : > { %v2181_v23 = vpop.f32.mrf.mxu2 }
 0x201   : > { %v2251_v20 = vadd.f32 %v2181_v23, %v2029_v59  ;;  %v1740_v28 = vpop.f32.mrf.mxu0  ;;  %v2302_v59 = vld [vmem:[#allocation2 + $0xd7] sm:$0xff] }
 0x202   : > { %v2403_v60 = vpop.f32.mrf.mxu3  ;;  %v1808_v34 = vadd.f32 %v1740_v28, %v7270_v29  ;;  %v1636_v29 = vld [vmem:[#allocation2 + $0xd4] sm:$0xff]  ;;  %v2321_v23 = vpack.c.bf16 %v2303_v1, %v2302_v59 }
 0x203   : > { %v1962_v40 = vpop.f32.mrf.mxu1  ;;  %v7422_v39 = vadd.f32 %v2403_v60, %v2251_v20  ;;  %v1655_v7 = vpack.c.bf16 %v1637_v41, %v1636_v29 }
 0x204   : > { %v2030_v42 = vadd.f32 %v1962_v40, %v1808_v34  ;;  %6197 = vmatmul.msk.bf16.gmra.mxu0 %vm715_vm2, %v1654_v31  ;;  %v1639_v34 = vld [vmem:[#allocation2 + $0xec] sm:$0xff] }
 0x205   : > { %6231 = vmatmul.msk.bf16.gmra.mxu2 %vm715_vm2, %v2098_v33 }
 0x206   : > { %6214 = vmatmul.msk.bf16.gmra.mxu1 %vm715_vm2, %v1876_v32 }
 0x207   : > { %6248 = vmatmul.msk.bf16.gmra.mxu3 %vm715_vm2, %v2320_v18  ;;  %v1638_v18 = vld [vmem:[#allocation2 + $0xe4] sm:$0xff] }
 0x208   : > { %v2184_v44 = vpop.f32.mrf.mxu2  ;;  %v1656_v29 = vpack.c.bf16 %v1639_v34, %v1638_v18 }
 0x209   : > { %v7428_v45 = vadd.f32 %v2184_v44, %v2030_v42  ;;  %v1742_v50 = vpop.f32.mrf.mxu0  ;;  %v1861_v42 = vld [vmem:[#allocation2 + $0xed] sm:$0xff] }
 0x20a   : > { %v1809_v54 = vadd.f32 %v1742_v50, %v7274_v53  ;;  %v2082_v44 = vld [vmem:[#allocation2 + $0xe6] sm:$0xff]  ;;  %v2083_v50 = vld [vmem:[#allocation2 + $0xee] sm:$0xff] }
 0x20b   : > { %v1964_v46 = vpop.f32.mrf.mxu1  ;;  %v2100_v63 = vpack.c.bf16 %v2083_v50, %v2082_v44 }
 0x20c   : > { %v2031_v55 = vadd.f32 %v1964_v46, %v1809_v54  ;;  %v2304_v46 = vld [vmem:[#allocation2 + $0xe7] sm:$0xff]  ;;  %v2305_v54 = vld [vmem:[#allocation2 + $0xef] sm:$0xff] }
 0x20d   : > { %v2322_v59 = vpack.c.bf16 %v2305_v54, %v2304_v46 }
 0x210   : > { %v2186_v3 = vpop.f32.mrf.mxu2 }
 0x211   : > { %v7431_v27 = vadd.f32 %v2186_v3, %v2031_v55  ;;  %v1745_v14 = vpop.f32.mrf.mxu0 }
 0x212   : > { %v1810_v53 = vadd.f32 %v1745_v14, %v7280_v62  ;;  %v1860_v62 = vld [vmem:[#allocation2 + $0xe5] sm:$0xff] }
 0x213   : > { %v1967_v16 = vpop.f32.mrf.mxu1  ;;  %v1878_v41 = vpack.c.bf16 %v1861_v42, %v1860_v62 }
 0x214   : > { %v2032_v60 = vadd.f32 %v1967_v16, %v1810_v53  ;;  %6198 = vmatmul.msk.bf16.gmra.mxu0 %vm715_vm2, %v1655_v7  ;;  %v1641_v53 = vld [vmem:[#allocation2 + $0xfc] sm:$0xff] }
 0x215   : > { %6232 = vmatmul.msk.bf16.gmra.mxu2 %vm715_vm2, %v2099_v19 }
 0x216   : > { %6215 = vmatmul.msk.bf16.gmra.mxu1 %vm715_vm2, %v1877_v8 }
 0x217   : > { %6249 = vmatmul.msk.bf16.gmra.mxu3 %vm715_vm2, %v2321_v23  ;;  %v1640_v23 = vld [vmem:[#allocation2 + $0xf4] sm:$0xff] }
 0x218   : > { %v2189_v31 = vpop.f32.mrf.mxu2  ;;  %v1657_v18 = vpack.c.bf16 %v1641_v53, %v1640_v23 }
 0x219   : > { %v7438_v32 = vadd.f32 %v2189_v31, %v2032_v60  ;;  %v1747_v20 = vpop.f32.mrf.mxu0  ;;  %v1863_v60 = vld [vmem:[#allocation2 + $0xfd] sm:$0xff] }
 0x21a   : > { %v1811_v40 = vadd.f32 %v1747_v20, %v7286_v24  ;;  %v2084_v31 = vld [vmem:[#allocation2 + $0xf6] sm:$0xff]  ;;  %v2085_v20 = vld [vmem:[#allocation2 + $0xfe] sm:$0xff] }
 0x21b   : > { %v1969_v28 = vpop.f32.mrf.mxu1  ;;  %v2101_v50 = vpack.c.bf16 %v2085_v20, %v2084_v31 }
 0x21c   : > { %v2033_v33 = vadd.f32 %v1969_v28, %v1811_v40  ;;  %v2306_v28 = vld [vmem:[#allocation2 + $0xf7] sm:$0xff]  ;;  %v2307_v40 = vld [vmem:[#allocation2 + $0xff] sm:$0xff] }
 0x21d   : > { %v2323_v46 = vpack.c.bf16 %v2307_v40, %v2306_v28 }
 0x220   : > { %v2191_v55 = vpop.f32.mrf.mxu2 }
 0x221   : > { %v7441_v17 = vadd.f32 %v2191_v55, %v2033_v33  ;;  %v1750_v56 = vpop.f32.mrf.mxu0 }
 0x222   : > { %v1812_v24 = vadd.f32 %v1750_v56, %v7304_v43  ;;  %v1862_v43 = vld [vmem:[#allocation2 + $0xf5] sm:$0xff] }
 0x223   : > { %v1972_v58 = vpop.f32.mrf.mxu1  ;;  %v1879_v34 = vpack.c.bf16 %v1863_v60, %v1862_v43 }
 0x224   : > { %v2034_v1 = vadd.f32 %v1972_v58, %v1812_v24  ;;  %6199 = vmatmul.msk.bf16.gmra.mxu0 %vm715_vm2, %v1656_v29  ;;  %v2499_v24 = vld [vmem:[#allocation2 + $0x10] sm:$0xff] }
 0x225   : > { %6233 = vmatmul.msk.bf16.gmra.mxu2 %vm715_vm2, %v2100_v63 }
 0x226   : > { %6216 = vmatmul.msk.bf16.gmra.mxu1 %vm715_vm2, %v1878_v41 }
 0x227   : > { %6250 = vmatmul.msk.bf16.gmra.mxu3 %vm715_vm2, %v2322_v59  ;;  %v2498_v59 = vld [vmem:[#allocation2 + $0x8] sm:$0xff] }
 0x228   : > { %v2194_v3 = vpop.f32.mrf.mxu2 }
 0x229   : > { %v7448_v7 = vadd.f32 %v2194_v3, %v2034_v1  ;;  %v1752_v8 = vpop.f32.mrf.mxu0  ;;  %v2721_v1 = vld [vmem:[#allocation2 + $0x11] sm:$0xff] }
 0x22a   : > { %v1813_v16 = vadd.f32 %v1752_v8, %v7306_v2  ;;  %v2942_v3 = vld [vmem:[#allocation2 + $0xa] sm:$0xff]  ;;  %v2943_v8 = vld [vmem:[#allocation2 + $0x12] sm:$0xff] }
 0x22b   : > { %v1974_v14 = vpop.f32.mrf.mxu1  ;;  %v2974_v60 = vpack.c.bf16 %v2943_v8, %v2942_v3 }
 0x22c   : > { %v2035_v19 = vadd.f32 %v1974_v14, %v1813_v16  ;;  %v2530_v16 = vpack.c.bf16 %v2499_v24, %v2498_v59 }
 0x230   : > { %v2196_v33 = vpop.f32.mrf.mxu2 }
 0x231   : > { %v7451_v62 = vadd.f32 %v2196_v33, %v2035_v19  ;;  %v1755_v42 = vpop.f32.mrf.mxu0 }
 0x232   : > { %v1814_v2 = vadd.f32 %v1755_v42, %v7312_v10  ;;  %v2720_v10 = vld [vmem:[#allocation2 + $0x9] sm:$0xff]  ;;  %v2500_v42 = vld [vmem:[#allocation2 + $0x18] sm:$0xff] }
 0x233   : > { %v1977_v44 = vpop.f32.mrf.mxu1  ;;  %v2752_v19 = vpack.c.bf16 %v2721_v1, %v2720_v10 }
 0x234   : > { %v2036_v54 = vadd.f32 %v1977_v44, %v1814_v2  ;;  %6200 = vmatmul.msk.bf16.gmra.mxu0 %vm715_vm2, %v1657_v18  ;;  %v2501_v44 = vld [vmem:[#allocation2 + $0x20] sm:$0xff] }
 0x235   : > { %6234 = vmatmul.msk.bf16.gmra.mxu2 %vm715_vm2, %v2101_v50  ;;  %v2722_v50 = vld [vmem:[#allocation2 + $0x19] sm:$0xff] }
 0x236   : > { %6217 = vmatmul.msk.bf16.gmra.mxu1 %vm715_vm2, %v1879_v34 }
 0x237   : > { %6251 = vmatmul.msk.bf16.gmra.mxu3 %vm715_vm2, %v2323_v46  ;;  %v2723_v46 = vld [vmem:[#allocation2 + $0x21] sm:$0xff] }
 0x238   : > { %v2199_v55 = vpop.f32.mrf.mxu2 }
 0x239   : > { %v7458_v29 = vadd.f32 %v2199_v55, %v2036_v54  ;;  %v1757_v41 = vpop.f32.mrf.mxu0  ;;  %v2944_v54 = vld [vmem:[#allocation2 + $0x1a] sm:$0xff]  ;;  %v2945_v55 = vld [vmem:[#allocation2 + $0x22] sm:$0xff] }
 0x23a   : > { %v1815_v58 = vadd.f32 %v1757_v41, %v7314_v38  ;;  %v2975_v24 = vpack.c.bf16 %v2945_v55, %v2944_v54 }
 0x23b   : > { %v1979_v56 = vpop.f32.mrf.mxu1 }
 0x23c   : > { %v2037_v63 = vadd.f32 %v1979_v56, %v1815_v58  ;;  %v2531_v56 = vpack.c.bf16 %v2501_v44, %v2500_v42  ;;  %v2753_v58 = vpack.c.bf16 %v2723_v46, %v2722_v50 }
 0x240   : > { %v2201_v14 = vpop.f32.mrf.mxu2 }
 0x241   : > { %v7461_v23 = vadd.f32 %v2201_v14, %v2037_v63  ;;  %v1760_v53 = vpop.f32.mrf.mxu0 }
 0x242   : > { %v1816_v31 = vadd.f32 %v1760_v53, %v7320_v48  ;;  %v6303_v48 = vld [vmem:[%s8650_s25 + $0x4] sm:$0xf] }
 0x243   : > { %v1982_v43 = vpop.f32.mrf.mxu1  ;;  %v3490_v2 = vsel %vm3488_vm3, %v6303_v48, 0 }
 0x244   : > { %v2038_v20 = vadd.f32 %v1982_v43, %v1816_v31  ;;  %6253 = vmatmul.msk.bf16.vlgmr.msra.gmra.mxu0 %vm715_vm2, %v2530_v16  ;;  %3499 = vmatpush.bf16.msra.mxu3 %v3490_v2  ;;  %v2502_v43 = vld [vmem:[#allocation2 + $0x28] sm:$0xff] }
 0x245   : > { %6287 = vmatmul.msk.bf16.vlgmr.msra.gmra.mxu2 %vm715_vm2, %v2974_v60  ;;  %v2503_v60 = vld [vmem:[#allocation2 + $0x30] sm:$0xff] }
 0x246   : > { %6270 = vmatmul.msk.bf16.vlgmr.msra.gmra.mxu1 %vm715_vm2, %v2752_v19  ;;  %v2724_v31 = vld [vmem:[#allocation2 + $0x29] sm:$0xff] }
 0x248   : > { %v2204_v38 = vpop.f32.mrf.mxu2 }
 0x249   : > { %v7467_v28 = vadd.f32 %v2204_v38, %v2038_v20  ;;  %v1762_v40 = vpop.f32.mrf.mxu0  ;;  %v2725_v20 = vld [vmem:[#allocation2 + $0x31] sm:$0xff] }
 0x24a   : > { %v1817_v18 = vadd.f32 %v1762_v40, %v7322_v9  ;;  %v2947_v38 = vld [vmem:[#allocation2 + $0x32] sm:$0xff] }
 0x24b   : > { %v1984_v33 = vpop.f32.mrf.mxu1 }
 0x24c   : > { %v2039_v34 = vadd.f32 %v1984_v33, %v1817_v18  ;;  %v2532_v33 = vpack.c.bf16 %v2503_v60, %v2502_v43  ;;  %v2754_v18 = vpack.c.bf16 %v2725_v20, %v2724_v31 }
 0x250   : > { %v2206_v41 = vpop.f32.mrf.mxu2 }
 0x251   : > { %v7474_v63 = vadd.f32 %v2206_v41, %v2039_v34  ;;  %v1765_v9 = vpop.f32.mrf.mxu0 }
 0x252   : > { %v1818_v10 = vadd.f32 %v1765_v9, %v7328_v21  ;;  %v2946_v21 = vld [vmem:[#allocation2 + $0x2a] sm:$0xff]  ;;  %v2505_v9 = vld [vmem:[#allocation2 + $0x40] sm:$0xff] }
 0x253   : > { %v1987_v59 = vpop.f32.mrf.mxu1  ;;  %v2976_v44 = vpack.c.bf16 %v2947_v38, %v2946_v21 }
 0x254   : > { %v2040_v1 = vadd.f32 %v1987_v59, %v1818_v10  ;;  %6254 = vmatmul.msk.bf16.gmra.mxu0 %vm715_vm2, %v2531_v56  ;;  %v2726_v59 = vld [vmem:[#allocation2 + $0x39] sm:$0xff]  ;;  %v2949_v10 = vld [vmem:[#allocation2 + $0x42] sm:$0xff] }
 0x255   : > { %6288 = vmatmul.msk.bf16.gmra.mxu2 %vm715_vm2, %v2975_v24  ;;  %v2727_v24 = vld [vmem:[#allocation2 + $0x41] sm:$0xff] }
 0x256   : > { %6271 = vmatmul.msk.bf16.gmra.mxu1 %vm715_vm2, %v2753_v58  ;;  %v2504_v58 = vld [vmem:[#allocation2 + $0x38] sm:$0xff] }
 0x258   : > { %v2209_v3 = vpop.f32.mrf.mxu2 }
 0x259   : > { %v7480_v8 = vadd.f32 %v2209_v3, %v2040_v1  ;;  %v1767_v14 = vpop.f32.mrf.mxu0  ;;  %v2533_v3 = vpack.c.bf16 %v2505_v9, %v2504_v58 }
 0x25a   : > { %v1819_v19 = vadd.f32 %v1767_v14, %v7330_v51  ;;  %v2755_v14 = vpack.c.bf16 %v2727_v24, %v2726_v59 }
 0x25b   : > { %v1989_v16 = vpop.f32.mrf.mxu1 }
 0x25c   : > { %v2041_v53 = vadd.f32 %v1989_v16, %v1819_v19 }
 0x260   : > { %v2211_v40 = vpop.f32.mrf.mxu2 }
 0x261   : > { %v7483_v34 = vadd.f32 %v2211_v40, %v2041_v53  ;;  %v1770_v42 = vpop.f32.mrf.mxu0 }
 0x262   : > { %v1820_v50 = vadd.f32 %v1770_v42, %v7336_v61  ;;  %v2948_v61 = vld [vmem:[#allocation2 + $0x3a] sm:$0xff]  ;;  %v2507_v42 = vld [vmem:[#allocation2 + $0x50] sm:$0xff] }
 0x263   : > { %v1992_v48 = vpop.f32.mrf.mxu1  ;;  %v2977_v43 = vpack.c.bf16 %v2949_v10, %v2948_v61 }
 0x264   : > { %v2042_v46 = vadd.f32 %v1992_v48, %v1820_v50  ;;  %6255 = vmatmul.msk.bf16.gmra.mxu0 %vm715_vm2, %v2532_v33  ;;  %v2728_v48 = vld [vmem:[#allocation2 + $0x49] sm:$0xff]  ;;  %v2951_v50 = vld [vmem:[#allocation2 + $0x52] sm:$0xff] }
 0x265   : > { %6289 = vmatmul.msk.bf16.gmra.mxu2 %vm715_vm2, %v2976_v44  ;;  %v2729_v44 = vld [vmem:[#allocation2 + $0x51] sm:$0xff] }
 0x266   : > { %6272 = vmatmul.msk.bf16.gmra.mxu1 %vm715_vm2, %v2754_v18  ;;  %v2506_v18 = vld [vmem:[#allocation2 + $0x48] sm:$0xff] }
 0x268   : > { %v2214_v51 = vpop.f32.mrf.mxu2 }
 0x269   : > { %v7489_v2 = vadd.f32 %v2214_v51, %v2042_v46  ;;  %v1772_v54 = vpop.f32.mrf.mxu0  ;;  %v2534_v51 = vpack.c.bf16 %v2507_v42, %v2506_v18 }
 0x26a   : > { %v1821_v41 = vadd.f32 %v1772_v54, %v7338_v26  ;;  %v2756_v54 = vpack.c.bf16 %v2729_v44, %v2728_v48 }
 0x26b   : > { %v1994_v55 = vpop.f32.mrf.mxu1 }
 0x26c   : > { %v2043_v56 = vadd.f32 %v1994_v55, %v1821_v41 }
 0x270   : > { %v2216_v1 = vpop.f32.mrf.mxu2 }
 0x271   : > { %v7492_v16 = vadd.f32 %v2216_v1, %v2043_v56  ;;  %v1775_v19 = vpop.f32.mrf.mxu0 }
 0x272   : > { %v1822_v60 = vadd.f32 %v1775_v19, %v7344_v37  ;;  %v2950_v37 = vld [vmem:[#allocation2 + $0x4a] sm:$0xff]  ;;  %v2509_v19 = vld [vmem:[#allocation2 + $0x60] sm:$0xff] }
 0x273   : > { %v1997_v53 = vpop.f32.mrf.mxu1  ;;  %v2978_v58 = vpack.c.bf16 %v2951_v50, %v2950_v37 }
 0x274   : > { %v2044_v31 = vadd.f32 %v1997_v53, %v1822_v60  ;;  %6256 = vmatmul.msk.bf16.gmra.mxu0 %vm715_vm2, %v2533_v3  ;;  %v2730_v53 = vld [vmem:[#allocation2 + $0x59] sm:$0xff]  ;;  %v2953_v60 = vld [vmem:[#allocation2 + $0x62] sm:$0xff] }
 0x275   : > { %6290 = vmatmul.msk.bf16.gmra.mxu2 %vm715_vm2, %v2977_v43  ;;  %v2731_v43 = vld [vmem:[#allocation2 + $0x61] sm:$0xff] }
 0x276   : > { %6273 = vmatmul.msk.bf16.gmra.mxu1 %vm715_vm2, %v2755_v14  ;;  %v2508_v14 = vld [vmem:[#allocation2 + $0x58] sm:$0xff] }
 0x278   : > { %v2219_v26 = vpop.f32.mrf.mxu2 }
 0x279   : > { %v7498_v20 = vadd.f32 %v2219_v26, %v2044_v31  ;;  %v1777_v21 = vpop.f32.mrf.mxu0  ;;  %v2535_v26 = vpack.c.bf16 %v2509_v19, %v2508_v14 }
 0x27a   : > { %v1823_v40 = vadd.f32 %v1777_v21, %v7346_v4  ;;  %v2757_v21 = vpack.c.bf16 %v2731_v43, %v2730_v53 }
 0x27b   : > { %v1999_v38 = vpop.f32.mrf.mxu1 }
 0x27c   : > { %v2045_v33 = vadd.f32 %v1999_v38, %v1823_v40 }
 0x280   : > { %v2221_v46 = vpop.f32.mrf.mxu2 }
 0x281   : > { %v7501_v55 = vadd.f32 %v2221_v46, %v2045_v33  ;;  %v1780_v41 = vpop.f32.mrf.mxu0 }
 0x282   : > { %v1824_v9 = vadd.f32 %v1780_v41, %v7352_v15  ;;  %v2952_v15 = vld [vmem:[#allocation2 + $0x5a] sm:$0xff]  ;;  %v2511_v41 = vld [vmem:[#allocation2 + $0x70] sm:$0xff] }
 0x283   : > { %v2002_v56 = vpop.f32.mrf.mxu1  ;;  %v2979_v18 = vpack.c.bf16 %v2953_v60, %v2952_v15 }
 0x284   : > { %v2046_v59 = vadd.f32 %v2002_v56, %v1824_v9  ;;  %6257 = vmatmul.msk.bf16.gmra.mxu0 %vm715_vm2, %v2534_v51  ;;  %v2732_v56 = vld [vmem:[#allocation2 + $0x69] sm:$0xff]  ;;  %v2955_v9 = vld [vmem:[#allocation2 + $0x72] sm:$0xff] }
 0x285   : > { %6291 = vmatmul.msk.bf16.gmra.mxu2 %vm715_vm2, %v2978_v58  ;;  %v2733_v58 = vld [vmem:[#allocation2 + $0x71] sm:$0xff] }
 0x286   : > { %6274 = vmatmul.msk.bf16.gmra.mxu1 %vm715_vm2, %v2756_v54  ;;  %v2510_v54 = vld [vmem:[#allocation2 + $0x68] sm:$0xff] }
 0x288   : > { %v2224_v4 = vpop.f32.mrf.mxu2 }
 0x289   : > { %v7507_v24 = vadd.f32 %v2224_v4, %v2046_v59  ;;  %v1782_v61 = vpop.f32.mrf.mxu0  ;;  %v2536_v4 = vpack.c.bf16 %v2511_v41, %v2510_v54 }
 0x28a   : > { %v1825_v1 = vadd.f32 %v1782_v61, %v7354_v52  ;;  %v2758_v61 = vpack.c.bf16 %v2733_v58, %v2732_v56 }
 0x28b   : > { %v2004_v10 = vpop.f32.mrf.mxu1 }
 0x28c   : > { %v2047_v3 = vadd.f32 %v2004_v10, %v1825_v1 }
 0x290   : > { %v2226_v31 = vpop.f32.mrf.mxu2 }
 0x291   : > { %v7510_v38 = vadd.f32 %v2226_v31, %v2047_v3  ;;  %v1785_v40 = vpop.f32.mrf.mxu0 }
 0x292   : > { %v1826_v42 = vadd.f32 %v1785_v40, %v7360_v0  ;;  %v2954_v0 = vld [vmem:[#allocation2 + $0x6a] sm:$0xff]  ;;  %v2513_v40 = vld [vmem:[#allocation2 + $0x80] sm:$0xff] }
 0x293   : > { %v2007_v33 = vpop.f32.mrf.mxu1  ;;  %v2980_v14 = vpack.c.bf16 %v2955_v9, %v2954_v0 }
 0x294   : > { %v2048_v48 = vadd.f32 %v2007_v33, %v1826_v42  ;;  %6258 = vmatmul.msk.bf16.gmra.mxu0 %vm715_vm2, %v2535_v26  ;;  %v2734_v33 = vld [vmem:[#allocation2 + $0x79] sm:$0xff]  ;;  %v2957_v42 = vld [vmem:[#allocation2 + $0x82] sm:$0xff] }
 0x295   : > { %6292 = vmatmul.msk.bf16.gmra.mxu2 %vm715_vm2, %v2979_v18  ;;  %v2735_v18 = vld [vmem:[#allocation2 + $0x81] sm:$0xff] }
 0x296   : > { %6275 = vmatmul.msk.bf16.gmra.mxu1 %vm715_vm2, %v2757_v21  ;;  %v2512_v21 = vld [vmem:[#allocation2 + $0x78] sm:$0xff] }
 0x298   : > { %v2229_v52 = vpop.f32.mrf.mxu2 }
 0x299   : > { %v7516_v44 = vadd.f32 %v2229_v52, %v2048_v48  ;;  %v1787_v37 = vpop.f32.mrf.mxu0  ;;  %v2537_v52 = vpack.c.bf16 %v2513_v40, %v2512_v21 }
 0x29a   : > { %v1827_v46 = vadd.f32 %v1787_v37, %v7362_v35  ;;  %v2759_v37 = vpack.c.bf16 %v2735_v18, %v2734_v33  ;;  %v7580_v33 = vld [vmem:[%s8651_s26] ss:$0 sm:$0xff] }
 0x29b   : > { %v2009_v50 = vpop.f32.mrf.mxu1 }
 0x29c   : > { %v2049_v51 = vadd.f32 %v2009_v50, %v1827_v46 }
 0x2a0   : > { %v2231_v59 = vpop.f32.mrf.mxu2 }
 0x2a1   : > { %v7519_v10 = vadd.f32 %v2231_v59, %v2049_v51  ;;  %v1790_v1 = vpop.f32.mrf.mxu0 }
 0x2a2   : > { %v1828_v19 = vadd.f32 %v1790_v1, %v7368_v47  ;;  %v2956_v47 = vld [vmem:[#allocation2 + $0x7a] sm:$0xff]  ;;  %v2736_v1 = vld [vmem:[#allocation2 + $0x89] sm:$0xff] }
 0x2a3   : > { %v2012_v3 = vpop.f32.mrf.mxu1  ;;  %v2981_v54 = vpack.c.bf16 %v2957_v42, %v2956_v47  ;;  %v7585_v42 = vld [vmem:[%s8652_s24] ss:$0 sm:$0xff] }
 0x2a4   : > { %v2050_v53 = vadd.f32 %v2012_v3, %v1828_v19  ;;  %6259 = vmatmul.msk.bf16.gmra.mxu0 %vm715_vm2, %v2536_v4  ;;  %v2514_v4 = vld [vmem:[#allocation2 + $0x88] sm:$0xff]  ;;  %v2737_v3 = vld [vmem:[#allocation2 + $0x91] sm:$0xff] }
 0x2a5   : > { %6293 = vmatmul.msk.bf16.gmra.mxu2 %vm715_vm2, %v2980_v14  ;;  %v2958_v14 = vld [vmem:[#allocation2 + $0x8a] sm:$0xff]  ;;  %v2959_v19 = vld [vmem:[#allocation2 + $0x92] sm:$0xff] }
 0x2a6   : > { %6276 = vmatmul.msk.bf16.gmra.mxu1 %vm715_vm2, %v2758_v61  ;;  %v2515_v61 = vld [vmem:[#allocation2 + $0x90] sm:$0xff] }
 0x2a8   : > { %v2234_v35 = vpop.f32.mrf.mxu2 }
 0x2a9   : > { %v7525_v43 = vadd.f32 %v2234_v35, %v2050_v53  ;;  %v1792_v15 = vpop.f32.mrf.mxu0  ;;  %v2538_v53 = vpack.c.bf16 %v2515_v61, %v2514_v4  ;;  %v2760_v35 = vpack.c.bf16 %v2737_v3, %v2736_v1 }
 0x2aa   : > { %v1829_v31 = vadd.f32 %v1792_v15, %v7370_v22 }
 0x2ab   : > { %v2014_v60 = vpop.f32.mrf.mxu1 }
 0x2ac   : > { %v2051_v26 = vadd.f32 %v2014_v60, %v1829_v31 }
 0x2b0   : > { %v2236_v48 = vpop.f32.mrf.mxu2 }
 0x2b1   : > { %v7530_v50 = vadd.f32 %v2236_v48, %v2051_v26  ;;  %v1795_v46 = vpop.f32.mrf.mxu0  ;;  %v2982_v26 = vpack.c.bf16 %v2959_v19, %v2958_v14 }
 0x2b2   : > { %v1830_v22 = vadd.f32 %v1795_v46, %v7376_v36  ;;  %v2516_v46 = vld [vmem:[#allocation2 + $0x98] sm:$0xff] }
 0x2b3   : > { %v2017_v51 = vpop.f32.mrf.mxu1 }
 0x2b4   : > { %v2052_v41 = vadd.f32 %v2017_v51, %v1830_v22  ;;  %6260 = vmatmul.msk.bf16.gmra.mxu0 %vm715_vm2, %v2537_v52  ;;  %v2738_v22 = vld [vmem:[#allocation2 + $0x99] sm:$0xff] }
 0x2b5   : > { %6294 = vmatmul.msk.bf16.gmra.mxu2 %vm715_vm2, %v2981_v54  ;;  %v2517_v54 = vld [vmem:[#allocation2 + $0xa0] sm:$0xff] }
 0x2b6   : > { %6277 = vmatmul.msk.bf16.gmra.mxu1 %vm715_vm2, %v2759_v37  ;;  %v2539_v61 = vpack.c.bf16 %v2517_v54, %v2516_v46  ;;  %v2740_v46 = vld [vmem:[#allocation2 + $0xa9] sm:$0xff] }
 0x2b7   : > { %v2962_v54 = vld [vmem:[#allocation2 + $0xaa] sm:$0xff] }
 0x2b8   : > { %v2239_v36 = vpop.f32.mrf.mxu2 }
 0x2b9   : > { %v7552_v56 = vadd.f32 %v2239_v36, %v2052_v41  ;;  %v1797_v58 = vpop.f32.mrf.mxu0  ;;  %v2739_v41 = vld [vmem:[#allocation2 + $0xa1] sm:$0xff]  ;;  %v7590_v36 = vpop.f32.mrf.mxu3 }
 0x2ba   : > { %v1831_v9 = vadd.f32 %v1797_v58, %v7381_v13  ;;  %v2960_v58 = vld [vmem:[#allocation2 + $0x9a] sm:$0xff]  ;;  %v2761_v1 = vpack.c.bf16 %v2739_v41, %v2738_v22  ;;  %v2963_v22 = vld [vmem:[#allocation2 + $0xb2] sm:$0xff] }
 0x2bb   : > { %v2019_v0 = vpop.f32.mrf.mxu1 }
 0x2bc   : > { %v2053_v59 = vadd.f32 %v2019_v0, %v1831_v9  ;;  %v2961_v0 = vld [vmem:[#allocation2 + $0xa2] sm:$0xff] }
 0x2bd   : > { %v2983_v19 = vpack.c.bf16 %v2961_v0, %v2960_v58 }
 0x2c0   : > { %v2241_v13 = vpop.f32.mrf.mxu2 }
 0x2c1   : > { %v7571_v15 = vadd.f32 %v2241_v13, %v2053_v59  ;;  %v2608_v60 = vpop.f32.mrf.mxu0 }
 0x2c2   : > { %v2688_v21 = vadd.f32 %v2608_v60, %v7389_v30 }
 0x2c3   : > { %v2830_v31 = vpop.f32.mrf.mxu1 }
 0x2c4   : > { %6261 = vmatmul.msk.bf16.gmra.mxu0 %vm715_vm2, %v2538_v53  ;;  %v2910_v40 = vadd.f32 %v2830_v31, %v2688_v21 }
 0x2c5   : > { %6295 = vmatmul.msk.bf16.gmra.mxu2 %vm715_vm2, %v2982_v26  ;;  %v7599_v26 = vpop.f32.mrf.mxu3 }
 0x2c6   : > { %6278 = vmatmul.msk.bf16.gmra.mxu1 %vm715_vm2, %v2760_v35 }
 0x2c8   : > { %v3052_v18 = vpop.f32.mrf.mxu2 }
 0x2c9   : > { %v3132_v47 = vadd.f32 %v3052_v18, %v2910_v40  ;;  %v2610_v30 = vpop.f32.mrf.mxu0 }
 0x2ca   : > { %v2689_v37 = vadd.f32 %v2610_v30, %v7392_v6 }
 0x2cb   : > { %v2832_v48 = vpop.f32.mrf.mxu1  ;;  %v3168_v52 = vmul.f32 %v7580_v33, %v3132_v47 }
 0x2cc   : > { %v2911_v59 = vadd.f32 %v2832_v48, %v2689_v37  ;;  %v2518_v48 = vld [vmem:[#allocation2 + $0xa8] sm:$0xff]  ;;  %v2519_v37 = vld [vmem:[#allocation2 + $0xb0] sm:$0xff] }
 0x2cd   : > { %v3204_v51 = vadd.f32 %v7585_v42, %v3168_v52 }
 0x2cf   : > { %v3236_v9 = vmax.f32 %v3204_v51, 0.0  ;;  %v2741_v51 = vld [vmem:[#allocation2 + $0xb1] sm:$0xff] }
 0x2d0   : > { %v3054_v4 = vpop.f32.mrf.mxu2 }
 0x2d1   : > { %3269 = vst.msk [vmem:[#allocation3] sm:$0xff] %vm3268_vm4, %v3236_v9  ;;  %v3133_v3 = vadd.f32 %v3054_v4, %v2911_v59  ;;  %v2613_v14 = vpop.f32.mrf.mxu0  ;;  %v2540_v4 = vpack.c.bf16 %v2519_v37, %v2518_v48 }
 0x2d2   : > { %v2690_v53 = vadd.f32 %v2613_v14, %v7399_v25 }
 0x2d3   : > { %v2835_v6 = vpop.f32.mrf.mxu1  ;;  %v3169_v13 = vmul.f32 %v7580_v33, %v3133_v3 }
 0x2d4   : > { %6262 = vmatmul.msk.bf16.gmra.mxu0 %vm715_vm2, %v2539_v61  ;;  %v2912_v31 = vadd.f32 %v2835_v6, %v2690_v53  ;;  %v2762_v61 = vpack.c.bf16 %v2741_v51, %v2740_v46  ;;  %v2984_v6 = vpack.c.bf16 %v2963_v22, %v2962_v54  ;;  %v2520_v22 = vld [vmem:[#allocation2 + $0xb8] sm:$0xff] }
 0x2d5   : > { %v3205_v35 = vadd.f32 %v7585_v42, %v3169_v13  ;;  %6296 = vmatmul.msk.bf16.gmra.mxu2 %vm715_vm2, %v2983_v19  ;;  %v7606_v19 = vpop.f32.mrf.mxu3 }
 0x2d6   : > { %6279 = vmatmul.msk.bf16.gmra.mxu1 %vm715_vm2, %v2761_v1 }
 0x2d7   : > { %v3237_v60 = vmax.f32 %v3205_v35, 0.0  ;;  %v6338_v35 = vld [vmem:[%s8650_s25 + $0x10] sm:$0xf] }
 0x2d8   : > { %v3057_v21 = vpop.f32.mrf.mxu2 }
 0x2d9   : > { %3270 = vst.msk [vmem:[#allocation3 + $0x8] sm:$0xff] %vm3268_vm4, %v3237_v60  ;;  %v3134_v40 = vadd.f32 %v3057_v21, %v2912_v31  ;;  %v2615_v18 = vpop.f32.mrf.mxu0  ;;  %v6320_v60 = vld [vmem:[%s8650_s25 + $0x8] sm:$0xf]  ;;  %v3904_v31 = vsel %vm3488_vm3, %v6338_v35, 0 }
 0x2da   : > { %v2691_v30 = vadd.f32 %v2615_v18, %v7402_v57  ;;  %v3668_v21 = vsel %vm3488_vm3, %v6320_v60, 0  ;;  %3913 = vmatpush.bf16.msrb.mxu2 %v3904_v31 }
 0x2db   : > { %v2837_v47 = vpop.f32.mrf.mxu1  ;;  %v3170_v25 = vmul.f32 %v7580_v33, %v3134_v40  ;;  %3677 = vmatpush.bf16.msrb.mxu0 %v3668_v21 }
 0x2dc   : > { %v2913_v58 = vadd.f32 %v2837_v47, %v2691_v30 }
 0x2dd   : > { %v3206_v52 = vadd.f32 %v7585_v42, %v3170_v25  ;;  %v7630_v54 = vpop.f32.mrf.mxu3 }
 0x2df   : > { %v3238_v41 = vmax.f32 %v3206_v52, 0.0 }
 0x2e0   : > { %v3301_v0 = vld [vmem:[#allocation3] ss:$2 sm:$0xff]  ;;  %v3333_v9 = vld [vmem:[#allocation3 + $0x1] ss:$2 sm:$0xff]  ;;  %v3059_v59 = vpop.f32.mrf.mxu2 }
 0x2e1   : > { %v3364_v1 = vmax.f32 %v3301_v0, %v3333_v9  ;;  %3271 = vst.msk [vmem:[#allocation3 + $0x10] sm:$0xff] %vm3268_vm4, %v3238_v41  ;;  %v3135_v3 = vadd.f32 %v3059_v59, %v2913_v58  ;;  %v2618_v57 = vpop.f32.mrf.mxu0  ;;  %v2521_v58 = vld [vmem:[#allocation2 + $0xc0] sm:$0xff] }
 0x2e2   : > { %v2692_v53 = vadd.f32 %v2618_v57, %v7409_v12  ;;  %v6329_v12 = vld [vmem:[%s8650_s25 + $0xc] sm:$0xf]  ;;  %v2742_v0 = vld [vmem:[#allocation2 + $0xb9] sm:$0xff]  ;;  %v2743_v9 = vld [vmem:[#allocation2 + $0xc1] sm:$0xff] }
 0x2e3   : > { %v2840_v14 = vpop.f32.mrf.mxu1  ;;  %3397 = vst.msk [vmem:[#allocation4 + $0x4] sm:$0xff] %vm3268_vm4, %v3364_v1  ;;  %v3171_v13 = vmul.f32 %v7580_v33, %v3135_v3  ;;  %v3786_v18 = vsel %vm3488_vm3, %v6329_v12, 0  ;;  %v2964_v59 = vld [vmem:[#allocation2 + $0xba] sm:$0xff] }
 0x2e4   : > { %6263 = vmatmul.msk.bf16.gmra.mxu0 %vm715_vm2, %v2540_v4  ;;  %3795 = vmatpush.bf16.msrb.mxu1 %v3786_v18  ;;  %v2914_v25 = vadd.f32 %v2840_v14, %v2692_v53  ;;  %v2965_v4 = vld [vmem:[#allocation2 + $0xc2] sm:$0xff] }
 0x2e5   : > { %v3207_v40 = vadd.f32 %v7585_v42, %v3171_v13  ;;  %6297 = vmatmul.msk.bf16.gmra.mxu2 %vm715_vm2, %v2984_v6  ;;  %v2541_v6 = vpack.c.bf16 %v2521_v58, %v2520_v22  ;;  %v2763_v13 = vpack.c.bf16 %v2743_v9, %v2742_v0  ;;  %v2985_v31 = vpack.c.bf16 %v2965_v4, %v2964_v59  ;;  %v7641_v18 = vpop.f32.mrf.mxu3  ;;  %v2522_v58 = vld [vmem:[#allocation2 + $0xc8] sm:$0xff]  ;;  %v2523_v9 = vld [vmem:[#allocation2 + $0xd0] sm:$0xff] }
 0x2e6   : > { %6280 = vmatmul.msk.bf16.gmra.mxu1 %vm715_vm2, %v2762_v61  ;;  %v2744_v59 = vld [vmem:[#allocation2 + $0xc9] sm:$0xff]  ;;  %v2745_v4 = vld [vmem:[#allocation2 + $0xd1] sm:$0xff] }
 0x2e7   : > { %v3239_v47 = vmax.f32 %v3207_v40, 0.0 }
 0x2e8   : > { %v3062_v30 = vpop.f32.mrf.mxu2 }
 0x2e9   : > { %3272 = vst.msk [vmem:[#allocation3 + $0x18] sm:$0xff] %vm3268_vm4, %v3239_v47  ;;  %v3136_v48 = vadd.f32 %v3062_v30, %v2914_v25  ;;  %v2620_v52 = vpop.f32.mrf.mxu0 }
 0x2ea   : > { %v2693_v51 = vadd.f32 %v2620_v52, %v7412_v49 }
 0x2eb   : > { %v2842_v37 = vpop.f32.mrf.mxu1  ;;  %v3172_v46 = vmul.f32 %v7580_v33, %v3136_v48 }
 0x2ec   : > { %v2915_v1 = vadd.f32 %v2842_v37, %v2693_v51 }
 0x2ed   : > { %v3208_v41 = vadd.f32 %v7585_v42, %v3172_v46  ;;  %v3438_v46 = vld [vmem:[#allocation4 + $0x1] sm:$0xff] }
 0x2ef   : > { %v3240_v61 = vmax.f32 %v3208_v41, 0.0 }
 0x2f0   : > { %v3303_v3 = vld [vmem:[#allocation3 + $0x10] ss:$2 sm:$0xff]  ;;  %v3335_v57 = vld [vmem:[#allocation3 + $0x11] ss:$2 sm:$0xff]  ;;  %v3064_v14 = vpop.f32.mrf.mxu2 }
 0x2f1   : > { %v3365_v53 = vmax.f32 %v3303_v3, %v3335_v57  ;;  %3273 = vst.msk [vmem:[#allocation3 + $0x20] sm:$0xff] %vm3268_vm4, %v3240_v61  ;;  %v3137_v49 = vadd.f32 %v3064_v14, %v2915_v1  ;;  %v2623_v35 = vpop.f32.mrf.mxu0  ;;  %v2966_v61 = vld [vmem:[#allocation2 + $0xca] sm:$0xff]  ;;  %v2967_v1 = vld [vmem:[#allocation2 + $0xd2] sm:$0xff]  ;;  %v7648_v14 = vpop.f32.mrf.mxu3 }
 0x2f2   : > { %v2694_v12 = vadd.f32 %v2623_v35, %v7419_v5  ;;  %v2474_v35 = vadd.f32 %v7590_v36, %v7428_v45 }
 0x2f3   : > { %v2845_v60 = vpop.f32.mrf.mxu1  ;;  %3398 = vst.msk [vmem:[#allocation4 + $0xc] sm:$0xff] %vm3268_vm4, %v3365_v53  ;;  %v3173_v21 = vmul.f32 %v7580_v33, %v3137_v49  ;;  %v2542_v49 = vpack.c.bf16 %v2523_v9, %v2522_v58  ;;  %v2524_v58 = vld [vmem:[#allocation2 + $0xd8] sm:$0xff]  ;;  %v2525_v9 = vld [vmem:[#allocation2 + $0xe0] sm:$0xff] }
 0x2f4   : > { %6264 = vmatmul.msk.bf16.gmra.mxu0 %vm715_vm2, %v2541_v6  ;;  %v2916_v25 = vadd.f32 %v2845_v60, %v2694_v12 }
 0x2f5   : > { %v3209_v40 = vadd.f32 %v7585_v42, %v3173_v21  ;;  %6298 = vmatmul.msk.bf16.gmra.mxu2 %vm715_vm2, %v2985_v31 }
 0x2f6   : > { %6281 = vmatmul.msk.bf16.gmra.mxu1 %vm715_vm2, %v2763_v13 }
 0x2f7   : > { %v3241_v47 = vmax.f32 %v3209_v40, 0.0  ;;  %v2986_v40 = vpack.c.bf16 %v2967_v1, %v2966_v61 }
 0x2f8   : > { %v3067_v30 = vpop.f32.mrf.mxu2 }
 0x2f9   : > { %3274 = vst.msk [vmem:[#allocation3 + $0x28] sm:$0xff] %vm3268_vm4, %v3241_v47  ;;  %v3138_v48 = vadd.f32 %v3067_v30, %v2916_v25  ;;  %v2625_v52 = vpop.f32.mrf.mxu0 }
 0x2fa   : > { %v3439_v5 = vld [vmem:[#allocation4 + $0x9] sm:$0xff]  ;;  %v2695_v22 = vadd.f32 %v2625_v52, %v7422_v39  ;;  %v2764_v39 = vpack.c.bf16 %v2745_v4, %v2744_v59  ;;  %v2475_v52 = vadd.f32 %v7599_v26, %v7431_v27  ;;  %v2747_v4 = vld [vmem:[#allocation2 + $0xe1] sm:$0xff] }
 0x2fb   : > { %v2847_v37 = vpop.f32.mrf.mxu1  ;;  %v3174_v51 = vmul.f32 %v7580_v33, %v3138_v48  ;;  %v3454_v41 = vpack.c.bf16 %v3439_v5, %v3438_v46  ;;  %v2746_v59 = vld [vmem:[#allocation2 + $0xd9] sm:$0xff]  ;;  %v2969_v26 = vld [vmem:[#allocation2 + $0xe2] sm:$0xff] }
 0x2fc   : > { %v2917_v57 = vadd.f32 %v2847_v37, %v2695_v22  ;;  %v2968_v27 = vld [vmem:[#allocation2 + $0xda] sm:$0xff] }
 0x2fd   : > { %v3210_v0 = vadd.f32 %v7585_v42, %v3174_v51  ;;  %6304 = vmatmul.msk.bf16.vlgmr.msra.gmra.mxu3 %vm3268_vm4, %v3454_v41  ;;  %v7662_v51 = vpop.f32.mrf.mxu3 }
 0x2ff   : > { %v3242_v3 = vmax.f32 %v3210_v0, 0.0 }
 0x300   : > { %v3305_v6 = vld [vmem:[#allocation3 + $0x20] ss:$2 sm:$0xff]  ;;  %v3337_v13 = vld [vmem:[#allocation3 + $0x21] ss:$2 sm:$0xff]  ;;  %v3069_v53 = vpop.f32.mrf.mxu2 }
 0x301   : > { %v3366_v60 = vmax.f32 %v3305_v6, %v3337_v13  ;;  %3275 = vst.msk [vmem:[#allocation3 + $0x30] sm:$0xff] %vm3268_vm4, %v3242_v3  ;;  %v3139_v31 = vadd.f32 %v3069_v53, %v2917_v57  ;;  %v2628_v21 = vpop.f32.mrf.mxu0  ;;  %v2543_v13 = vpack.c.bf16 %v2525_v9, %v2524_v58  ;;  %v2765_v53 = vpack.c.bf16 %v2747_v4, %v2746_v59  ;;  %v2526_v58 = vld [vmem:[#allocation2 + $0xe8] sm:$0xff]  ;;  %v2527_v9 = vld [vmem:[#allocation2 + $0xf0] sm:$0xff] }
 0x302   : > { %v2696_v25 = vadd.f32 %v2628_v21, %v2474_v35  ;;  %v2987_v21 = vpack.c.bf16 %v2969_v26, %v2968_v27  ;;  %v2748_v59 = vld [vmem:[#allocation2 + $0xe9] sm:$0xff]  ;;  %v2749_v4 = vld [vmem:[#allocation2 + $0xf1] sm:$0xff] }
 0x303   : > { %v2850_v12 = vpop.f32.mrf.mxu1  ;;  %3399 = vst.msk [vmem:[#allocation4 + $0x14] sm:$0xff] %vm3268_vm4, %v3366_v60  ;;  %v3175_v47 = vmul.f32 %v7580_v33, %v3139_v31  ;;  %v2971_v27 = vld [vmem:[#allocation2 + $0xf2] sm:$0xff] }
 0x304   : > { %6265 = vmatmul.msk.bf16.gmra.mxu0 %vm715_vm2, %v2542_v49  ;;  %v2918_v36 = vadd.f32 %v2850_v12, %v2696_v25  ;;  %v2476_v49 = vadd.f32 %v7606_v19, %v7438_v32 }
 0x305   : > { %v3211_v30 = vadd.f32 %v7585_v42, %v3175_v47  ;;  %6299 = vmatmul.msk.bf16.gmra.mxu2 %vm715_vm2, %v2986_v40  ;;  %v7672_v47 = vpop.f32.mrf.mxu3 }
 0x306   : > { %6282 = vmatmul.msk.bf16.gmra.mxu1 %vm715_vm2, %v2764_v39 }
 0x307   : > { %v3243_v45 = vmax.f32 %v3211_v30, 0.0 }
 0x308   : > { %v3072_v48 = vpop.f32.mrf.mxu2 }
 0x309   : > { %3276 = vst.msk [vmem:[#allocation3 + $0x38] sm:$0xff] %vm3268_vm4, %v3243_v45  ;;  %v3140_v37 = vadd.f32 %v3072_v48, %v2918_v36  ;;  %v2630_v46 = vpop.f32.mrf.mxu0  ;;  %v2477_v45 = vadd.f32 %v7630_v54, %v7441_v17  ;;  %v2970_v54 = vld [vmem:[#allocation2 + $0xea] sm:$0xff] }
 0x30a   : > { %v2697_v41 = vadd.f32 %v2630_v46, %v2475_v52 }
 0x30b   : > { %v2852_v5 = vpop.f32.mrf.mxu1  ;;  %v3176_v22 = vmul.f32 %v7580_v33, %v3140_v37  ;;  %v3440_v37 = vld [vmem:[#allocation4 + $0x11] sm:$0xff] }
 0x30c   : > { %v2919_v1 = vadd.f32 %v2852_v5, %v2697_v41 }
 0x30d   : > { %v3212_v0 = vadd.f32 %v7585_v42, %v3176_v22  ;;  %v7684_v17 = vpop.f32.mrf.mxu3 }
 0x30f   : > { %v3244_v61 = vmax.f32 %v3212_v0, 0.0 }
 0x310   : > { %v3307_v3 = vld [vmem:[#allocation3 + $0x30] ss:$2 sm:$0xff]  ;;  %v3339_v57 = vld [vmem:[#allocation3 + $0x31] ss:$2 sm:$0xff]  ;;  %v3074_v6 = vpop.f32.mrf.mxu2 }
 0x311   : > { %v3367_v39 = vmax.f32 %v3307_v3, %v3339_v57  ;;  %3277 = vst.msk [vmem:[#allocation3 + $0x40] sm:$0xff] %vm3268_vm4, %v3244_v61  ;;  %v3141_v35 = vadd.f32 %v3074_v6, %v2919_v1  ;;  %v2633_v60 = vpop.f32.mrf.mxu0  ;;  %v2544_v6 = vpack.c.bf16 %v2527_v9, %v2526_v58  ;;  %v2972_v58 = vld [vmem:[#allocation2 + $0xfa] sm:$0xff] }
 0x312   : > { %v2698_v40 = vadd.f32 %v2633_v60, %v2476_v49 }
 0x313   : > { %v2855_v31 = vpop.f32.mrf.mxu1  ;;  %3400 = vst.msk [vmem:[#allocation4 + $0x1c] sm:$0xff] %vm3268_vm4, %v3367_v39  ;;  %v3177_v12 = vmul.f32 %v7580_v33, %v3141_v35 }
 0x314   : > { %6266 = vmatmul.msk.bf16.gmra.mxu0 %vm715_vm2, %v2543_v13  ;;  %v2920_v25 = vadd.f32 %v2855_v31, %v2698_v40  ;;  %v2766_v13 = vpack.c.bf16 %v2749_v4, %v2748_v59  ;;  %v2988_v31 = vpack.c.bf16 %v2971_v27, %v2970_v54 }
 0x315   : > { %v3213_v32 = vadd.f32 %v7585_v42, %v3177_v12  ;;  %6300 = vmatmul.msk.bf16.gmra.mxu2 %vm715_vm2, %v2987_v21 }
 0x316   : > { %6283 = vmatmul.msk.bf16.gmra.mxu1 %vm715_vm2, %v2765_v53  ;;  %v2478_v53 = vadd.f32 %v7641_v18, %v7448_v7 }
 0x317   : > { %v3245_v19 = vmax.f32 %v3213_v32, 0.0  ;;  %v7695_v32 = vpop.f32.mrf.mxu3 }
 0x318   : > { %v3077_v30 = vpop.f32.mrf.mxu2 }
 0x319   : > { %3278 = vst.msk [vmem:[#allocation3 + $0x48] sm:$0xff] %vm3268_vm4, %v3245_v19  ;;  %v3142_v36 = vadd.f32 %v3077_v30, %v2920_v25  ;;  %v2635_v48 = vpop.f32.mrf.mxu0  ;;  %v2479_v25 = vadd.f32 %v7648_v14, %v7451_v62 }
 0x31a   : > { %v3441_v46 = vld [vmem:[#allocation4 + $0x19] sm:$0xff]  ;;  %v2699_v22 = vadd.f32 %v2635_v48, %v2477_v45 }
 0x31b   : > { %v2857_v52 = vpop.f32.mrf.mxu1  ;;  %v3178_v5 = vmul.f32 %v7580_v33, %v3142_v36  ;;  %v3455_v41 = vpack.c.bf16 %v3441_v46, %v3440_v37  ;;  %v2528_v37 = vld [vmem:[#allocation2 + $0xf8] sm:$0xff] }
 0x31c   : > { %v2921_v61 = vadd.f32 %v2857_v52, %v2699_v22  ;;  %v2750_v22 = vld [vmem:[#allocation2 + $0xf9] sm:$0xff] }
 0x31d   : > { %v3214_v0 = vadd.f32 %v7585_v42, %v3178_v5  ;;  %6305 = vmatmul.msk.bf16.gmra.mxu3 %vm3268_vm4, %v3455_v41  ;;  %v2529_v5 = vld [vmem:[#allocation2 + $0x100] sm:$0xff] }
 0x31e   : > { %v2751_v41 = vld [vmem:[#allocation2 + $0x101] sm:$0xff]  ;;  %v2545_v54 = vpack.c.bf16 %v2529_v5, %v2528_v37 }
 0x31f   : > { %v3246_v26 = vmax.f32 %v3214_v0, 0.0  ;;  %v2973_v0 = vld [vmem:[#allocation2 + $0x102] sm:$0xff]  ;;  %v2767_v27 = vpack.c.bf16 %v2751_v41, %v2750_v22  ;;  %v2482_v22 = vadd.f32 %v7684_v17, %v7467_v28 }
 0x320   : > { %v3309_v1 = vld [vmem:[#allocation3 + $0x40] ss:$2 sm:$0xff]  ;;  %v3341_v3 = vld [vmem:[#allocation3 + $0x41] ss:$2 sm:$0xff]  ;;  %v3079_v57 = vpop.f32.mrf.mxu2 }
 0x321   : > { %v3368_v49 = vmax.f32 %v3309_v1, %v3341_v3  ;;  %3279 = vst.msk [vmem:[#allocation3 + $0x50] sm:$0xff] %vm3268_vm4, %v3246_v26  ;;  %v3143_v39 = vadd.f32 %v3079_v57, %v2921_v61  ;;  %v2638_v35 = vpop.f32.mrf.mxu0  ;;  %v2480_v26 = vadd.f32 %v7662_v51, %v7458_v29  ;;  %v3854_v5 = vld [vmem:[#allocation4 + $0xc] sm:$0xff] }
 0x322   : > { %v2700_v12 = vadd.f32 %v2638_v35, %v2478_v53 }
 0x323   : > { %v2860_v60 = vpop.f32.mrf.mxu1  ;;  %3401 = vst.msk [vmem:[#allocation4 + $0x24] sm:$0xff] %vm3268_vm4, %v3368_v49  ;;  %v3179_v21 = vmul.f32 %v7580_v33, %v3143_v39 }
 0x324   : > { %6267 = vmatmul.msk.bf16.gmra.mxu0 %vm715_vm2, %v2544_v6  ;;  %v2922_v18 = vadd.f32 %v2860_v60, %v2700_v12  ;;  %v2989_v6 = vpack.c.bf16 %v2973_v0, %v2972_v58  ;;  %v2481_v60 = vadd.f32 %v7672_v47, %v7461_v23  ;;  %v3618_v23 = vld [vmem:[#allocation4 + $0xa] sm:$0xff] }
 0x325   : > { %v3215_v40 = vadd.f32 %v7585_v42, %v3179_v21  ;;  %6301 = vmatmul.msk.bf16.gmra.mxu2 %vm715_vm2, %v2988_v31  ;;  %v3736_v47 = vld [vmem:[#allocation4 + $0xb] sm:$0xff] }
 0x326   : > { %6284 = vmatmul.msk.bf16.gmra.mxu1 %vm715_vm2, %v2766_v13  ;;  %v7705_v13 = vpop.f32.mrf.mxu3 }
 0x327   : > { %v3247_v7 = vmax.f32 %v3215_v40, 0.0 }
 0x328   : > { %v3082_v19 = vpop.f32.mrf.mxu2 }
 0x329   : > { %3280 = vst.msk [vmem:[#allocation3 + $0x58] sm:$0xff] %vm3268_vm4, %v3247_v7  ;;  %v3144_v30 = vadd.f32 %v3082_v19, %v2922_v18  ;;  %v2640_v45 = vpop.f32.mrf.mxu0 }
 0x32a   : > { %v2701_v52 = vadd.f32 %v2640_v45, %v2479_v25  ;;  %v3442_v40 = vld [vmem:[#allocation4 + $0x21] sm:$0xff] }
 0x32b   : > { %v2862_v36 = vpop.f32.mrf.mxu1  ;;  %v3180_v48 = vmul.f32 %v7580_v33, %v3144_v30 }
 0x32c   : > { %v2923_v59 = vadd.f32 %v2862_v36, %v2701_v52 }
 0x32d   : > { %v3216_v46 = vadd.f32 %v7585_v42, %v3180_v48 }
 0x32e   : > { %v7717_v30 = vpop.f32.mrf.mxu3 }
 0x32f   : > { %v3248_v9 = vmax.f32 %v3216_v46, 0.0 }
 0x330   : > { %v3311_v4 = vld [vmem:[#allocation3 + $0x50] ss:$2 sm:$0xff]  ;;  %v3343_v62 = vld [vmem:[#allocation3 + $0x51] ss:$2 sm:$0xff]  ;;  %v3084_v14 = vpop.f32.mrf.mxu2 }
 0x331   : > { %v3369_v61 = vmax.f32 %v3311_v4, %v3343_v62  ;;  %3281 = vst.msk [vmem:[#allocation3 + $0x60] sm:$0xff] %vm3268_vm4, %v3248_v9  ;;  %v3145_v1 = vadd.f32 %v3084_v14, %v2923_v59  ;;  %v2643_v3 = vpop.f32.mrf.mxu0  ;;  %v3617_v59 = vld [vmem:[#allocation4 + $0x2] sm:$0xff] }
 0x332   : > { %v2702_v49 = vadd.f32 %v2643_v3, %v2480_v26  ;;  %v3735_v4 = vld [vmem:[#allocation4 + $0x3] sm:$0xff]  ;;  %v3633_v62 = vpack.c.bf16 %v3618_v23, %v3617_v59  ;;  %v3619_v23 = vld [vmem:[#allocation4 + $0x12] sm:$0xff] }
 0x333   : > { %v2865_v57 = vpop.f32.mrf.mxu1  ;;  %3402 = vst.msk [vmem:[#allocation4 + $0x2c] sm:$0xff] %vm3268_vm4, %v3369_v61  ;;  %v3181_v53 = vmul.f32 %v7580_v33, %v3145_v1  ;;  %v3751_v14 = vpack.c.bf16 %v3736_v47, %v3735_v4  ;;  %v3737_v47 = vld [vmem:[#allocation4 + $0x13] sm:$0xff]  ;;  %v2485_v4 = vadd.f32 %v7717_v30, %v7483_v34 }
 0x334   : > { %6268 = vmatmul.msk.bf16.gmra.mxu0 %vm715_vm2, %v2545_v54  ;;  %v2924_v39 = vadd.f32 %v2865_v57, %v2702_v49  ;;  %v3853_v54 = vld [vmem:[#allocation4 + $0x4] sm:$0xff] }
 0x335   : > { %v3217_v29 = vadd.f32 %v7585_v42, %v3181_v53  ;;  %6302 = vmatmul.msk.bf16.gmra.mxu2 %vm715_vm2, %v2989_v6  ;;  %v3869_v61 = vpack.c.bf16 %v3854_v5, %v3853_v54  ;;  %v2483_v6 = vadd.f32 %v7695_v32, %v7474_v63  ;;  %v3856_v63 = vld [vmem:[#allocation4 + $0x1c] sm:$0xff]  ;;  %v2484_v32 = vadd.f32 %v7705_v13, %v7480_v8  ;;  %v3437_v8 = vld [vmem:[%s8650_s25] sm:$0xf] }
 0x336   : > { %6285 = vmatmul.msk.bf16.gmra.mxu1 %vm715_vm2, %v2767_v27  ;;  %v7730_v17 = vpop.f32.mrf.mxu3  ;;  %v3566_v13 = vsel %vm3488_vm3, %v3437_v8, 0 }
 0x337   : > { %v3249_v51 = vmax.f32 %v3217_v29, 0.0  ;;  %3575 = vmatpush.bf16.msrb.mxu3 %v3566_v13 }
 0x338   : > { %v3087_v35 = vpop.f32.mrf.mxu2 }
 0x339   : > { %3282 = vst.msk [vmem:[#allocation3 + $0x68] sm:$0xff] %vm3268_vm4, %v3249_v51  ;;  %v3146_v31 = vadd.f32 %v3087_v35, %v2924_v39  ;;  %v2645_v21 = vpop.f32.mrf.mxu0 }
 0x33a   : > { %v3443_v7 = vld [vmem:[#allocation4 + $0x29] sm:$0xff]  ;;  %v2703_v19 = vadd.f32 %v2645_v21, %v2481_v60  ;;  %v3620_v21 = vld [vmem:[#allocation4 + $0x1a] sm:$0xff] }
 0x33b   : > { %v2867_v12 = vpop.f32.mrf.mxu1  ;;  %v3182_v18 = vmul.f32 %v7580_v33, %v3146_v31  ;;  %v3456_v25 = vpack.c.bf16 %v3443_v7, %v3442_v40  ;;  %v3740_v34 = vld [vmem:[#allocation4 + $0x2b] sm:$0xff] }
 0x33c   : > { %v2925_v48 = vadd.f32 %v2867_v12, %v2703_v19  ;;  %v3738_v12 = vld [vmem:[#allocation4 + $0x1b] sm:$0xff] }
 0x33d   : > { %v3218_v45 = vadd.f32 %v7585_v42, %v3182_v18  ;;  %6306 = vmatmul.msk.bf16.gmra.mxu3 %vm3268_vm4, %v3456_v25 }
 0x33e   : > { %v7737_v40 = vpop.f32.mrf.mxu3 }
 0x33f   : > { %v3250_v36 = vmax.f32 %v3218_v45, 0.0 }
 0x340   : > { %v3313_v52 = vld [vmem:[#allocation3 + $0x60] ss:$2 sm:$0xff]  ;;  %v3345_v37 = vld [vmem:[#allocation3 + $0x61] ss:$2 sm:$0xff]  ;;  %v3089_v46 = vpop.f32.mrf.mxu2 }
 0x341   : > { %v3370_v41 = vmax.f32 %v3313_v52, %v3345_v37  ;;  %3283 = vst.msk [vmem:[#allocation3 + $0x70] sm:$0xff] %vm3268_vm4, %v3250_v36  ;;  %v3147_v58 = vadd.f32 %v3089_v46, %v2925_v48  ;;  %v2648_v0 = vpop.f32.mrf.mxu0  ;;  %v3634_v52 = vpack.c.bf16 %v3620_v21, %v3619_v23  ;;  %v3752_v37 = vpack.c.bf16 %v3738_v12, %v3737_v47  ;;  %v3855_v46 = vld [vmem:[#allocation4 + $0x14] sm:$0xff] }
 0x342   : > { %v2704_v26 = vadd.f32 %v2648_v0, %v2482_v22 }
 0x343   : > { %v2870_v9 = vpop.f32.mrf.mxu1  ;;  %3403 = vst.msk [vmem:[#allocation4 + $0x34] sm:$0xff] %vm3268_vm4, %v3370_v41  ;;  %v3183_v27 = vmul.f32 %v7580_v33, %v3147_v58  ;;  %v3870_v41 = vpack.c.bf16 %v3856_v63, %v3855_v46 }
 0x344   : > { %6321 = vmatmul.msk.bf16.vlgmr.msrb.gmra.mxu0 %vm3268_vm4, %v3633_v62  ;;  %v2926_v3 = vadd.f32 %v2870_v9, %v2704_v26 }
 0x345   : > { %v3219_v28 = vadd.f32 %v7585_v42, %v3183_v27  ;;  %6339 = vmatmul.msk.bf16.vlgmr.msrb.gmra.mxu2 %vm3268_vm4, %v3869_v61 }
 0x346   : > { %6330 = vmatmul.msk.bf16.vlgmr.msrb.gmra.mxu1 %vm3268_vm4, %v3751_v14  ;;  %v2441_v27 = vpop.f32.mrf.mxu3 }
 0x347   : > { %v3251_v1 = vmax.f32 %v3219_v28, 0.0 }
 0x348   : > { %v3092_v57 = vpop.f32.mrf.mxu2 }
 0x349   : > { %3284 = vst.msk [vmem:[#allocation3 + $0x78] sm:$0xff] %vm3268_vm4, %v3251_v1  ;;  %v3148_v53 = vadd.f32 %v3092_v57, %v2926_v3  ;;  %v2650_v49 = vpop.f32.mrf.mxu0 }
 0x34a   : > { %v2705_v39 = vadd.f32 %v2650_v49, %v2483_v6  ;;  %v3444_v26 = vld [vmem:[#allocation4 + $0x31] sm:$0xff] }
 0x34b   : > { %v2872_v29 = vpop.f32.mrf.mxu1  ;;  %v3184_v51 = vmul.f32 %v7580_v33, %v3148_v53  ;;  %v3622_v49 = vld [vmem:[#allocation4 + $0x2a] sm:$0xff] }
 0x34c   : > { %v2927_v31 = vadd.f32 %v2872_v29, %v2705_v39  ;;  %v3858_v39 = vld [vmem:[#allocation4 + $0x2c] sm:$0xff] }
 0x34d   : > { %v3220_v35 = vadd.f32 %v7585_v42, %v3184_v51 }
 0x34f   : > { %v3252_v60 = vmax.f32 %v3220_v35, 0.0  ;;  %v2486_v35 = vadd.f32 %v7730_v17, %v7489_v2 }
 0x350   : > { %v3315_v7 = vld [vmem:[#allocation3 + $0x70] ss:$2 sm:$0xff]  ;;  %v3347_v18 = vld [vmem:[#allocation3 + $0x71] ss:$2 sm:$0xff]  ;;  %v3094_v19 = vpop.f32.mrf.mxu2 }
 0x351   : > { %v3371_v25 = vmax.f32 %v3315_v7, %v3347_v18  ;;  %3285 = vst.msk [vmem:[#allocation3 + $0x80] sm:$0xff] %vm3268_vm4, %v3252_v60  ;;  %v3149_v45 = vadd.f32 %v3094_v19, %v2927_v31  ;;  %v2653_v36 = vpop.f32.mrf.mxu0  ;;  %v3621_v7 = vld [vmem:[#allocation4 + $0x22] sm:$0xff] }
 0x352   : > { %v2706_v22 = vadd.f32 %v2653_v36, %v2484_v32  ;;  %v3739_v18 = vld [vmem:[#allocation4 + $0x23] sm:$0xff]  ;;  %v3635_v19 = vpack.c.bf16 %v3622_v49, %v3621_v7 }
 0x353   : > { %v2875_v48 = vpop.f32.mrf.mxu1  ;;  %3404 = vst.msk [vmem:[#allocation4 + $0x3c] sm:$0xff] %vm3268_vm4, %v3371_v25  ;;  %v3185_v5 = vmul.f32 %v7580_v33, %v3149_v45  ;;  %v3753_v63 = vpack.c.bf16 %v3740_v34, %v3739_v18  ;;  %v3857_v32 = vld [vmem:[#allocation4 + $0x24] sm:$0xff] }
 0x354   : > { %6322 = vmatmul.msk.bf16.gmra.mxu0 %vm3268_vm4, %v3634_v52  ;;  %v2928_v9 = vadd.f32 %v2875_v48, %v2706_v22  ;;  %v3871_v36 = vpack.c.bf16 %v3858_v39, %v3857_v32  ;;  %v2443_v48 = vpop.f32.mrf.mxu3  ;;  %v2487_v52 = vadd.f32 %v7737_v40, %v7492_v16  ;;  %v2488_v16 = vadd.f32 %v2441_v27, %v7498_v20 }
 0x355   : > { %v3221_v58 = vadd.f32 %v7585_v42, %v3185_v5  ;;  %6340 = vmatmul.msk.bf16.gmra.mxu2 %vm3268_vm4, %v3870_v41 }
 0x356   : > { %6331 = vmatmul.msk.bf16.gmra.mxu1 %vm3268_vm4, %v3752_v37 }
 0x357   : > { %v3253_v0 = vmax.f32 %v3221_v58, 0.0 }
 0x358   : > { %v3097_v59 = vpop.f32.mrf.mxu2 }
 0x359   : > { %3286 = vst.msk [vmem:[#allocation3 + $0x88] sm:$0xff] %vm3268_vm4, %v3253_v0  ;;  %v3150_v62 = vadd.f32 %v3097_v59, %v2928_v9  ;;  %v2655_v14 = vpop.f32.mrf.mxu0 }
 0x35a   : > { %v3445_v61 = vld [vmem:[#allocation4 + $0x39] sm:$0xff]  ;;  %v2707_v1 = vadd.f32 %v2655_v14, %v2485_v4 }
 0x35b   : > { %v2877_v54 = vpop.f32.mrf.mxu1  ;;  %v3186_v28 = vmul.f32 %v7580_v33, %v3150_v62  ;;  %v3457_v3 = vpack.c.bf16 %v3445_v61, %v3444_v26  ;;  %v3624_v9 = vld [vmem:[#allocation4 + $0x3a] sm:$0xff] }
 0x35c   : > { %v2929_v53 = vadd.f32 %v2877_v54, %v2707_v1  ;;  %v2446_v13 = vpop.f32.mrf.mxu3  ;;  %v3742_v59 = vld [vmem:[#allocation4 + $0x3b] sm:$0xff]  ;;  %v3623_v1 = vld [vmem:[#allocation4 + $0x32] sm:$0xff] }
 0x35d   : > { %v3222_v57 = vadd.f32 %v7585_v42, %v3186_v28  ;;  %6307 = vmatmul.msk.bf16.gmra.mxu3 %vm3268_vm4, %v3457_v3  ;;  %v3860_v54 = vld [vmem:[#allocation4 + $0x3c] sm:$0xff]  ;;  %v3741_v3 = vld [vmem:[#allocation4 + $0x33] sm:$0xff] }
 0x35f   : > { %v3254_v6 = vmax.f32 %v3222_v57, 0.0  ;;  %v3636_v57 = vpack.c.bf16 %v3624_v9, %v3623_v1 }
 0x360   : > { %v3317_v30 = vld [vmem:[#allocation3 + $0x80] ss:$2 sm:$0xff]  ;;  %v3349_v29 = vld [vmem:[#allocation3 + $0x81] ss:$2 sm:$0xff]  ;;  %v3099_v51 = vpop.f32.mrf.mxu2 }
 0x361   : > { %v3372_v60 = vmax.f32 %v3317_v30, %v3349_v29  ;;  %3287 = vst.msk [vmem:[#allocation3 + $0x90] sm:$0xff] %vm3268_vm4, %v3254_v6  ;;  %v3151_v31 = vadd.f32 %v3099_v51, %v2929_v53  ;;  %v2658_v21 = vpop.f32.mrf.mxu0  ;;  %v3754_v6 = vpack.c.bf16 %v3742_v59, %v3741_v3  ;;  %v3859_v53 = vld [vmem:[#allocation4 + $0x34] sm:$0xff] }
 0x362   : > { %v2708_v45 = vadd.f32 %v2658_v21, %v2486_v35  ;;  %v3872_v30 = vpack.c.bf16 %v3860_v54, %v3859_v53  ;;  %v2489_v35 = vadd.f32 %v2443_v48, %v7501_v55 }
 0x363   : > { %v2880_v12 = vpop.f32.mrf.mxu1  ;;  %3405 = vst.msk [vmem:[#allocation4 + $0x44] sm:$0xff] %vm3268_vm4, %v3372_v60  ;;  %v3187_v25 = vmul.f32 %v7580_v33, %v3151_v31 }
 0x364   : > { %6323 = vmatmul.msk.bf16.gmra.mxu0 %vm3268_vm4, %v3635_v19  ;;  %v2930_v23 = vadd.f32 %v2880_v12, %v2708_v45  ;;  %v2448_v51 = vpop.f32.mrf.mxu3 }
 0x365   : > { %v3223_v2 = vadd.f32 %v7585_v42, %v3187_v25  ;;  %6341 = vmatmul.msk.bf16.gmra.mxu2 %vm3268_vm4, %v3871_v36 }
 0x366   : > { %6332 = vmatmul.msk.bf16.gmra.mxu1 %vm3268_vm4, %v3753_v63 }
 0x367   : > { %v3255_v17 = vmax.f32 %v3223_v2, 0.0 }
 0x368   : > { %v3102_v47 = vpop.f32.mrf.mxu2 }
 0x369   : > { %3288 = vst.msk [vmem:[#allocation3 + $0x98] sm:$0xff] %vm3268_vm4, %v3255_v17  ;;  %v3152_v37 = vadd.f32 %v3102_v47, %v2930_v23  ;;  %v2660_v46 = vpop.f32.mrf.mxu0  ;;  %v2490_v47 = vadd.f32 %v2446_v13, %v7507_v24 }
 0x36a   : > { %v2709_v41 = vadd.f32 %v2660_v46, %v2487_v52  ;;  %v3446_v12 = vld [vmem:[#allocation4 + $0x41] sm:$0xff] }
 0x36b   : > { %v2882_v5 = vpop.f32.mrf.mxu1  ;;  %v3188_v22 = vmul.f32 %v7580_v33, %v3152_v37  ;;  %v3861_v9 = vld [vmem:[#allocation4 + $0x44] sm:$0xff] }
 0x36c   : > { %v2931_v0 = vadd.f32 %v2882_v5, %v2709_v41  ;;  %v3743_v41 = vld [vmem:[#allocation4 + $0x43] sm:$0xff] }
 0x36d   : > { %v3224_v8 = vadd.f32 %v7585_v42, %v3188_v22  ;;  %v3625_v22 = vld [vmem:[#allocation4 + $0x42] sm:$0xff] }
 0x36f   : > { %v3256_v58 = vmax.f32 %v3224_v8, 0.0  ;;  %v2451_v8 = vpop.f32.mrf.mxu3 }
 0x370   : > { %v3319_v4 = vld [vmem:[#allocation3 + $0x90] ss:$2 sm:$0xff]  ;;  %v3351_v62 = vld [vmem:[#allocation3 + $0x91] ss:$2 sm:$0xff]  ;;  %v3104_v14 = vpop.f32.mrf.mxu2 }
 0x371   : > { %v3373_v40 = vmax.f32 %v3319_v4, %v3351_v62  ;;  %3289 = vst.msk [vmem:[#allocation3 + $0xa0] sm:$0xff] %vm3268_vm4, %v3256_v58  ;;  %v3153_v26 = vadd.f32 %v3104_v14, %v2931_v0  ;;  %v2663_v61 = vpop.f32.mrf.mxu0 }
 0x372   : > { %v2710_v34 = vadd.f32 %v2663_v61, %v2488_v16  ;;  %v2491_v16 = vadd.f32 %v2448_v51, %v7510_v38 }
 0x373   : > { %v2885_v28 = vpop.f32.mrf.mxu1  ;;  %3406 = vst.msk [vmem:[#allocation4 + $0x4c] sm:$0xff] %vm3268_vm4, %v3373_v40  ;;  %v3189_v49 = vmul.f32 %v7580_v33, %v3153_v26 }
 0x374   : > { %6324 = vmatmul.msk.bf16.gmra.mxu0 %vm3268_vm4, %v3636_v57  ;;  %v2932_v29 = vadd.f32 %v2885_v28, %v2710_v34 }
 0x375   : > { %v3225_v20 = vadd.f32 %v7585_v42, %v3189_v49  ;;  %6342 = vmatmul.msk.bf16.gmra.mxu2 %vm3268_vm4, %v3872_v30 }
 0x376   : > { %6333 = vmatmul.msk.bf16.gmra.mxu1 %vm3268_vm4, %v3754_v6 }
 0x377   : > { %v3257_v27 = vmax.f32 %v3225_v20, 0.0  ;;  %v2453_v3 = vpop.f32.mrf.mxu3  ;;  %v2492_v20 = vadd.f32 %v2451_v8, %v7516_v44  ;;  %v7809_v44 = vld [vmem:[%s8652_s24] ss:$0 sm:$0xff]  ;;  %s8691_s24 = sld [smem:[#allocation64_spill]] }
 0x378   : > { %v3107_v39 = vpop.f32.mrf.mxu2 }
 0x379   : > { %3290 = vst.msk [vmem:[#allocation3 + $0xa8] sm:$0xff] %vm3268_vm4, %v3257_v27  ;;  %v3154_v60 = vadd.f32 %v3107_v39, %v2932_v29  ;;  %v2665_v31 = vpop.f32.mrf.mxu0 }
 0x37a   : > { %v3447_v7 = vld [vmem:[#allocation4 + $0x49] sm:$0xff]  ;;  %v2711_v19 = vadd.f32 %v2665_v31, %v2489_v35 }
 0x37b   : > { %v2887_v21 = vpop.f32.mrf.mxu1  ;;  %v3190_v18 = vmul.f32 %v7580_v33, %v3154_v60  ;;  %v3458_v63 = vpack.c.bf16 %v3447_v7, %v3446_v12  ;;  %v3626_v36 = vld [vmem:[#allocation4 + $0x4a] sm:$0xff]  ;;  %v2493_v12 = vadd.f32 %v2453_v3, %v7519_v10 }
 0x37c   : > { %v2933_v45 = vadd.f32 %v2887_v21, %v2711_v19  ;;  %v3744_v2 = vld [vmem:[#allocation4 + $0x4b] sm:$0xff]  ;;  %v3637_v58 = vpack.c.bf16 %v3626_v36, %v3625_v22 }
 0x37d   : > { %v3226_v32 = vadd.f32 %v7585_v42, %v3190_v18  ;;  %6308 = vmatmul.msk.bf16.gmra.mxu3 %vm3268_vm4, %v3458_v63  ;;  %v3862_v23 = vld [vmem:[#allocation4 + $0x4c] sm:$0xff]  ;;  %v3755_v0 = vpack.c.bf16 %v3744_v2, %v3743_v41 }
 0x37e   : > { %v3873_v62 = vpack.c.bf16 %v3862_v23, %v3861_v9 }
 0x37f   : > { %v3258_v25 = vmax.f32 %v3226_v32, 0.0  ;;  %v2456_v60 = vpop.f32.mrf.mxu3 }
 0x380   : > { %v3321_v55 = vld [vmem:[#allocation3 + $0xa0] ss:$2 sm:$0xff]  ;;  %v3353_v48 = vld [vmem:[#allocation3 + $0xa1] ss:$2 sm:$0xff]  ;;  %v3109_v17 = vpop.f32.mrf.mxu2 }
 0x381   : > { %v3374_v52 = vmax.f32 %v3321_v55, %v3353_v48  ;;  %3291 = vst.msk [vmem:[#allocation3 + $0xb0] sm:$0xff] %vm3268_vm4, %v3258_v25  ;;  %v3155_v37 = vadd.f32 %v3109_v17, %v2933_v45  ;;  %v2668_v46 = vpop.f32.mrf.mxu0 }
 0x382   : > { %v2712_v4 = vadd.f32 %v2668_v46, %v2490_v47 }
 0x383   : > { %v2890_v5 = vpop.f32.mrf.mxu1  ;;  %3407 = vst.msk [vmem:[#allocation4 + $0x54] sm:$0xff] %vm3268_vm4, %v3374_v52  ;;  %v3191_v59 = vmul.f32 %v7580_v33, %v3155_v37 }
 0x384   : > { %6325 = vmatmul.msk.bf16.gmra.mxu0 %vm3268_vm4, %v3637_v58  ;;  %v2934_v14 = vadd.f32 %v2890_v5, %v2712_v4 }
 0x385   : > { %v3227_v24 = vadd.f32 %v7585_v42, %v3191_v59  ;;  %6343 = vmatmul.msk.bf16.gmra.mxu2 %vm3268_vm4, %v3873_v62  ;;  %v2494_v59 = vadd.f32 %v2456_v60, %v7525_v43 }
 0x386   : > { %6334 = vmatmul.msk.bf16.gmra.mxu1 %vm3268_vm4, %v3755_v0 }
 0x387   : > { %v3259_v13 = vmax.f32 %v3227_v24, 0.0  ;;  %v2458_v8 = vpop.f32.mrf.mxu3 }
 0x388   : > { %v3112_v54 = vpop.f32.mrf.mxu2 }
 0x389   : > { %3292 = vst.msk [vmem:[#allocation3 + $0xb8] sm:$0xff] %vm3268_vm4, %v3259_v13  ;;  %v3156_v40 = vadd.f32 %v3112_v54, %v2934_v14  ;;  %v2670_v26 = vpop.f32.mrf.mxu0 }
 0x38a   : > { %v2713_v1 = vadd.f32 %v2670_v26, %v2491_v16  ;;  %v3448_v32 = vld [vmem:[#allocation4 + $0x51] sm:$0xff] }
 0x38b   : > { %v2892_v61 = vpop.f32.mrf.mxu1  ;;  %v3192_v28 = vmul.f32 %v7580_v33, %v3156_v40  ;;  %v7803_v33 = vld [vmem:[%s8651_s26] ss:$0 sm:$0xff]  ;;  %v3627_v25 = vld [vmem:[#allocation4 + $0x52] sm:$0xff] }
 0x38c   : > { %v2935_v53 = vadd.f32 %v2892_v61, %v2713_v1  ;;  %v3745_v45 = vld [vmem:[#allocation4 + $0x53] sm:$0xff] }
 0x38d   : > { %v3228_v57 = vadd.f32 %v7585_v42, %v3192_v28  ;;  %v3863_v37 = vld [vmem:[#allocation4 + $0x54] sm:$0xff]  ;;  %v2495_v28 = vadd.f32 %v2458_v8, %v7530_v50 }
 0x38f   : > { %v3260_v6 = vmax.f32 %v3228_v57, 0.0  ;;  %v2461_v57 = vpop.f32.mrf.mxu3 }
 0x390   : > { %v3323_v49 = vld [vmem:[#allocation3 + $0xb0] ss:$2 sm:$0xff]  ;;  %v3355_v34 = vld [vmem:[#allocation3 + $0xb1] ss:$2 sm:$0xff]  ;;  %v3114_v30 = vpop.f32.mrf.mxu2 }
 0x391   : > { %v3375_v27 = vmax.f32 %v3323_v49, %v3355_v34  ;;  %3293 = vst.msk [vmem:[#allocation3 + $0xc0] sm:$0xff] %vm3268_vm4, %v3260_v6  ;;  %v3157_v38 = vadd.f32 %v3114_v30, %v2935_v53  ;;  %v2673_v29 = vpop.f32.mrf.mxu0 }
 0x392   : > { %v2714_v39 = vadd.f32 %v2673_v29, %v2492_v20  ;;  %v2496_v29 = vadd.f32 %v2461_v57, %v7552_v56 }
 0x393   : > { %v2895_v51 = vpop.f32.mrf.mxu1  ;;  %3408 = vst.msk [vmem:[#allocation4 + $0x5c] sm:$0xff] %vm3268_vm4, %v3375_v27  ;;  %v3193_v42 = vmul.f32 %v7803_v33, %v3157_v38 }
 0x394   : > { %v2936_v21 = vadd.f32 %v2895_v51, %v2714_v39 }
 0x395   : > { %v3229_v35 = vadd.f32 %v7809_v44, %v3193_v42 }
 0x397   : > { %v3261_v31 = vmax.f32 %v3229_v35, 0.0 }
 0x398   : > { %v3117_v7 = vpop.f32.mrf.mxu2 }
 0x399   : > { %3294 = vst.msk [vmem:[#allocation3 + $0xc8] sm:$0xff] %vm3268_vm4, %v3261_v31  ;;  %v3158_v18 = vadd.f32 %v3117_v7, %v2936_v21  ;;  %v2675_v19 = vpop.f32.mrf.mxu0  ;;  %v2463_v31 = vpop.f32.mrf.mxu3 }
 0x39a   : > { %v2715_v36 = vadd.f32 %v2675_v19, %v2493_v12  ;;  %v3449_v2 = vld [vmem:[#allocation4 + $0x59] sm:$0xff] }
 0x39b   : > { %v2897_v63 = vpop.f32.mrf.mxu1  ;;  %v3628_v55 = vld [vmem:[#allocation4 + $0x5a] sm:$0xff]  ;;  %v3194_v17 = vmul.f32 %v7803_v33, %v3158_v18  ;;  %v3459_v23 = vpack.c.bf16 %v3449_v2, %v3448_v32  ;;  %v2497_v18 = vadd.f32 %v2463_v31, %v7571_v15  ;;  %v4089_v31 = vld [vmem:[#allocation4 + $0x6] sm:$0xff] }
 0x39c   : > { %v3746_v48 = vld [vmem:[#allocation4 + $0x5b] sm:$0xff]  ;;  %v3638_v47 = vpack.c.bf16 %v3628_v55, %v3627_v25  ;;  %v2937_v41 = vadd.f32 %v2897_v63, %v2715_v36 }
 0x39d   : > { %v3756_v52 = vpack.c.bf16 %v3746_v48, %v3745_v45  ;;  %v3864_v10 = vld [vmem:[#allocation4 + $0x5c] sm:$0xff]  ;;  %v3230_v5 = vadd.f32 %v7809_v44, %v3194_v17  ;;  %6309 = vmatmul.msk.bf16.gmra.mxu3 %vm3268_vm4, %v3459_v23 }
 0x39e   : > { %v3874_v46 = vpack.c.bf16 %v3864_v10, %v3863_v37  ;;  %6326 = vmatmul.msk.bf16.gmra.mxu0 %vm3268_vm4, %v3638_v47 }
 0x39f   : > { %6335 = vmatmul.msk.bf16.gmra.mxu1 %vm3268_vm4, %v3756_v52  ;;  %v3262_v22 = vmax.f32 %v3230_v5, 0.0 }
 0x3a0   : > { %6344 = vmatmul.msk.bf16.gmra.mxu2 %vm3268_vm4, %v3874_v46  ;;  %v3325_v58 = vld [vmem:[#allocation3 + $0xc0] ss:$2 sm:$0xff]  ;;  %v3357_v0 = vld [vmem:[#allocation3 + $0xc1] ss:$2 sm:$0xff]  ;;  %v3119_v9 = vpop.f32.mrf.mxu2 }
 0x3a1   : > { %v3376_v4 = vmax.f32 %v3325_v58, %v3357_v0  ;;  %3295 = vst.msk [vmem:[#allocation3 + $0xd0] sm:$0xff] %vm3268_vm4, %v3262_v22  ;;  %v3159_v62 = vadd.f32 %v3119_v9, %v2937_v41  ;;  %v2678_v24 = vpop.f32.mrf.mxu0 }
 0x3a2   : > { %v2716_v54 = vadd.f32 %v2678_v24, %v2494_v59 }
 0x3a3   : > { %v2900_v13 = vpop.f32.mrf.mxu1  ;;  %3409 = vst.msk [vmem:[#allocation4 + $0x64] sm:$0xff] %vm3268_vm4, %v3376_v4  ;;  %v3195_v14 = vmul.f32 %v7803_v33, %v3159_v62 }
 0x3a4   : > { %v2938_v26 = vadd.f32 %v2900_v13, %v2716_v54  ;;  %v6356_v13 = vld [vmem:[%s8650_s25 + $0x18] sm:$0xf] }
 0x3a5   : > { %v3231_v16 = vadd.f32 %v7809_v44, %v3195_v14  ;;  %v6365_v14 = vld [vmem:[%s8650_s25 + $0x1c] sm:$0xf]  ;;  %v4140_v54 = vsel %vm3488_vm3, %v6356_v13, 0 }
 0x3a6   : > { %4149 = vmatpush.bf16.msra.mxu0 %v4140_v54  ;;  %v4096_v54 = vld [vmem:[#allocation4 + $0x3e] sm:$0xff] }
 0x3a7   : > { %v3263_v40 = vmax.f32 %v3231_v16, 0.0  ;;  %v4258_v16 = vsel %vm3488_vm3, %v6365_v14, 0  ;;  %v3420_v14 = vld [vmem:[#allocation4 + $0x38] sm:$0xff] }
 0x3a8   : > { %v3122_v61 = vpop.f32.mrf.mxu2  ;;  %4267 = vmatpush.bf16.msra.mxu1 %v4258_v16  ;;  %v4214_v16 = vld [vmem:[#allocation4 + $0x3f] sm:$0xff] }
 0x3a9   : > { %3296 = vst.msk [vmem:[#allocation3 + $0xd8] sm:$0xff] %vm3268_vm4, %v3263_v40  ;;  %v3160_v43 = vadd.f32 %v3122_v61, %v2938_v26  ;;  %v2680_v1 = vpop.f32.mrf.mxu0  ;;  %v6347_v40 = vld [vmem:[%s8650_s25 + $0x14] sm:$0xf] }
 0x3aa   : > { %v2717_v53 = vadd.f32 %v2680_v1, %v2495_v28  ;;  %v3450_v32 = vld [vmem:[#allocation4 + $0x61] sm:$0xff]  ;;  %v4022_v26 = vsel %vm3488_vm3, %v6347_v40, 0 }
 0x3ab   : > { %v2902_v3 = vpop.f32.mrf.mxu1  ;;  %v3196_v6 = vmul.f32 %v7803_v33, %v3160_v43  ;;  %v3629_v25 = vld [vmem:[#allocation4 + $0x62] sm:$0xff]  ;;  %4031 = vmatpush.bf16.msra.mxu3 %v4022_v26 }
 0x3ac   : > { %v2939_v30 = vadd.f32 %v2902_v3, %v2717_v53  ;;  %v3747_v45 = vld [vmem:[#allocation4 + $0x63] sm:$0xff] }
 0x3ad   : > { %v3232_v49 = vadd.f32 %v7809_v44, %v3196_v6  ;;  %v3865_v37 = vld [vmem:[#allocation4 + $0x64] sm:$0xff] }
 0x3af   : > { %v3264_v34 = vmax.f32 %v3232_v49, 0.0 }
 0x3b0   : > { %v3327_v20 = vld [vmem:[#allocation3 + $0xd0] ss:$2 sm:$0xff]  ;;  %v3359_v27 = vld [vmem:[#allocation3 + $0xd1] ss:$2 sm:$0xff]  ;;  %v3124_v38 = vpop.f32.mrf.mxu2 }
 0x3b1   : > { %v3377_v51 = vmax.f32 %v3327_v20, %v3359_v27  ;;  %3297 = vst.msk [vmem:[#allocation3 + $0xe0] sm:$0xff] %vm3268_vm4, %v3264_v34  ;;  %v3161_v50 = vadd.f32 %v3124_v38, %v2939_v30  ;;  %v2683_v42 = vpop.f32.mrf.mxu0 }
 0x3b2   : > { %v2718_v35 = vadd.f32 %v2683_v42, %v2496_v29  ;;  %v4090_v42 = vld [vmem:[#allocation4 + $0xe] sm:$0xff] }
 0x3b3   : > { %3410 = vst.msk [vmem:[#allocation4 + $0x6c] sm:$0xff] %vm3268_vm4, %v3377_v51  ;;  %v3197_v39 = vmul.f32 %v7803_v33, %v3161_v50  ;;  %v2905_v60 = vpop.f32.mrf.mxu1  ;;  %v7868_v51 = vpop.f32.mrf.mxu3  ;;  %v3414_v50 = vld [vmem:[#allocation4 + $0x8] sm:$0xff] }
 0x3b4   : > { %v2940_v7 = vadd.f32 %v2905_v60, %v2718_v35  ;;  %v4326_v35 = vld [vmem:[#allocation4 + $0x10] sm:$0xff]  ;;  %v3413_v60 = vld [vmem:[#allocation4] sm:$0xff] }
 0x3b5   : > { %v3233_v21 = vadd.f32 %v7809_v44, %v3197_v39  ;;  %v4208_v39 = vld [vmem:[#allocation4 + $0xf] sm:$0xff] }
 0x3b7   : > { %v3265_v12 = vmax.f32 %v3233_v21, 0.0  ;;  %v3429_v21 = vpack.c.bf16 %v3414_v50, %v3413_v60 }
 0x3b8   : > { %v3127_v19 = vpop.f32.mrf.mxu2 }
 0x3b9   : > { %3298 = vst.msk [vmem:[#allocation3 + $0xe8] sm:$0xff] %vm3268_vm4, %v3265_v12  ;;  %v3162_v56 = vadd.f32 %v3127_v19, %v2940_v7  ;;  %v2685_v63 = vpop.f32.mrf.mxu0  ;;  %v4105_v12 = vpack.c.bf16 %v4090_v42, %v4089_v31  ;;  %v4207_v7 = vld [vmem:[#allocation4 + $0x7] sm:$0xff] }
 0x3ba   : > { %v2719_v36 = vadd.f32 %v2685_v63, %v2497_v18  ;;  %v3451_v2 = vld [vmem:[#allocation4 + $0x69] sm:$0xff]  ;;  %v4223_v19 = vpack.c.bf16 %v4208_v39, %v4207_v7 }
 0x3bb   : > { %v3630_v55 = vld [vmem:[#allocation4 + $0x6a] sm:$0xff]  ;;  %v3198_v17 = vmul.f32 %v7803_v33, %v3162_v56  ;;  %v3460_v23 = vpack.c.bf16 %v3451_v2, %v3450_v32  ;;  %v2907_v5 = vpop.f32.mrf.mxu1  ;;  %v7870_v18 = vpop.f32.mrf.mxu3  ;;  %v4341_v56 = vpack.c.bf16 %v4326_v35, %v3414_v50  ;;  %v3416_v32 = vld [vmem:[#allocation4 + $0x18] sm:$0xff] }
 0x3bc   : > { %v3748_v48 = vld [vmem:[#allocation4 + $0x6b] sm:$0xff]  ;;  %v3639_v47 = vpack.c.bf16 %v3630_v55, %v3629_v25  ;;  %v2941_v41 = vadd.f32 %v2907_v5, %v2719_v36  ;;  %v4092_v25 = vld [vmem:[#allocation4 + $0x1e] sm:$0xff]  ;;  %v4091_v2 = vld [vmem:[#allocation4 + $0x16] sm:$0xff]  ;;  %v3430_v55 = vpack.c.bf16 %v3416_v32, %v4326_v35 }
 0x3bd   : > { %v3757_v52 = vpack.c.bf16 %v3748_v48, %v3747_v45  ;;  %v3866_v10 = vld [vmem:[#allocation4 + $0x6c] sm:$0xff]  ;;  %v3234_v46 = vadd.f32 %v7809_v44, %v3198_v17  ;;  %6310 = vmatmul.msk.bf16.gmra.mxu3 %vm3268_vm4, %v3460_v23  ;;  %v4210_v45 = vld [vmem:[#allocation4 + $0x1f] sm:$0xff]  ;;  %v4106_v48 = vpack.c.bf16 %v4092_v25, %v4091_v2  ;;  %v4209_v17 = vld [vmem:[#allocation4 + $0x17] sm:$0xff] }
 0x3be   : > { %v3875_v15 = vpack.c.bf16 %v3866_v10, %v3865_v37  ;;  %6327 = vmatmul.msk.bf16.gmra.mxu0 %vm3268_vm4, %v3639_v47  ;;  %v4328_v36 = vld [vmem:[#allocation4 + $0x20] sm:$0xff]  ;;  %v4224_v23 = vpack.c.bf16 %v4210_v45, %v4209_v17  ;;  %v3418_v10 = vld [vmem:[#allocation4 + $0x28] sm:$0xff]  ;;  %v4330_v5 = vld [vmem:[#allocation4 + $0x30] sm:$0xff] }
 0x3bf   : > { %6336 = vmatmul.msk.bf16.gmra.mxu1 %vm3268_vm4, %v3757_v52  ;;  %v3266_v22 = vmax.f32 %v3234_v46, 0.0  ;;  %v4342_v47 = vpack.c.bf16 %v4328_v36, %v3416_v32  ;;  %v4212_v46 = vld [vmem:[#allocation4 + $0x2f] sm:$0xff]  ;;  %v3432_v40 = vpack.c.bf16 %v3420_v14, %v4330_v5  ;;  %v4215_v42 = vld [vmem:[#allocation4 + $0x47] sm:$0xff]  ;;  %v4100_v32 = vld [vmem:[#allocation4 + $0x5e] sm:$0xff] }
 0x3c0   : > { %6345 = vmatmul.msk.bf16.gmra.mxu2 %vm3268_vm4, %v3875_v15  ;;  %v3329_v8 = vld [vmem:[#allocation3 + $0xe0] ss:$2 sm:$0xff]  ;;  %v3361_v58 = vld [vmem:[#allocation3 + $0xe1] ss:$2 sm:$0xff]  ;;  %v3129_v0 = vpop.f32.mrf.mxu2 }
 0x3c1   : > { %v3378_v9 = vmax.f32 %v3329_v8, %v3361_v58  ;;  %3299 = vst.msk [vmem:[#allocation3 + $0xf0] sm:$0xff] %vm3268_vm4, %v3266_v22  ;;  %v3163_v59 = vadd.f32 %v3129_v0, %v2941_v41  ;;  %v4094_v15 = vld [vmem:[#allocation4 + $0x2e] sm:$0xff]  ;;  %v4093_v22 = vld [vmem:[#allocation4 + $0x26] sm:$0xff]  ;;  %v3431_v41 = vpack.c.bf16 %v3418_v10, %v4328_v36  ;;  %v4099_v36 = vld [vmem:[#allocation4 + $0x56] sm:$0xff] }
 0x3c2   : > { %v4107_v8 = vpack.c.bf16 %v4094_v15, %v4093_v22  ;;  %v4211_v58 = vld [vmem:[#allocation4 + $0x27] sm:$0xff]  ;;  %v4218_v25 = vld [vmem:[#allocation4 + $0x5f] sm:$0xff] }
 0x3c3   : > { %3411 = vst.msk [vmem:[#allocation4 + $0x74] sm:$0xff] %vm3268_vm4, %v3378_v9  ;;  %v3199_v4 = vmul.f32 %v7803_v33, %v3163_v59  ;;  %v6374_v33 = vld [vmem:[%s8650_s25 + $0x20] sm:$0xf]  ;;  %v7876_v63 = vpop.f32.mrf.mxu3  ;;  %v4225_v0 = vpack.c.bf16 %v4212_v46, %v4211_v58  ;;  %v4343_v9 = vpack.c.bf16 %v4330_v5, %v3418_v10  ;;  %v4336_v45 = vld [vmem:[#allocation4 + $0x60] sm:$0xff]  ;;  %v3426_v22 = vld [vmem:[#allocation4 + $0x68] sm:$0xff] }
 0x3c5   : > { %v3235_v62 = vadd.f32 %v7809_v44, %v3199_v4  ;;  %v4376_v44 = vsel %vm3488_vm3, %v6374_v33, 0  ;;  %v7892_v4 = vpop.f32.mrf.mxu0  ;;  %v4332_v33 = vld [vmem:[#allocation4 + $0x40] sm:$0xff] }
 0x3c6   : > { %4385 = vmatpush.bf16.msra.mxu2 %v4376_v44  ;;  %v4095_v44 = vld [vmem:[#allocation4 + $0x36] sm:$0xff] }
 0x3c7   : > { %v3267_v24 = vmax.f32 %v3235_v62, 0.0  ;;  %v7894_v62 = vpop.f32.mrf.mxu1  ;;  %v4108_v26 = vpack.c.bf16 %v4096_v54, %v4095_v44  ;;  %v4101_v54 = vld [vmem:[#allocation4 + $0x66] sm:$0xff] }
 0x3c8   : > { %v4219_v44 = vld [vmem:[#allocation4 + $0x67] sm:$0xff] }
 0x3c9   : > { %3300 = vst.msk [vmem:[#allocation3 + $0xf8] sm:$0xff] %vm3268_vm4, %v3267_v24  ;;  %v7896_v24 = vpop.f32.mrf.mxu2 }
 0x3ca   : > { %v3452_v1 = vld [vmem:[#allocation4 + $0x71] sm:$0xff] }
 0x3cb   : > { %v3631_v3 = vld [vmem:[#allocation4 + $0x72] sm:$0xff]  ;;  %v7880_v52 = vpop.f32.mrf.mxu3 }
 0x3cc   : > { %v3749_v57 = vld [vmem:[#allocation4 + $0x73] sm:$0xff] }
 0x3cd   : > { %v3867_v27 = vld [vmem:[#allocation4 + $0x74] sm:$0xff] }
 0x3ce   : > { %v4220_v58 = vld [vmem:[#allocation4 + $0x6f] sm:$0xff] }
 0x3d0   : > { %v3331_v61 = vld [vmem:[#allocation3 + $0xf0] ss:$2 sm:$0xff]  ;;  %v3363_v28 = vld [vmem:[#allocation3 + $0xf1] ss:$2 sm:$0xff] }
 0x3d1   : > { %v3379_v43 = vmax.f32 %v3331_v61, %v3363_v28  ;;  %v4213_v61 = vld [vmem:[#allocation4 + $0x37] sm:$0xff] }
 0x3d2   : > { %v4226_v28 = vpack.c.bf16 %v4214_v16, %v4213_v61  ;;  %v3435_v16 = vpack.c.bf16 %v3426_v22, %v4336_v45 }
 0x3d3   : > { %3412 = vst.msk [vmem:[#allocation4 + $0x7c] sm:$0xff] %vm3268_vm4, %v3379_v43  ;;  %v7884_v37 = vpop.f32.mrf.mxu3  ;;  %v4344_v43 = vpack.c.bf16 %v4332_v33, %v3420_v14 }
 0x3da   : > { %v3453_v6 = vld [vmem:[#allocation4 + $0x79] sm:$0xff] }
 0x3db   : > { %v3632_v53 = vld [vmem:[#allocation4 + $0x7a] sm:$0xff]  ;;  %v3461_v34 = vpack.c.bf16 %v3453_v6, %v3452_v1  ;;  %v7890_v59 = vpop.f32.mrf.mxu3  ;;  %v7904_v1 = vpop.f32.mrf.mxu0 }
 0x3dc   : > { %v3750_v49 = vld [vmem:[#allocation4 + $0x7b] sm:$0xff]  ;;  %v3640_v30 = vpack.c.bf16 %v3632_v53, %v3631_v3  ;;  %v7906_v3 = vpop.f32.mrf.mxu1  ;;  %v3422_v53 = vld [vmem:[#allocation4 + $0x48] sm:$0xff] }
 0x3dd   : > { %v3758_v20 = vpack.c.bf16 %v3750_v49, %v3749_v57  ;;  %v3868_v38 = vld [vmem:[#allocation4 + $0x7c] sm:$0xff]  ;;  %6311 = vmatmul.msk.bf16.gmra.mxu3 %vm3268_vm4, %v3461_v34  ;;  %v7908_v57 = vpop.f32.mrf.mxu2  ;;  %v4098_v49 = vld [vmem:[#allocation4 + $0x4e] sm:$0xff] }
 0x3de   : > { %v3876_v29 = vpack.c.bf16 %v3868_v38, %v3867_v27  ;;  %6328 = vmatmul.msk.bf16.gmra.mxu0 %vm3268_vm4, %v3640_v30  ;;  %v4216_v34 = vld [vmem:[#allocation4 + $0x4f] sm:$0xff]  ;;  %v4097_v27 = vld [vmem:[#allocation4 + $0x46] sm:$0xff] }
 0x3df   : > { %6337 = vmatmul.msk.bf16.gmra.mxu1 %vm3268_vm4, %v3758_v20  ;;  %v4334_v30 = vld [vmem:[#allocation4 + $0x50] sm:$0xff]  ;;  %v4109_v50 = vpack.c.bf16 %v4098_v49, %v4097_v27  ;;  %v4227_v60 = vpack.c.bf16 %v4216_v34, %v4215_v42  ;;  %v3428_v34 = vld [vmem:[#allocation4 + $0x78] sm:$0xff]  ;;  %v4340_v42 = vld [vmem:[#allocation4 + $0x80] sm:$0xff] }
 0x3e0   : > { %6346 = vmatmul.msk.bf16.gmra.mxu2 %vm3268_vm4, %v3876_v29  ;;  %v3433_v29 = vpack.c.bf16 %v3422_v53, %v4332_v33  ;;  %v4345_v31 = vpack.c.bf16 %v4334_v30, %v3422_v53  ;;  %v4104_v27 = vld [vmem:[#allocation4 + $0x7e] sm:$0xff] }
 0x3e3   : > { %v7898_v13 = vpop.f32.mrf.mxu3  ;;  %v7914_v38 = vpop.f32.mrf.mxu0 }
 0x3e4   : > { %v7916_v39 = vpop.f32.mrf.mxu1 }
 0x3e5   : > { %v7918_v35 = vpop.f32.mrf.mxu2 }
 0x3eb   : > { %v7910_v6 = vpop.f32.mrf.mxu3 }
 0x3ec   : > { %v7928_v7 = vpop.f32.mrf.mxu1 }
 0x3ed   : > { %6312 = vmatmul.msk.bf16.vlgmr.msrb.gmra.mxu3 %vm3268_vm4, %v3429_v21 }
 0x3ee   : > { %6357 = vmatmul.msk.bf16.vlgmr.msra.gmra.mxu0 %vm3268_vm4, %v4105_v12  ;;  %v7926_v12 = vpop.f32.mrf.mxu0 }
 0x3ef   : > { %6366 = vmatmul.msk.bf16.vlgmr.msra.gmra.mxu1 %vm3268_vm4, %v4223_v19  ;;  %v7930_v19 = vpop.f32.mrf.mxu2 }
 0x3f0   : > { %6375 = vmatmul.msk.bf16.vlgmr.msra.gmra.mxu2 %vm3268_vm4, %v4341_v56  ;;  %v3424_v56 = vld [vmem:[#allocation4 + $0x58] sm:$0xff] }
 0x3f1   : > { %v3434_v2 = vpack.c.bf16 %v3424_v56, %v4334_v30  ;;  %v4103_v30 = vld [vmem:[#allocation4 + $0x76] sm:$0xff] }
 0x3f4   : > { %v7940_v15 = vpop.f32.mrf.mxu1 }
 0x3f6   : > { %v7938_v10 = vpop.f32.mrf.mxu0 }
 0x3f7   : > { %v7942_v46 = vpop.f32.mrf.mxu2 }
 0x3fd   : > { %6313 = vmatmul.msk.bf16.gmra.mxu3 %vm3268_vm4, %v3430_v55  ;;  %v4110_v55 = vpack.c.bf16 %v4100_v32, %v4099_v36  ;;  %v4348_v32 = vpack.c.bf16 %v4340_v42, %v3428_v34 }
 0x3fe   : > { %6358 = vmatmul.msk.bf16.gmra.mxu0 %vm3268_vm4, %v4106_v48  ;;  %v4217_v48 = vld [vmem:[#allocation4 + $0x57] sm:$0xff] }
 0x3ff   : > { %6367 = vmatmul.msk.bf16.gmra.mxu1 %vm3268_vm4, %v4224_v23  ;;  %v4228_v23 = vpack.c.bf16 %v4218_v25, %v4217_v48  ;;  %v7950_v14 = vpop.f32.mrf.mxu2  ;;  %v3972_v48 = vld [vmem:[#allocation4 + $0xd] sm:$0xff] }
 0x400   : > { %6376 = vmatmul.msk.bf16.gmra.mxu2 %vm3268_vm4, %v4342_v47  ;;  %v7912_v20 = vpop.f32.mrf.mxu3  ;;  %v4346_v47 = vpack.c.bf16 %v4336_v45, %v3424_v56 }
 0x407   : > { %v7962_v53 = vpop.f32.mrf.mxu2 }
 0x408   : > { %v7924_v21 = vpop.f32.mrf.mxu3 }
 0x40d   : > { %6314 = vmatmul.msk.bf16.gmra.mxu3 %vm3268_vm4, %v3431_v41  ;;  %v4102_v41 = vld [vmem:[#allocation4 + $0x6e] sm:$0xff] }
 0x40e   : > { %6359 = vmatmul.msk.bf16.gmra.mxu0 %vm3268_vm4, %v4107_v8  ;;  %v7946_v8 = vpop.f32.mrf.mxu0  ;;  %v4111_v33 = vpack.c.bf16 %v4102_v41, %v4101_v54 }
 0x40f   : > { %6368 = vmatmul.msk.bf16.gmra.mxu1 %vm3268_vm4, %v4225_v0  ;;  %v4338_v0 = vld [vmem:[#allocation4 + $0x70] sm:$0xff]  ;;  %v7972_v36 = vpop.f32.mrf.mxu2 }
 0x410   : > { %6377 = vmatmul.msk.bf16.gmra.mxu2 %vm3268_vm4, %v4343_v9  ;;  %v7948_v9 = vpop.f32.mrf.mxu1 }
 0x41d   : > { %6315 = vmatmul.msk.bf16.gmra.mxu3 %vm3268_vm4, %v3432_v40  ;;  %v4229_v40 = vpack.c.bf16 %v4220_v58, %v4219_v44  ;;  %v3974_v58 = vld [vmem:[#allocation4 + $0x1d] sm:$0xff]  ;;  %v3976_v44 = vld [vmem:[#allocation4 + $0x2d] sm:$0xff] }
 0x41e   : > { %6360 = vmatmul.msk.bf16.gmra.mxu0 %vm3268_vm4, %v4108_v26  ;;  %v4347_v26 = vpack.c.bf16 %v4338_v0, %v3426_v22 }
 0x41f   : > { %6369 = vmatmul.msk.bf16.gmra.mxu1 %vm3268_vm4, %v4226_v28  ;;  %v7958_v28 = vpop.f32.mrf.mxu0 }
 0x420   : > { %6378 = vmatmul.msk.bf16.gmra.mxu2 %vm3268_vm4, %v4344_v43  ;;  %v7932_v17 = vpop.f32.mrf.mxu3  ;;  %v7960_v43 = vpop.f32.mrf.mxu1 }
 0x421   : > { %8653 = vst [vmem:[#allocation23_spill] sm:$0xff] %v7932_v17 }
 0x427   : > { %v7966_v25 = vpop.f32.mrf.mxu0 }
 0x428   : > { %v7944_v5 = vpop.f32.mrf.mxu3  ;;  %v7970_v45 = vpop.f32.mrf.mxu1 }
 0x429   : > { %8654 = vst [vmem:[#allocation24_spill] sm:$0xff] %v7944_v5 }
 0x42d   : > { %6316 = vmatmul.msk.bf16.gmra.mxu3 %vm3268_vm4, %v3433_v29  ;;  %v4221_v29 = vld [vmem:[#allocation4 + $0x77] sm:$0xff] }
 0x42e   : > { %6361 = vmatmul.msk.bf16.gmra.mxu0 %vm3268_vm4, %v4109_v50  ;;  %v4222_v50 = vld [vmem:[#allocation4 + $0x7f] sm:$0xff] }
 0x42f   : > { %6370 = vmatmul.msk.bf16.gmra.mxu1 %vm3268_vm4, %v4227_v60  ;;  %v3436_v60 = vpack.c.bf16 %v3428_v34, %v4338_v0  ;;  %v4230_v56 = vpack.c.bf16 %v4222_v50, %v4221_v29  ;;  %v3973_v0 = vld [vmem:[#allocation4 + $0x15] sm:$0xff] }
 0x430   : > { %6379 = vmatmul.msk.bf16.gmra.mxu2 %vm3268_vm4, %v4345_v31  ;;  %v4112_v31 = vpack.c.bf16 %v4104_v27, %v4103_v30  ;;  %v3988_v54 = vpack.c.bf16 %v3974_v58, %v3973_v0  ;;  %v7992_v30 = vpop.f32.mrf.mxu1  ;;  %v7995_v27 = vpop.f32.mrf.mxu2 }
 0x431   : > { %8659 = vst [vmem:[#allocation29_spill] sm:$0xff] %v7995_v27 }
 0x438   : > { %v8001_v42 = vpop.f32.mrf.mxu1 }
 0x439   : > { %8661 = vst [vmem:[#allocation31_spill] sm:$0xff] %v8001_v42 }
 0x43d   : > { %6317 = vmatmul.msk.bf16.gmra.mxu3 %vm3268_vm4, %v3434_v2 }
 0x43e   : > { %6362 = vmatmul.msk.bf16.gmra.mxu0 %vm3268_vm4, %v4110_v55 }
 0x43f   : > { %6371 = vmatmul.msk.bf16.gmra.mxu1 %vm3268_vm4, %v4228_v23  ;;  %v3971_v23 = vld [vmem:[#allocation4 + $0x5] sm:$0xff] }
 0x440   : > { %6380 = vmatmul.msk.bf16.gmra.mxu2 %vm3268_vm4, %v4346_v47  ;;  %v7954_v61 = vpop.f32.mrf.mxu3  ;;  %v3987_v47 = vpack.c.bf16 %v3972_v48, %v3971_v23 }
 0x441   : > { %8655 = vst [vmem:[#allocation25_spill] sm:$0xff] %v7954_v61 }
 0x448   : > { %v7964_v49 = vpop.f32.mrf.mxu3 }
 0x449   : > { %8656 = vst [vmem:[#allocation26_spill] sm:$0xff] %v7964_v49 }
 0x44d   : > { %6318 = vmatmul.msk.bf16.gmra.mxu3 %vm3268_vm4, %v3435_v16 }
 0x44e   : > { %6363 = vmatmul.msk.bf16.gmra.mxu0 %vm3268_vm4, %v4111_v33 }
 0x44f   : > { %6372 = vmatmul.msk.bf16.gmra.mxu1 %vm3268_vm4, %v4229_v40  ;;  %v7990_v40 = vpop.f32.mrf.mxu0 }
 0x450   : > { %6381 = vmatmul.msk.bf16.gmra.mxu2 %vm3268_vm4, %v4347_v26  ;;  %v3975_v26 = vld [vmem:[#allocation4 + $0x25] sm:$0xff] }
 0x451   : > { %v3989_v34 = vpack.c.bf16 %v3976_v44, %v3975_v26 }
 0x457   : > { %v7999_v50 = vpop.f32.mrf.mxu0 }
 0x458   : > { %8660 = vst [vmem:[#allocation30_spill] sm:$0xff] %v7999_v50 }
 0x45d   : > { %6319 = vmatmul.msk.bf16.gmra.mxu3 %vm3268_vm4, %v3436_v60  ;;  %v8003_v60 = vpop.f32.mrf.mxu2 }
 0x45e   : > { %6364 = vmatmul.msk.bf16.gmra.mxu0 %vm3268_vm4, %v4112_v31  ;;  %8662 = vst [vmem:[#allocation32_spill] sm:$0xff] %v8003_v60 }
 0x45f   : > { %6373 = vmatmul.msk.bf16.gmra.mxu1 %vm3268_vm4, %v4230_v56  ;;  %v3978_v56 = vld [vmem:[#allocation4 + $0x3d] sm:$0xff]  ;;  %v8007_v23 = vpop.f32.mrf.mxu0 }
 0x460   : > { %6382 = vmatmul.msk.bf16.gmra.mxu2 %vm3268_vm4, %v4348_v32  ;;  %v7976_v2 = vpop.f32.mrf.mxu3  ;;  %v3977_v32 = vld [vmem:[#allocation4 + $0x35] sm:$0xff]  ;;  %8663 = vst [vmem:[#allocation33_spill] sm:$0xff] %v8007_v23 }
 0x461   : > { %8657 = vst [vmem:[#allocation27_spill] sm:$0xff] %v7976_v2  ;;  %v3990_v48 = vpack.c.bf16 %v3978_v56, %v3977_v32  ;;  %v3979_v56 = vld [vmem:[#allocation4 + $0x45] sm:$0xff] }
 0x465   : > { %v8012_v58 = vpop.f32.mrf.mxu2 }
 0x466   : > { %8665 = vst [vmem:[#allocation35_spill] sm:$0xff] %v8012_v58  ;;  %v3982_v58 = vld [vmem:[#allocation4 + $0x5d] sm:$0xff] }
 0x468   : > { %v7978_v55 = vpop.f32.mrf.mxu3 }
 0x469   : > { %8658 = vst [vmem:[#allocation28_spill] sm:$0xff] %v7978_v55 }
 0x46d   : > { %6348 = vmatmul.msk.bf16.vlgmr.msra.gmra.mxu3 %vm3268_vm4, %v3987_v47  ;;  %v8010_v47 = vpop.f32.mrf.mxu1  ;;  %v8022_v11 = vpop.f32.mrf.mxu2 }
 0x46e   : > { %8664 = vst [vmem:[#allocation34_spill] sm:$0xff] %v8010_v47 }
 0x46f   : > { %8668 = vst [vmem:[#allocation38_spill] sm:$0xff] %v8022_v11  ;;  %v3981_v11 = vld [vmem:[#allocation4 + $0x55] sm:$0xff] }
 0x470   : > { %v7981_v22 = vpop.f32.mrf.mxu3  ;;  %v3992_v47 = vpack.c.bf16 %v3982_v58, %v3981_v11  ;;  %v3984_v11 = vld [vmem:[#allocation4 + $0x6d] sm:$0xff] }
 0x475   : > { %v8018_v44 = vpop.f32.mrf.mxu1  ;;  %v8031_v49 = vpop.f32.mrf.mxu2 }
 0x476   : > { %8667 = vst [vmem:[#allocation37_spill] sm:$0xff] %v8018_v44 }
 0x477   : > { %8671 = vst [vmem:[#allocation41_spill] sm:$0xff] %v8031_v49 }
 0x478   : > { %v7983_v41 = vpop.f32.mrf.mxu3 }
 0x47d   : > { %6349 = vmatmul.msk.bf16.gmra.mxu3 %vm3268_vm4, %v3988_v54  ;;  %v8016_v54 = vpop.f32.mrf.mxu0  ;;  %v8027_v55 = vpop.f32.mrf.mxu1 }
 0x47e   : > { %8666 = vst [vmem:[#allocation36_spill] sm:$0xff] %v8016_v54 }
 0x47f   : > { %8670 = vst [vmem:[#allocation40_spill] sm:$0xff] %v8027_v55 }
 0x480   : > { %v7986_v16 = vpop.f32.mrf.mxu3 }
 0x481   : > { %v3583_v17 = vadd.f32 %v7986_v16, %v7876_v63 }
 0x485   : > { %v8037_v54 = vpop.f32.mrf.mxu1 }
 0x486   : > { %8674 = vst [vmem:[#allocation44_spill] sm:$0xff] %v8037_v54 }
 0x488   : > { %v7988_v33 = vpop.f32.mrf.mxu3 }
 0x48d   : > { %6350 = vmatmul.msk.bf16.gmra.mxu3 %vm3268_vm4, %v3989_v34  ;;  %v3980_v34 = vld [vmem:[#allocation4 + $0x4d] sm:$0xff] }
 0x48e   : > { %v3991_v32 = vpack.c.bf16 %v3980_v34, %v3979_v56  ;;  %v6700_v34 = vld [vmem:[%s8675_s7 + $0x8] sm:$0xff]  ;;  %v8042_v56 = vpop.f32.mrf.mxu2 }
 0x48f   : > { %8676 = vst [vmem:[#allocation45_spill] sm:$0xff] %v8042_v56  ;;  %4627 = vmatpush.bf16.msrb.mxu3 %v6700_v34 }
 0x490   : > { %v7997_v29 = vpop.f32.mrf.mxu3 }
 0x496   : > { %v8051_v55 = vpop.f32.mrf.mxu2 }
 0x497   : > { %8680 = vst [vmem:[#allocation49_spill] sm:$0xff] %v8051_v55  ;;  %v3985_v55 = vld [vmem:[#allocation4 + $0x75] sm:$0xff] }
 0x498   : > { %v8005_v31 = vpop.f32.mrf.mxu3 }
 0x49d   : > { %6351 = vmatmul.msk.bf16.gmra.mxu3 %vm3268_vm4, %v3990_v48  ;;  %v8025_v48 = vpop.f32.mrf.mxu0 }
 0x49e   : > { %8669 = vst [vmem:[#allocation39_spill] sm:$0xff] %v8025_v48  ;;  %v3983_v48 = vld [vmem:[#allocation4 + $0x65] sm:$0xff] }
 0x49f   : > { %v3993_v5 = vpack.c.bf16 %v3984_v11, %v3983_v48  ;;  %v8687_v11 = vmov 0.0  }
 0x4a0   : > { %v8014_v0 = vpop.f32.mrf.mxu3  ;;  %4555 = vst.msk [vmem:[#allocation6] sm:$0xff] %vm4499_vm6, %v8687_v11 }
 0x4a1   : > { %4556 = vst.msk [vmem:[#allocation6 + $0x8] sm:$0xff] %vm4499_vm6, %v8687_v11 }
 0x4a2   : > { %4557 = vst.msk [vmem:[#allocation6 + $0x10] sm:$0xff] %vm4499_vm6, %v8687_v11 }
 0x4a3   : > { %4558 = vst.msk [vmem:[#allocation6 + $0x18] sm:$0xff] %vm4499_vm6, %v8687_v11 }
 0x4a4   : > { %4559 = vst.msk [vmem:[#allocation6 + $0x20] sm:$0xff] %vm4499_vm6, %v8687_v11 }
 0x4a5   : > { %v8033_v61 = vpop.f32.mrf.mxu0  ;;  %4560 = vst.msk [vmem:[#allocation6 + $0x28] sm:$0xff] %vm4499_vm6, %v8687_v11 }
 0x4a6   : > { %8672 = vst [vmem:[#allocation42_spill] sm:$0xff] %v8033_v61  ;;  %v8049_v61 = vpop.f32.mrf.mxu1 }
 0x4a7   : > { %8679 = vst [vmem:[#allocation48_spill] sm:$0xff] %v8049_v61 }
 0x4a8   : > { %v8020_v26 = vpop.f32.mrf.mxu3  ;;  %4561 = vst.msk [vmem:[#allocation6 + $0x30] sm:$0xff] %vm4499_vm6, %v8687_v11 }
 0x4a9   : > { %4562 = vst.msk [vmem:[#allocation6 + $0x38] sm:$0xff] %vm4499_vm6, %v8687_v11 }
 0x4aa   : > { %5105 = vst.msk [vmem:[#allocation8] sm:$0xff] %vm4499_vm6, %v8687_v11 }
 0x4ab   : > { %5106 = vst.msk [vmem:[#allocation8 + $0x8] sm:$0xff] %vm4499_vm6, %v8687_v11 }
 0x4ac   : > { %5107 = vst.msk [vmem:[#allocation8 + $0x10] sm:$0xff] %vm4499_vm6, %v8687_v11 }
 0x4ad   : > { %6352 = vmatmul.msk.bf16.gmra.mxu3 %vm3268_vm4, %v3991_v32  ;;  %v8045_v32 = vpop.f32.mrf.mxu0  ;;  %5108 = vst.msk [vmem:[#allocation8 + $0x18] sm:$0xff] %vm4499_vm6, %v8687_v11 }
 0x4ae   : > { %8677 = vst [vmem:[#allocation46_spill] sm:$0xff] %v8045_v32  ;;  %v8057_v60 = vpop.f32.mrf.mxu1 }
 0x4af   : > { %8683 = vst [vmem:[#allocation52_spill] sm:$0xff] %v8057_v60 }
 0x4b0   : > { %v8029_v2 = vpop.f32.mrf.mxu3 }
 0x4b5   : > { %v8055_v58 = vpop.f32.mrf.mxu0 }
 0x4b6   : > { %8682 = vst [vmem:[#allocation51_spill] sm:$0xff] %v8055_v58  ;;  %v4269_v32 = vpop.f32.mrf.mxu1 }
 0x4b8   : > { %v8035_v44 = vpop.f32.mrf.mxu3 }
 0x4b9   : > { %8673 = vst [vmem:[#allocation43_spill] sm:$0xff] %v8035_v44 }
 0x4bd   : > { %6353 = vmatmul.msk.bf16.gmra.mxu3 %vm3268_vm4, %v3992_v47  ;;  %v8060_v47 = vpop.f32.mrf.mxu2  ;;  %v4151_v56 = vpop.f32.mrf.mxu0 }
 0x4be   : > { %8684 = vst [vmem:[#allocation53_spill] sm:$0xff] %v8060_v47 }
 0x4c0   : > { %v8047_v49 = vpop.f32.mrf.mxu3 }
 0x4c1   : > { %8678 = vst [vmem:[#allocation47_spill] sm:$0xff] %v8047_v49 }
 0x4c5   : > { %v4387_v61 = vpop.f32.mrf.mxu2  ;;  %v4153_v48 = vpop.f32.mrf.mxu0 }
 0x4c8   : > { %v8053_v54 = vpop.f32.mrf.mxu3 }
 0x4c9   : > { %8681 = vst [vmem:[#allocation50_spill] sm:$0xff] %v8053_v54  ;;  %v3986_v54 = vld [vmem:[#allocation4 + $0x7d] sm:$0xff] }
 0x4ca   : > { %v3994_v42 = vpack.c.bf16 %v3986_v54, %v3985_v55 }
 0x4cd   : > { %6354 = vmatmul.msk.bf16.gmra.mxu3 %vm3268_vm4, %v3993_v5  ;;  %v4271_v5 = vpop.f32.mrf.mxu1  ;;  %v4389_v55 = vpop.f32.mrf.mxu2 }
 0x4ce   : > { %v4156_v60 = vpop.f32.mrf.mxu0 }
 0x4d0   : > { %v8062_v34 = vpop.f32.mrf.mxu3 }
 0x4d1   : > { %8685 = vst [vmem:[#allocation54_spill] sm:$0xff] %v8062_v34 }
 0x4d8   : > { %v8064_v23 = vpop.f32.mrf.mxu3 }
 0x4d9   : > { %8686 = vst [vmem:[#allocation55_spill] sm:$0xff] %v8064_v23  ;;  %v4392_v23 = vpop.f32.mrf.mxu2 }
 0x4dd   : > { %6355 = vmatmul.msk.bf16.gmra.mxu3 %vm3268_vm4, %v3994_v42  ;;  %v3578_v42 = vadd.f32 %v7981_v22, %v7868_v51  ;;  %v4274_v51 = vpop.f32.mrf.mxu1  ;;  %v3580_v22 = vadd.f32 %v7983_v41, %v7870_v18  ;;  %v8109_v18 = vld [vmem:[%s8690_s2] ss:$0 sm:$0xff] }
 0x4de   : > { %v8115_v41 = vld [vmem:[%s8691_s24] ss:$0 sm:$0xff] }
 0x4df   : > { %v3719_v54 = vadd.f32 %v7892_v4, %v3578_v42  ;;  %v3720_v4 = vadd.f32 %v7904_v1, %v3580_v22  ;;  %v3721_v1 = vadd.f32 %v7914_v38, %v3583_v17 }
 0x4e0   : > { %v8071_v47 = vpop.f32.mrf.mxu3 }
 0x4e1   : > { %8688 = vst [vmem:[#allocation56_spill] sm:$0xff] %v8071_v47  ;;  %v3837_v47 = vadd.f32 %v7894_v62, %v3719_v54  ;;  %v3838_v11 = vadd.f32 %v7906_v3, %v3720_v4  ;;  %v4394_v62 = vpop.f32.mrf.mxu2  ;;  %v3839_v38 = vadd.f32 %v7916_v39, %v3721_v1 }
 0x4e3   : > { %v3955_v42 = vadd.f32 %v7896_v24, %v3837_v47  ;;  %v3956_v63 = vadd.f32 %v7908_v57, %v3838_v11  ;;  %v3957_v11 = vadd.f32 %v7918_v35, %v3839_v38 }
 0x4e5   : > { %v4276_v50 = vpop.f32.mrf.mxu1 }
 0x4e8   : > { %v8092_v58 = vpop.f32.mrf.mxu3 }
 0x4e9   : > { %8689 = vst [vmem:[#allocation57_spill] sm:$0xff] %v8092_v58  ;;  %v4158_v58 = vpop.f32.mrf.mxu0  ;;  %v4397_v54 = vpop.f32.mrf.mxu2 }
 0x4ed   : > { %v4279_v47 = vpop.f32.mrf.mxu1 }
 0x4f0   : > { %v4033_v34 = vpop.f32.mrf.mxu3 }
 0x4f1   : > { %v4073_v49 = vadd.f32 %v4033_v34, %v3955_v42  ;;  %v4161_v17 = vpop.f32.mrf.mxu0 }
 0x4f3   : > { %v4191_v27 = vadd.f32 %v4151_v56, %v4073_v49 }
 0x4f5   : > { %v4309_v44 = vadd.f32 %v4269_v32, %v4191_v27  ;;  %v3585_v27 = vadd.f32 %v7988_v33, %v7880_v52 }
 0x4f7   : > { %v4427_v24 = vadd.f32 %v4387_v61, %v4309_v44  ;;  %v3722_v34 = vadd.f32 %v7926_v12, %v3585_v27 }
 0x4f8   : > { %v4035_v49 = vpop.f32.mrf.mxu3 }
 0x4f9   : > { %v4447_v3 = vmul.f32 %v8109_v18, %v4427_v24  ;;  %v4074_v16 = vadd.f32 %v4035_v49, %v3956_v63  ;;  %v4281_v63 = vpop.f32.mrf.mxu1 }
 0x4fb   : > { %v4467_v56 = vadd.f32 %v8115_v41, %v4447_v3  ;;  %v4192_v32 = vadd.f32 %v4153_v48, %v4074_v16  ;;  %v3588_v48 = vadd.f32 %v7997_v29, %v7884_v37  ;;  %v6701_v29 = vld [vmem:[%s8675_s7 + $0x10] sm:$0xff] }
 0x4fc   : > { %4736 = vmatpush.bf16.msrb.mxu0 %v6701_v29 }
 0x4fd   : > { %v4483_v61 = vmax.f32 %v4467_v56, 0.0  ;;  %v4310_v44 = vadd.f32 %v4271_v5, %v4192_v32  ;;  %v3840_v5 = vadd.f32 %v7928_v7, %v3722_v34  ;;  %v3723_v1 = vadd.f32 %v7938_v10, %v3588_v48  ;;  %v6702_v7 = vld [vmem:[%s8675_s7 + $0x18] sm:$0xff]  ;;  %v4399_v10 = vpop.f32.mrf.mxu2 }
 0x4fe   : > { %4806 = vmatpush.bf16.msrb.mxu1 %v6702_v7 }
 0x4ff   : > { %4500 = vst.msk [vmem:[#allocation5] sm:$0xff] %vm4499_vm6, %v4483_v61  ;;  %v4428_v57 = vadd.f32 %v4389_v55, %v4310_v44  ;;  %v4163_v55 = vpop.f32.mrf.mxu0  ;;  %v3958_v24 = vadd.f32 %v7930_v19, %v3840_v5 }
 0x500   : > { %v4038_v22 = vpop.f32.mrf.mxu3 }
 0x501   : > { %v4448_v52 = vmul.f32 %v8109_v18, %v4428_v57  ;;  %v4075_v33 = vadd.f32 %v4038_v22, %v3957_v11 }
 0x503   : > { %v4468_v39 = vadd.f32 %v8115_v41, %v4448_v52  ;;  %v4193_v4 = vadd.f32 %v4156_v60, %v4075_v33  ;;  %v3841_v60 = vadd.f32 %v7940_v15, %v3723_v1 }
 0x505   : > { %v4484_v42 = vmax.f32 %v4468_v39, 0.0  ;;  %v4311_v12 = vadd.f32 %v4274_v51, %v4193_v4  ;;  %v3959_v15 = vadd.f32 %v7942_v46, %v3841_v60  ;;  %v4402_v52 = vpop.f32.mrf.mxu2 }
 0x507   : > { %4501 = vst.msk [vmem:[#allocation5 + $0x8] sm:$0xff] %vm4499_vm6, %v4484_v42  ;;  %v4429_v35 = vadd.f32 %v4392_v23, %v4311_v12  ;;  %v3590_v23 = vadd.f32 %v8005_v31, %v7890_v59  ;;  %v4166_v34 = vpop.f32.mrf.mxu0 }
 0x508   : > { %v4040_v49 = vpop.f32.mrf.mxu3 }
 0x509   : > { %v4449_v3 = vmul.f32 %v8109_v18, %v4429_v35  ;;  %v4076_v37 = vadd.f32 %v4040_v49, %v3958_v24  ;;  %v3724_v38 = vadd.f32 %v7946_v8, %v3590_v23 }
 0x50b   : > { %v4469_v19 = vadd.f32 %v8115_v41, %v4449_v3  ;;  %v4194_v51 = vadd.f32 %v4158_v58, %v4076_v37  ;;  %v4284_v58 = vpop.f32.mrf.mxu1  ;;  %v3842_v22 = vadd.f32 %v7948_v9, %v3724_v38  ;;  %v3595_v9 = vadd.f32 %v8020_v26, %v7910_v6 }
 0x50d   : > { %v4485_v16 = vmax.f32 %v4469_v19, 0.0  ;;  %v4312_v27 = vadd.f32 %v4276_v50, %v4194_v51  ;;  %v3593_v50 = vadd.f32 %v8014_v0, %v7898_v13  ;;  %v3960_v39 = vadd.f32 %v7950_v14, %v3842_v22  ;;  %v6703_v13 = vld [vmem:[%s8675_s7 + $0x20] sm:$0xff]  ;;  %v4404_v1 = vpop.f32.mrf.mxu2 }
 0x50e   : > { %v4516_v56 = vld [vmem:[#allocation5] ss:$2 sm:$0xff]  ;;  %v4532_v32 = vld [vmem:[#allocation5 + $0x1] ss:$2 sm:$0xff]  ;;  %4876 = vmatpush.bf16.msrb.mxu2 %v6703_v13  ;;  %v3726_v49 = vadd.f32 %v7966_v25, %v3595_v9 }
 0x50f   : > { %v4547_v61 = vmax.f32 %v4516_v56, %v4532_v32  ;;  %4502 = vst.msk [vmem:[#allocation5 + $0x10] sm:$0xff] %vm4499_vm6, %v4485_v16  ;;  %v4430_v44 = vadd.f32 %v4394_v62, %v4312_v27  ;;  %v3725_v46 = vadd.f32 %v7958_v28, %v3593_v50  ;;  %v4168_v0 = vpop.f32.mrf.mxu0  ;;  %v8695_v9 = vld [vmem:[#allocation23_spill] sm:$0xff] }
 0x510   : > { %v4043_v57 = vpop.f32.mrf.mxu3  ;;  %v3844_v25 = vadd.f32 %v7970_v45, %v3726_v49 }
 0x511   : > { %4565 = vst.msk [vmem:[#allocation6 + $0x3] sm:$0xff] %vm4499_vm6, %v4547_v61  ;;  %v4450_v59 = vmul.f32 %v8109_v18, %v4430_v44  ;;  %v4077_v31 = vadd.f32 %v4043_v57, %v3959_v15 }
 0x512   : > { %v3962_v16 = vadd.f32 %v7972_v36, %v3844_v25 }
 0x513   : > { %v4470_v11 = vadd.f32 %v8115_v41, %v4450_v59  ;;  %v4195_v8 = vadd.f32 %v4161_v17, %v4077_v31  ;;  %v8692_v31 = vld [vmem:[#allocation43_spill] sm:$0xff] }
 0x515   : > { %v4486_v62 = vmax.f32 %v4470_v11, 0.0  ;;  %v4313_v33 = vadd.f32 %v4279_v47, %v4195_v8  ;;  %v3843_v47 = vadd.f32 %v7960_v43, %v3725_v46  ;;  %v4407_v32 = vpop.f32.mrf.mxu2 }
 0x517   : > { %4503 = vst.msk [vmem:[#allocation5 + $0x18] sm:$0xff] %vm4499_vm6, %v4486_v62  ;;  %v4431_v48 = vadd.f32 %v4397_v54, %v4313_v33  ;;  %v4286_v54 = vpop.f32.mrf.mxu1  ;;  %v3961_v6 = vadd.f32 %v7962_v53, %v3843_v47  ;;  %v4171_v60 = vpop.f32.mrf.mxu0  ;;  %v8693_v33 = vld [vmem:[#allocation30_spill] sm:$0xff] }
 0x518   : > { %v4045_v4 = vpop.f32.mrf.mxu3  ;;  %v4587_v27 = vld [vmem:[#allocation6 + $0x1] sm:$0xff] }
 0x519   : > { %v4451_v5 = vmul.f32 %v8109_v18, %v4431_v48  ;;  %v4078_v42 = vadd.f32 %v4045_v4, %v3960_v39  ;;  %v4696_v56 = vld [vmem:[#allocation6 + $0x2] sm:$0xff]  ;;  %v8694_v48 = vld [vmem:[#allocation29_spill] sm:$0xff] }
 0x51a   : > { %v4766_v57 = vld [vmem:[#allocation6 + $0x3] sm:$0xff] }
 0x51b   : > { %v4471_v17 = vadd.f32 %v8115_v41, %v4451_v5  ;;  %v4196_v28 = vadd.f32 %v4163_v55, %v4078_v42 }
 0x51d   : > { %v4487_v14 = vmax.f32 %v4471_v17, 0.0  ;;  %v4314_v12 = vadd.f32 %v4281_v63, %v4196_v28  ;;  %v3598_v63 = vadd.f32 %v8029_v2, %v7912_v20  ;;  %v8696_v17 = vld [vmem:[#allocation47_spill] sm:$0xff] }
 0x51e   : > { %v4518_v35 = vld [vmem:[#allocation5 + $0x10] ss:$2 sm:$0xff]  ;;  %v4534_v24 = vld [vmem:[#allocation5 + $0x11] ss:$2 sm:$0xff]  ;;  %v3603_v28 = vadd.f32 %v8696_v17, %v8695_v9 }
 0x51f   : > { %v4548_v3 = vmax.f32 %v4518_v35, %v4534_v24  ;;  %4504 = vst.msk [vmem:[#allocation5 + $0x20] sm:$0xff] %vm4499_vm6, %v4487_v14  ;;  %v4432_v37 = vadd.f32 %v4399_v10, %v4314_v12  ;;  %v4289_v10 = vpop.f32.mrf.mxu1  ;;  %v3727_v53 = vadd.f32 %v7990_v40, %v3598_v63  ;;  %v4173_v22 = vpop.f32.mrf.mxu0  ;;  %v8697_v14 = vld [vmem:[#allocation31_spill] sm:$0xff]  ;;  %v8698_v24 = vld [vmem:[#allocation33_spill] sm:$0xff] }
 0x520   : > { %v4048_v26 = vpop.f32.mrf.mxu3  ;;  %v3729_v49 = vadd.f32 %v8698_v24, %v3603_v28 }
 0x521   : > { %4566 = vst.msk [vmem:[#allocation6 + $0xb] sm:$0xff] %vm4499_vm6, %v4548_v3  ;;  %v4452_v43 = vmul.f32 %v8109_v18, %v4432_v37  ;;  %v4079_v55 = vadd.f32 %v4048_v26, %v3961_v6  ;;  %v3845_v40 = vadd.f32 %v7992_v30, %v3727_v53  ;;  %v8699_v37 = vld [vmem:[#allocation32_spill] sm:$0xff] }
 0x523   : > { %v4472_v29 = vadd.f32 %v8115_v41, %v4452_v43  ;;  %v4197_v7 = vadd.f32 %v4166_v34, %v4079_v55  ;;  %v3963_v39 = vadd.f32 %v8694_v48, %v3845_v40  ;;  %v8708_v48 = vld [vmem:[#allocation39_spill] sm:$0xff] }
 0x525   : > { %v4488_v23 = vmax.f32 %v4472_v29, 0.0  ;;  %v4315_v19 = vadd.f32 %v4284_v58, %v4197_v7  ;;  %v3600_v58 = vadd.f32 %v8692_v31, %v7924_v21 }
 0x527   : > { %4505 = vst.msk [vmem:[#allocation5 + $0x28] sm:$0xff] %vm4499_vm6, %v4488_v23  ;;  %v4433_v51 = vadd.f32 %v4402_v52, %v4315_v19  ;;  %v3728_v46 = vadd.f32 %v8693_v33, %v3600_v58  ;;  %v4291_v4 = vpop.f32.mrf.mxu1  ;;  %v4176_v26 = vpop.f32.mrf.mxu0  ;;  %v8700_v23 = vld [vmem:[#allocation24_spill] sm:$0xff]  ;;  %v8701_v19 = vld [vmem:[#allocation50_spill] sm:$0xff] }
 0x528   : > { %v4050_v20 = vpop.f32.mrf.mxu3  ;;  %v4588_v2 = vld [vmem:[#allocation6 + $0x9] sm:$0xff]  ;;  %v3605_v53 = vadd.f32 %v8701_v19, %v8700_v23  ;;  %v8713_v19 = vld [vmem:[#allocation42_spill] sm:$0xff] }
 0x529   : > { %v4697_v38 = vld [vmem:[#allocation6 + $0xa] sm:$0xff]  ;;  %v4453_v45 = vmul.f32 %v8109_v18, %v4433_v51  ;;  %v4080_v44 = vadd.f32 %v4050_v20, %v3962_v16  ;;  %v4595_v15 = vpack.c.bf16 %v4588_v2, %v4587_v27  ;;  %v3846_v12 = vadd.f32 %v8697_v14, %v3728_v46  ;;  %v8702_v16 = vld [vmem:[#allocation34_spill] sm:$0xff] }
 0x52a   : > { %v4767_v61 = vld [vmem:[#allocation6 + $0xb] sm:$0xff]  ;;  %v4704_v34 = vpack.c.bf16 %v4697_v38, %v4696_v56  ;;  %v3847_v27 = vadd.f32 %v8702_v16, %v3729_v49 }
 0x52b   : > { %v4774_v59 = vpack.c.bf16 %v4767_v61, %v4766_v57  ;;  %v4473_v36 = vadd.f32 %v8115_v41, %v4453_v45  ;;  %v4198_v50 = vadd.f32 %v4168_v0, %v4080_v44  ;;  %6389 = vmatmul.msk.bf16.vlgmr.msrb.gmra.mxu3 %vm4499_vm6, %v4595_v15  ;;  %v4409_v0 = vpop.f32.mrf.mxu2  ;;  %v3964_v6 = vadd.f32 %v8699_v37, %v3846_v12  ;;  %v4836_v55 = vld [vmem:[#allocation6 + $0x4] sm:$0xff]  ;;  %v8711_v37 = vld [vmem:[#allocation26_spill] sm:$0xff]  ;;  %v8714_v16 = vld [vmem:[#allocation41_spill] sm:$0xff] }
 0x52c   : > { %6407 = vmatmul.msk.bf16.vlgmr.msrb.gmra.mxu0 %vm4499_vm6, %v4704_v34  ;;  %v8703_v61 = vld [vmem:[#allocation36_spill] sm:$0xff]  ;;  %v8704_v34 = vld [vmem:[#allocation35_spill] sm:$0xff] }
 0x52d   : > { %6417 = vmatmul.msk.bf16.vlgmr.msrb.gmra.mxu1 %vm4499_vm6, %v4774_v59  ;;  %v4489_v11 = vmax.f32 %v4473_v36, 0.0  ;;  %v4316_v8 = vadd.f32 %v4286_v54, %v4198_v50  ;;  %v3730_v45 = vadd.f32 %v8703_v61, %v3605_v53  ;;  %v3965_v57 = vadd.f32 %v8704_v34, %v3847_v27  ;;  %v8705_v36 = vld [vmem:[#allocation25_spill] sm:$0xff]  ;;  %v8706_v50 = vld [vmem:[#allocation54_spill] sm:$0xff]  ;;  %v8710_v49 = vld [vmem:[#allocation40_spill] sm:$0xff] }
 0x52e   : > { %v4520_v52 = vld [vmem:[#allocation5 + $0x20] ss:$2 sm:$0xff]  ;;  %v4536_v62 = vld [vmem:[#allocation5 + $0x21] ss:$2 sm:$0xff] }
 0x52f   : > { %v4549_v30 = vmax.f32 %v4520_v52, %v4536_v62  ;;  %4506 = vst.msk [vmem:[#allocation5 + $0x30] sm:$0xff] %vm4499_vm6, %v4489_v11  ;;  %v4434_v21 = vadd.f32 %v4404_v1, %v4316_v8  ;;  %v4178_v58 = vpop.f32.mrf.mxu0  ;;  %v3608_v11 = vadd.f32 %v8706_v50, %v8705_v36  ;;  %v8707_v52 = vld [vmem:[#allocation37_spill] sm:$0xff]  ;;  %v8715_v61 = vld [vmem:[#allocation27_spill] sm:$0xff]  ;;  %v8718_v36 = vld [vmem:[#allocation46_spill] sm:$0xff] }
 0x530   : > { %v4053_v5 = vpop.f32.mrf.mxu3  ;;  %v3848_v62 = vadd.f32 %v8707_v52, %v3730_v45  ;;  %v8716_v45 = vld [vmem:[#allocation56_spill] sm:$0xff] }
 0x531   : > { %4567 = vst.msk [vmem:[#allocation6 + $0x13] sm:$0xff] %vm4499_vm6, %v4549_v30  ;;  %v4454_v42 = vmul.f32 %v8109_v18, %v4434_v21  ;;  %v4081_v13 = vadd.f32 %v4053_v5, %v3963_v39  ;;  %v3731_v39 = vadd.f32 %v8708_v48, %v3608_v11  ;;  %v8709_v5 = vld [vmem:[#allocation38_spill] sm:$0xff] }
 0x533   : > { %v4474_v47 = vadd.f32 %v8115_v41, %v4454_v42  ;;  %v4199_v54 = vadd.f32 %v4171_v60, %v4081_v13  ;;  %v4294_v60 = vpop.f32.mrf.mxu1  ;;  %v4412_v56 = vpop.f32.mrf.mxu2  ;;  %v3966_v42 = vadd.f32 %v8709_v5, %v3848_v62 }
 0x535   : > { %v4490_v35 = vmax.f32 %v4474_v47, 0.0  ;;  %v4317_v1 = vadd.f32 %v4289_v10, %v4199_v54 }
 0x537   : > { %4507 = vst.msk [vmem:[#allocation5 + $0x38] sm:$0xff] %vm4499_vm6, %v4490_v35  ;;  %v4435_v3 = vadd.f32 %v4407_v32, %v4317_v1 }
 0x538   : > { %v4055_v43 = vpop.f32.mrf.mxu3  ;;  %v4837_v63 = vld [vmem:[#allocation6 + $0xc] sm:$0xff] }
 0x539   : > { %v4455_v29 = vmul.f32 %v8109_v18, %v4435_v3  ;;  %v4082_v7 = vadd.f32 %v4055_v43, %v3964_v6  ;;  %v4844_v25 = vpack.c.bf16 %v4837_v63, %v4836_v55  ;;  %v4589_v13 = vld [vmem:[#allocation6 + $0x11] sm:$0xff]  ;;  %v3849_v3 = vadd.f32 %v8710_v49, %v3731_v39  ;;  %v8712_v6 = vld [vmem:[#allocation55_spill] sm:$0xff]  ;;  %v4181_v63 = vpop.f32.mrf.mxu0 }
 0x53a   : > { %v4768_v1 = vld [vmem:[#allocation6 + $0x13] sm:$0xff] }
 0x53b   : > { %v4475_v10 = vadd.f32 %v8115_v41, %v4455_v29  ;;  %v4200_v51 = vadd.f32 %v4173_v22, %v4082_v7  ;;  %6427 = vmatmul.msk.bf16.vlgmr.msrb.gmra.mxu2 %vm4499_vm6, %v4844_v25  ;;  %v4296_v33 = vpop.f32.mrf.mxu1  ;;  %v4414_v21 = vpop.f32.mrf.mxu2  ;;  %v3967_v27 = vadd.f32 %v8714_v16, %v3849_v3 }
 0x53d   : > { %v4491_v32 = vmax.f32 %v4475_v10, 0.0  ;;  %v4318_v20 = vadd.f32 %v4291_v4, %v4200_v51 }
 0x53e   : > { %v4522_v2 = vld [vmem:[#allocation5 + $0x30] ss:$2 sm:$0xff]  ;;  %v4538_v38 = vld [vmem:[#allocation5 + $0x31] ss:$2 sm:$0xff] }
 0x53f   : > { %v4550_v44 = vmax.f32 %v4522_v2, %v4538_v38  ;;  %4508 = vst.msk [vmem:[#allocation5 + $0x40] sm:$0xff] %vm4499_vm6, %v4491_v32  ;;  %v4436_v15 = vadd.f32 %v4409_v0, %v4318_v20  ;;  %v4698_v0 = vld [vmem:[#allocation6 + $0x12] sm:$0xff]  ;;  %v6699_v38 = vld [vmem:[%s8675_s7] sm:$0xff] }
 0x540   : > { %v4058_v59 = vpop.f32.mrf.mxu3  ;;  %4674 = vmatpush.bf16.msra.mxu3 %v6699_v38 }
 0x541   : > { %4568 = vst.msk [vmem:[#allocation6 + $0x1b] sm:$0xff] %vm4499_vm6, %v4550_v44  ;;  %v4456_v40 = vmul.f32 %v8109_v18, %v4436_v15  ;;  %v4083_v31 = vadd.f32 %v4058_v59, %v3965_v57  ;;  %v3613_v44 = vadd.f32 %v8716_v45, %v8715_v61  ;;  %v8717_v57 = vld [vmem:[#allocation44_spill] sm:$0xff] }
 0x543   : > { %v4476_v8 = vadd.f32 %v8115_v41, %v4456_v40  ;;  %v4201_v22 = vadd.f32 %v4176_v26, %v4083_v31  ;;  %v3610_v26 = vadd.f32 %v8712_v6, %v8711_v37  ;;  %v4299_v25 = vpop.f32.mrf.mxu1  ;;  %v3733_v50 = vadd.f32 %v8718_v36, %v3613_v44  ;;  %v6705_v36 = vld [vmem:[%s8675_s7 + $0x30] sm:$0xff] }
 0x544   : > { %5016 = vmatpush.bf16.msra.mxu0 %v6705_v36 }
 0x545   : > { %v4492_v46 = vmax.f32 %v4476_v8, 0.0  ;;  %v4319_v30 = vadd.f32 %v4294_v60, %v4201_v22  ;;  %v3732_v53 = vadd.f32 %v8713_v19, %v3610_v26  ;;  %v8719_v8 = vld [vmem:[#allocation45_spill] sm:$0xff]  ;;  %v8725_v26 = vmov 0.0  }
 0x546   : > { %4564 = vst.msk [vmem:[#allocation6 + $0x40] sm:$0x3f] %vm4563_vm7, %v8725_v26 }
 0x547   : > { %4509 = vst.msk [vmem:[#allocation5 + $0x48] sm:$0xff] %vm4499_vm6, %v4492_v46  ;;  %v4437_v4 = vadd.f32 %v4412_v56, %v4319_v30  ;;  %v4417_v56 = vpop.f32.mrf.mxu2  ;;  %v3850_v59 = vadd.f32 %v8717_v57, %v3732_v53 }
 0x548   : > { %v4060_v9 = vpop.f32.mrf.mxu3  ;;  %v4590_v17 = vld [vmem:[#allocation6 + $0x19] sm:$0xff]  ;;  %5109 = vst.msk [vmem:[#allocation8 + $0x20] sm:$0x3f] %vm4563_vm7, %v8725_v26 }
 0x549   : > { %v4699_v28 = vld [vmem:[#allocation6 + $0x1a] sm:$0xff]  ;;  %v4457_v54 = vmul.f32 %v8109_v18, %v4437_v4  ;;  %v4084_v14 = vadd.f32 %v4060_v9, %v3966_v42  ;;  %v4596_v12 = vpack.c.bf16 %v4590_v17, %v4589_v13  ;;  %v3968_v22 = vadd.f32 %v8719_v8, %v3850_v59  ;;  %v8720_v4 = vld [vmem:[#allocation48_spill] sm:$0xff]  ;;  %v8722_v13 = vld [vmem:[#allocation57_spill] sm:$0xff]  ;;  %5447 = vst.msk [vmem:[#allocation10] sm:$0xff] %vm5433_vm8, %v8725_v26 }
 0x54a   : > { %v4769_v47 = vld [vmem:[#allocation6 + $0x1b] sm:$0xff]  ;;  %v4705_v35 = vpack.c.bf16 %v4699_v28, %v4698_v0  ;;  %v3851_v5 = vadd.f32 %v8720_v4, %v3733_v50  ;;  %v8721_v42 = vld [vmem:[#allocation28_spill] sm:$0xff]  ;;  %5448 = vst.msk [vmem:[#allocation10 + $0x8] sm:$0xff] %vm5433_vm8, %v8725_v26 }
 0x54b   : > { %v4775_v24 = vpack.c.bf16 %v4769_v47, %v4768_v1  ;;  %v4477_v43 = vadd.f32 %v8115_v41, %v4457_v54  ;;  %v4202_v55 = vadd.f32 %v4178_v58, %v4084_v14  ;;  %6390 = vmatmul.msk.bf16.gmra.mxu3 %vm4499_vm6, %v4596_v12  ;;  %v4183_v58 = vpop.f32.mrf.mxu0  ;;  %v4301_v52 = vpop.f32.mrf.mxu1  ;;  %v3615_v0 = vadd.f32 %v8722_v13, %v8721_v42  ;;  %v8723_v12 = vld [vmem:[#allocation49_spill] sm:$0xff]  ;;  %v8724_v1 = vld [vmem:[#allocation51_spill] sm:$0xff] }
 0x54c   : > { %6408 = vmatmul.msk.bf16.gmra.mxu0 %vm4499_vm6, %v4705_v35  ;;  %v3969_v35 = vadd.f32 %v8723_v12, %v3851_v5  ;;  %v6704_v5 = vld [vmem:[%s8675_s7 + $0x28] sm:$0xff]  ;;  %5663 = vst.msk [vmem:[#allocation12] sm:$0xff] %vm5433_vm8, %v8725_v26 }
 0x54d   : > { %6418 = vmatmul.msk.bf16.gmra.mxu1 %vm4499_vm6, %v4775_v24  ;;  %v4493_v29 = vmax.f32 %v4477_v43, 0.0  ;;  %v4320_v7 = vadd.f32 %v4296_v33, %v4202_v55  ;;  %v4838_v33 = vld [vmem:[#allocation6 + $0x14] sm:$0xff]  ;;  %v3734_v24 = vadd.f32 %v8724_v1, %v3615_v0  ;;  %4946 = vmatpush.bf16.msrb.mxu3 %v6704_v5  ;;  %5450 = vst.msk [vmem:[#allocation10 + $0x10] sm:$0xf] %vm5449_vm9, %v8725_v26 }
 0x54e   : > { %v4524_v60 = vld [vmem:[#allocation5 + $0x40] ss:$2 sm:$0xff]  ;;  %v4540_v23 = vld [vmem:[#allocation5 + $0x41] ss:$2 sm:$0xff]  ;;  %5664 = vst.msk [vmem:[#allocation12 + $0x8] sm:$0xf] %vm5449_vm9, %v8725_v26 }
 0x54f   : > { %v4551_v10 = vmax.f32 %v4524_v60, %v4540_v23  ;;  %4510 = vst.msk [vmem:[#allocation5 + $0x50] sm:$0xff] %vm4499_vm6, %v4493_v29  ;;  %v4438_v51 = vadd.f32 %v4414_v21, %v4320_v7  ;;  %v4419_v39 = vpop.f32.mrf.mxu2 }
 0x550   : > { %v4063_v32 = vpop.f32.mrf.mxu3  ;;  %5861 = vst.msk [vmem:[#allocation14] sm:$0x3f] %vm5860_vm10, %v8725_v26  ;;  %v6742_v26 = vld [vmem:[%s8615_s19 + $0x48] sm:$0xff] }
 0x551   : > { %4569 = vst.msk [vmem:[#allocation6 + $0x23] sm:$0xff] %vm4499_vm6, %v4551_v10  ;;  %v4458_v20 = vmul.f32 %v8109_v18, %v4438_v51  ;;  %v4085_v2 = vadd.f32 %v4063_v32, %v3967_v27  ;;  %v8727_v51 = vld [vmem:[#allocation53_spill] sm:$0xff] }
 0x553   : > { %v4478_v15 = vadd.f32 %v8115_v41, %v4458_v20  ;;  %v4203_v34 = vadd.f32 %v4181_v63, %v4085_v2  ;;  %v4186_v37 = vpop.f32.mrf.mxu0  ;;  %v4304_v63 = vpop.f32.mrf.mxu1 }
 0x555   : > { %v4494_v40 = vmax.f32 %v4478_v15, 0.0  ;;  %v4321_v31 = vadd.f32 %v4299_v25, %v4203_v34  ;;  %v8726_v25 = vld [vmem:[#allocation52_spill] sm:$0xff] }
 0x556   : > { %v3852_v60 = vadd.f32 %v8726_v25, %v3734_v24  ;;  %v4978_v25 = vld [vmem:[#allocation6 + $0x16] sm:$0xff] }
 0x557   : > { %4511 = vst.msk [vmem:[#allocation5 + $0x58] sm:$0xff] %vm4499_vm6, %v4494_v40  ;;  %v4439_v11 = vadd.f32 %v4417_v56, %v4321_v31  ;;  %v4422_v23 = vpop.f32.mrf.mxu2 }
 0x558   : > { %v4065_v62 = vpop.f32.mrf.mxu3  ;;  %v4839_v46 = vld [vmem:[#allocation6 + $0x1c] sm:$0xff]  ;;  %v3970_v16 = vadd.f32 %v8727_v51, %v3852_v60 }
 0x559   : > { %v4459_v30 = vmul.f32 %v8109_v18, %v4439_v11  ;;  %v4086_v21 = vadd.f32 %v4065_v62, %v3968_v22  ;;  %v4845_v48 = vpack.c.bf16 %v4839_v46, %v4838_v33  ;;  %v4591_v27 = vld [vmem:[#allocation6 + $0x21] sm:$0xff] }
 0x55a   : > { %v4700_v56 = vld [vmem:[#allocation6 + $0x22] sm:$0xff] }
 0x55b   : > { %v4479_v9 = vadd.f32 %v8115_v41, %v4459_v30  ;;  %v4204_v17 = vadd.f32 %v4183_v58, %v4086_v21  ;;  %6428 = vmatmul.msk.bf16.gmra.mxu2 %vm4499_vm6, %v4845_v48  ;;  %v4770_v34 = vld [vmem:[#allocation6 + $0x23] sm:$0xff]  ;;  %v4188_v57 = vpop.f32.mrf.mxu0  ;;  %v4306_v58 = vpop.f32.mrf.mxu1 }
 0x55d   : > { %v4495_v28 = vmax.f32 %v4479_v9, 0.0  ;;  %v4322_v47 = vadd.f32 %v4301_v52, %v4204_v17 }
 0x55e   : > { %v4526_v54 = vld [vmem:[#allocation5 + $0x50] ss:$2 sm:$0xff]  ;;  %v4542_v14 = vld [vmem:[#allocation5 + $0x51] ss:$2 sm:$0xff] }
 0x55f   : > { %v4552_v49 = vmax.f32 %v4526_v54, %v4542_v14  ;;  %4512 = vst.msk [vmem:[#allocation5 + $0x60] sm:$0xff] %vm4499_vm6, %v4495_v28  ;;  %v4440_v3 = vadd.f32 %v4419_v39, %v4322_v47  ;;  %v4424_v8 = vpop.f32.mrf.mxu2 }
 0x560   : > { %v4068_v6 = vpop.f32.mrf.mxu3 }
 0x561   : > { %4570 = vst.msk [vmem:[#allocation6 + $0x2b] sm:$0xff] %vm4499_vm6, %v4552_v49  ;;  %v4460_v43 = vmul.f32 %v8109_v18, %v4440_v3  ;;  %v4087_v55 = vadd.f32 %v4068_v6, %v3969_v35  ;;  %v4574_v49 = vld [vmem:[#allocation6 + $0x8] sm:$0xff] }
 0x562   : > { %v4977_v3 = vld [vmem:[#allocation6 + $0xe] sm:$0xff]  ;;  %v4976_v6 = vld [vmem:[#allocation6 + $0x6] sm:$0xff] }
 0x563   : > { %v4480_v29 = vadd.f32 %v8115_v41, %v4460_v43  ;;  %v4205_v7 = vadd.f32 %v4186_v37, %v4087_v55  ;;  %v4573_v37 = vld [vmem:[#allocation6] sm:$0xff]  ;;  %v4984_v55 = vpack.c.bf16 %v4977_v3, %v4976_v6 }
 0x564   : > { %v4581_v43 = vpack.c.bf16 %v4574_v49, %v4573_v37 }
 0x565   : > { %v4496_v19 = vmax.f32 %v4480_v29, 0.0  ;;  %v4323_v53 = vadd.f32 %v4304_v63, %v4205_v7  ;;  %v4576_v63 = vld [vmem:[#allocation6 + $0x18] sm:$0xff]  ;;  %v4575_v7 = vld [vmem:[#allocation6 + $0x10] sm:$0xff] }
 0x566   : > { %v4979_v29 = vld [vmem:[#allocation6 + $0x1e] sm:$0xff]  ;;  %v4582_v60 = vpack.c.bf16 %v4576_v63, %v4575_v7 }
 0x567   : > { %4513 = vst.msk [vmem:[#allocation5 + $0x68] sm:$0xff] %vm4499_vm6, %v4496_v19  ;;  %v4441_v10 = vadd.f32 %v4422_v23, %v4323_v53  ;;  %v4985_v23 = vpack.c.bf16 %v4979_v29, %v4978_v25  ;;  %v6708_v63 = vld [vmem:[%s8728_s10 + $0x10] sm:$0xff]  ;;  %v6707_v29 = vld [vmem:[%s8728_s10 + $0x8] sm:$0xff] }
 0x568   : > { %v4070_v32 = vpop.f32.mrf.mxu3  ;;  %v4592_v20 = vld [vmem:[#allocation6 + $0x29] sm:$0xff]  ;;  %5150 = vmatpush.bf16.msra.mxu1 %v6707_v29 }
 0x569   : > { %v4701_v2 = vld [vmem:[#allocation6 + $0x2a] sm:$0xff]  ;;  %v4461_v61 = vmul.f32 %v8109_v18, %v4441_v10  ;;  %v4088_v45 = vadd.f32 %v4070_v32, %v3970_v16  ;;  %v4597_v44 = vpack.c.bf16 %v4592_v20, %v4591_v27  ;;  %v4577_v10 = vld [vmem:[#allocation6 + $0x20] sm:$0xff] }
 0x56a   : > { %v4771_v38 = vld [vmem:[#allocation6 + $0x2b] sm:$0xff]  ;;  %v4706_v15 = vpack.c.bf16 %v4701_v2, %v4700_v56 }
 0x56b   : > { %v4776_v59 = vpack.c.bf16 %v4771_v38, %v4770_v34  ;;  %v4481_v40 = vadd.f32 %v8115_v41, %v4461_v61  ;;  %v4206_v31 = vadd.f32 %v4188_v57, %v4088_v45  ;;  %6391 = vmatmul.msk.bf16.gmra.mxu3 %vm4499_vm6, %v4597_v44  ;;  %v4840_v48 = vld [vmem:[#allocation6 + $0x24] sm:$0xff]  ;;  %v4907_v45 = vld [vmem:[#allocation6 + $0xd] sm:$0xff] }
 0x56c   : > { %6409 = vmatmul.msk.bf16.gmra.mxu0 %vm4499_vm6, %v4706_v15  ;;  %v4578_v19 = vld [vmem:[#allocation6 + $0x28] sm:$0xff] }
 0x56d   : > { %6419 = vmatmul.msk.bf16.gmra.mxu1 %vm4499_vm6, %v4776_v59  ;;  %v4497_v50 = vmax.f32 %v4481_v40, 0.0  ;;  %v4324_v11 = vadd.f32 %v4306_v58, %v4206_v31  ;;  %v4980_v51 = vld [vmem:[#allocation6 + $0x26] sm:$0xff]  ;;  %v4583_v16 = vpack.c.bf16 %v4578_v19, %v4577_v10  ;;  %v4909_v59 = vld [vmem:[#allocation6 + $0x1d] sm:$0xff]  ;;  %v4908_v40 = vld [vmem:[#allocation6 + $0x15] sm:$0xff] }
 0x56e   : > { %v4528_v22 = vld [vmem:[#allocation5 + $0x60] ss:$2 sm:$0xff]  ;;  %v4544_v52 = vld [vmem:[#allocation5 + $0x61] ss:$2 sm:$0xff]  ;;  %v4915_v31 = vpack.c.bf16 %v4909_v59, %v4908_v40 }
 0x56f   : > { %v4553_v62 = vmax.f32 %v4528_v22, %v4544_v52  ;;  %4514 = vst.msk [vmem:[#allocation5 + $0x70] sm:$0xff] %vm4499_vm6, %v4497_v50  ;;  %v4442_v33 = vadd.f32 %v4424_v8, %v4324_v11  ;;  %v4906_v15 = vld [vmem:[#allocation6 + $0x5] sm:$0xff] }
 0x570   : > { %v4914_v34 = vpack.c.bf16 %v4907_v45, %v4906_v15  ;;  %v4910_v11 = vld [vmem:[#allocation6 + $0x25] sm:$0xff] }
 0x571   : > { %4571 = vst.msk [vmem:[#allocation6 + $0x33] sm:$0xff] %vm4499_vm6, %v4553_v62  ;;  %v4462_v46 = vmul.f32 %v8109_v18, %v4442_v33  ;;  %v8325_v10 = vld [vmem:[%s8729_s8] ss:$0 sm:$0xff]  ;;  %s6695_s8 = sshll.u32 %s7004_s4, 1 }
 0x572   : > { %s6046_s2 = scalar_lea.hbm %s8618_s22, %s6695_s8 }
 0x573   : > { %v4482_v30 = vadd.f32 %v8115_v41, %v4462_v46  ;;  %s6050_s24 = sshll.u32 %s6046_s2, 4  ;;  %s6051_s24 = int_to_ptr.hbm [resolvable:$true] %s6050_s24 }
 0x575   : > { %v4498_v21 = vmax.f32 %v4482_v30, 0.0 }
 0x577   : > { %4515 = vst.msk [vmem:[#allocation5 + $0x78] sm:$0xff] %vm4499_vm6, %v4498_v21 }
 0x578   : > { %v4841_v39 = vld [vmem:[#allocation6 + $0x2c] sm:$0xff] }
 0x579   : > { %v4846_v4 = vpack.c.bf16 %v4841_v39, %v4840_v48  ;;  %v4593_v18 = vld [vmem:[#allocation6 + $0x31] sm:$0xff] }
 0x57a   : > { %v4702_v41 = vld [vmem:[#allocation6 + $0x32] sm:$0xff] }
 0x57b   : > { %6429 = vmatmul.msk.bf16.gmra.mxu2 %vm4499_vm6, %v4846_v4  ;;  %v4772_v9 = vld [vmem:[#allocation6 + $0x33] sm:$0xff] }
 0x57c   : > { %v4981_v53 = vld [vmem:[#allocation6 + $0x2e] sm:$0xff] }
 0x57d   : > { %v4986_v27 = vpack.c.bf16 %v4981_v53, %v4980_v51  ;;  %v4579_v2 = vld [vmem:[#allocation6 + $0x30] sm:$0xff] }
 0x57e   : > { %v4530_v42 = vld [vmem:[#allocation5 + $0x70] ss:$2 sm:$0xff]  ;;  %v4546_v13 = vld [vmem:[#allocation5 + $0x71] ss:$2 sm:$0xff] }
 0x57f   : > { %v4554_v0 = vmax.f32 %v4530_v42, %v4546_v13  ;;  %v4911_v50 = vld [vmem:[#allocation6 + $0x2d] sm:$0xff] }
 0x580   : > { %v4916_v8 = vpack.c.bf16 %v4911_v50, %v4910_v11 }
 0x581   : > { %4572 = vst.msk [vmem:[#allocation6 + $0x3b] sm:$0xff] %vm4499_vm6, %v4554_v0 }
 0x588   : > { %v4594_v17 = vld [vmem:[#allocation6 + $0x39] sm:$0xff] }
 0x589   : > { %v4703_v28 = vld [vmem:[#allocation6 + $0x3a] sm:$0xff]  ;;  %v4598_v54 = vpack.c.bf16 %v4594_v17, %v4593_v18 }
 0x58a   : > { %v4773_v47 = vld [vmem:[#allocation6 + $0x3b] sm:$0xff]  ;;  %v4707_v14 = vpack.c.bf16 %v4703_v28, %v4702_v41 }
 0x58b   : > { %v4777_v12 = vpack.c.bf16 %v4773_v47, %v4772_v9  ;;  %v4842_v35 = vld [vmem:[#allocation6 + $0x34] sm:$0xff]  ;;  %v4843_v1 = vld [vmem:[#allocation6 + $0x3c] sm:$0xff]  ;;  %6392 = vmatmul.msk.bf16.gmra.mxu3 %vm4499_vm6, %v4598_v54 }
 0x58c   : > { %v4847_v24 = vpack.c.bf16 %v4843_v1, %v4842_v35  ;;  %6410 = vmatmul.msk.bf16.gmra.mxu0 %vm4499_vm6, %v4707_v14  ;;  %v4580_v56 = vld [vmem:[#allocation6 + $0x38] sm:$0xff]  ;;  %v6706_v14 = vld [vmem:[%s8728_s10] sm:$0xff] }
 0x58d   : > { %6420 = vmatmul.msk.bf16.gmra.mxu1 %vm4499_vm6, %v4777_v12  ;;  %v4982_v32 = vld [vmem:[#allocation6 + $0x36] sm:$0xff]  ;;  %v4983_v20 = vld [vmem:[#allocation6 + $0x3e] sm:$0xff]  ;;  %v4584_v38 = vpack.c.bf16 %v4580_v56, %v4579_v2  ;;  %5181 = vmatpush.bf16.msra.mxu2 %v6706_v14 }
 0x58e   : > { %6430 = vmatmul.msk.bf16.gmra.mxu2 %vm4499_vm6, %v4847_v24  ;;  %v4987_v61 = vpack.c.bf16 %v4983_v20, %v4982_v32  ;;  %v4912_v62 = vld [vmem:[#allocation6 + $0x35] sm:$0xff]  ;;  %v4913_v33 = vld [vmem:[#allocation6 + $0x3d] sm:$0xff] }
 0x58f   : > { %v4917_v30 = vpack.c.bf16 %v4913_v33, %v4912_v62 }
 0x59b   : > { %6397 = vmatmul.msk.bf16.vlgmr.msra.gmra.mxu3 %vm4499_vm6, %v4581_v43 }
 0x59c   : > { %6447 = vmatmul.msk.bf16.vlgmr.msra.gmra.mxu0 %vm4499_vm6, %v4984_v55  ;;  %5221 = vmatpush.bf16.msra.mxu3 %v6708_v63 }
 0x5a9   : > { %v4738_v46 = vpop.f32.mrf.mxu0 }
 0x5aa   : > { %v4808_v35 = vpop.f32.mrf.mxu1 }
 0x5ab   : > { %6398 = vmatmul.msk.bf16.gmra.mxu3 %vm4499_vm6, %v4582_v60 }
 0x5ac   : > { %6448 = vmatmul.msk.bf16.gmra.mxu0 %vm4499_vm6, %v4985_v23 }
 0x5ae   : > { %v4629_v44 = vpop.f32.mrf.mxu3 }
 0x5b1   : > { %v4740_v48 = vpop.f32.mrf.mxu0 }
 0x5b2   : > { %v4810_v55 = vpop.f32.mrf.mxu1 }
 0x5b6   : > { %v4631_v57 = vpop.f32.mrf.mxu3 }
 0x5bb   : > { %6399 = vmatmul.msk.bf16.gmra.mxu3 %vm4499_vm6, %v4583_v16 }
 0x5bc   : > { %6449 = vmatmul.msk.bf16.gmra.mxu0 %vm4499_vm6, %v4986_v27  ;;  %v8330_v27 = vld [vmem:[%s8730_s9] ss:$0 sm:$0xff] }
 0x5be   : > { %v4878_v24 = vpop.f32.mrf.mxu2 }
 0x5c6   : > { %v4880_v7 = vpop.f32.mrf.mxu2 }
 0x5c9   : > { %v4743_v4 = vpop.f32.mrf.mxu0 }
 0x5ca   : > { %v4813_v32 = vpop.f32.mrf.mxu1 }
 0x5cb   : > { %6400 = vmatmul.msk.bf16.gmra.mxu3 %vm4499_vm6, %v4584_v38 }
 0x5cc   : > { %6450 = vmatmul.msk.bf16.gmra.mxu0 %vm4499_vm6, %v4987_v61 }
 0x5ce   : > { %v4634_v58 = vpop.f32.mrf.mxu3 }
 0x5d1   : > { %v4745_v42 = vpop.f32.mrf.mxu0 }
 0x5d2   : > { %v4815_v50 = vpop.f32.mrf.mxu1 }
 0x5d6   : > { %v8287_v36 = vpop.f32.mrf.mxu3 }
 0x5db   : > { %6437 = vmatmul.msk.bf16.vlgmr.msrb.gmra.mxu3 %vm4499_vm6, %v4914_v34 }
 0x5de   : > { %v4883_v2 = vpop.f32.mrf.mxu2 }
 0x5e6   : > { %v4885_v33 = vpop.f32.mrf.mxu2 }
 0x5e9   : > { %v8299_v0 = vpop.f32.mrf.mxu0 }
 0x5eb   : > { %6438 = vmatmul.msk.bf16.gmra.mxu3 %vm4499_vm6, %v4915_v31 }
 0x5ee   : > { %v8290_v22 = vpop.f32.mrf.mxu3 }
 0x5f1   : > { %v8301_v41 = vpop.f32.mrf.mxu0 }
 0x5f6   : > { %v8292_v52 = vpop.f32.mrf.mxu3 }
 0x5fb   : > { %6439 = vmatmul.msk.bf16.gmra.mxu3 %vm4499_vm6, %v4916_v8 }
 0x609   : > { %v8303_v17 = vpop.f32.mrf.mxu0 }
 0x60b   : > { %6440 = vmatmul.msk.bf16.gmra.mxu3 %vm4499_vm6, %v4917_v30 }
 0x60e   : > { %v8295_v21 = vpop.f32.mrf.mxu3 }
 0x611   : > { %v8307_v54 = vpop.f32.mrf.mxu0 }
 0x616   : > { %v8297_v39 = vpop.f32.mrf.mxu3 }
 0x619   : > { %v5018_v49 = vpop.f32.mrf.mxu0 }
 0x61e   : > { %v4676_v5 = vpop.f32.mrf.mxu3 }
 0x61f   : > { %v4677_v1 = vadd.f32 %v4676_v5, %v4629_v44 }
 0x621   : > { %v4758_v3 = vadd.f32 %v4738_v46, %v4677_v1  ;;  %v5020_v25 = vpop.f32.mrf.mxu0  ;;  %v4888_v1 = vpop.f32.mrf.mxu2 }
 0x623   : > { %v4828_v43 = vadd.f32 %v4808_v35, %v4758_v3 }
 0x625   : > { %v4898_v23 = vadd.f32 %v4878_v24, %v4828_v43 }
 0x626   : > { %v4678_v13 = vpop.f32.mrf.mxu3 }
 0x627   : > { %v4679_v6 = vadd.f32 %v4678_v13, %v4631_v57 }
 0x629   : > { %v4759_v60 = vadd.f32 %v4740_v48, %v4679_v6  ;;  %v5023_v44 = vpop.f32.mrf.mxu0 }
 0x62b   : > { %v4829_v56 = vadd.f32 %v4810_v55, %v4759_v60 }
 0x62d   : > { %v4899_v45 = vadd.f32 %v4880_v7, %v4829_v56  ;;  %v6712_v7 = vld [vmem:[%s8728_s10 + $0x30] sm:$0xff] }
 0x62e   : > { %v4681_v18 = vpop.f32.mrf.mxu3  ;;  %5397 = vmatpush.bf16.msrb.mxu0 %v6712_v7 }
 0x62f   : > { %v4682_v51 = vadd.f32 %v4681_v18, %v4634_v58 }
 0x631   : > { %v4760_v38 = vadd.f32 %v4743_v4, %v4682_v51  ;;  %v5025_v4 = vpop.f32.mrf.mxu0  ;;  %v4890_v51 = vpop.f32.mrf.mxu2 }
 0x633   : > { %v4830_v31 = vadd.f32 %v4813_v32, %v4760_v38 }
 0x635   : > { %v4900_v62 = vadd.f32 %v4883_v2, %v4830_v31 }
 0x636   : > { %v4683_v9 = vpop.f32.mrf.mxu3 }
 0x637   : > { %v4684_v59 = vadd.f32 %v4683_v9, %v8287_v36  ;;  %v4818_v9 = vpop.f32.mrf.mxu1 }
 0x639   : > { %v4761_v11 = vadd.f32 %v4745_v42, %v4684_v59  ;;  %v5028_v29 = vpop.f32.mrf.mxu0 }
 0x63b   : > { %v4831_v13 = vadd.f32 %v4815_v50, %v4761_v11  ;;  %v6710_v50 = vld [vmem:[%s8728_s10 + $0x20] sm:$0xff]  ;;  %v6711_v11 = vld [vmem:[%s8728_s10 + $0x28] sm:$0xff] }
 0x63c   : > { %5309 = vmatpush.bf16.msrb.mxu2 %v6710_v50  ;;  %5353 = vmatpush.bf16.msrb.mxu3 %v6711_v11 }
 0x63d   : > { %v4901_v35 = vadd.f32 %v4885_v33, %v4831_v13 }
 0x63e   : > { %v4686_v28 = vpop.f32.mrf.mxu3 }
 0x63f   : > { %v4687_v5 = vadd.f32 %v4686_v28, %v8290_v22 }
 0x641   : > { %v4762_v14 = vadd.f32 %v8299_v0, %v4687_v5  ;;  %v5030_v2 = vpop.f32.mrf.mxu0 }
 0x643   : > { %v4832_v63 = vadd.f32 %v4818_v9, %v4762_v14 }
 0x646   : > { %v8305_v47 = vpop.f32.mrf.mxu3 }
 0x647   : > { %v4689_v22 = vadd.f32 %v8305_v47, %v8292_v52  ;;  %v4820_v52 = vpop.f32.mrf.mxu1 }
 0x649   : > { %v5033_v33 = vpop.f32.mrf.mxu0 }
 0x64e   : > { %v8312_v12 = vpop.f32.mrf.mxu3 }
 0x656   : > { %v8314_v37 = vpop.f32.mrf.mxu3 }
 0x65e   : > { %v4948_v19 = vpop.f32.mrf.mxu3 }
 0x65f   : > { %v4968_v53 = vadd.f32 %v4948_v19, %v4898_v23  ;;  %v4902_v23 = vadd.f32 %v4888_v1, %v4832_v63  ;;  %v5035_v63 = vpop.f32.mrf.mxu0 }
 0x661   : > { %v5038_v16 = vadd.f32 %v5018_v49, %v4968_v53 }
 0x663   : > { %v5050_v20 = vmul.f32 %v8325_v10, %v5038_v16  ;;  %v4692_v16 = vadd.f32 %v8312_v12, %v8295_v21  ;;  %v4694_v21 = vadd.f32 %v8314_v37, %v8297_v39  ;;  %v6709_v39 = vld [vmem:[%s8728_s10 + $0x18] sm:$0xff]  ;;  %s6816_s10 = sshra.s32 %s6051_s24, 4  ;;  %s6817_s10 = int_to_ptr.hbm [resolvable:$true] %s6816_s10 }
 0x664   : > { %5265 = vmatpush.bf16.msrb.mxu1 %v6709_v39  ;;  %s6818_s4 = scalar_lea.hbm %s6817_s10, 2  ;;  %p6823_p0 = scmp.lt.s32.totalorder %s6817_s10, %s8618_s22 }
 0x665   : > { %v5062_v61 = vadd.f32 %v8330_v27, %v5050_v20  ;;  %v4765_v37 = vadd.f32 %v8307_v54, %v4694_v21  ;;  %p6819_p11 = scmp.ne.s32.totalorder %s6817_s10, %s6818_s4  ;;  %p6824_p1 = scmp.lt.s32.totalorder %s6822_s5, %s6818_s4 }
 0x666   : > { %v4950_v15 = vpop.f32.mrf.mxu3 }
 0x667   : > { %v5070_v34 = vmax.f32 %v5062_v61, 0.0  ;;  %v4969_v57 = vadd.f32 %v4950_v15, %v4899_v45  ;;  %v4823_v45 = vpop.f32.mrf.mxu1  ;;  %p6820_p12 = pnand %p6819_p11, %p7021_p5  ;;  %p6825_p2 = por %p6824_p1, %p6823_p0 }
 0x669   : > { %5078 = vst.msk [vmem:[#allocation7] sm:$0xff] %vm4499_vm6, %v5070_v34  ;;  %v5039_v40 = vadd.f32 %v5020_v25, %v4969_v57  ;;  %v4763_v25 = vadd.f32 %v8301_v41, %v4689_v22  ;;  %v4764_v41 = vadd.f32 %v8303_v17, %v4692_v16  ;;  %p6821_p13 = pneg %p6820_p12 }
 0x66b   : > { %v5051_v58 = vmul.f32 %v8325_v10, %v5039_v40  ;;  %v4833_v32 = vadd.f32 %v4820_v52, %v4763_v25  ;;  %v4834_v31 = vadd.f32 %v4823_v45, %v4764_v41  ;;  %p6826_p3 = pnand %p6825_p2, %p6821_p13 }
 0x66d   : > { %v5063_v8 = vadd.f32 %v8330_v27, %v5051_v58  ;;  %v4903_v61 = vadd.f32 %v4890_v51, %v4833_v32  ;;  %v4893_v58 = vpop.f32.mrf.mxu2 }
 0x66e   : > { %v4953_v46 = vpop.f32.mrf.mxu3 }
 0x66f   : > { %v5071_v30 = vmax.f32 %v5063_v8, 0.0  ;;  %v4970_v48 = vadd.f32 %v4953_v46, %v4900_v62  ;;  %v4904_v62 = vadd.f32 %v4893_v58, %v4834_v31 }
 0x671   : > { %5079 = vst.msk [vmem:[#allocation7 + $0x8] sm:$0xff] %vm4499_vm6, %v5071_v30  ;;  %v5040_v36 = vadd.f32 %v5023_v44, %v4970_v48 }
 0x673   : > { %v5052_v18 = vmul.f32 %v8325_v10, %v5040_v36 }
 0x675   : > { %v5064_v42 = vadd.f32 %v8330_v27, %v5052_v18 }
 0x676   : > { %v4955_v24 = vpop.f32.mrf.mxu3 }
 0x677   : > { %v5072_v49 = vmax.f32 %v5064_v42, 0.0  ;;  %v4971_v3 = vadd.f32 %v4955_v24, %v4901_v35 }
 0x678   : > { %v5086_v6 = vld [vmem:[#allocation7] ss:$2 sm:$0xff]  ;;  %v5094_v43 = vld [vmem:[#allocation7 + $0x1] ss:$2 sm:$0xff] }
 0x679   : > { %v5101_v28 = vmax.f32 %v5086_v6, %v5094_v43  ;;  %5080 = vst.msk [vmem:[#allocation7 + $0x10] sm:$0xff] %vm4499_vm6, %v5072_v49  ;;  %v5041_v55 = vadd.f32 %v5025_v4, %v4971_v3  ;;  %v4825_v4 = vpop.f32.mrf.mxu1  ;;  %v4895_v3 = vpop.f32.mrf.mxu2 }
 0x67a   : > { %v4835_v9 = vadd.f32 %v4825_v4, %v4765_v37 }
 0x67b   : > { %5110 = vst.msk [vmem:[#allocation8 + $0x3] sm:$0xff] %vm4499_vm6, %v5101_v28  ;;  %v5053_v0 = vmul.f32 %v8325_v10, %v5041_v55 }
 0x67c   : > { %v4905_v43 = vadd.f32 %v4895_v3, %v4835_v9 }
 0x67d   : > { %v5065_v60 = vadd.f32 %v8330_v27, %v5053_v0 }
 0x67e   : > { %v4958_v47 = vpop.f32.mrf.mxu3 }
 0x67f   : > { %v5073_v19 = vmax.f32 %v5065_v60, 0.0  ;;  %v4972_v53 = vadd.f32 %v4958_v47, %v4902_v23 }
 0x681   : > { %5081 = vst.msk [vmem:[#allocation7 + $0x18] sm:$0xff] %vm4499_vm6, %v5073_v19  ;;  %v5042_v56 = vadd.f32 %v5028_v29, %v4972_v53 }
 0x682   : > { %v5122_v36 = vld [vmem:[#allocation8 + $0x1] sm:$0xff] }
 0x683   : > { %v5054_v20 = vmul.f32 %v8325_v10, %v5042_v56  ;;  %v5114_v13 = vld [vmem:[#allocation8] sm:$0xff] }
 0x684   : > { %v5193_v18 = vld [vmem:[#allocation8 + $0x2] sm:$0xff] }
 0x685   : > { %v5066_v38 = vadd.f32 %v8330_v27, %v5054_v20 }
 0x686   : > { %v4960_v44 = vpop.f32.mrf.mxu3 }
 0x687   : > { %v5074_v15 = vmax.f32 %v5066_v38, 0.0  ;;  %v4973_v34 = vadd.f32 %v4960_v44, %v4903_v61 }
 0x688   : > { %v5088_v57 = vld [vmem:[#allocation7 + $0x10] ss:$2 sm:$0xff]  ;;  %v5096_v59 = vld [vmem:[#allocation7 + $0x11] ss:$2 sm:$0xff] }
 0x689   : > { %v5102_v12 = vmax.f32 %v5088_v57, %v5096_v59  ;;  %5082 = vst.msk [vmem:[#allocation7 + $0x20] sm:$0xff] %vm4499_vm6, %v5074_v15  ;;  %v5043_v40 = vadd.f32 %v5030_v2, %v4973_v34 }
 0x68b   : > { %5111 = vst.msk [vmem:[#allocation8 + $0xb] sm:$0xff] %vm4499_vm6, %v5102_v12  ;;  %v5055_v17 = vmul.f32 %v8325_v10, %v5043_v40  ;;  %v5237_v12 = vld [vmem:[#allocation8 + $0x3] sm:$0xff] }
 0x68d   : > { %v5067_v8 = vadd.f32 %v8330_v27, %v5055_v17 }
 0x68e   : > { %v4963_v46 = vpop.f32.mrf.mxu3 }
 0x68f   : > { %v5075_v30 = vmax.f32 %v5067_v8, 0.0  ;;  %v4974_v48 = vadd.f32 %v4963_v46, %v4904_v62 }
 0x691   : > { %5083 = vst.msk [vmem:[#allocation7 + $0x28] sm:$0xff] %vm4499_vm6, %v5075_v30  ;;  %v5044_v5 = vadd.f32 %v5033_v33, %v4974_v48 }
 0x692   : > { %v5123_v14 = vld [vmem:[#allocation8 + $0x9] sm:$0xff] }
 0x693   : > { %v5115_v54 = vld [vmem:[#allocation8 + $0x8] sm:$0xff]  ;;  %v5056_v35 = vmul.f32 %v8325_v10, %v5044_v5  ;;  %v5126_v1 = vpack.c.bf16 %v5123_v14, %v5122_v36 }
 0x694   : > { %v5194_v42 = vld [vmem:[#allocation8 + $0xa] sm:$0xff]  ;;  %v5118_v24 = vpack.c.bf16 %v5115_v54, %v5114_v13 }
 0x695   : > { %v5197_v49 = vpack.c.bf16 %v5194_v42, %v5193_v18  ;;  %v5068_v6 = vadd.f32 %v8330_v27, %v5056_v35  ;;  %6457 = vmatmul.msk.bf16.vlgmr.msra.gmra.mxu1 %vm4499_vm6, %v5126_v1  ;;  %v5369_v47 = vld [vmem:[#allocation8 + $0x6] sm:$0xff] }
 0x696   : > { %6463 = vmatmul.msk.bf16.vlgmr.msra.gmra.mxu2 %vm4499_vm6, %v5118_v24  ;;  %v4965_v22 = vpop.f32.mrf.mxu3  ;;  %v5238_v57 = vld [vmem:[#allocation8 + $0xb] sm:$0xff] }
 0x697   : > { %6471 = vmatmul.msk.bf16.vlgmr.msra.gmra.mxu3 %vm4499_vm6, %v5197_v49  ;;  %v5076_v28 = vmax.f32 %v5068_v6, 0.0  ;;  %v4975_v55 = vadd.f32 %v4965_v22, %v4905_v43  ;;  %v5281_v40 = vld [vmem:[#allocation8 + $0x4] sm:$0xff]  ;;  %v5241_v31 = vpack.c.bf16 %v5238_v57, %v5237_v12 }
 0x698   : > { %v5090_v29 = vld [vmem:[#allocation7 + $0x20] ss:$2 sm:$0xff]  ;;  %v5098_v0 = vld [vmem:[#allocation7 + $0x21] ss:$2 sm:$0xff] }
 0x699   : > { %v5103_v7 = vmax.f32 %v5090_v29, %v5098_v0  ;;  %5084 = vst.msk [vmem:[#allocation7 + $0x30] sm:$0xff] %vm4499_vm6, %v5076_v28  ;;  %v5045_v25 = vadd.f32 %v5035_v63, %v4975_v55  ;;  %v5325_v17 = vld [vmem:[#allocation8 + $0x5] sm:$0xff] }
 0x69b   : > { %5112 = vst.msk [vmem:[#allocation8 + $0x13] sm:$0xff] %vm4499_vm6, %v5103_v7  ;;  %v5057_v60 = vmul.f32 %v8325_v10, %v5045_v25  ;;  %v8407_v25 = vld [vmem:[%s8607_s11] ss:$0 sm:$0xff] }
 0x69d   : > { %v5069_v23 = vadd.f32 %v8330_v27, %v5057_v60 }
 0x69f   : > { %v5077_v52 = vmax.f32 %v5069_v23, 0.0 }
 0x6a1   : > { %5085 = vst.msk [vmem:[#allocation7 + $0x38] sm:$0xff] %vm4499_vm6, %v5077_v52  ;;  %v8412_v52 = vld [vmem:[%s8608_s12] ss:$0 sm:$0xff] }
 0x6a2   : > { %v5370_v19 = vld [vmem:[#allocation8 + $0xe] sm:$0xff] }
 0x6a3   : > { %v5373_v53 = vpack.c.bf16 %v5370_v19, %v5369_v47  ;;  %v5124_v32 = vld [vmem:[#allocation8 + $0x11] sm:$0xff] }
 0x6a4   : > { %v5116_v20 = vld [vmem:[#allocation8 + $0x10] sm:$0xff] }
 0x6a5   : > { %6503 = vmatmul.msk.bf16.vlgmr.msrb.gmra.mxu0 %vm4499_vm6, %v5373_v53  ;;  %v5195_v2 = vld [vmem:[#allocation8 + $0x12] sm:$0xff] }
 0x6a6   : > { %v5282_v59 = vld [vmem:[#allocation8 + $0xc] sm:$0xff] }
 0x6a7   : > { %v5326_v21 = vld [vmem:[#allocation8 + $0xd] sm:$0xff]  ;;  %v5285_v58 = vpack.c.bf16 %v5282_v59, %v5281_v40 }
 0x6a8   : > { %v5092_v51 = vld [vmem:[#allocation7 + $0x30] ss:$2 sm:$0xff]  ;;  %v5100_v16 = vld [vmem:[#allocation7 + $0x31] ss:$2 sm:$0xff]  ;;  %v5329_v50 = vpack.c.bf16 %v5326_v21, %v5325_v17 }
 0x6a9   : > { %v5104_v56 = vmax.f32 %v5092_v51, %v5100_v16  ;;  %v5239_v33 = vld [vmem:[#allocation8 + $0x13] sm:$0xff] }
 0x6ab   : > { %5113 = vst.msk [vmem:[#allocation8 + $0x1b] sm:$0xff] %vm4499_vm6, %v5104_v56 }
 0x6b2   : > { %v5125_v41 = vld [vmem:[#allocation8 + $0x19] sm:$0xff] }
 0x6b3   : > { %v5117_v10 = vld [vmem:[#allocation8 + $0x18] sm:$0xff]  ;;  %v5127_v27 = vpack.c.bf16 %v5125_v41, %v5124_v32 }
 0x6b4   : > { %v5196_v38 = vld [vmem:[#allocation8 + $0x1a] sm:$0xff]  ;;  %v5119_v61 = vpack.c.bf16 %v5117_v10, %v5116_v20 }
 0x6b5   : > { %v5198_v45 = vpack.c.bf16 %v5196_v38, %v5195_v2  ;;  %v5371_v44 = vld [vmem:[#allocation8 + $0x16] sm:$0xff]  ;;  %v5372_v15 = vld [vmem:[#allocation8 + $0x1e] sm:$0xff]  ;;  %6458 = vmatmul.msk.bf16.gmra.mxu1 %vm4499_vm6, %v5127_v27 }
 0x6b6   : > { %v5374_v34 = vpack.c.bf16 %v5372_v15, %v5371_v44  ;;  %6464 = vmatmul.msk.bf16.gmra.mxu2 %vm4499_vm6, %v5119_v61  ;;  %v5240_v11 = vld [vmem:[#allocation8 + $0x1b] sm:$0xff]  ;;  %v6714_v44 = vld [vmem:[%s8609_s13 + $0x8] sm:$0xff] }
 0x6b7   : > { %6472 = vmatmul.msk.bf16.gmra.mxu3 %vm4499_vm6, %v5198_v45  ;;  %v5283_v39 = vld [vmem:[#allocation8 + $0x14] sm:$0xff]  ;;  %v5284_v37 = vld [vmem:[#allocation8 + $0x1c] sm:$0xff]  ;;  %v5242_v46 = vpack.c.bf16 %v5240_v11, %v5239_v33  ;;  %5518 = vmatpush.bf16.msra.mxu2 %v6714_v44  ;;  %v6724_v44 = vld [vmem:[%s8612_s16 + $0x8] sm:$0xff] }
 0x6b8   : > { %6504 = vmatmul.msk.bf16.gmra.mxu0 %vm4499_vm6, %v5374_v34  ;;  %v5327_v8 = vld [vmem:[#allocation8 + $0x15] sm:$0xff]  ;;  %v5328_v62 = vld [vmem:[#allocation8 + $0x1d] sm:$0xff]  ;;  %v5286_v30 = vpack.c.bf16 %v5284_v37, %v5283_v39  ;;  %v6718_v34 = vld [vmem:[%s8609_s13 + $0x28] sm:$0xff] }
 0x6b9   : > { %v5330_v48 = vpack.c.bf16 %v5328_v62, %v5327_v8  ;;  %v6716_v15 = vld [vmem:[%s8609_s13 + $0x18] sm:$0xff]  ;;  %5555 = vmatpush.bf16.msra.mxu3 %v6718_v34  ;;  %5728 = vmatpush.bf16.msra.mxu0 %v6724_v44  ;;  %v6796_v44 = vld [vmem:[%s8613_s17] ss:$0 sm:$0xff] }
 0x6ba   : > { %5489 = vmatpush.bf16.msra.mxu1 %v6716_v15  ;;  %v6728_v15 = vld [vmem:[%s8612_s16 + $0x28] sm:$0xff]  ;;  %v6730_v34 = vld [vmem:[%s8612_s16 + $0x38] sm:$0xff] }
 0x6c5   : > { %6479 = vmatmul.msk.bf16.vlgmr.msrb.gmra.mxu1 %vm4499_vm6, %v5241_v31  ;;  %v6713_v31 = vld [vmem:[%s8609_s13] sm:$0xff] }
 0x6c6   : > { %6487 = vmatmul.msk.bf16.vlgmr.msrb.gmra.mxu2 %vm4499_vm6, %v5285_v58  ;;  %v6715_v58 = vld [vmem:[%s8609_s13 + $0x10] sm:$0xff] }
 0x6c7   : > { %6495 = vmatmul.msk.bf16.vlgmr.msrb.gmra.mxu3 %vm4499_vm6, %v5329_v50  ;;  %v6717_v50 = vld [vmem:[%s8609_s13 + $0x20] sm:$0xff]  ;;  %5519 = vmatpush.bf16.msra.mxu2 %v6713_v31 }
 0x6c8   : > { %5490 = vmatpush.bf16.msra.mxu1 %v6715_v58  ;;  %5556 = vmatpush.bf16.msra.mxu3 %v6717_v50  ;;  %v6794_v58 = vld [vmem:[%s8610_s14] ss:$0 sm:$0xff] }
 0x6d5   : > { %6480 = vmatmul.msk.bf16.gmra.mxu1 %vm4499_vm6, %v5242_v46 }
 0x6d6   : > { %6488 = vmatmul.msk.bf16.gmra.mxu2 %vm4499_vm6, %v5286_v30 }
 0x6d7   : > { %6496 = vmatmul.msk.bf16.gmra.mxu3 %vm4499_vm6, %v5330_v48 }
 0x712   : > { %v5152_v4 = vpop.f32.mrf.mxu1 }
 0x719   : > { %v5183_v5 = vpop.f32.mrf.mxu2 }
 0x71a   : > { %v5223_v36 = vpop.f32.mrf.mxu3  ;;  %v5154_v13 = vpop.f32.mrf.mxu1  ;;  %v5184_v24 = vadd.f32 %v5183_v5, %v5152_v4 }
 0x71c   : > { %v5233_v6 = vadd.f32 %v5223_v36, %v5184_v24  ;;  %v6722_v36 = vld [vmem:[%s8609_s13 + $0x48] sm:$0xff] }
 0x71d   : > { %5633 = vmatpush.bf16.msrb.mxu2 %v6722_v36  ;;  %v6731_v36 = vld [vmem:[%s8612_s16 + $0x40] sm:$0xff] }
 0x721   : > { %v5185_v18 = vpop.f32.mrf.mxu2 }
 0x722   : > { %v5225_v9 = vpop.f32.mrf.mxu3  ;;  %v5399_v43 = vpop.f32.mrf.mxu0  ;;  %v5186_v55 = vadd.f32 %v5185_v18, %v5154_v13  ;;  %v6720_v13 = vld [vmem:[%s8609_s13 + $0x38] sm:$0xff] }
 0x723   : > { %5594 = vmatpush.bf16.msrb.mxu1 %v6720_v13 }
 0x724   : > { %v5234_v60 = vadd.f32 %v5225_v9, %v5186_v55 }
 0x72a   : > { %v5401_v53 = vpop.f32.mrf.mxu0 }
 0x732   : > { %v5157_v14 = vpop.f32.mrf.mxu1 }
 0x735   : > { %v5404_v17 = vpop.f32.mrf.mxu0 }
 0x739   : > { %v5188_v54 = vpop.f32.mrf.mxu2 }
 0x73a   : > { %v5228_v42 = vpop.f32.mrf.mxu3  ;;  %v5159_v35 = vpop.f32.mrf.mxu1  ;;  %v5189_v16 = vadd.f32 %v5188_v54, %v5157_v14  ;;  %v6721_v14 = vld [vmem:[%s8609_s13 + $0x40] sm:$0xff] }
 0x73b   : > { %5634 = vmatpush.bf16.msrb.mxu2 %v6721_v14 }
 0x73c   : > { %v5235_v38 = vadd.f32 %v5228_v42, %v5189_v16 }
 0x73d   : > { %v5406_v54 = vpop.f32.mrf.mxu0 }
 0x741   : > { %v5190_v1 = vpop.f32.mrf.mxu2 }
 0x742   : > { %v5230_v49 = vpop.f32.mrf.mxu3  ;;  %v5267_v3 = vpop.f32.mrf.mxu1  ;;  %v5191_v59 = vadd.f32 %v5190_v1, %v5159_v35  ;;  %v6719_v1 = vld [vmem:[%s8609_s13 + $0x30] sm:$0xff] }
 0x743   : > { %v5277_v22 = vadd.f32 %v5267_v3, %v5233_v6  ;;  %5595 = vmatpush.bf16.msrb.mxu1 %v6719_v1 }
 0x744   : > { %v5236_v8 = vadd.f32 %v5230_v49, %v5191_v59  ;;  %v6725_v59 = vld [vmem:[%s8612_s16 + $0x10] sm:$0xff] }
 0x749   : > { %v5311_v28 = vpop.f32.mrf.mxu2 }
 0x74a   : > { %v5321_v63 = vadd.f32 %v5311_v28, %v5277_v22  ;;  %v5355_v29 = vpop.f32.mrf.mxu3  ;;  %v5269_v0 = vpop.f32.mrf.mxu1 }
 0x74b   : > { %v5278_v19 = vadd.f32 %v5269_v0, %v5234_v60 }
 0x74c   : > { %v5365_v7 = vadd.f32 %v5355_v29, %v5321_v63 }
 0x74e   : > { %v5409_v23 = vadd.f32 %v5399_v43, %v5365_v7 }
 0x750   : > { %v5417_v47 = vmul.f32 %v8407_v25, %v5409_v23 }
 0x751   : > { %v5313_v51 = vpop.f32.mrf.mxu2 }
 0x752   : > { %v5425_v56 = vadd.f32 %v8412_v52, %v5417_v47  ;;  %v5322_v32 = vadd.f32 %v5313_v51, %v5278_v19  ;;  %v5357_v20 = vpop.f32.mrf.mxu3  ;;  %v5272_v2 = vpop.f32.mrf.mxu1 }
 0x753   : > { %v5279_v45 = vadd.f32 %v5272_v2, %v5235_v38 }
 0x754   : > { %v5429_v41 = vmax.f32 %v5425_v56, 0.0  ;;  %v5366_v10 = vadd.f32 %v5357_v20, %v5322_v32 }
 0x756   : > { %5434 = vst.msk [vmem:[#allocation9] sm:$0xff] %vm5433_vm8, %v5429_v41  ;;  %v5410_v27 = vadd.f32 %v5401_v53, %v5366_v10 }
 0x758   : > { %v5418_v61 = vmul.f32 %v8407_v25, %v5410_v27 }
 0x759   : > { %v5316_v57 = vpop.f32.mrf.mxu2 }
 0x75a   : > { %v5426_v21 = vadd.f32 %v8412_v52, %v5418_v61  ;;  %v5323_v12 = vadd.f32 %v5316_v57, %v5279_v45  ;;  %v5360_v40 = vpop.f32.mrf.mxu3  ;;  %v5274_v37 = vpop.f32.mrf.mxu1  ;;  %v6726_v45 = vld [vmem:[%s8612_s16 + $0x18] sm:$0xff] }
 0x75b   : > { %v5280_v46 = vadd.f32 %v5274_v37, %v5236_v8  ;;  %5700 = vmatpush.bf16.msrb.mxu3 %v6726_v45 }
 0x75c   : > { %v5430_v11 = vmax.f32 %v5426_v21, 0.0  ;;  %v5367_v39 = vadd.f32 %v5360_v40, %v5323_v12  ;;  %v6723_v21 = vld [vmem:[%s8612_s16] sm:$0xff]  ;;  %v6729_v40 = vld [vmem:[%s8612_s16 + $0x30] sm:$0xff] }
 0x75d   : > { %v6727_v12 = vld [vmem:[%s8612_s16 + $0x20] sm:$0xff]  ;;  %5729 = vmatpush.bf16.msra.mxu0 %v6723_v21 }
 0x75e   : > { %5435 = vst.msk [vmem:[#allocation9 + $0x8] sm:$0xff] %vm5433_vm8, %v5430_v11  ;;  %v5411_v62 = vadd.f32 %v5404_v17, %v5367_v39  ;;  %v6795_v39 = vld [vmem:[%s8611_s15] ss:$0 sm:$0xff] }
 0x75f   : > { %5701 = vmatpush.bf16.msrb.mxu3 %v6725_v59 }
 0x760   : > { %v5419_v33 = vmul.f32 %v8407_v25, %v5411_v62 }
 0x761   : > { %v5318_v30 = vpop.f32.mrf.mxu2 }
 0x762   : > { %v5427_v48 = vadd.f32 %v8412_v52, %v5419_v33  ;;  %v5324_v4 = vadd.f32 %v5318_v30, %v5280_v46  ;;  %v5362_v5 = vpop.f32.mrf.mxu3  ;;  %v6732_v30 = vld [vmem:[%s8612_s16 + $0x48] sm:$0xff] }
 0x764   : > { %v5431_v18 = vmax.f32 %v5427_v48, 0.0  ;;  %v5368_v9 = vadd.f32 %v5362_v5, %v5324_v4 }
 0x765   : > { %v5438_v42 = vld [vmem:[#allocation9] ss:$2 sm:$0xff]  ;;  %v5442_v35 = vld [vmem:[#allocation9 + $0x1] ss:$2 sm:$0xff] }
 0x766   : > { %v5445_v24 = vmax.f32 %v5438_v42, %v5442_v35  ;;  %5436 = vst.msk [vmem:[#allocation9 + $0x10] sm:$0xff] %vm5433_vm8, %v5431_v18  ;;  %v5412_v49 = vadd.f32 %v5406_v54, %v5368_v9 }
 0x768   : > { %5451 = vst.msk [vmem:[#allocation10 + $0x2] sm:$0xff] %vm5433_vm8, %v5445_v24  ;;  %v5420_v3 = vmul.f32 %v8407_v25, %v5412_v49 }
 0x76a   : > { %v5428_v6 = vadd.f32 %v8412_v52, %v5420_v3 }
 0x76c   : > { %v5432_v43 = vmax.f32 %v5428_v6, 0.0 }
 0x76e   : > { %5437 = vst.msk [vmem:[#allocation9 + $0x18] sm:$0xff] %vm5433_vm8, %v5432_v43 }
 0x76f   : > { %v5460_v63 = vld [vmem:[#allocation10 + $0x1] sm:$0xff] }
 0x770   : > { %v5453_v29 = vld [vmem:[#allocation10] sm:$0xff] }
 0x771   : > { %v5526_v0 = vld [vmem:[#allocation10 + $0x2] sm:$0xff] }
 0x775   : > { %v5440_v22 = vld [vmem:[#allocation9 + $0x10] ss:$2 sm:$0xff]  ;;  %v5444_v28 = vld [vmem:[#allocation9 + $0x11] ss:$2 sm:$0xff] }
 0x776   : > { %v5446_v55 = vmax.f32 %v5440_v22, %v5444_v28 }
 0x778   : > { %5452 = vst.msk [vmem:[#allocation10 + $0xa] sm:$0xff] %vm5433_vm8, %v5446_v55 }
 0x77f   : > { %v5461_v7 = vld [vmem:[#allocation10 + $0x9] sm:$0xff] }
 0x780   : > { %v5454_v60 = vld [vmem:[#allocation10 + $0x8] sm:$0xff]  ;;  %v5462_v47 = vpack.c.bf16 %v5461_v7, %v5460_v63  ;;  %v6744_v7 = vld [vmem:[%s8615_s19 + $0x58] sm:$0xff] }
 0x781   : > { %v5527_v23 = vld [vmem:[#allocation10 + $0xa] sm:$0xff]  ;;  %v5455_v25 = vpack.c.bf16 %v5454_v60, %v5453_v29 }
 0x782   : > { %v5528_v19 = vpack.c.bf16 %v5527_v23, %v5526_v0  ;;  %6517 = vmatmul.msk.bf16.vlgmr.msra.gmra.mxu1 %vm5433_vm8, %v5462_v47  ;;  %v5565_v52 = vld [vmem:[#allocation10 + $0x3] sm:$0xff]  ;;  %v5566_v53 = vld [vmem:[#allocation10 + $0xb] sm:$0xff] }
 0x783   : > { %6526 = vmatmul.msk.bf16.vlgmr.msra.gmra.mxu2 %vm5433_vm8, %v5455_v25  ;;  %v5604_v51 = vld [vmem:[#allocation10 + $0x4] sm:$0xff]  ;;  %v5605_v16 = vld [vmem:[#allocation10 + $0xc] sm:$0xff]  ;;  %v5567_v56 = vpack.c.bf16 %v5566_v53, %v5565_v52  ;;  %5763 = vmatpush.bf16.msra.mxu1 %v6728_v15 }
 0x784   : > { %6539 = vmatmul.msk.bf16.vlgmr.msra.gmra.mxu3 %vm5433_vm8, %v5528_v19  ;;  %v5606_v32 = vpack.c.bf16 %v5605_v16, %v5604_v51  ;;  %5799 = vmatpush.bf16.msra.mxu2 %v6730_v34  ;;  %v6740_v60 = vld [vmem:[%s8615_s19 + $0x38] sm:$0xff]  ;;  %v6743_v53 = vld [vmem:[%s8615_s19 + $0x50] sm:$0xff] }
 0x785   : > { %5835 = vmatpush.bf16.msra.mxu3 %v6732_v30  ;;  %v6736_v23 = vld [vmem:[%s8615_s19 + $0x18] sm:$0xff]  ;;  %5916 = vmatpush.bf16.msrb.mxu0 %v6740_v60  ;;  %v6739_v51 = vld [vmem:[%s8615_s19 + $0x30] sm:$0xff] }
 0x786   : > { %v6735_v16 = vld [vmem:[%s8615_s19 + $0x10] sm:$0xff] }
 0x787   : > { %5764 = vmatpush.bf16.msra.mxu1 %v6727_v12 }
 0x788   : > { %5800 = vmatpush.bf16.msra.mxu2 %v6729_v40 }
 0x789   : > { %5836 = vmatpush.bf16.msra.mxu3 %v6731_v36  ;;  %5917 = vmatpush.bf16.msrb.mxu0 %v6739_v51  ;;  %v6799_v36 = vld [vmem:[%s8617_s21] ss:$0 sm:$0xff] }
 0x792   : > { %6552 = vmatmul.msk.bf16.vlgmr.msrb.gmra.mxu1 %vm5433_vm8, %v5567_v56  ;;  %v6738_v56 = vld [vmem:[%s8615_s19 + $0x28] sm:$0xff] }
 0x793   : > { %6565 = vmatmul.msk.bf16.vlgmr.msrb.gmra.mxu2 %vm5433_vm8, %v5606_v32  ;;  %5956 = vmatpush.bf16.msrb.mxu1 %v6736_v23  ;;  %v6734_v32 = vld [vmem:[%s8615_s19 + $0x8] sm:$0xff] }
 0x794   : > { %6007 = vmatpush.bf16.msrb.mxu2 %v6744_v7  ;;  %5918 = vmatpush.bf16.msrb.mxu0 %v6738_v56 }
 0x797   : > { %5957 = vmatpush.bf16.msrb.mxu1 %v6735_v16 }
 0x798   : > { %6008 = vmatpush.bf16.msrb.mxu2 %v6743_v53 }
 0x79b   : > { %5958 = vmatpush.bf16.msrb.mxu1 %v6734_v32 }
 0x79c   : > { %6009 = vmatpush.bf16.msrb.mxu2 %v6742_v26 }
 0x7ff   : > { %v5492_v20 = vpop.f32.mrf.mxu1 }
 0x806   : > { %v5521_v2 = vpop.f32.mrf.mxu2 }
 0x807   : > { %v5494_v41 = vpop.f32.mrf.mxu1  ;;  %v5522_v38 = vadd.f32 %v5521_v2, %v5492_v20  ;;  %v5558_v27 = vpop.f32.mrf.mxu3 }
 0x809   : > { %v5563_v57 = vadd.f32 %v5558_v27, %v5522_v38  ;;  %v6737_v38 = vld [vmem:[%s8615_s19 + $0x20] sm:$0xff] }
 0x80a   : > { %v6733_v27 = vld [vmem:[%s8615_s19] sm:$0xff]  ;;  %5919 = vmatpush.bf16.msrb.mxu0 %v6737_v38 }
 0x80b   : > { %5959 = vmatpush.bf16.msrb.mxu1 %v6733_v27 }
 0x80e   : > { %v5523_v10 = vpop.f32.mrf.mxu2 }
 0x80f   : > { %v5597_v61 = vpop.f32.mrf.mxu1  ;;  %v5524_v50 = vadd.f32 %v5523_v10, %v5494_v41  ;;  %v5560_v8 = vpop.f32.mrf.mxu3  ;;  %v6741_v10 = vld [vmem:[%s8615_s19 + $0x40] sm:$0xff] }
 0x810   : > { %v5602_v31 = vadd.f32 %v5597_v61, %v5563_v57  ;;  %6010 = vmatpush.bf16.msrb.mxu2 %v6741_v10  ;;  %v6797_v57 = vld [vmem:[%s8614_s18] ss:$0 sm:$0xff] }
 0x811   : > { %v5564_v33 = vadd.f32 %v5560_v8, %v5524_v50 }
 0x816   : > { %v5636_v17 = vpop.f32.mrf.mxu2 }
 0x817   : > { %v5641_v11 = vadd.f32 %v5636_v17, %v5602_v31  ;;  %v5599_v62 = vpop.f32.mrf.mxu1 }
 0x818   : > { %v5603_v4 = vadd.f32 %v5599_v62, %v5564_v33 }
 0x819   : > { %v5647_v37 = vmul.f32 %v6794_v58, %v5641_v11 }
 0x81b   : > { %v5653_v46 = vadd.f32 %v6795_v39, %v5647_v37 }
 0x81d   : > { %v5655_v48 = vmax.f32 %v5653_v46, 0.0 }
 0x81e   : > { %v5638_v5 = vpop.f32.mrf.mxu2 }
 0x81f   : > { %5657 = vst.msk [vmem:[#allocation11] sm:$0xff] %vm5433_vm8, %v5655_v48  ;;  %v5642_v13 = vadd.f32 %v5638_v5, %v5603_v4  ;;  %v6798_v48 = vld [vmem:[%s8616_s20] ss:$0 sm:$0xff] }
 0x821   : > { %v5648_v18 = vmul.f32 %v6794_v58, %v5642_v13 }
 0x823   : > { %v5654_v9 = vadd.f32 %v6795_v39, %v5648_v18 }
 0x825   : > { %v5656_v14 = vmax.f32 %v5654_v9, 0.0 }
 0x827   : > { %5658 = vst.msk [vmem:[#allocation11 + $0x8] sm:$0xff] %vm5433_vm8, %v5656_v14 }
 0x82e   : > { %v5659_v54 = vld [vmem:[#allocation11] ss:$2 sm:$0xff]  ;;  %v5661_v42 = vld [vmem:[#allocation11 + $0x1] ss:$2 sm:$0xff] }
 0x82f   : > { %v5662_v35 = vmax.f32 %v5659_v54, %v5661_v42 }
 0x831   : > { %5665 = vst.msk [vmem:[#allocation12 + $0x2] sm:$0xff] %vm5433_vm8, %v5662_v35 }
 0x838   : > { %v5672_v1 = vld [vmem:[#allocation12 + $0x1] sm:$0xff] }
 0x839   : > { %v5666_v24 = vld [vmem:[#allocation12] sm:$0xff]  ;;  %v5673_v3 = vpack.c.bf16 %v5672_v1, %v5672_v1 }
 0x83a   : > { %v5735_v49 = vld [vmem:[#allocation12 + $0x2] sm:$0xff]  ;;  %v5667_v6 = vpack.c.bf16 %v5666_v24, %v5666_v24 }
 0x83b   : > { %v5736_v43 = vpack.c.bf16 %v5735_v49, %v5735_v49  ;;  %v5771_v22 = vld [vmem:[#allocation12 + $0x3] sm:$0xff]  ;;  %6578 = vmatmul.msk.bf16.vlgmr.msrb.gmra.mxu3 %vm5433_vm8, %v5673_v3 }
 0x83c   : > { %v5772_v28 = vpack.c.bf16 %v5771_v22, %v5771_v22  ;;  %6587 = vmatmul.msk.bf16.vlgmr.msra.gmra.mxu0 %vm5433_vm8, %v5667_v6  ;;  %v5807_v55 = vld [vmem:[#allocation12 + $0x4] sm:$0xff] }
 0x83d   : > { %6600 = vmatmul.msk.bf16.vlgmr.msra.gmra.mxu1 %vm5433_vm8, %v5736_v43  ;;  %v5808_v63 = vpack.c.bf16 %v5807_v55, %v5807_v55 }
 0x83e   : > { %6613 = vmatmul.msk.bf16.vlgmr.msra.gmra.mxu2 %vm5433_vm8, %v5772_v28 }
 0x84b   : > { %6626 = vmatmul.msk.bf16.vlgmr.msra.gmra.mxu3 %vm5433_vm8, %v5808_v63 }
 0x8b9   : > { %v5731_v29 = vpop.f32.mrf.mxu0 }
 0x8ba   : > { %v5766_v0 = vpop.f32.mrf.mxu1 }
 0x8be   : > { %v5703_v47 = vpop.f32.mrf.mxu3 }
 0x8bf   : > { %v5732_v20 = vadd.f32 %v5731_v29, %v5703_v47 }
 0x8c1   : > { %v5802_v25 = vpop.f32.mrf.mxu2  ;;  %v5733_v19 = vpop.f32.mrf.mxu0  ;;  %v5770_v61 = vadd.f32 %v5766_v0, %v5732_v20 }
 0x8c2   : > { %v5768_v52 = vpop.f32.mrf.mxu1 }
 0x8c3   : > { %v5806_v45 = vadd.f32 %v5802_v25, %v5770_v61 }
 0x8c6   : > { %v5705_v2 = vpop.f32.mrf.mxu3 }
 0x8c9   : > { %v5804_v41 = vpop.f32.mrf.mxu2 }
 0x8ce   : > { %v5838_v15 = vpop.f32.mrf.mxu3 }
 0x8cf   : > { %v5842_v34 = vadd.f32 %v5838_v15, %v5806_v45 }
 0x8d1   : > { %v5847_v59 = vmul.f32 %v6796_v44, %v5842_v34 }
 0x8d3   : > { %v5852_v21 = vadd.f32 %v6797_v57, %v5847_v59 }
 0x8d5   : > { %v5853_v12 = vmax.f32 %v5852_v21, 0.0 }
 0x8d6   : > { %v5840_v40 = vpop.f32.mrf.mxu3 }
 0x8d7   : > { %5855 = vst.msk [vmem:[#allocation13] sm:$0xff] %vm5854_vm11, %v5853_v12 }
 0x8de   : > { %v5856_v31 = vld [vmem:[#allocation13] ss:$2 sm:$0xf]  ;;  %v5858_v58 = vld [vmem:[#allocation13 + $0x1] ss:$2 sm:$0xf] }
 0x8df   : > { %v5859_v17 = vmax.f32 %v5856_v31, %v5858_v58 }
 0x8e1   : > { %5863 = vst.msk [vmem:[#allocation14 + $0x1] sm:$0xf] %vm5862_vm12, %v5859_v17 }
 0x8e8   : > { %v5874_v50 = vld [vmem:[#allocation14 + $0x1] sm:$0xf] }
 0x8e9   : > { %v5864_v11 = vld [vmem:[#allocation14] sm:$0xf]  ;;  %v5875_v37 = vpack.c.bf16 %v5874_v50, %v5874_v50 }
 0x8ea   : > { %v5965_v39 = vld [vmem:[#allocation14 + $0x2] sm:$0xf]  ;;  %v5865_v8 = vpack.c.bf16 %v5864_v11, %v5864_v11 }
 0x8eb   : > { %v5966_v62 = vpack.c.bf16 %v5965_v39, %v5965_v39  ;;  %6651 = vmatmul.msk.bf16.vlgmr.msrb.gmra.mxu0 %vm5854_vm11, %v5875_v37 }
 0x8ec   : > { %6668 = vmatmul.msk.bf16.vlgmr.msrb.gmra.mxu1 %vm5854_vm11, %v5865_v8 }
 0x8ed   : > { %6693 = vmatmul.msk.bf16.vlgmr.msrb.gmra.mxu2 %vm5854_vm11, %v5966_v62 }
 0x968   : > { %v5921_v33 = vpop.f32.mrf.mxu0 }
 0x969   : > { %v5961_v46 = vpop.f32.mrf.mxu1 }
 0x96a   : > { %v5962_v30 = vadd.f32 %v5961_v46, %v5921_v33 }
 0x970   : > { %v6012_v4 = vpop.f32.mrf.mxu2  ;;  %v5923_v13 = vpop.f32.mrf.mxu0 }
 0x971   : > { %v6016_v5 = vadd.f32 %v6012_v4, %v5962_v30  ;;  %v5963_v18 = vpop.f32.mrf.mxu1 }
 0x973   : > { %v6021_v9 = vmul.f32 %v6798_v48, %v6016_v5 }
 0x975   : > { %v6026_v14 = vadd.f32 %v6799_v36, %v6021_v9 }
 0x977   : > { %v6027_v54 = vmax.f32 %v6026_v14, 0.0 }
 0x978   : > { %v6014_v42 = vpop.f32.mrf.mxu2 }
 0x979   : > { %6028 = vst.msk [vmem:[#allocation15] sm:$0xf] %vm5862_vm12, %v6027_v54 }
 0x980   : > { %v6029_v35 = vld [vmem:[#allocation15] ss:$2 sm:$0x3]  ;;  %v6031_v1 = vld [vmem:[#allocation15 + $0x1] ss:$2 sm:$0x3] }
 0x981   : > { %v6032_v24 = vmax.f32 %v6029_v35, %v6031_v1 }
 0x983   : > { %6034 = vst.msk [vmem:[%s676_s29] sm:$0x3] %vm6033_vm13, %v6032_v24 }
 0x984   : > { %6829 = shalt.err (!%p6826_p3)
}
 0x985   : > { %6745 = dma.vmem_to_hbm [thread:$0]  (%p7021_p5), %s6049_s0, 32, %s6051_s24, %s6036_s23  }
 0x986 PF: > { %p6751_p4 = scmp.ge.s32.totalorder %s6864_s30, 2  ;;  %s6062_s29 = sand.u32 1, %s6852_s3  }
 0x987   : > { %s6063_s8 = scalar_lea.sflag [#allocation17], %s6062_s29 }
 0x988   : > { %p6748_p7 = pnand %p6751_p4, %p7025_p6 }
 0x98a   : > { %p6749_p8 = pneg %p6748_p7 }
 0x98c   : > { %6847 = dma.done.wait (%p6749_p8), %s6063_s8, 32  }
 0x98d   : > { %6849 = vsyncadd (%p6749_p8), %s6063_s8, 4294967264  ;;  %s8732_s30 = sld [smem:[#allocation20_spill]]  ;;  %s8735_s3 = smov %s6856_s28 }
 0x98e   : > { %s8733_s10 = sld [smem:[#allocation19_spill]] }
 0x98f   : > { %s8734_s29 = sld [smem:[#allocation21_spill]] }
 0x993   : > { %p32_p9 = scmp.ge.s32.totalorder %s8732_s30, 4  }
 0x994   : > { %s8736_s28 = smov %s8733_s10 }
 0x995   :  { %34 = sbr.rel (!%p32_p9) target bundleno = 15 (0xf), region = 242 }
 0x99a   :  { %6069 = vsyncpa [#allocation17], 1 }
 0x99b   :  { %6071 = vsyncpa [#allocation17 + $0x1], 1 }

</bundles_post_ra>
